<compile_context>
chip_gen: v7x
topology: tpu7x:2x2x1
jax: 0.10.0
libtpu: 0.0.40
codegen_flags: <defaults>
</compile_context>

<pallas_src>
import functools
import math

import jax
import jax.numpy as jnp
from jax import lax
from jax.experimental import pallas as pl
from jax.experimental.pallas import tpu as pltpu


# ---------------------------------------------------------------------------
# Pallas kernel: fused 3x3 conv (im2col matmul) + affine + ReLU + 2x2 maxpool
# ---------------------------------------------------------------------------
def _conv_relu_pool_kernel(x_ref, w_ref, scale_ref, off_ref, o_ref):
    """x_ref:    (4, TM, K)  bf16 im2col block (pool-pos, pooled pixel, 9*Cin)
       w_ref:    (K, Cout)   bf16 stacked 3x3 weights, taps*Cin flattened
       scale_ref:(1, Cout)   f32 folded BN scale (ones when no BN)
       off_ref:  (1, Cout)   f32 folded bias + BN offset
       o_ref:    (TM, Cout)  f32 pooled output rows."""
    w = w_ref[...]
    scale = scale_ref[...]
    off = off_ref[...]

    def affine(p):
        return jnp.dot(x_ref[p], w, preferred_element_type=jnp.float32) * scale + off

    acc = affine(0)
    for p in range(1, 4):                     # 2x2 max-pool over pool positions
        acc = jnp.maximum(acc, affine(p))
    o_ref[...] = jnp.maximum(acc, 0.0)        # ReLU (commutes with the max)


# ---------------------------------------------------------------------------
# Host-side glue: NHWC -> (4, M, 9*Cin) pool-window-major im2col (bf16)
# ---------------------------------------------------------------------------
def _round_up(x, m):
    return ((x + m - 1) // m) * m


def _im2col_pool(x_nhwc):
    n, h, w, c = x_nhwc.shape
    h2, w2 = h // 2, w // 2
    xp = jnp.pad(x_nhwc, ((0, 0), (1, 1), (1, 1), (0, 0)))
    taps = []
    for dy in range(3):
        for dx in range(3):
            win = xp[:, dy:dy + h, dx:dx + w, :]          # value at pixel + (dy-1, dx-1)
            win = win.reshape(n, h2, 2, w2, 2, c)
            win = jnp.transpose(win, (2, 4, 0, 1, 3, 5))  # (a, b, n, h2, w2, c)
            taps.append(win.reshape(4, n * h2 * w2, c))
    return jnp.concatenate(taps, axis=-1)                 # (4, M, 9*c)


def conv_stage(x_nhwc, w_hwio, scale, offset, *, tm_max=512):
    """One fused conv3x3[+BN]+ReLU+MaxPool stage (all blocks stacked on Cout)."""
    n, h, w, cin = x_nhwc.shape
    cout = w_hwio.shape[-1]
    h2, w2 = h // 2, w // 2
    m = n * h2 * w2
    k = 9 * cin

    xcol = _im2col_pool(x_nhwc.astype(jnp.bfloat16))       # (4, M, K) bf16
    tm = min(tm_max, _round_up(m, 8))
    m_pad = _round_up(m, tm)
    if m_pad != m:
        xcol = jnp.pad(xcol, ((0, 0), (0, m_pad - m), (0, 0)))
    wf = w_hwio.reshape(k, cout).astype(jnp.bfloat16)

    cost = pl.CostEstimate(
        flops=2 * 4 * m_pad * k * cout,
        transcendentals=0,
        bytes_accessed=xcol.size * 2 + wf.size * 2 + m_pad * cout * 4)

    out = pl.pallas_call(
        _conv_relu_pool_kernel,
        out_shape=jax.ShapeDtypeStruct((m_pad, cout), jnp.float32),
        grid=(m_pad // tm,),
        in_specs=[
            pl.BlockSpec((4, tm, k), lambda i: (0, i, 0)),
            pl.BlockSpec((k, cout), lambda i: (0, 0)),
            pl.BlockSpec((1, cout), lambda i: (0, 0)),
            pl.BlockSpec((1, cout), lambda i: (0, 0)),
        ],
        out_specs=pl.BlockSpec((tm, cout), lambda i: (i, 0)),
        compiler_params=pltpu.CompilerParams(
            dimension_semantics=("parallel",)),
        cost_estimate=cost,
    )(xcol, wf, scale.reshape(1, -1), offset.reshape(1, -1))
    return out[:m].reshape(n, h2, w2, cout)


# ---------------------------------------------------------------------------
# Parameter init (deterministic, PyTorch-like; BN folded to scale/offset)
# ---------------------------------------------------------------------------
def _conv_init(key, cin, cout):
    kw, kb = jax.random.split(key)
    bound = 1.0 / math.sqrt(cin * 9)
    w = jax.random.uniform(kw, (3, 3, cin, cout), jnp.float32, -bound, bound)
    b = jax.random.uniform(kb, (cout,), jnp.float32, -bound, bound)
    return w, b


def init_params(key, in_channels, out_channels, hidden_size, num_tasks, num_block):
    block_size = hidden_size // num_block
    keys = list(jax.random.split(key, 512))
    kit = iter(keys)

    def nobn_block(cin, cout):
        w, b = _conv_init(next(kit), cin, cout)
        return dict(w=w, scale=jnp.ones((cout,), jnp.float32), offset=b)

    def bn_block(cin, cout):
        w, b = _conv_init(next(kit), cin, cout)
        k1, k2, k3, k4 = jax.random.split(next(kit), 4)
        gamma = 1.0 + 0.1 * jax.random.normal(k1, (cout,), jnp.float32)
        beta = 0.1 * jax.random.normal(k2, (cout,), jnp.float32)
        running_mean = 0.05 * jax.random.normal(k3, (cout,), jnp.float32)
        running_var = 1.0 + 0.2 * jax.random.uniform(k4, (cout,), jnp.float32)
        scale = gamma / jnp.sqrt(running_var + 1e-5)
        offset = (b - running_mean) * scale + beta
        return dict(w=w, scale=scale, offset=offset)

    return {
        "conv1": [nobn_block(in_channels, block_size) for _ in range(num_block)],
        "conv2": [nobn_block(hidden_size, block_size) for _ in range(num_block)],
        "conv3": [nobn_block(hidden_size, block_size) for _ in range(num_block)],
        "domain_out": [
            [bn_block(hidden_size, hidden_size),
             bn_block(hidden_size, out_channels)]
            for _ in range(num_tasks)
        ],
    }


def _stack_blocks(blocks):
    """Stack NUM_BLOCK blocks along Cout => kernel emits the channel concat."""
    w = jnp.concatenate([b["w"] for b in blocks], axis=-1)
    scale = jnp.concatenate([b["scale"] for b in blocks], axis=0)
    offset = jnp.concatenate([b["offset"] for b in blocks], axis=0)
    return w, scale, offset


# ---------------------------------------------------------------------------
# Forward pass (Pallas) and pure-JAX reference
# ---------------------------------------------------------------------------
@functools.partial(jax.jit, static_argnums=2)   # domain_id must stay static
def forward(params, inputs_5d, domain_id):
    b1, b2, c, h, w = inputs_5d.shape
    x = inputs_5d.reshape(b1 * b2, c, h, w)
    x = jnp.transpose(x, (0, 2, 3, 1))                     # NCHW -> NHWC
    for stage in ("conv1", "conv2", "conv3"):
        ws, sc, off = _stack_blocks(params[stage])
        x = conv_stage(x, ws, sc, off)                     # fused concat output
    for blk in params["domain_out"][domain_id]:
        x = conv_stage(x, blk["w"], blk["scale"], blk["offset"])
    x = jnp.transpose(x, (0, 3, 1, 2))                     # back to NCHW layout
    return x.reshape(b1, b2, -1)


def _ref_block(x_nhwc, w_hwio, scale, offset):
    # Operands pre-rounded to bf16 (matching the kernel), conv accumulates f32.
    xb = x_nhwc.astype(jnp.bfloat16).astype(jnp.float32)
    wb = w_hwio.astype(jnp.bfloat16).astype(jnp.float32)
    y = lax.conv_general_dilated(
        xb, wb, window_strides=(1, 1), padding="SAME",
        dimension_numbers=("NHWC", "HWIO", "NHWC"))
    y = jnp.maximum(y * scale + offset, 0.0)
    n, h, w, c = y.shape
    return y.reshape(n, h // 2, 2, w // 2, 2, c).max(axis=(2, 4))


def forward_ref(params, inputs_5d, domain_id):
    b1, b2, c, h, w = inputs_5d.shape
    x = inputs_5d.reshape(b1 * b2, c, h, w)
    x = jnp.transpose(x, (0, 2, 3, 1))
    for stage in ("conv1", "conv2", "conv3"):
        outs = [_ref_block(x, blk["w"], blk["scale"], blk["offset"])
                for blk in params[stage]]
        x = jnp.concatenate(outs, axis=-1)
    for blk in params["domain_out"][domain_id]:
        x = _ref_block(x, blk["w"], blk["scale"], blk["offset"])
    x = jnp.transpose(x, (0, 3, 1, 2))
    return x.reshape(b1, b2, -1)


# ---------------------------------------------------------------------------
if __name__ == "__main__":
    key = jax.random.PRNGKey(0)
    kx, kp = jax.random.split(key)

    # Small shapes: 5 pool stages => spatial 32 halves cleanly down to 1x1.
    B1, B2, C_IN, H, W = 2, 3, 3, 32, 32
    HIDDEN, C_OUT, NUM_TASKS, NUM_BLOCK = 16, 8, 2, 2
    DOMAIN_ID = 1

    inputs = jax.random.normal(kx, (B1, B2, C_IN, H, W), jnp.float32)
    params = init_params(kp, C_IN, C_OUT, HIDDEN, NUM_TASKS, NUM_BLOCK)

    out = forward(params, inputs, DOMAIN_ID)
    out = jax.block_until_ready(out)

    ref = forward_ref(params, inputs, DOMAIN_ID)
    assert out.shape == (B1, B2, C_OUT * 1 * 1), out.shape
    assert bool(jnp.allclose(out, ref, atol=2e-3, rtol=2e-3)), (
        float(jnp.max(jnp.abs(out - ref))))

    print("KERNEL_OK")
</pallas_src>

<mosaic_0001>
module attributes {stable_mosaic.version = 11 : i64} {
  func.func @_conv_relu_pool_kernel(%arg0: i32, %arg1: memref<4x512x27xbf16, #tpu.memory_space<vmem>>, %arg2: memref<27x16xbf16, #tpu.memory_space<vmem>>, %arg3: memref<1x16xf32, #tpu.memory_space<vmem>>, %arg4: memref<1x16xf32, #tpu.memory_space<vmem>>, %arg5: memref<512x16xf32, #tpu.memory_space<vmem>>) attributes {dimension_semantics = [#tpu.dimension_semantics<parallel>], iteration_bounds = array<i64: 3>, scalar_prefetch = 0 : i64, scratch_operands = 0 : i64, tpu.core_type = #tpu.core_type<tc>, window_params = [{transform_indices = @transform_0, window_bounds = array<i64: 4, 512, 27>}, {pipeline_mode = #tpu.pipeline_mode<synchronous>, transform_indices = @transform_1, window_bounds = array<i64: 27, 16>}, {pipeline_mode = #tpu.pipeline_mode<synchronous>, transform_indices = @transform_2, window_bounds = array<i64: 1, 16>}, {pipeline_mode = #tpu.pipeline_mode<synchronous>, transform_indices = @transform_3, window_bounds = array<i64: 1, 16>}, {transform_indices = @transform_4, window_bounds = array<i64: 512, 16>}]} {
    %c0 = arith.constant 0 : index
    %c0_0 = arith.constant 0 : index
    %0 = vector.load %arg2[%c0, %c0_0] : memref<27x16xbf16, #tpu.memory_space<vmem>>, vector<27x16xbf16>
    %c0_1 = arith.constant 0 : index
    %c0_2 = arith.constant 0 : index
    %1 = vector.load %arg3[%c0_1, %c0_2] : memref<1x16xf32, #tpu.memory_space<vmem>>, vector<1x16xf32>
    %c0_3 = arith.constant 0 : index
    %c0_4 = arith.constant 0 : index
    %2 = vector.load %arg4[%c0_3, %c0_4] : memref<1x16xf32, #tpu.memory_space<vmem>>, vector<1x16xf32>
    %c0_5 = arith.constant 0 : index
    %c0_6 = arith.constant 0 : index
    %c0_7 = arith.constant 0 : index
    %3 = vector.load %arg1[%c0_5, %c0_6, %c0_7] : memref<4x512x27xbf16, #tpu.memory_space<vmem>>, vector<1x512x27xbf16>
    %4 = vector.shape_cast %3 : vector<1x512x27xbf16> to vector<512x27xbf16>
    %cst = arith.constant dense<0.000000e+00> : vector<512x16xf32>
    %5 = tpu.matmul %4, %0, %cst {dimension_numbers = #tpu.dot_dimension_numbers<[1], [0], [0], [1], [0, 0, 1, 1], [], []>} : vector<512x27xbf16>, vector<27x16xbf16>, vector<512x16xf32> -> vector<512x16xf32>
    %6 = vector.broadcast %1 : vector<1x16xf32> to vector<512x16xf32>
    %7 = arith.mulf %5, %6 : vector<512x16xf32>
    %8 = vector.broadcast %2 : vector<1x16xf32> to vector<512x16xf32>
    %9 = arith.addf %7, %8 : vector<512x16xf32>
    %c1 = arith.constant 1 : index
    %c0_8 = arith.constant 0 : index
    %c0_9 = arith.constant 0 : index
    %10 = vector.load %arg1[%c1, %c0_8, %c0_9] : memref<4x512x27xbf16, #tpu.memory_space<vmem>>, vector<1x512x27xbf16>
    %11 = vector.shape_cast %10 : vector<1x512x27xbf16> to vector<512x27xbf16>
    %cst_10 = arith.constant dense<0.000000e+00> : vector<512x16xf32>
    %12 = tpu.matmul %11, %0, %cst_10 {dimension_numbers = #tpu.dot_dimension_numbers<[1], [0], [0], [1], [0, 0, 1, 1], [], []>} : vector<512x27xbf16>, vector<27x16xbf16>, vector<512x16xf32> -> vector<512x16xf32>
    %13 = vector.broadcast %1 : vector<1x16xf32> to vector<512x16xf32>
    %14 = arith.mulf %12, %13 : vector<512x16xf32>
    %15 = vector.broadcast %2 : vector<1x16xf32> to vector<512x16xf32>
    %16 = arith.addf %14, %15 : vector<512x16xf32>
    %17 = arith.maximumf %9, %16 : vector<512x16xf32>
    %c2 = arith.constant 2 : index
    %c0_11 = arith.constant 0 : index
    %c0_12 = arith.constant 0 : index
    %18 = vector.load %arg1[%c2, %c0_11, %c0_12] : memref<4x512x27xbf16, #tpu.memory_space<vmem>>, vector<1x512x27xbf16>
    %19 = vector.shape_cast %18 : vector<1x512x27xbf16> to vector<512x27xbf16>
    %cst_13 = arith.constant dense<0.000000e+00> : vector<512x16xf32>
    %20 = tpu.matmul %19, %0, %cst_13 {dimension_numbers = #tpu.dot_dimension_numbers<[1], [0], [0], [1], [0, 0, 1, 1], [], []>} : vector<512x27xbf16>, vector<27x16xbf16>, vector<512x16xf32> -> vector<512x16xf32>
    %21 = vector.broadcast %1 : vector<1x16xf32> to vector<512x16xf32>
    %22 = arith.mulf %20, %21 : vector<512x16xf32>
    %23 = vector.broadcast %2 : vector<1x16xf32> to vector<512x16xf32>
    %24 = arith.addf %22, %23 : vector<512x16xf32>
    %25 = arith.maximumf %17, %24 : vector<512x16xf32>
    %c3 = arith.constant 3 : index
    %c0_14 = arith.constant 0 : index
    %c0_15 = arith.constant 0 : index
    %26 = vector.load %arg1[%c3, %c0_14, %c0_15] : memref<4x512x27xbf16, #tpu.memory_space<vmem>>, vector<1x512x27xbf16>
    %27 = vector.shape_cast %26 : vector<1x512x27xbf16> to vector<512x27xbf16>
    %cst_16 = arith.constant dense<0.000000e+00> : vector<512x16xf32>
    %28 = tpu.matmul %27, %0, %cst_16 {dimension_numbers = #tpu.dot_dimension_numbers<[1], [0], [0], [1], [0, 0, 1, 1], [], []>} : vector<512x27xbf16>, vector<27x16xbf16>, vector<512x16xf32> -> vector<512x16xf32>
    %29 = vector.broadcast %1 : vector<1x16xf32> to vector<512x16xf32>
    %30 = arith.mulf %28, %29 : vector<512x16xf32>
    %31 = vector.broadcast %2 : vector<1x16xf32> to vector<512x16xf32>
    %32 = arith.addf %30, %31 : vector<512x16xf32>
    %33 = arith.maximumf %25, %32 : vector<512x16xf32>
    %cst_17 = arith.constant 0.000000e+00 : f32
    %34 = vector.broadcast %cst_17 : f32 to vector<512x16xf32>
    %35 = arith.maximumf %33, %34 : vector<512x16xf32>
    %c0_18 = arith.constant 0 : index
    %c0_19 = arith.constant 0 : index
    %36 = vector.load %arg5[%c0_18, %c0_19] : memref<512x16xf32, #tpu.memory_space<vmem>>, vector<512x16xf32>
    tpu.vector_store %arg5[%c0_18, %c0_19], %35 {strides = array<i32>} : memref<512x16xf32, #tpu.memory_space<vmem>>, vector<512x16xf32>,
    return
  }
  func.func @transform_0(%arg0: i32) -> (i32, i32, i32) {
    %c0_i32 = arith.constant 0 : i32
    %c0_i32_0 = arith.constant 0 : i32
    %c0_i32_1 = arith.constant 0 : i32
    return %c0_i32, %arg0, %c0_i32_0 : i32, i32, i32
  }
  func.func @transform_1(%arg0: i32) -> (i32, i32) {
    %c0_i32 = arith.constant 0 : i32
    %c0_i32_0 = arith.constant 0 : i32
    %c0_i32_1 = arith.constant 0 : i32
    return %c0_i32, %c0_i32_0 : i32, i32
  }
  func.func @transform_2(%arg0: i32) -> (i32, i32) {
    %c0_i32 = arith.constant 0 : i32
    %c0_i32_0 = arith.constant 0 : i32
    %c0_i32_1 = arith.constant 0 : i32
    return %c0_i32, %c0_i32_0 : i32, i32
  }
  func.func @transform_3(%arg0: i32) -> (i32, i32) {
    %c0_i32 = arith.constant 0 : i32
    %c0_i32_0 = arith.constant 0 : i32
    %c0_i32_1 = arith.constant 0 : i32
    return %c0_i32, %c0_i32_0 : i32, i32
  }
  func.func @transform_4(%arg0: i32) -> (i32, i32) {
    %c0_i32 = arith.constant 0 : i32
    %c0_i32_0 = arith.constant 0 : i32
    return %arg0, %c0_i32 : i32, i32
  }
}

module attributes {stable_mosaic.version = 11 : i64} {
  func.func @_conv_relu_pool_kernel(%arg0: i32, %arg1: memref<4x384x144xbf16, #tpu.memory_space<vmem>>, %arg2: memref<144x16xbf16, #tpu.memory_space<vmem>>, %arg3: memref<1x16xf32, #tpu.memory_space<vmem>>, %arg4: memref<1x16xf32, #tpu.memory_space<vmem>>, %arg5: memref<384x16xf32, #tpu.memory_space<vmem>>) attributes {dimension_semantics = [#tpu.dimension_semantics<parallel>], iteration_bounds = array<i64: 1>, scalar_prefetch = 0 : i64, scratch_operands = 0 : i64, tpu.core_type = #tpu.core_type<tc>, window_params = [{transform_indices = @transform_0, window_bounds = array<i64: 4, 384, 144>}, {pipeline_mode = #tpu.pipeline_mode<synchronous>, transform_indices = @transform_1, window_bounds = array<i64: 144, 16>}, {pipeline_mode = #tpu.pipeline_mode<synchronous>, transform_indices = @transform_2, window_bounds = array<i64: 1, 16>}, {pipeline_mode = #tpu.pipeline_mode<synchronous>, transform_indices = @transform_3, window_bounds = array<i64: 1, 16>}, {transform_indices = @transform_4, window_bounds = array<i64: 384, 16>}]} {
    %c0 = arith.constant 0 : index
    %c0_0 = arith.constant 0 : index
    %0 = vector.load %arg2[%c0, %c0_0] : memref<144x16xbf16, #tpu.memory_space<vmem>>, vector<144x16xbf16>
    %c0_1 = arith.constant 0 : index
    %c0_2 = arith.constant 0 : index
    %1 = vector.load %arg3[%c0_1, %c0_2] : memref<1x16xf32, #tpu.memory_space<vmem>>, vector<1x16xf32>
    %c0_3 = arith.constant 0 : index
    %c0_4 = arith.constant 0 : index
    %2 = vector.load %arg4[%c0_3, %c0_4] : memref<1x16xf32, #tpu.memory_space<vmem>>, vector<1x16xf32>
    %c0_5 = arith.constant 0 : index
    %c0_6 = arith.constant 0 : index
    %c0_7 = arith.constant 0 : index
    %3 = vector.load %arg1[%c0_5, %c0_6, %c0_7] : memref<4x384x144xbf16, #tpu.memory_space<vmem>>, vector<1x384x144xbf16>
    %4 = vector.shape_cast %3 : vector<1x384x144xbf16> to vector<384x144xbf16>
    %cst = arith.constant dense<0.000000e+00> : vector<384x16xf32>
    %5 = tpu.matmul %4, %0, %cst {dimension_numbers = #tpu.dot_dimension_numbers<[1], [0], [0], [1], [0, 0, 1, 1], [], []>} : vector<384x144xbf16>, vector<144x16xbf16>, vector<384x16xf32> -> vector<384x16xf32>
    %6 = vector.broadcast %1 : vector<1x16xf32> to vector<384x16xf32>
    %7 = arith.mulf %5, %6 : vector<384x16xf32>
    %8 = vector.broadcast %2 : vector<1x16xf32> to vector<384x16xf32>
    %9 = arith.addf %7, %8 : vector<384x16xf32>
    %c1 = arith.constant 1 : index
    %c0_8 = arith.constant 0 : index
    %c0_9 = arith.constant 0 : index
    %10 = vector.load %arg1[%c1, %c0_8, %c0_9] : memref<4x384x144xbf16, #tpu.memory_space<vmem>>, vector<1x384x144xbf16>
    %11 = vector.shape_cast %10 : vector<1x384x144xbf16> to vector<384x144xbf16>
    %cst_10 = arith.constant dense<0.000000e+00> : vector<384x16xf32>
    %12 = tpu.matmul %11, %0, %cst_10 {dimension_numbers = #tpu.dot_dimension_numbers<[1], [0], [0], [1], [0, 0, 1, 1], [], []>} : vector<384x144xbf16>, vector<144x16xbf16>, vector<384x16xf32> -> vector<384x16xf32>
    %13 = vector.broadcast %1 : vector<1x16xf32> to vector<384x16xf32>
    %14 = arith.mulf %12, %13 : vector<384x16xf32>
    %15 = vector.broadcast %2 : vector<1x16xf32> to vector<384x16xf32>
    %16 = arith.addf %14, %15 : vector<384x16xf32>
    %17 = arith.maximumf %9, %16 : vector<384x16xf32>
    %c2 = arith.constant 2 : index
    %c0_11 = arith.constant 0 : index
    %c0_12 = arith.constant 0 : index
    %18 = vector.load %arg1[%c2, %c0_11, %c0_12] : memref<4x384x144xbf16, #tpu.memory_space<vmem>>, vector<1x384x144xbf16>
    %19 = vector.shape_cast %18 : vector<1x384x144xbf16> to vector<384x144xbf16>
    %cst_13 = arith.constant dense<0.000000e+00> : vector<384x16xf32>
    %20 = tpu.matmul %19, %0, %cst_13 {dimension_numbers = #tpu.dot_dimension_numbers<[1], [0], [0], [1], [0, 0, 1, 1], [], []>} : vector<384x144xbf16>, vector<144x16xbf16>, vector<384x16xf32> -> vector<384x16xf32>
    %21 = vector.broadcast %1 : vector<1x16xf32> to vector<384x16xf32>
    %22 = arith.mulf %20, %21 : vector<384x16xf32>
    %23 = vector.broadcast %2 : vector<1x16xf32> to vector<384x16xf32>
    %24 = arith.addf %22, %23 : vector<384x16xf32>
    %25 = arith.maximumf %17, %24 : vector<384x16xf32>
    %c3 = arith.constant 3 : index
    %c0_14 = arith.constant 0 : index
    %c0_15 = arith.constant 0 : index
    %26 = vector.load %arg1[%c3, %c0_14, %c0_15] : memref<4x384x144xbf16, #tpu.memory_space<vmem>>, vector<1x384x144xbf16>
    %27 = vector.shape_cast %26 : vector<1x384x144xbf16> to vector<384x144xbf16>
    %cst_16 = arith.constant dense<0.000000e+00> : vector<384x16xf32>
    %28 = tpu.matmul %27, %0, %cst_16 {dimension_numbers = #tpu.dot_dimension_numbers<[1], [0], [0], [1], [0, 0, 1, 1], [], []>} : vector<384x144xbf16>, vector<144x16xbf16>, vector<384x16xf32> -> vector<384x16xf32>
    %29 = vector.broadcast %1 : vector<1x16xf32> to vector<384x16xf32>
    %30 = arith.mulf %28, %29 : vector<384x16xf32>
    %31 = vector.broadcast %2 : vector<1x16xf32> to vector<384x16xf32>
    %32 = arith.addf %30, %31 : vector<384x16xf32>
    %33 = arith.maximumf %25, %32 : vector<384x16xf32>
    %cst_17 = arith.constant 0.000000e+00 : f32
    %34 = vector.broadcast %cst_17 : f32 to vector<384x16xf32>
    %35 = arith.maximumf %33, %34 : vector<384x16xf32>
    %c0_18 = arith.constant 0 : index
    %c0_19 = arith.constant 0 : index
    %36 = vector.load %arg5[%c0_18, %c0_19] : memref<384x16xf32, #tpu.memory_space<vmem>>, vector<384x16xf32>
    tpu.vector_store %arg5[%c0_18, %c0_19], %35 {strides = array<i32>} : memref<384x16xf32, #tpu.memory_space<vmem>>, vector<384x16xf32>,
    return
  }
  func.func @transform_0(%arg0: i32) -> (i32, i32, i32) {
    %c0_i32 = arith.constant 0 : i32
    %c0_i32_0 = arith.constant 0 : i32
    %c0_i32_1 = arith.constant 0 : i32
    return %c0_i32, %arg0, %c0_i32_0 : i32, i32, i32
  }
  func.func @transform_1(%arg0: i32) -> (i32, i32) {
    %c0_i32 = arith.constant 0 : i32
    %c0_i32_0 = arith.constant 0 : i32
    %c0_i32_1 = arith.constant 0 : i32
    return %c0_i32, %c0_i32_0 : i32, i32
  }
  func.func @transform_2(%arg0: i32) -> (i32, i32) {
    %c0_i32 = arith.constant 0 : i32
    %c0_i32_0 = arith.constant 0 : i32
    %c0_i32_1 = arith.constant 0 : i32
    return %c0_i32, %c0_i32_0 : i32, i32
  }
  func.func @transform_3(%arg0: i32) -> (i32, i32) {
    %c0_i32 = arith.constant 0 : i32
    %c0_i32_0 = arith.constant 0 : i32
    %c0_i32_1 = arith.constant 0 : i32
    return %c0_i32, %c0_i32_0 : i32, i32
  }
  func.func @transform_4(%arg0: i32) -> (i32, i32) {
    %c0_i32 = arith.constant 0 : i32
    %c0_i32_0 = arith.constant 0 : i32
    return %arg0, %c0_i32 : i32, i32
  }
}

module attributes {stable_mosaic.version = 11 : i64} {
  func.func @_conv_relu_pool_kernel(%arg0: i32, %arg1: memref<4x96x144xbf16, #tpu.memory_space<vmem>>, %arg2: memref<144x16xbf16, #tpu.memory_space<vmem>>, %arg3: memref<1x16xf32, #tpu.memory_space<vmem>>, %arg4: memref<1x16xf32, #tpu.memory_space<vmem>>, %arg5: memref<96x16xf32, #tpu.memory_space<vmem>>) attributes {dimension_semantics = [#tpu.dimension_semantics<parallel>], iteration_bounds = array<i64: 1>, scalar_prefetch = 0 : i64, scratch_operands = 0 : i64, tpu.core_type = #tpu.core_type<tc>, window_params = [{transform_indices = @transform_0, window_bounds = array<i64: 4, 96, 144>}, {pipeline_mode = #tpu.pipeline_mode<synchronous>, transform_indices = @transform_1, window_bounds = array<i64: 144, 16>}, {pipeline_mode = #tpu.pipeline_mode<synchronous>, transform_indices = @transform_2, window_bounds = array<i64: 1, 16>}, {pipeline_mode = #tpu.pipeline_mode<synchronous>, transform_indices = @transform_3, window_bounds = array<i64: 1, 16>}, {transform_indices = @transform_4, window_bounds = array<i64: 96, 16>}]} {
    %c0 = arith.constant 0 : index
    %c0_0 = arith.constant 0 : index
    %0 = vector.load %arg2[%c0, %c0_0] : memref<144x16xbf16, #tpu.memory_space<vmem>>, vector<144x16xbf16>
    %c0_1 = arith.constant 0 : index
    %c0_2 = arith.constant 0 : index
    %1 = vector.load %arg3[%c0_1, %c0_2] : memref<1x16xf32, #tpu.memory_space<vmem>>, vector<1x16xf32>
    %c0_3 = arith.constant 0 : index
    %c0_4 = arith.constant 0 : index
    %2 = vector.load %arg4[%c0_3, %c0_4] : memref<1x16xf32, #tpu.memory_space<vmem>>, vector<1x16xf32>
    %c0_5 = arith.constant 0 : index
    %c0_6 = arith.constant 0 : index
    %c0_7 = arith.constant 0 : index
    %3 = vector.load %arg1[%c0_5, %c0_6, %c0_7] : memref<4x96x144xbf16, #tpu.memory_space<vmem>>, vector<1x96x144xbf16>
    %4 = vector.shape_cast %3 : vector<1x96x144xbf16> to vector<96x144xbf16>
    %cst = arith.constant dense<0.000000e+00> : vector<96x16xf32>
    %5 = tpu.matmul %4, %0, %cst {dimension_numbers = #tpu.dot_dimension_numbers<[1], [0], [0], [1], [0, 0, 1, 1], [], []>} : vector<96x144xbf16>, vector<144x16xbf16>, vector<96x16xf32> -> vector<96x16xf32>
    %6 = vector.broadcast %1 : vector<1x16xf32> to vector<96x16xf32>
    %7 = arith.mulf %5, %6 : vector<96x16xf32>
    %8 = vector.broadcast %2 : vector<1x16xf32> to vector<96x16xf32>
    %9 = arith.addf %7, %8 : vector<96x16xf32>
    %c1 = arith.constant 1 : index
    %c0_8 = arith.constant 0 : index
    %c0_9 = arith.constant 0 : index
    %10 = vector.load %arg1[%c1, %c0_8, %c0_9] : memref<4x96x144xbf16, #tpu.memory_space<vmem>>, vector<1x96x144xbf16>
    %11 = vector.shape_cast %10 : vector<1x96x144xbf16> to vector<96x144xbf16>
    %cst_10 = arith.constant dense<0.000000e+00> : vector<96x16xf32>
    %12 = tpu.matmul %11, %0, %cst_10 {dimension_numbers = #tpu.dot_dimension_numbers<[1], [0], [0], [1], [0, 0, 1, 1], [], []>} : vector<96x144xbf16>, vector<144x16xbf16>, vector<96x16xf32> -> vector<96x16xf32>
    %13 = vector.broadcast %1 : vector<1x16xf32> to vector<96x16xf32>
    %14 = arith.mulf %12, %13 : vector<96x16xf32>
    %15 = vector.broadcast %2 : vector<1x16xf32> to vector<96x16xf32>
    %16 = arith.addf %14, %15 : vector<96x16xf32>
    %17 = arith.maximumf %9, %16 : vector<96x16xf32>
    %c2 = arith.constant 2 : index
    %c0_11 = arith.constant 0 : index
    %c0_12 = arith.constant 0 : index
    %18 = vector.load %arg1[%c2, %c0_11, %c0_12] : memref<4x96x144xbf16, #tpu.memory_space<vmem>>, vector<1x96x144xbf16>
    %19 = vector.shape_cast %18 : vector<1x96x144xbf16> to vector<96x144xbf16>
    %cst_13 = arith.constant dense<0.000000e+00> : vector<96x16xf32>
    %20 = tpu.matmul %19, %0, %cst_13 {dimension_numbers = #tpu.dot_dimension_numbers<[1], [0], [0], [1], [0, 0, 1, 1], [], []>} : vector<96x144xbf16>, vector<144x16xbf16>, vector<96x16xf32> -> vector<96x16xf32>
    %21 = vector.broadcast %1 : vector<1x16xf32> to vector<96x16xf32>
    %22 = arith.mulf %20, %21 : vector<96x16xf32>
    %23 = vector.broadcast %2 : vector<1x16xf32> to vector<96x16xf32>
    %24 = arith.addf %22, %23 : vector<96x16xf32>
    %25 = arith.maximumf %17, %24 : vector<96x16xf32>
    %c3 = arith.constant 3 : index
    %c0_14 = arith.constant 0 : index
    %c0_15 = arith.constant 0 : index
    %26 = vector.load %arg1[%c3, %c0_14, %c0_15] : memref<4x96x144xbf16, #tpu.memory_space<vmem>>, vector<1x96x144xbf16>
    %27 = vector.shape_cast %26 : vector<1x96x144xbf16> to vector<96x144xbf16>
    %cst_16 = arith.constant dense<0.000000e+00> : vector<96x16xf32>
    %28 = tpu.matmul %27, %0, %cst_16 {dimension_numbers = #tpu.dot_dimension_numbers<[1], [0], [0], [1], [0, 0, 1, 1], [], []>} : vector<96x144xbf16>, vector<144x16xbf16>, vector<96x16xf32> -> vector<96x16xf32>
    %29 = vector.broadcast %1 : vector<1x16xf32> to vector<96x16xf32>
    %30 = arith.mulf %28, %29 : vector<96x16xf32>
    %31 = vector.broadcast %2 : vector<1x16xf32> to vector<96x16xf32>
    %32 = arith.addf %30, %31 : vector<96x16xf32>
    %33 = arith.maximumf %25, %32 : vector<96x16xf32>
    %cst_17 = arith.constant 0.000000e+00 : f32
    %34 = vector.broadcast %cst_17 : f32 to vector<96x16xf32>
    %35 = arith.maximumf %33, %34 : vector<96x16xf32>
    %c0_18 = arith.constant 0 : index
    %c0_19 = arith.constant 0 : index
    %36 = vector.load %arg5[%c0_18, %c0_19] : memref<96x16xf32, #tpu.memory_space<vmem>>, vector<96x16xf32>
    tpu.vector_store %arg5[%c0_18, %c0_19], %35 {strides = array<i32>} : memref<96x16xf32, #tpu.memory_space<vmem>>, vector<96x16xf32>,
    return
  }
  func.func @transform_0(%arg0: i32) -> (i32, i32, i32) {
    %c0_i32 = arith.constant 0 : i32
    %c0_i32_0 = arith.constant 0 : i32
    %c0_i32_1 = arith.constant 0 : i32
    return %c0_i32, %arg0, %c0_i32_0 : i32, i32, i32
  }
  func.func @transform_1(%arg0: i32) -> (i32, i32) {
    %c0_i32 = arith.constant 0 : i32
    %c0_i32_0 = arith.constant 0 : i32
    %c0_i32_1 = arith.constant 0 : i32
    return %c0_i32, %c0_i32_0 : i32, i32
  }
  func.func @transform_2(%arg0: i32) -> (i32, i32) {
    %c0_i32 = arith.constant 0 : i32
    %c0_i32_0 = arith.constant 0 : i32
    %c0_i32_1 = arith.constant 0 : i32
    return %c0_i32, %c0_i32_0 : i32, i32
  }
  func.func @transform_3(%arg0: i32) -> (i32, i32) {
    %c0_i32 = arith.constant 0 : i32
    %c0_i32_0 = arith.constant 0 : i32
    %c0_i32_1 = arith.constant 0 : i32
    return %c0_i32, %c0_i32_0 : i32, i32
  }
  func.func @transform_4(%arg0: i32) -> (i32, i32) {
    %c0_i32 = arith.constant 0 : i32
    %c0_i32_0 = arith.constant 0 : i32
    return %arg0, %c0_i32 : i32, i32
  }
}

module attributes {stable_mosaic.version = 11 : i64} {
  func.func @_conv_relu_pool_kernel(%arg0: i32, %arg1: memref<4x24x144xbf16, #tpu.memory_space<vmem>>, %arg2: memref<144x16xbf16, #tpu.memory_space<vmem>>, %arg3: memref<1x16xf32, #tpu.memory_space<vmem>>, %arg4: memref<1x16xf32, #tpu.memory_space<vmem>>, %arg5: memref<24x16xf32, #tpu.memory_space<vmem>>) attributes {dimension_semantics = [#tpu.dimension_semantics<parallel>], iteration_bounds = array<i64: 1>, scalar_prefetch = 0 : i64, scratch_operands = 0 : i64, tpu.core_type = #tpu.core_type<tc>, window_params = [{transform_indices = @transform_0, window_bounds = array<i64: 4, 24, 144>}, {pipeline_mode = #tpu.pipeline_mode<synchronous>, transform_indices = @transform_1, window_bounds = array<i64: 144, 16>}, {pipeline_mode = #tpu.pipeline_mode<synchronous>, transform_indices = @transform_2, window_bounds = array<i64: 1, 16>}, {pipeline_mode = #tpu.pipeline_mode<synchronous>, transform_indices = @transform_3, window_bounds = array<i64: 1, 16>}, {transform_indices = @transform_4, window_bounds = array<i64: 24, 16>}]} {
    %c0 = arith.constant 0 : index
    %c0_0 = arith.constant 0 : index
    %0 = vector.load %arg2[%c0, %c0_0] : memref<144x16xbf16, #tpu.memory_space<vmem>>, vector<144x16xbf16>
    %c0_1 = arith.constant 0 : index
    %c0_2 = arith.constant 0 : index
    %1 = vector.load %arg3[%c0_1, %c0_2] : memref<1x16xf32, #tpu.memory_space<vmem>>, vector<1x16xf32>
    %c0_3 = arith.constant 0 : index
    %c0_4 = arith.constant 0 : index
    %2 = vector.load %arg4[%c0_3, %c0_4] : memref<1x16xf32, #tpu.memory_space<vmem>>, vector<1x16xf32>
    %c0_5 = arith.constant 0 : index
    %c0_6 = arith.constant 0 : index
    %c0_7 = arith.constant 0 : index
    %3 = vector.load %arg1[%c0_5, %c0_6, %c0_7] : memref<4x24x144xbf16, #tpu.memory_space<vmem>>, vector<1x24x144xbf16>
    %4 = vector.shape_cast %3 : vector<1x24x144xbf16> to vector<24x144xbf16>
    %cst = arith.constant dense<0.000000e+00> : vector<24x16xf32>
    %5 = tpu.matmul %4, %0, %cst {dimension_numbers = #tpu.dot_dimension_numbers<[1], [0], [0], [1], [0, 0, 1, 1], [], []>} : vector<24x144xbf16>, vector<144x16xbf16>, vector<24x16xf32> -> vector<24x16xf32>
    %6 = vector.broadcast %1 : vector<1x16xf32> to vector<24x16xf32>
    %7 = arith.mulf %5, %6 : vector<24x16xf32>
    %8 = vector.broadcast %2 : vector<1x16xf32> to vector<24x16xf32>
    %9 = arith.addf %7, %8 : vector<24x16xf32>
    %c1 = arith.constant 1 : index
    %c0_8 = arith.constant 0 : index
    %c0_9 = arith.constant 0 : index
    %10 = vector.load %arg1[%c1, %c0_8, %c0_9] : memref<4x24x144xbf16, #tpu.memory_space<vmem>>, vector<1x24x144xbf16>
    %11 = vector.shape_cast %10 : vector<1x24x144xbf16> to vector<24x144xbf16>
    %cst_10 = arith.constant dense<0.000000e+00> : vector<24x16xf32>
    %12 = tpu.matmul %11, %0, %cst_10 {dimension_numbers = #tpu.dot_dimension_numbers<[1], [0], [0], [1], [0, 0, 1, 1], [], []>} : vector<24x144xbf16>, vector<144x16xbf16>, vector<24x16xf32> -> vector<24x16xf32>
    %13 = vector.broadcast %1 : vector<1x16xf32> to vector<24x16xf32>
    %14 = arith.mulf %12, %13 : vector<24x16xf32>
    %15 = vector.broadcast %2 : vector<1x16xf32> to vector<24x16xf32>
    %16 = arith.addf %14, %15 : vector<24x16xf32>
    %17 = arith.maximumf %9, %16 : vector<24x16xf32>
    %c2 = arith.constant 2 : index
    %c0_11 = arith.constant 0 : index
    %c0_12 = arith.constant 0 : index
    %18 = vector.load %arg1[%c2, %c0_11, %c0_12] : memref<4x24x144xbf16, #tpu.memory_space<vmem>>, vector<1x24x144xbf16>
    %19 = vector.shape_cast %18 : vector<1x24x144xbf16> to vector<24x144xbf16>
    %cst_13 = arith.constant dense<0.000000e+00> : vector<24x16xf32>
    %20 = tpu.matmul %19, %0, %cst_13 {dimension_numbers = #tpu.dot_dimension_numbers<[1], [0], [0], [1], [0, 0, 1, 1], [], []>} : vector<24x144xbf16>, vector<144x16xbf16>, vector<24x16xf32> -> vector<24x16xf32>
    %21 = vector.broadcast %1 : vector<1x16xf32> to vector<24x16xf32>
    %22 = arith.mulf %20, %21 : vector<24x16xf32>
    %23 = vector.broadcast %2 : vector<1x16xf32> to vector<24x16xf32>
    %24 = arith.addf %22, %23 : vector<24x16xf32>
    %25 = arith.maximumf %17, %24 : vector<24x16xf32>
    %c3 = arith.constant 3 : index
    %c0_14 = arith.constant 0 : index
    %c0_15 = arith.constant 0 : index
    %26 = vector.load %arg1[%c3, %c0_14, %c0_15] : memref<4x24x144xbf16, #tpu.memory_space<vmem>>, vector<1x24x144xbf16>
    %27 = vector.shape_cast %26 : vector<1x24x144xbf16> to vector<24x144xbf16>
    %cst_16 = arith.constant dense<0.000000e+00> : vector<24x16xf32>
    %28 = tpu.matmul %27, %0, %cst_16 {dimension_numbers = #tpu.dot_dimension_numbers<[1], [0], [0], [1], [0, 0, 1, 1], [], []>} : vector<24x144xbf16>, vector<144x16xbf16>, vector<24x16xf32> -> vector<24x16xf32>
    %29 = vector.broadcast %1 : vector<1x16xf32> to vector<24x16xf32>
    %30 = arith.mulf %28, %29 : vector<24x16xf32>
    %31 = vector.broadcast %2 : vector<1x16xf32> to vector<24x16xf32>
    %32 = arith.addf %30, %31 : vector<24x16xf32>
    %33 = arith.maximumf %25, %32 : vector<24x16xf32>
    %cst_17 = arith.constant 0.000000e+00 : f32
    %34 = vector.broadcast %cst_17 : f32 to vector<24x16xf32>
    %35 = arith.maximumf %33, %34 : vector<24x16xf32>
    %c0_18 = arith.constant 0 : index
    %c0_19 = arith.constant 0 : index
    %36 = vector.load %arg5[%c0_18, %c0_19] : memref<24x16xf32, #tpu.memory_space<vmem>>, vector<24x16xf32>
    tpu.vector_store %arg5[%c0_18, %c0_19], %35 {strides = array<i32>} : memref<24x16xf32, #tpu.memory_space<vmem>>, vector<24x16xf32>,
    return
  }
  func.func @transform_0(%arg0: i32) -> (i32, i32, i32) {
    %c0_i32 = arith.constant 0 : i32
    %c0_i32_0 = arith.constant 0 : i32
    %c0_i32_1 = arith.constant 0 : i32
    return %c0_i32, %arg0, %c0_i32_0 : i32, i32, i32
  }
  func.func @transform_1(%arg0: i32) -> (i32, i32) {
    %c0_i32 = arith.constant 0 : i32
    %c0_i32_0 = arith.constant 0 : i32
    %c0_i32_1 = arith.constant 0 : i32
    return %c0_i32, %c0_i32_0 : i32, i32
  }
  func.func @transform_2(%arg0: i32) -> (i32, i32) {
    %c0_i32 = arith.constant 0 : i32
    %c0_i32_0 = arith.constant 0 : i32
    %c0_i32_1 = arith.constant 0 : i32
    return %c0_i32, %c0_i32_0 : i32, i32
  }
  func.func @transform_3(%arg0: i32) -> (i32, i32) {
    %c0_i32 = arith.constant 0 : i32
    %c0_i32_0 = arith.constant 0 : i32
    %c0_i32_1 = arith.constant 0 : i32
    return %c0_i32, %c0_i32_0 : i32, i32
  }
  func.func @transform_4(%arg0: i32) -> (i32, i32) {
    %c0_i32 = arith.constant 0 : i32
    %c0_i32_0 = arith.constant 0 : i32
    return %arg0, %c0_i32 : i32, i32
  }
}

module attributes {stable_mosaic.version = 11 : i64} {
  func.func @_conv_relu_pool_kernel(%arg0: i32, %arg1: memref<4x8x144xbf16, #tpu.memory_space<vmem>>, %arg2: memref<144x8xbf16, #tpu.memory_space<vmem>>, %arg3: memref<1x8xf32, #tpu.memory_space<vmem>>, %arg4: memref<1x8xf32, #tpu.memory_space<vmem>>, %arg5: memref<8x8xf32, #tpu.memory_space<vmem>>) attributes {dimension_semantics = [#tpu.dimension_semantics<parallel>], iteration_bounds = array<i64: 1>, scalar_prefetch = 0 : i64, scratch_operands = 0 : i64, tpu.core_type = #tpu.core_type<tc>, window_params = [{transform_indices = @transform_0, window_bounds = array<i64: 4, 8, 144>}, {pipeline_mode = #tpu.pipeline_mode<synchronous>, transform_indices = @transform_1, window_bounds = array<i64: 144, 8>}, {pipeline_mode = #tpu.pipeline_mode<synchronous>, transform_indices = @transform_2, window_bounds = array<i64: 1, 8>}, {pipeline_mode = #tpu.pipeline_mode<synchronous>, transform_indices = @transform_3, window_bounds = array<i64: 1, 8>}, {transform_indices = @transform_4, window_bounds = array<i64: 8, 8>}]} {
    %c0 = arith.constant 0 : index
    %c0_0 = arith.constant 0 : index
    %0 = vector.load %arg2[%c0, %c0_0] : memref<144x8xbf16, #tpu.memory_space<vmem>>, vector<144x8xbf16>
    %c0_1 = arith.constant 0 : index
    %c0_2 = arith.constant 0 : index
    %1 = vector.load %arg3[%c0_1, %c0_2] : memref<1x8xf32, #tpu.memory_space<vmem>>, vector<1x8xf32>
    %c0_3 = arith.constant 0 : index
    %c0_4 = arith.constant 0 : index
    %2 = vector.load %arg4[%c0_3, %c0_4] : memref<1x8xf32, #tpu.memory_space<vmem>>, vector<1x8xf32>
    %c0_5 = arith.constant 0 : index
    %c0_6 = arith.constant 0 : index
    %c0_7 = arith.constant 0 : index
    %3 = vector.load %arg1[%c0_5, %c0_6, %c0_7] : memref<4x8x144xbf16, #tpu.memory_space<vmem>>, vector<1x8x144xbf16>
    %4 = vector.shape_cast %3 : vector<1x8x144xbf16> to vector<8x144xbf16>
    %cst = arith.constant dense<0.000000e+00> : vector<8x8xf32>
    %5 = tpu.matmul %4, %0, %cst {dimension_numbers = #tpu.dot_dimension_numbers<[1], [0], [0], [1], [0, 0, 1, 1], [], []>} : vector<8x144xbf16>, vector<144x8xbf16>, vector<8x8xf32> -> vector<8x8xf32>
    %6 = vector.broadcast %1 : vector<1x8xf32> to vector<8x8xf32>
    %7 = arith.mulf %5, %6 : vector<8x8xf32>
    %8 = vector.broadcast %2 : vector<1x8xf32> to vector<8x8xf32>
    %9 = arith.addf %7, %8 : vector<8x8xf32>
    %c1 = arith.constant 1 : index
    %c0_8 = arith.constant 0 : index
    %c0_9 = arith.constant 0 : index
    %10 = vector.load %arg1[%c1, %c0_8, %c0_9] : memref<4x8x144xbf16, #tpu.memory_space<vmem>>, vector<1x8x144xbf16>
    %11 = vector.shape_cast %10 : vector<1x8x144xbf16> to vector<8x144xbf16>
    %cst_10 = arith.constant dense<0.000000e+00> : vector<8x8xf32>
    %12 = tpu.matmul %11, %0, %cst_10 {dimension_numbers = #tpu.dot_dimension_numbers<[1], [0], [0], [1], [0, 0, 1, 1], [], []>} : vector<8x144xbf16>, vector<144x8xbf16>, vector<8x8xf32> -> vector<8x8xf32>
    %13 = vector.broadcast %1 : vector<1x8xf32> to vector<8x8xf32>
    %14 = arith.mulf %12, %13 : vector<8x8xf32>
    %15 = vector.broadcast %2 : vector<1x8xf32> to vector<8x8xf32>
    %16 = arith.addf %14, %15 : vector<8x8xf32>
    %17 = arith.maximumf %9, %16 : vector<8x8xf32>
    %c2 = arith.constant 2 : index
    %c0_11 = arith.constant 0 : index
    %c0_12 = arith.constant 0 : index
    %18 = vector.load %arg1[%c2, %c0_11, %c0_12] : memref<4x8x144xbf16, #tpu.memory_space<vmem>>, vector<1x8x144xbf16>
    %19 = vector.shape_cast %18 : vector<1x8x144xbf16> to vector<8x144xbf16>
    %cst_13 = arith.constant dense<0.000000e+00> : vector<8x8xf32>
    %20 = tpu.matmul %19, %0, %cst_13 {dimension_numbers = #tpu.dot_dimension_numbers<[1], [0], [0], [1], [0, 0, 1, 1], [], []>} : vector<8x144xbf16>, vector<144x8xbf16>, vector<8x8xf32> -> vector<8x8xf32>
    %21 = vector.broadcast %1 : vector<1x8xf32> to vector<8x8xf32>
    %22 = arith.mulf %20, %21 : vector<8x8xf32>
    %23 = vector.broadcast %2 : vector<1x8xf32> to vector<8x8xf32>
    %24 = arith.addf %22, %23 : vector<8x8xf32>
    %25 = arith.maximumf %17, %24 : vector<8x8xf32>
    %c3 = arith.constant 3 : index
    %c0_14 = arith.constant 0 : index
    %c0_15 = arith.constant 0 : index
    %26 = vector.load %arg1[%c3, %c0_14, %c0_15] : memref<4x8x144xbf16, #tpu.memory_space<vmem>>, vector<1x8x144xbf16>
    %27 = vector.shape_cast %26 : vector<1x8x144xbf16> to vector<8x144xbf16>
    %cst_16 = arith.constant dense<0.000000e+00> : vector<8x8xf32>
    %28 = tpu.matmul %27, %0, %cst_16 {dimension_numbers = #tpu.dot_dimension_numbers<[1], [0], [0], [1], [0, 0, 1, 1], [], []>} : vector<8x144xbf16>, vector<144x8xbf16>, vector<8x8xf32> -> vector<8x8xf32>
    %29 = vector.broadcast %1 : vector<1x8xf32> to vector<8x8xf32>
    %30 = arith.mulf %28, %29 : vector<8x8xf32>
    %31 = vector.broadcast %2 : vector<1x8xf32> to vector<8x8xf32>
    %32 = arith.addf %30, %31 : vector<8x8xf32>
    %33 = arith.maximumf %25, %32 : vector<8x8xf32>
    %cst_17 = arith.constant 0.000000e+00 : f32
    %34 = vector.broadcast %cst_17 : f32 to vector<8x8xf32>
    %35 = arith.maximumf %33, %34 : vector<8x8xf32>
    %c0_18 = arith.constant 0 : index
    %c0_19 = arith.constant 0 : index
    %36 = vector.load %arg5[%c0_18, %c0_19] : memref<8x8xf32, #tpu.memory_space<vmem>>, vector<8x8xf32>
    tpu.vector_store %arg5[%c0_18, %c0_19], %35 {strides = array<i32>} : memref<8x8xf32, #tpu.memory_space<vmem>>, vector<8x8xf32>,
    return
  }
  func.func @transform_0(%arg0: i32) -> (i32, i32, i32) {
    %c0_i32 = arith.constant 0 : i32
    %c0_i32_0 = arith.constant 0 : i32
    %c0_i32_1 = arith.constant 0 : i32
    return %c0_i32, %arg0, %c0_i32_0 : i32, i32, i32
  }
  func.func @transform_1(%arg0: i32) -> (i32, i32) {
    %c0_i32 = arith.constant 0 : i32
    %c0_i32_0 = arith.constant 0 : i32
    %c0_i32_1 = arith.constant 0 : i32
    return %c0_i32, %c0_i32_0 : i32, i32
  }
  func.func @transform_2(%arg0: i32) -> (i32, i32) {
    %c0_i32 = arith.constant 0 : i32
    %c0_i32_0 = arith.constant 0 : i32
    %c0_i32_1 = arith.constant 0 : i32
    return %c0_i32, %c0_i32_0 : i32, i32
  }
  func.func @transform_3(%arg0: i32) -> (i32, i32) {
    %c0_i32 = arith.constant 0 : i32
    %c0_i32_0 = arith.constant 0 : i32
    %c0_i32_1 = arith.constant 0 : i32
    return %c0_i32, %c0_i32_0 : i32, i32
  }
  func.func @transform_4(%arg0: i32) -> (i32, i32) {
    %c0_i32 = arith.constant 0 : i32
    %c0_i32_0 = arith.constant 0 : i32
    return %arg0, %c0_i32 : i32, i32
  }
}

</mosaic_0001>

<bundles_post_ra>
// kernel: forward.5
= control target key start
LH: loop header
LB: loop body
LE: loop exit
PB: predicated region body
PF: predicated region fallthrough
CT: control target
= control target key end

     0   :  { %s5717_s15 = smov 0   ;;  %s5719_s16 = smov 0   ;;  %s7541_s0 = inlined_call_operand.vmem [shape: bf16[4,1536,27], index: 0, kind: input, shape index: {}]   ;;  %s7542_s1 = inlined_call_operand.vmem [shape: bf16[27,16], index: 1, kind: input, shape index: {}]   ;;  %s7543_s2 = inlined_call_operand.vmem [shape: f32[1,16], index: 2, kind: input, shape index: {}]   ;;  %s7544_s3 = inlined_call_operand.vmem [shape: f32[1,16], index: 3, kind: input, shape index: {}]   ;;  %s7545_s4 = inlined_call_operand.vmem [shape: f32[1536,16], index: 4, kind: output, shape index: {}]  }
   0x1   :  { %s5721_s17 = smov 0  }
   0x2 LB: > { %s4634_s18 = sadd.s32 4294967295, %s5689_s17   ;;  %s5734_s19 = sadd.s32 1, %s5689_s17   ;;  %s5689_s17 = sphi %s5721_s17, %s7861_s17   ;;  %s5685_s16 = sphi %s5719_s16, %s7860_s16   ;;  %s5681_s15 = sphi %s5717_s15, %s7859_s15  }
   0x3   : > { %s18_s20 = ssub.s32 %s5689_s17, %s5734_s19  ;;  %s21_s21 = sadd.s32 1, %s5685_s16 }
   0x4   : > { %p19_p0 = scmp.eq.s32.totalorder %s18_s20, 0  ;;  %p28_p1 = scmp.ne.s32.totalorder %s5685_s16, %s5681_s15 }
   0x5   : > { %p29_p2 = scmp.eq.s32.totalorder %s5689_s17, 0  ;;  %p4637_p4 = scmp.ge.s32.totalorder %s5689_s17, 3 }
   0x6   : > { %s5743_s22 = scalar_select %p19_p0, %s5685_s16, %s21_s21  }
   0x7   : > { %p30_p3 = por %p29_p2, %p28_p1  ;;  %152 = sbr.rel (%p4637_p4) target bundleno = 82 (0x52), region = 28 }
   0xe   : > { %155 = sbr.rel (!%p30_p3) target bundleno = 82 (0x52), region = 32  ;;  %s157_s23 = sand.u32 (%p30_p3), 1, %s5685_s16  }
   0xf   : > { %s5099_s24 = sshll.u32 (%p30_p3), %s5689_s17, 8  ;;  %s4638_s25 = sshll.u32 (%p30_p3), %s157_s23, 10 }
  0x10   : > { %s5751_s28 = scalar_lea.vmem (%p30_p3), %s7541_s0, %s5099_s24  ;;  %s5756_s29 = scalar_lea.vmem (%p30_p3), [#allocation2], %s4638_s25 }
  0x11   : > { %v178_v0 = vld [vmem:[%s5751_s28] sm:$0xff] (%p30_p3)   ;;  %v182_v1 = vld [vmem:[%s5751_s28 + $0x8] sm:$0xff] (%p30_p3)   ;;  %v186_v2 = vld [vmem:[%s5751_s28 + $0x10] sm:$0xff] (%p30_p3)  }
  0x12   : > { %179 = vst [vmem:[%s5756_s29] sm:$0xff] (%p30_p3), %v178_v0   ;;  %183 = vst [vmem:[%s5756_s29 + $0x8] sm:$0xff] (%p30_p3), %v182_v1   ;;  %v190_v3 = vld [vmem:[%s5751_s28 + $0x18] sm:$0xff] (%p30_p3)   ;;  %v194_v4 = vld [vmem:[%s5751_s28 + $0x20] sm:$0xff] (%p30_p3)  }
  0x13   : > { %187 = vst [vmem:[%s5756_s29 + $0x10] sm:$0xff] (%p30_p3), %v186_v2   ;;  %v198_v5 = vld [vmem:[%s5751_s28 + $0x28] sm:$0xff] (%p30_p3)   ;;  %191 = vst [vmem:[%s5756_s29 + $0x18] sm:$0xff] (%p30_p3), %v190_v3   ;;  %v202_v6 = vld [vmem:[%s5751_s28 + $0x30] sm:$0xff] (%p30_p3)  }
  0x14   : > { %195 = vst [vmem:[%s5756_s29 + $0x20] sm:$0xff] (%p30_p3), %v194_v4   ;;  %199 = vst [vmem:[%s5756_s29 + $0x28] sm:$0xff] (%p30_p3), %v198_v5   ;;  %v206_v7 = vld [vmem:[%s5751_s28 + $0x38] sm:$0xff] (%p30_p3)   ;;  %v210_v8 = vld [vmem:[%s5751_s28 + $0x40] sm:$0xff] (%p30_p3)  }
  0x15   : > { %203 = vst [vmem:[%s5756_s29 + $0x30] sm:$0xff] %v202_v6   ;;  %207 = vst [vmem:[%s5756_s29 + $0x38] sm:$0xff] %v206_v7   ;;  %v214_v9 = vld [vmem:[%s5751_s28 + $0x48] sm:$0xff]   ;;  %v218_v10 = vld [vmem:[%s5751_s28 + $0x50] sm:$0xff]  }
  0x16   : > { %211 = vst [vmem:[%s5756_s29 + $0x40] sm:$0xff] %v210_v8   ;;  %v222_v11 = vld [vmem:[%s5751_s28 + $0x58] sm:$0xff]   ;;  %215 = vst [vmem:[%s5756_s29 + $0x48] sm:$0xff] %v214_v9   ;;  %v226_v12 = vld [vmem:[%s5751_s28 + $0x60] sm:$0xff]  }
  0x17   : > { %219 = vst [vmem:[%s5756_s29 + $0x50] sm:$0xff] %v218_v10   ;;  %223 = vst [vmem:[%s5756_s29 + $0x58] sm:$0xff] %v222_v11   ;;  %v230_v13 = vld [vmem:[%s5751_s28 + $0x68] sm:$0xff]   ;;  %v234_v14 = vld [vmem:[%s5751_s28 + $0x70] sm:$0xff]  }
  0x18   : > { %227 = vst [vmem:[%s5756_s29 + $0x60] sm:$0xff] %v226_v12   ;;  %231 = vst [vmem:[%s5756_s29 + $0x68] sm:$0xff] %v230_v13   ;;  %v238_v15 = vld [vmem:[%s5751_s28 + $0x78] sm:$0xff]   ;;  %v242_v16 = vld [vmem:[%s5751_s28 + $0x80] sm:$0xff]  }
  0x19   : > { %235 = vst [vmem:[%s5756_s29 + $0x70] sm:$0xff] %v234_v14   ;;  %v246_v17 = vld [vmem:[%s5751_s28 + $0x88] sm:$0xff]   ;;  %239 = vst [vmem:[%s5756_s29 + $0x78] sm:$0xff] %v238_v15   ;;  %v250_v18 = vld [vmem:[%s5751_s28 + $0x90] sm:$0xff]  }
  0x1a   : > { %243 = vst [vmem:[%s5756_s29 + $0x80] sm:$0xff] %v242_v16   ;;  %247 = vst [vmem:[%s5756_s29 + $0x88] sm:$0xff] %v246_v17   ;;  %v254_v19 = vld [vmem:[%s5751_s28 + $0x98] sm:$0xff]   ;;  %v258_v20 = vld [vmem:[%s5751_s28 + $0xa0] sm:$0xff]  }
  0x1b   : > { %251 = vst [vmem:[%s5756_s29 + $0x90] sm:$0xff] %v250_v18   ;;  %255 = vst [vmem:[%s5756_s29 + $0x98] sm:$0xff] %v254_v19   ;;  %v262_v21 = vld [vmem:[%s5751_s28 + $0xa8] sm:$0xff]   ;;  %v266_v22 = vld [vmem:[%s5751_s28 + $0xb0] sm:$0xff]  }
  0x1c   : > { %259 = vst [vmem:[%s5756_s29 + $0xa0] sm:$0xff] %v258_v20   ;;  %v270_v23 = vld [vmem:[%s5751_s28 + $0xb8] sm:$0xff]   ;;  %263 = vst [vmem:[%s5756_s29 + $0xa8] sm:$0xff] %v262_v21   ;;  %v274_v24 = vld [vmem:[%s5751_s28 + $0xc0] sm:$0xff]  }
  0x1d   : > { %267 = vst [vmem:[%s5756_s29 + $0xb0] sm:$0xff] %v266_v22   ;;  %271 = vst [vmem:[%s5756_s29 + $0xb8] sm:$0xff] %v270_v23   ;;  %v278_v25 = vld [vmem:[%s5751_s28 + $0xc8] sm:$0xff]   ;;  %v282_v26 = vld [vmem:[%s5751_s28 + $0xd0] sm:$0xff]  }
  0x1e   : > { %275 = vst [vmem:[%s5756_s29 + $0xc0] sm:$0xff] %v274_v24   ;;  %279 = vst [vmem:[%s5756_s29 + $0xc8] sm:$0xff] %v278_v25   ;;  %v286_v27 = vld [vmem:[%s5751_s28 + $0xd8] sm:$0xff]   ;;  %v290_v28 = vld [vmem:[%s5751_s28 + $0xe0] sm:$0xff]  }
  0x1f   : > { %283 = vst [vmem:[%s5756_s29 + $0xd0] sm:$0xff] %v282_v26   ;;  %v294_v29 = vld [vmem:[%s5751_s28 + $0xe8] sm:$0xff]   ;;  %287 = vst [vmem:[%s5756_s29 + $0xd8] sm:$0xff] %v286_v27   ;;  %v298_v30 = vld [vmem:[%s5751_s28 + $0xf0] sm:$0xff]  }
  0x20   : > { %291 = vst [vmem:[%s5756_s29 + $0xe0] sm:$0xff] %v290_v28   ;;  %295 = vst [vmem:[%s5756_s29 + $0xe8] sm:$0xff] %v294_v29   ;;  %v302_v31 = vld [vmem:[%s5751_s28 + $0xf8] sm:$0xff]   ;;  %v306_v32 = vld [vmem:[%s5751_s28 + $0x300] sm:$0xff]  }
  0x21   : > { %299 = vst [vmem:[%s5756_s29 + $0xf0] sm:$0xff] %v298_v30   ;;  %303 = vst [vmem:[%s5756_s29 + $0xf8] sm:$0xff] %v302_v31   ;;  %v310_v33 = vld [vmem:[%s5751_s28 + $0x308] sm:$0xff]   ;;  %v314_v34 = vld [vmem:[%s5751_s28 + $0x310] sm:$0xff]  }
  0x22   : > { %307 = vst [vmem:[%s5756_s29 + $0x100] sm:$0xff] %v306_v32   ;;  %v318_v35 = vld [vmem:[%s5751_s28 + $0x318] sm:$0xff]   ;;  %311 = vst [vmem:[%s5756_s29 + $0x108] sm:$0xff] %v310_v33   ;;  %v322_v36 = vld [vmem:[%s5751_s28 + $0x320] sm:$0xff]  }
  0x23   : > { %315 = vst [vmem:[%s5756_s29 + $0x110] sm:$0xff] %v314_v34   ;;  %319 = vst [vmem:[%s5756_s29 + $0x118] sm:$0xff] %v318_v35   ;;  %v326_v37 = vld [vmem:[%s5751_s28 + $0x328] sm:$0xff]   ;;  %v330_v38 = vld [vmem:[%s5751_s28 + $0x330] sm:$0xff]  }
  0x24   : > { %323 = vst [vmem:[%s5756_s29 + $0x120] sm:$0xff] %v322_v36   ;;  %327 = vst [vmem:[%s5756_s29 + $0x128] sm:$0xff] %v326_v37   ;;  %v334_v39 = vld [vmem:[%s5751_s28 + $0x338] sm:$0xff]   ;;  %v338_v40 = vld [vmem:[%s5751_s28 + $0x340] sm:$0xff]  }
  0x25   : > { %331 = vst [vmem:[%s5756_s29 + $0x130] sm:$0xff] %v330_v38   ;;  %v342_v41 = vld [vmem:[%s5751_s28 + $0x348] sm:$0xff]   ;;  %335 = vst [vmem:[%s5756_s29 + $0x138] sm:$0xff] %v334_v39   ;;  %v346_v42 = vld [vmem:[%s5751_s28 + $0x350] sm:$0xff]  }
  0x26   : > { %339 = vst [vmem:[%s5756_s29 + $0x140] sm:$0xff] %v338_v40   ;;  %343 = vst [vmem:[%s5756_s29 + $0x148] sm:$0xff] %v342_v41   ;;  %v350_v43 = vld [vmem:[%s5751_s28 + $0x358] sm:$0xff]   ;;  %v354_v44 = vld [vmem:[%s5751_s28 + $0x360] sm:$0xff]  }
  0x27   : > { %347 = vst [vmem:[%s5756_s29 + $0x150] sm:$0xff] %v346_v42   ;;  %351 = vst [vmem:[%s5756_s29 + $0x158] sm:$0xff] %v350_v43   ;;  %v358_v45 = vld [vmem:[%s5751_s28 + $0x368] sm:$0xff]   ;;  %v362_v46 = vld [vmem:[%s5751_s28 + $0x370] sm:$0xff]  }
  0x28   : > { %355 = vst [vmem:[%s5756_s29 + $0x160] sm:$0xff] %v354_v44   ;;  %v366_v47 = vld [vmem:[%s5751_s28 + $0x378] sm:$0xff]   ;;  %359 = vst [vmem:[%s5756_s29 + $0x168] sm:$0xff] %v358_v45   ;;  %v370_v48 = vld [vmem:[%s5751_s28 + $0x380] sm:$0xff]  }
  0x29   : > { %363 = vst [vmem:[%s5756_s29 + $0x170] sm:$0xff] %v362_v46   ;;  %367 = vst [vmem:[%s5756_s29 + $0x178] sm:$0xff] %v366_v47   ;;  %v374_v49 = vld [vmem:[%s5751_s28 + $0x388] sm:$0xff]   ;;  %v378_v50 = vld [vmem:[%s5751_s28 + $0x390] sm:$0xff]  }
  0x2a   : > { %371 = vst [vmem:[%s5756_s29 + $0x180] sm:$0xff] %v370_v48   ;;  %375 = vst [vmem:[%s5756_s29 + $0x188] sm:$0xff] %v374_v49   ;;  %v382_v51 = vld [vmem:[%s5751_s28 + $0x398] sm:$0xff]   ;;  %v386_v52 = vld [vmem:[%s5751_s28 + $0x3a0] sm:$0xff]  }
  0x2b   : > { %379 = vst [vmem:[%s5756_s29 + $0x190] sm:$0xff] %v378_v50   ;;  %v390_v53 = vld [vmem:[%s5751_s28 + $0x3a8] sm:$0xff]   ;;  %383 = vst [vmem:[%s5756_s29 + $0x198] sm:$0xff] %v382_v51   ;;  %v394_v54 = vld [vmem:[%s5751_s28 + $0x3b0] sm:$0xff]  }
  0x2c   : > { %387 = vst [vmem:[%s5756_s29 + $0x1a0] sm:$0xff] %v386_v52   ;;  %391 = vst [vmem:[%s5756_s29 + $0x1a8] sm:$0xff] %v390_v53   ;;  %v398_v55 = vld [vmem:[%s5751_s28 + $0x3b8] sm:$0xff]   ;;  %v402_v56 = vld [vmem:[%s5751_s28 + $0x3c0] sm:$0xff]  }
  0x2d   : > { %395 = vst [vmem:[%s5756_s29 + $0x1b0] sm:$0xff] %v394_v54   ;;  %399 = vst [vmem:[%s5756_s29 + $0x1b8] sm:$0xff] %v398_v55   ;;  %v406_v57 = vld [vmem:[%s5751_s28 + $0x3c8] sm:$0xff]   ;;  %v410_v58 = vld [vmem:[%s5751_s28 + $0x3d0] sm:$0xff]  }
  0x2e   : > { %403 = vst [vmem:[%s5756_s29 + $0x1c0] sm:$0xff] %v402_v56   ;;  %v414_v59 = vld [vmem:[%s5751_s28 + $0x3d8] sm:$0xff]   ;;  %407 = vst [vmem:[%s5756_s29 + $0x1c8] sm:$0xff] %v406_v57   ;;  %v418_v60 = vld [vmem:[%s5751_s28 + $0x3e0] sm:$0xff]  }
  0x2f   : > { %411 = vst [vmem:[%s5756_s29 + $0x1d0] sm:$0xff] %v410_v58   ;;  %415 = vst [vmem:[%s5756_s29 + $0x1d8] sm:$0xff] %v414_v59   ;;  %v422_v61 = vld [vmem:[%s5751_s28 + $0x3e8] sm:$0xff]   ;;  %v426_v62 = vld [vmem:[%s5751_s28 + $0x3f0] sm:$0xff]  }
  0x30   : > { %419 = vst [vmem:[%s5756_s29 + $0x1e0] sm:$0xff] %v418_v60   ;;  %423 = vst [vmem:[%s5756_s29 + $0x1e8] sm:$0xff] %v422_v61   ;;  %v430_v63 = vld [vmem:[%s5751_s28 + $0x3f8] sm:$0xff]   ;;  %v434_v0 = vld [vmem:[%s5751_s28 + $0x600] sm:$0xff]  }
  0x31   : > { %427 = vst [vmem:[%s5756_s29 + $0x1f0] sm:$0xff] %v426_v62   ;;  %v438_v1 = vld [vmem:[%s5751_s28 + $0x608] sm:$0xff]   ;;  %431 = vst [vmem:[%s5756_s29 + $0x1f8] sm:$0xff] %v430_v63   ;;  %v442_v2 = vld [vmem:[%s5751_s28 + $0x610] sm:$0xff]  }
  0x32   : > { %435 = vst [vmem:[%s5756_s29 + $0x200] sm:$0xff] %v434_v0   ;;  %439 = vst [vmem:[%s5756_s29 + $0x208] sm:$0xff] %v438_v1   ;;  %v446_v3 = vld [vmem:[%s5751_s28 + $0x618] sm:$0xff]   ;;  %v450_v4 = vld [vmem:[%s5751_s28 + $0x620] sm:$0xff]  }
  0x33   : > { %443 = vst [vmem:[%s5756_s29 + $0x210] sm:$0xff] %v442_v2   ;;  %447 = vst [vmem:[%s5756_s29 + $0x218] sm:$0xff] %v446_v3   ;;  %v454_v5 = vld [vmem:[%s5751_s28 + $0x628] sm:$0xff]   ;;  %v458_v6 = vld [vmem:[%s5751_s28 + $0x630] sm:$0xff]  }
  0x34   : > { %451 = vst [vmem:[%s5756_s29 + $0x220] sm:$0xff] %v450_v4   ;;  %v462_v7 = vld [vmem:[%s5751_s28 + $0x638] sm:$0xff]   ;;  %455 = vst [vmem:[%s5756_s29 + $0x228] sm:$0xff] %v454_v5   ;;  %v466_v8 = vld [vmem:[%s5751_s28 + $0x640] sm:$0xff]  }
  0x35   : > { %459 = vst [vmem:[%s5756_s29 + $0x230] sm:$0xff] %v458_v6   ;;  %463 = vst [vmem:[%s5756_s29 + $0x238] sm:$0xff] %v462_v7   ;;  %v470_v9 = vld [vmem:[%s5751_s28 + $0x648] sm:$0xff]   ;;  %v474_v10 = vld [vmem:[%s5751_s28 + $0x650] sm:$0xff]  }
  0x36   : > { %467 = vst [vmem:[%s5756_s29 + $0x240] sm:$0xff] %v466_v8   ;;  %471 = vst [vmem:[%s5756_s29 + $0x248] sm:$0xff] %v470_v9   ;;  %v478_v11 = vld [vmem:[%s5751_s28 + $0x658] sm:$0xff]   ;;  %v482_v12 = vld [vmem:[%s5751_s28 + $0x660] sm:$0xff]  }
  0x37   : > { %475 = vst [vmem:[%s5756_s29 + $0x250] sm:$0xff] %v474_v10   ;;  %v486_v13 = vld [vmem:[%s5751_s28 + $0x668] sm:$0xff]   ;;  %479 = vst [vmem:[%s5756_s29 + $0x258] sm:$0xff] %v478_v11   ;;  %v490_v14 = vld [vmem:[%s5751_s28 + $0x670] sm:$0xff]  }
  0x38   : > { %483 = vst [vmem:[%s5756_s29 + $0x260] sm:$0xff] %v482_v12   ;;  %487 = vst [vmem:[%s5756_s29 + $0x268] sm:$0xff] %v486_v13   ;;  %v494_v15 = vld [vmem:[%s5751_s28 + $0x678] sm:$0xff]   ;;  %v498_v16 = vld [vmem:[%s5751_s28 + $0x680] sm:$0xff]  }
  0x39   : > { %491 = vst [vmem:[%s5756_s29 + $0x270] sm:$0xff] %v490_v14   ;;  %495 = vst [vmem:[%s5756_s29 + $0x278] sm:$0xff] %v494_v15   ;;  %v502_v17 = vld [vmem:[%s5751_s28 + $0x688] sm:$0xff]   ;;  %v506_v18 = vld [vmem:[%s5751_s28 + $0x690] sm:$0xff]  }
  0x3a   : > { %499 = vst [vmem:[%s5756_s29 + $0x280] sm:$0xff] %v498_v16   ;;  %v510_v19 = vld [vmem:[%s5751_s28 + $0x698] sm:$0xff]   ;;  %503 = vst [vmem:[%s5756_s29 + $0x288] sm:$0xff] %v502_v17   ;;  %v514_v20 = vld [vmem:[%s5751_s28 + $0x6a0] sm:$0xff]  }
  0x3b   : > { %507 = vst [vmem:[%s5756_s29 + $0x290] sm:$0xff] %v506_v18   ;;  %511 = vst [vmem:[%s5756_s29 + $0x298] sm:$0xff] %v510_v19   ;;  %v518_v21 = vld [vmem:[%s5751_s28 + $0x6a8] sm:$0xff]   ;;  %v522_v22 = vld [vmem:[%s5751_s28 + $0x6b0] sm:$0xff]  }
  0x3c   : > { %515 = vst [vmem:[%s5756_s29 + $0x2a0] sm:$0xff] %v514_v20   ;;  %519 = vst [vmem:[%s5756_s29 + $0x2a8] sm:$0xff] %v518_v21   ;;  %v526_v23 = vld [vmem:[%s5751_s28 + $0x6b8] sm:$0xff]   ;;  %v530_v24 = vld [vmem:[%s5751_s28 + $0x6c0] sm:$0xff]  }
  0x3d   : > { %523 = vst [vmem:[%s5756_s29 + $0x2b0] sm:$0xff] %v522_v22   ;;  %v534_v25 = vld [vmem:[%s5751_s28 + $0x6c8] sm:$0xff]   ;;  %527 = vst [vmem:[%s5756_s29 + $0x2b8] sm:$0xff] %v526_v23   ;;  %v538_v26 = vld [vmem:[%s5751_s28 + $0x6d0] sm:$0xff]  }
  0x3e   : > { %531 = vst [vmem:[%s5756_s29 + $0x2c0] sm:$0xff] %v530_v24   ;;  %535 = vst [vmem:[%s5756_s29 + $0x2c8] sm:$0xff] %v534_v25   ;;  %v542_v27 = vld [vmem:[%s5751_s28 + $0x6d8] sm:$0xff]   ;;  %v546_v28 = vld [vmem:[%s5751_s28 + $0x6e0] sm:$0xff]  }
  0x3f   : > { %539 = vst [vmem:[%s5756_s29 + $0x2d0] sm:$0xff] %v538_v26   ;;  %543 = vst [vmem:[%s5756_s29 + $0x2d8] sm:$0xff] %v542_v27   ;;  %v550_v29 = vld [vmem:[%s5751_s28 + $0x6e8] sm:$0xff]   ;;  %v554_v30 = vld [vmem:[%s5751_s28 + $0x6f0] sm:$0xff]  }
  0x40   : > { %547 = vst [vmem:[%s5756_s29 + $0x2e0] sm:$0xff] %v546_v28   ;;  %v558_v31 = vld [vmem:[%s5751_s28 + $0x6f8] sm:$0xff]   ;;  %551 = vst [vmem:[%s5756_s29 + $0x2e8] sm:$0xff] %v550_v29   ;;  %v562_v32 = vld [vmem:[%s5751_s28 + $0x900] sm:$0xff]  }
  0x41   : > { %555 = vst [vmem:[%s5756_s29 + $0x2f0] sm:$0xff] %v554_v30   ;;  %559 = vst [vmem:[%s5756_s29 + $0x2f8] sm:$0xff] %v558_v31   ;;  %v566_v33 = vld [vmem:[%s5751_s28 + $0x908] sm:$0xff]   ;;  %v570_v34 = vld [vmem:[%s5751_s28 + $0x910] sm:$0xff]  }
  0x42   : > { %563 = vst [vmem:[%s5756_s29 + $0x300] sm:$0xff] %v562_v32   ;;  %567 = vst [vmem:[%s5756_s29 + $0x308] sm:$0xff] %v566_v33   ;;  %v574_v35 = vld [vmem:[%s5751_s28 + $0x918] sm:$0xff]   ;;  %v578_v36 = vld [vmem:[%s5751_s28 + $0x920] sm:$0xff]  }
  0x43   : > { %571 = vst [vmem:[%s5756_s29 + $0x310] sm:$0xff] %v570_v34   ;;  %v582_v37 = vld [vmem:[%s5751_s28 + $0x928] sm:$0xff]   ;;  %575 = vst [vmem:[%s5756_s29 + $0x318] sm:$0xff] %v574_v35   ;;  %v586_v38 = vld [vmem:[%s5751_s28 + $0x930] sm:$0xff]  }
  0x44   : > { %579 = vst [vmem:[%s5756_s29 + $0x320] sm:$0xff] %v578_v36   ;;  %583 = vst [vmem:[%s5756_s29 + $0x328] sm:$0xff] %v582_v37   ;;  %v590_v39 = vld [vmem:[%s5751_s28 + $0x938] sm:$0xff]   ;;  %v594_v40 = vld [vmem:[%s5751_s28 + $0x940] sm:$0xff]  }
  0x45   : > { %587 = vst [vmem:[%s5756_s29 + $0x330] sm:$0xff] %v586_v38   ;;  %591 = vst [vmem:[%s5756_s29 + $0x338] sm:$0xff] %v590_v39   ;;  %v598_v41 = vld [vmem:[%s5751_s28 + $0x948] sm:$0xff]   ;;  %v602_v42 = vld [vmem:[%s5751_s28 + $0x950] sm:$0xff]  }
  0x46   : > { %595 = vst [vmem:[%s5756_s29 + $0x340] sm:$0xff] %v594_v40   ;;  %v606_v43 = vld [vmem:[%s5751_s28 + $0x958] sm:$0xff]   ;;  %599 = vst [vmem:[%s5756_s29 + $0x348] sm:$0xff] %v598_v41   ;;  %v610_v44 = vld [vmem:[%s5751_s28 + $0x960] sm:$0xff]  }
  0x47   : > { %603 = vst [vmem:[%s5756_s29 + $0x350] sm:$0xff] %v602_v42   ;;  %607 = vst [vmem:[%s5756_s29 + $0x358] sm:$0xff] %v606_v43   ;;  %v614_v45 = vld [vmem:[%s5751_s28 + $0x968] sm:$0xff]   ;;  %v618_v46 = vld [vmem:[%s5751_s28 + $0x970] sm:$0xff]  }
  0x48   : > { %611 = vst [vmem:[%s5756_s29 + $0x360] sm:$0xff] %v610_v44   ;;  %615 = vst [vmem:[%s5756_s29 + $0x368] sm:$0xff] %v614_v45   ;;  %v622_v47 = vld [vmem:[%s5751_s28 + $0x978] sm:$0xff]   ;;  %v626_v48 = vld [vmem:[%s5751_s28 + $0x980] sm:$0xff]  }
  0x49   : > { %619 = vst [vmem:[%s5756_s29 + $0x370] sm:$0xff] %v618_v46   ;;  %v630_v49 = vld [vmem:[%s5751_s28 + $0x988] sm:$0xff]   ;;  %623 = vst [vmem:[%s5756_s29 + $0x378] sm:$0xff] %v622_v47   ;;  %v634_v50 = vld [vmem:[%s5751_s28 + $0x990] sm:$0xff]  }
  0x4a   : > { %627 = vst [vmem:[%s5756_s29 + $0x380] sm:$0xff] %v626_v48   ;;  %631 = vst [vmem:[%s5756_s29 + $0x388] sm:$0xff] %v630_v49   ;;  %v638_v51 = vld [vmem:[%s5751_s28 + $0x998] sm:$0xff]   ;;  %v642_v52 = vld [vmem:[%s5751_s28 + $0x9a0] sm:$0xff]  }
  0x4b   : > { %635 = vst [vmem:[%s5756_s29 + $0x390] sm:$0xff] %v634_v50   ;;  %639 = vst [vmem:[%s5756_s29 + $0x398] sm:$0xff] %v638_v51   ;;  %v646_v53 = vld [vmem:[%s5751_s28 + $0x9a8] sm:$0xff]   ;;  %v650_v54 = vld [vmem:[%s5751_s28 + $0x9b0] sm:$0xff]  }
  0x4c   : > { %643 = vst [vmem:[%s5756_s29 + $0x3a0] sm:$0xff] %v642_v52   ;;  %v654_v55 = vld [vmem:[%s5751_s28 + $0x9b8] sm:$0xff]   ;;  %647 = vst [vmem:[%s5756_s29 + $0x3a8] sm:$0xff] %v646_v53   ;;  %v658_v56 = vld [vmem:[%s5751_s28 + $0x9c0] sm:$0xff]  }
  0x4d   : > { %651 = vst [vmem:[%s5756_s29 + $0x3b0] sm:$0xff] %v650_v54   ;;  %655 = vst [vmem:[%s5756_s29 + $0x3b8] sm:$0xff] %v654_v55   ;;  %v662_v57 = vld [vmem:[%s5751_s28 + $0x9c8] sm:$0xff]   ;;  %v666_v58 = vld [vmem:[%s5751_s28 + $0x9d0] sm:$0xff]  }
  0x4e   : > { %659 = vst [vmem:[%s5756_s29 + $0x3c0] sm:$0xff] %v658_v56   ;;  %663 = vst [vmem:[%s5756_s29 + $0x3c8] sm:$0xff] %v662_v57   ;;  %v670_v59 = vld [vmem:[%s5751_s28 + $0x9d8] sm:$0xff]   ;;  %v674_v60 = vld [vmem:[%s5751_s28 + $0x9e0] sm:$0xff]  }
  0x4f   : > { %667 = vst [vmem:[%s5756_s29 + $0x3d0] sm:$0xff] %v666_v58   ;;  %v678_v61 = vld [vmem:[%s5751_s28 + $0x9e8] sm:$0xff]   ;;  %671 = vst [vmem:[%s5756_s29 + $0x3d8] sm:$0xff] %v670_v59   ;;  %v682_v62 = vld [vmem:[%s5751_s28 + $0x9f0] sm:$0xff]  }
  0x50   : > { %675 = vst [vmem:[%s5756_s29 + $0x3e0] sm:$0xff] %v674_v60   ;;  %679 = vst [vmem:[%s5756_s29 + $0x3e8] sm:$0xff] %v678_v61   ;;  %v686_v63 = vld [vmem:[%s5751_s28 + $0x9f8] sm:$0xff]  }
  0x51   : > { %683 = vst [vmem:[%s5756_s29 + $0x3f0] sm:$0xff] %v682_v62   ;;  %687 = vst [vmem:[%s5756_s29 + $0x3f8] sm:$0xff] %v686_v63  }
  0x52 PF: > { %p4641_p5 = scmp.ge.s32.totalorder %s5689_s17, 1  ;;  %p1223_p6 = scmp.lt.s32.totalorder %s5689_s17, 4 }
  0x54   : > { %p1224_p7 = pnand %p4641_p5, %p1223_p6 }
  0x56   : > { %1227 = sbr.rel (%p1224_p7) target bundleno = 579 (0x243), region = 73 }
  0x5d   : > { %v5533_v0 = vld [vmem:[%s7542_s1] sm:$0xff]   ;;  %vm1601_vm0 = vcmask 1044480   ;;  %v5534_v1 = vld [vmem:[%s7542_s1 + $0x8] sm:$0x3f]   ;;  %vm1602_vm1 = vcmask 1045504   ;;  %s1230_s8 = sand.u32 1, %s5681_s15  }
  0x5e   : > { %5236 = vmatprep.subr.bf16.mxu0 %v5533_v0  ;;  %5304 = vmatprep.subr.bf16.mxu1 %v5533_v0  ;;  %v5691_v2 = vmov 65535   ;;  %s4642_s9 = sshll.u32 %s1230_s8, 10  ;;  %vm1504_vm2 = vcmask 220160   ;;  %s4643_s15 = sshll.u32 %s4634_s18, 6  ;;  %vm4507_vm3 = vcmask 130048  }
  0x5f   : > { %5237 = vmatpush3.bf16.msra.mxu0 %v5533_v0  ;;  %5305 = vmatpush3.bf16.msra.mxu1 %v5533_v0  ;;  %v1603_v3 = vsel %vm1601_vm0, 4294967295, %v5691_v2  ;;  %s6020_s10 = scalar_lea.vmem [#allocation2], %s4642_s9  ;;  %p1257_p8 = scmp.lt.s32.totalorder %s4643_s15, 191 }
  0x60   : > { %v1604_v4 = vsel %vm1602_vm1, %v1603_v3, 0  ;;  %v5535_v6 = vld [vmem:[%s6020_s10] sm:$0xff]   ;;  %v5537_v8 = vld [vmem:[%s6020_s10 + $0x8] sm:$0xff]   ;;  %v5539_v10 = vld [vmem:[%s6020_s10 + $0x10] sm:$0xff]  }
  0x61   : > { %v1606_v5 = vand.u32 %v5534_v1, %v1604_v4  ;;  %v5536_v7 = vld [vmem:[%s6020_s10 + $0x100] sm:$0xff]   ;;  %v5538_v9 = vld [vmem:[%s6020_s10 + $0x108] sm:$0xff]   ;;  %5240 = vmatprep.mubr.msk.bf16.mxu0 %vm1504_vm2, %v5535_v6  ;;  %v5540_v11 = vld [vmem:[%s6020_s10 + $0x110] sm:$0xff]   ;;  %s7863_s15 = smov (!%p1257_p8, %s4643_s15), 191 }
  0x62   : > { %5308 = vmatprep.mubr.msk.bf16.mxu1 %vm1504_vm2, %v5536_v7  ;;  %v5541_v12 = vld [vmem:[%s6020_s10 + $0x18] sm:$0xff]   ;;  %v5543_v14 = vld [vmem:[%s6020_s10 + $0x20] sm:$0xff]   ;;  %v5545_v16 = vld [vmem:[%s6020_s10 + $0x28] sm:$0xff]   ;;  %s4644_s17 = sshll.u32 %s7863_s15, 3 }
  0x63   : > { %5238 = vmatprep.subr.bf16.mxu0 %v1606_v5  ;;  %5306 = vmatprep.subr.bf16.mxu1 %v1606_v5  ;;  %v5542_v13 = vld [vmem:[%s6020_s10 + $0x118] sm:$0xff]   ;;  %v5544_v15 = vld [vmem:[%s6020_s10 + $0x120] sm:$0xff]   ;;  %v5546_v17 = vld [vmem:[%s6020_s10 + $0x128] sm:$0xff]   ;;  %s6962_s24 = scalar_lea.vmem %s7545_s4, %s4644_s17 }
  0x64   : > { %5239 = vmatpush3.bf16.msra.mxu0 %v1606_v5  ;;  %5307 = vmatpush3.bf16.msra.mxu1 %v1606_v5  ;;  %v5547_v18 = vld [vmem:[%s6020_s10 + $0x30] sm:$0xff]   ;;  %v5549_v20 = vld [vmem:[%s6020_s10 + $0x38] sm:$0xff]   ;;  %v5551_v22 = vld [vmem:[%s6020_s10 + $0x40] sm:$0xff]  }
  0x65   : > { %5372 = vmatprep.subr.bf16.mxu0 %v5533_v0  ;;  %5440 = vmatprep.subr.bf16.mxu1 %v5533_v0  ;;  %v5548_v19 = vld [vmem:[%s6020_s10 + $0x130] sm:$0xff]   ;;  %v5550_v21 = vld [vmem:[%s6020_s10 + $0x138] sm:$0xff]   ;;  %v5552_v23 = vld [vmem:[%s6020_s10 + $0x140] sm:$0xff]  }
  0x66   : > { %v5553_v24 = vld [vmem:[%s6020_s10 + $0x48] sm:$0xff]   ;;  %v5555_v26 = vld [vmem:[%s6020_s10 + $0x50] sm:$0xff]   ;;  %v5557_v28 = vld [vmem:[%s6020_s10 + $0x58] sm:$0xff]  }
  0x67   : > { %5241 = vmatmul.mubr.msk.bf16.vlgmr.msra.gmra.mrb[0].mxu0 %vm1504_vm2, %v5537_v8  ;;  %5309 = vmatmul.mubr.msk.bf16.vlgmr.msra.gmra.mrb[0].mxu1 %vm1504_vm2, %v5538_v9  ;;  %v5554_v25 = vld [vmem:[%s6020_s10 + $0x148] sm:$0xff]   ;;  %v5556_v27 = vld [vmem:[%s6020_s10 + $0x150] sm:$0xff]   ;;  %v5558_v29 = vld [vmem:[%s6020_s10 + $0x158] sm:$0xff]  }
  0x68   : > { %5373 = vmatpush3.bf16.msra.mxu0 %v5533_v0  ;;  %5441 = vmatpush3.bf16.msra.mxu1 %v5533_v0  ;;  %v5559_v30 = vld [vmem:[%s6020_s10 + $0x60] sm:$0xff]   ;;  %v5561_v32 = vld [vmem:[%s6020_s10 + $0x68] sm:$0xff]   ;;  %v5563_v34 = vld [vmem:[%s6020_s10 + $0x70] sm:$0xff]  }
  0x69   : > { %5244 = vmatprep.mubr.msk.bf16.mxu0 %vm1504_vm2, %v5539_v10  ;;  %5312 = vmatprep.mubr.msk.bf16.mxu1 %vm1504_vm2, %v5540_v11  ;;  %v5560_v31 = vld [vmem:[%s6020_s10 + $0x160] sm:$0xff]   ;;  %v5562_v33 = vld [vmem:[%s6020_s10 + $0x168] sm:$0xff]   ;;  %v5564_v35 = vld [vmem:[%s6020_s10 + $0x170] sm:$0xff]  }
  0x6a   : > { %5374 = vmatprep.subr.bf16.mxu0 %v1606_v5  ;;  %5442 = vmatprep.subr.bf16.mxu1 %v1606_v5  ;;  %v5565_v36 = vld [vmem:[%s6020_s10 + $0x78] sm:$0xff]   ;;  %v5567_v38 = vld [vmem:[%s6020_s10 + $0x80] sm:$0xff]   ;;  %v5569_v40 = vld [vmem:[%s6020_s10 + $0x88] sm:$0xff]  }
  0x6b   : > { %v5566_v37 = vld [vmem:[%s6020_s10 + $0x178] sm:$0xff]   ;;  %v5568_v39 = vld [vmem:[%s6020_s10 + $0x180] sm:$0xff]   ;;  %v5570_v41 = vld [vmem:[%s6020_s10 + $0x188] sm:$0xff]  }
  0x6c   : > { %5375 = vmatpush3.bf16.msra.mxu0 %v1606_v5  ;;  %5443 = vmatpush3.bf16.msra.mxu1 %v1606_v5  ;;  %v5571_v42 = vld [vmem:[%s6020_s10 + $0x90] sm:$0xff]   ;;  %v5573_v44 = vld [vmem:[%s6020_s10 + $0x98] sm:$0xff]   ;;  %v5575_v46 = vld [vmem:[%s6020_s10 + $0xa0] sm:$0xff]  }
  0x6d   : > { %v5572_v43 = vld [vmem:[%s6020_s10 + $0x190] sm:$0xff]   ;;  %v5574_v45 = vld [vmem:[%s6020_s10 + $0x198] sm:$0xff]   ;;  %v5576_v47 = vld [vmem:[%s6020_s10 + $0x1a0] sm:$0xff]  }
  0x6e   : > { %v5577_v48 = vld [vmem:[%s6020_s10 + $0xa8] sm:$0xff]   ;;  %v5579_v50 = vld [vmem:[%s6020_s10 + $0xb0] sm:$0xff]   ;;  %v5581_v52 = vld [vmem:[%s6020_s10 + $0xb8] sm:$0xff]  }
  0x6f   : > { %5245 = vmatmul.mubr.msk.bf16.gmra.mrb[4].mxu0 %vm1504_vm2, %v5541_v12  ;;  %5313 = vmatmul.mubr.msk.bf16.gmra.mrb[4].mxu1 %vm1504_vm2, %v5542_v13  ;;  %v5578_v49 = vld [vmem:[%s6020_s10 + $0x1a8] sm:$0xff]   ;;  %v5580_v51 = vld [vmem:[%s6020_s10 + $0x1b0] sm:$0xff]   ;;  %v5582_v53 = vld [vmem:[%s6020_s10 + $0x1b8] sm:$0xff]  }
  0x70   : > { %5248 = vmatprep.mubr.msk.bf16.mxu0 %vm1504_vm2, %v5543_v14  ;;  %5316 = vmatprep.mubr.msk.bf16.mxu1 %vm1504_vm2, %v5544_v15  ;;  %v5583_v54 = vld [vmem:[%s6020_s10 + $0xc0] sm:$0xff]   ;;  %v5585_v56 = vld [vmem:[%s6020_s10 + $0xc8] sm:$0xff]   ;;  %v5587_v58 = vld [vmem:[%s6020_s10 + $0xd0] sm:$0xff]  }
  0x71   : > { %v5584_v55 = vld [vmem:[%s6020_s10 + $0x1c0] sm:$0xff]   ;;  %v5586_v57 = vld [vmem:[%s6020_s10 + $0x1c8] sm:$0xff]   ;;  %v5588_v59 = vld [vmem:[%s6020_s10 + $0x1d0] sm:$0xff]  }
  0x72   : > { %v5589_v60 = vld [vmem:[%s6020_s10 + $0xd8] sm:$0xff]   ;;  %v5591_v62 = vld [vmem:[%s6020_s10 + $0xe0] sm:$0xff]   ;;  %v5593_v0 = vld [vmem:[%s6020_s10 + $0xe8] sm:$0xff]  }
  0x73   : > { %v5590_v61 = vld [vmem:[%s6020_s10 + $0x1d8] sm:$0xff]   ;;  %v5592_v63 = vld [vmem:[%s6020_s10 + $0x1e0] sm:$0xff]   ;;  %v5594_v1 = vld [vmem:[%s6020_s10 + $0x1e8] sm:$0xff]  }
  0x74   : > { %v5595_v2 = vld [vmem:[%s6020_s10 + $0xf0] sm:$0xff]   ;;  %v5597_v4 = vld [vmem:[%s6020_s10 + $0xf8] sm:$0xff]   ;;  %v5599_v6 = vld [vmem:[%s6020_s10 + $0x200] sm:$0xff]  }
  0x75   : > { %v5596_v3 = vld [vmem:[%s6020_s10 + $0x1f0] sm:$0xff]   ;;  %v5598_v5 = vld [vmem:[%s6020_s10 + $0x1f8] sm:$0xff]   ;;  %v5600_v7 = vld [vmem:[%s6020_s10 + $0x300] sm:$0xff]  }
  0x76   : > { %v5601_v8 = vld [vmem:[%s6020_s10 + $0x208] sm:$0xff]   ;;  %v5603_v10 = vld [vmem:[%s6020_s10 + $0x210] sm:$0xff]   ;;  %v5605_v12 = vld [vmem:[%s6020_s10 + $0x218] sm:$0xff]  }
  0x77   : > { %5249 = vmatmul.mubr.msk.bf16.gmra.mrb[8].mxu0 %vm1504_vm2, %v5545_v16  ;;  %5317 = vmatmul.mubr.msk.bf16.gmra.mrb[8].mxu1 %vm1504_vm2, %v5546_v17  ;;  %v5602_v9 = vld [vmem:[%s6020_s10 + $0x308] sm:$0xff]   ;;  %v5604_v11 = vld [vmem:[%s6020_s10 + $0x310] sm:$0xff]   ;;  %v5606_v13 = vld [vmem:[%s6020_s10 + $0x318] sm:$0xff]  }
  0x78   : > { %5252 = vmatprep.mubr.msk.bf16.mxu0 %vm1504_vm2, %v5547_v18  ;;  %5320 = vmatprep.mubr.msk.bf16.mxu1 %vm1504_vm2, %v5548_v19  ;;  %v5607_v14 = vld [vmem:[%s6020_s10 + $0x220] sm:$0xff]   ;;  %v5609_v16 = vld [vmem:[%s6020_s10 + $0x228] sm:$0xff]   ;;  %v5611_v18 = vld [vmem:[%s6020_s10 + $0x230] sm:$0xff]  }
  0x79   : > { %v5608_v15 = vld [vmem:[%s6020_s10 + $0x320] sm:$0xff]   ;;  %v5610_v17 = vld [vmem:[%s6020_s10 + $0x328] sm:$0xff]   ;;  %v5612_v19 = vld [vmem:[%s6020_s10 + $0x330] sm:$0xff]  }
  0x7f   : > { %5253 = vmatmul.mubr.msk.bf16.gmra.mrb[12].mxu0 %vm1504_vm2, %v5549_v20  ;;  %5321 = vmatmul.mubr.msk.bf16.gmra.mrb[12].mxu1 %vm1504_vm2, %v5550_v21  ;;  %v5613_v20 = vld [vmem:[%s6020_s10 + $0x238] sm:$0xff]  }
  0x80   : > { %5256 = vmatprep.mubr.msk.bf16.mxu0 %vm1504_vm2, %v5551_v22  ;;  %5324 = vmatprep.mubr.msk.bf16.mxu1 %vm1504_vm2, %v5552_v23  ;;  %v5614_v21 = vld [vmem:[%s6020_s10 + $0x338] sm:$0xff]   ;;  %v5615_v22 = vld [vmem:[%s6020_s10 + $0x240] sm:$0xff]  }
  0x81   : > { %v5616_v23 = vld [vmem:[%s6020_s10 + $0x340] sm:$0xff]  }
  0x87   : > { %5257 = vmatmul.mubr.msk.bf16.gmra.mrb[16].mxu0 %vm1504_vm2, %v5553_v24  ;;  %5325 = vmatmul.mubr.msk.bf16.gmra.mrb[16].mxu1 %vm1504_vm2, %v5554_v25  ;;  %v5617_v24 = vld [vmem:[%s6020_s10 + $0x248] sm:$0xff]  }
  0x88   : > { %5260 = vmatprep.mubr.msk.bf16.mxu0 %vm1504_vm2, %v5555_v26  ;;  %5328 = vmatprep.mubr.msk.bf16.mxu1 %vm1504_vm2, %v5556_v27  ;;  %v5618_v25 = vld [vmem:[%s6020_s10 + $0x348] sm:$0xff]   ;;  %v5619_v26 = vld [vmem:[%s6020_s10 + $0x250] sm:$0xff]  }
  0x89   : > { %v5620_v27 = vld [vmem:[%s6020_s10 + $0x350] sm:$0xff]  }
  0x8f   : > { %5261 = vmatmul.mubr.msk.bf16.gmra.mrb[20].mxu0 %vm1504_vm2, %v5557_v28  ;;  %5329 = vmatmul.mubr.msk.bf16.gmra.mrb[20].mxu1 %vm1504_vm2, %v5558_v29  ;;  %v5621_v28 = vld [vmem:[%s6020_s10 + $0x258] sm:$0xff]  }
  0x90   : > { %5264 = vmatprep.mubr.msk.bf16.mxu0 %vm1504_vm2, %v5559_v30  ;;  %5332 = vmatprep.mubr.msk.bf16.mxu1 %vm1504_vm2, %v5560_v31  ;;  %v5622_v29 = vld [vmem:[%s6020_s10 + $0x358] sm:$0xff]   ;;  %v5623_v30 = vld [vmem:[%s6020_s10 + $0x260] sm:$0xff]  }
  0x91   : > { %v5624_v31 = vld [vmem:[%s6020_s10 + $0x360] sm:$0xff]  }
  0x97   : > { %5265 = vmatmul.mubr.msk.bf16.gmra.mrb[24].mxu0 %vm1504_vm2, %v5561_v32  ;;  %5333 = vmatmul.mubr.msk.bf16.gmra.mrb[24].mxu1 %vm1504_vm2, %v5562_v33  ;;  %v5625_v32 = vld [vmem:[%s6020_s10 + $0x268] sm:$0xff]  }
  0x98   : > { %5268 = vmatprep.mubr.msk.bf16.mxu0 %vm1504_vm2, %v5563_v34  ;;  %5336 = vmatprep.mubr.msk.bf16.mxu1 %vm1504_vm2, %v5564_v35  ;;  %v5626_v33 = vld [vmem:[%s6020_s10 + $0x368] sm:$0xff]   ;;  %v5627_v34 = vld [vmem:[%s6020_s10 + $0x270] sm:$0xff]  }
  0x99   : > { %v5628_v35 = vld [vmem:[%s6020_s10 + $0x370] sm:$0xff]  }
  0x9f   : > { %5269 = vmatmul.mubr.msk.bf16.gmra.mrb[28].mxu0 %vm1504_vm2, %v5565_v36  ;;  %5337 = vmatmul.mubr.msk.bf16.gmra.mrb[28].mxu1 %vm1504_vm2, %v5566_v37  ;;  %v5629_v36 = vld [vmem:[%s6020_s10 + $0x278] sm:$0xff]  }
  0xa0   : > { %5272 = vmatprep.mubr.msk.bf16.mxu0 %vm1504_vm2, %v5567_v38  ;;  %5340 = vmatprep.mubr.msk.bf16.mxu1 %vm1504_vm2, %v5568_v39  ;;  %v5630_v37 = vld [vmem:[%s6020_s10 + $0x378] sm:$0xff]   ;;  %v5631_v38 = vld [vmem:[%s6020_s10 + $0x280] sm:$0xff]  }
  0xa1   : > { %v5632_v39 = vld [vmem:[%s6020_s10 + $0x380] sm:$0xff]  }
  0xa7   : > { %5273 = vmatmul.mubr.msk.bf16.gmra.mrb[32].mxu0 %vm1504_vm2, %v5569_v40  ;;  %5341 = vmatmul.mubr.msk.bf16.gmra.mrb[32].mxu1 %vm1504_vm2, %v5570_v41  ;;  %v5633_v40 = vld [vmem:[%s6020_s10 + $0x288] sm:$0xff]  }
  0xa8   : > { %5276 = vmatprep.mubr.msk.bf16.mxu0 %vm1504_vm2, %v5571_v42  ;;  %5344 = vmatprep.mubr.msk.bf16.mxu1 %vm1504_vm2, %v5572_v43  ;;  %v5634_v41 = vld [vmem:[%s6020_s10 + $0x388] sm:$0xff]   ;;  %v5635_v42 = vld [vmem:[%s6020_s10 + $0x290] sm:$0xff]  }
  0xa9   : > { %v5636_v43 = vld [vmem:[%s6020_s10 + $0x390] sm:$0xff]  }
  0xaf   : > { %5277 = vmatmul.mubr.msk.bf16.gmra.mrb[36].mxu0 %vm1504_vm2, %v5573_v44  ;;  %5345 = vmatmul.mubr.msk.bf16.gmra.mrb[36].mxu1 %vm1504_vm2, %v5574_v45  ;;  %v5637_v44 = vld [vmem:[%s6020_s10 + $0x298] sm:$0xff]  }
  0xb0   : > { %5280 = vmatprep.mubr.msk.bf16.mxu0 %vm1504_vm2, %v5575_v46  ;;  %5348 = vmatprep.mubr.msk.bf16.mxu1 %vm1504_vm2, %v5576_v47  ;;  %v5638_v45 = vld [vmem:[%s6020_s10 + $0x398] sm:$0xff]   ;;  %v5639_v46 = vld [vmem:[%s6020_s10 + $0x2a0] sm:$0xff]  }
  0xb1   : > { %v5640_v47 = vld [vmem:[%s6020_s10 + $0x3a0] sm:$0xff]  }
  0xb7   : > { %5281 = vmatmul.mubr.msk.bf16.gmra.mrb[40].mxu0 %vm1504_vm2, %v5577_v48  ;;  %5349 = vmatmul.mubr.msk.bf16.gmra.mrb[40].mxu1 %vm1504_vm2, %v5578_v49  ;;  %v5641_v48 = vld [vmem:[%s6020_s10 + $0x2a8] sm:$0xff]  }
  0xb8   : > { %5284 = vmatprep.mubr.msk.bf16.mxu0 %vm1504_vm2, %v5579_v50  ;;  %5352 = vmatprep.mubr.msk.bf16.mxu1 %vm1504_vm2, %v5580_v51  ;;  %v5642_v49 = vld [vmem:[%s6020_s10 + $0x3a8] sm:$0xff]   ;;  %v5643_v50 = vld [vmem:[%s6020_s10 + $0x2b0] sm:$0xff]  }
  0xb9   : > { %v5644_v51 = vld [vmem:[%s6020_s10 + $0x3b0] sm:$0xff]  }
  0xbf   : > { %5285 = vmatmul.mubr.msk.bf16.gmra.mrb[44].mxu0 %vm1504_vm2, %v5581_v52  ;;  %5353 = vmatmul.mubr.msk.bf16.gmra.mrb[44].mxu1 %vm1504_vm2, %v5582_v53  ;;  %v6243_v52 = vld [vmem:[%s7543_s2] ss:$0 sm:$0xff] }
  0xc0   : > { %5288 = vmatprep.mubr.msk.bf16.mxu0 %vm1504_vm2, %v5583_v54  ;;  %5356 = vmatprep.mubr.msk.bf16.mxu1 %vm1504_vm2, %v5584_v55  ;;  %v6250_v53 = vld [vmem:[%s7544_s3] ss:$0 sm:$0xff] }
  0xc7   : > { %5289 = vmatmul.mubr.msk.bf16.gmra.mrb[48].mxu0 %vm1504_vm2, %v5585_v56  ;;  %5357 = vmatmul.mubr.msk.bf16.gmra.mrb[48].mxu1 %vm1504_vm2, %v5586_v57 }
  0xc8   : > { %5292 = vmatprep.mubr.msk.bf16.mxu0 %vm1504_vm2, %v5587_v58  ;;  %5360 = vmatprep.mubr.msk.bf16.mxu1 %vm1504_vm2, %v5588_v59 }
  0xcf   : > { %5293 = vmatmul.mubr.msk.bf16.gmra.mrb[52].mxu0 %vm1504_vm2, %v5589_v60  ;;  %5361 = vmatmul.mubr.msk.bf16.gmra.mrb[52].mxu1 %vm1504_vm2, %v5590_v61  ;;  %v5645_v60 = vld [vmem:[%s6020_s10 + $0x2b8] sm:$0xff]  }
  0xd0   : > { %5296 = vmatprep.mubr.msk.bf16.mxu0 %vm1504_vm2, %v5591_v62  ;;  %5364 = vmatprep.mubr.msk.bf16.mxu1 %vm1504_vm2, %v5592_v63  ;;  %v5646_v61 = vld [vmem:[%s6020_s10 + $0x3b8] sm:$0xff]  }
  0xd7   : > { %5297 = vmatmul.mubr.msk.bf16.gmra.mrb[56].mxu0 %vm1504_vm2, %v5593_v0  ;;  %5365 = vmatmul.mubr.msk.bf16.gmra.mrb[56].mxu1 %vm1504_vm2, %v5594_v1 }
  0xd8   : > { %5300 = vmatprep.mubr.msk.bf16.mxu0 %vm1504_vm2, %v5595_v2  ;;  %5368 = vmatprep.mubr.msk.bf16.mxu1 %vm1504_vm2, %v5596_v3  ;;  %v5647_v2 = vld [vmem:[%s6020_s10 + $0x2c0] sm:$0xff]  }
  0xd9   : > { %v5648_v3 = vld [vmem:[%s6020_s10 + $0x3c0] sm:$0xff]  }
  0xdf   : > { %5301 = vmatmul.mubr.msk.bf16.gmra.mrb[60].mxu0 %vm1504_vm2, %v5597_v4  ;;  %5369 = vmatmul.mubr.msk.bf16.gmra.mrb[60].mxu1 %vm1504_vm2, %v5598_v5 }
  0xe0   : > { %5376 = vmatprep.mubr.msk.bf16.mxu0 %vm1504_vm2, %v5599_v6  ;;  %5444 = vmatprep.mubr.msk.bf16.mxu1 %vm1504_vm2, %v5600_v7 }
  0xe7   : > { %5377 = vmatmul.mubr.msk.bf16.vlgmr.msra.gmra.mrb[64].mxu0 %vm1504_vm2, %v5601_v8  ;;  %5445 = vmatmul.mubr.msk.bf16.vlgmr.msra.gmra.mrb[64].mxu1 %vm1504_vm2, %v5602_v9 }
  0xe8   : > { %5380 = vmatprep.mubr.msk.bf16.mxu0 %vm1504_vm2, %v5603_v10  ;;  %5448 = vmatprep.mubr.msk.bf16.mxu1 %vm1504_vm2, %v5604_v11 }
  0xef   : > { %5381 = vmatmul.mubr.msk.bf16.gmra.mrb[68].mxu0 %vm1504_vm2, %v5605_v12  ;;  %5449 = vmatmul.mubr.msk.bf16.gmra.mrb[68].mxu1 %vm1504_vm2, %v5606_v13 }
  0xf0   : > { %5384 = vmatprep.mubr.msk.bf16.mxu0 %vm1504_vm2, %v5607_v14  ;;  %5452 = vmatprep.mubr.msk.bf16.mxu1 %vm1504_vm2, %v5608_v15 }
  0xf7   : > { %5385 = vmatmul.mubr.msk.bf16.gmra.mrb[72].mxu0 %vm1504_vm2, %v5609_v16  ;;  %5453 = vmatmul.mubr.msk.bf16.gmra.mrb[72].mxu1 %vm1504_vm2, %v5610_v17 }
  0xf8   : > { %5388 = vmatprep.mubr.msk.bf16.mxu0 %vm1504_vm2, %v5611_v18  ;;  %5456 = vmatprep.mubr.msk.bf16.mxu1 %vm1504_vm2, %v5612_v19 }
  0xff   : > { %5389 = vmatmul.mubr.msk.bf16.gmra.mrb[76].mxu0 %vm1504_vm2, %v5613_v20  ;;  %5457 = vmatmul.mubr.msk.bf16.gmra.mrb[76].mxu1 %vm1504_vm2, %v5614_v21 }
 0x100   : > { %5392 = vmatprep.mubr.msk.bf16.mxu0 %vm1504_vm2, %v5615_v22  ;;  %5460 = vmatprep.mubr.msk.bf16.mxu1 %vm1504_vm2, %v5616_v23 }
 0x107   : > { %5393 = vmatmul.mubr.msk.bf16.gmra.mrb[80].mxu0 %vm1504_vm2, %v5617_v24  ;;  %5461 = vmatmul.mubr.msk.bf16.gmra.mrb[80].mxu1 %vm1504_vm2, %v5618_v25 }
 0x108   : > { %5396 = vmatprep.mubr.msk.bf16.mxu0 %vm1504_vm2, %v5619_v26  ;;  %5464 = vmatprep.mubr.msk.bf16.mxu1 %vm1504_vm2, %v5620_v27 }
 0x10f   : > { %5397 = vmatmul.mubr.msk.bf16.gmra.mrb[84].mxu0 %vm1504_vm2, %v5621_v28  ;;  %5465 = vmatmul.mubr.msk.bf16.gmra.mrb[84].mxu1 %vm1504_vm2, %v5622_v29  ;;  %v5649_v28 = vld [vmem:[%s6020_s10 + $0x2c8] sm:$0xff]  }
 0x110   : > { %5400 = vmatprep.mubr.msk.bf16.mxu0 %vm1504_vm2, %v5623_v30  ;;  %5468 = vmatprep.mubr.msk.bf16.mxu1 %vm1504_vm2, %v5624_v31  ;;  %v5650_v29 = vld [vmem:[%s6020_s10 + $0x3c8] sm:$0xff]  }
 0x117   : > { %5401 = vmatmul.mubr.msk.bf16.gmra.mrb[88].mxu0 %vm1504_vm2, %v5625_v32  ;;  %5469 = vmatmul.mubr.msk.bf16.gmra.mrb[88].mxu1 %vm1504_vm2, %v5626_v33 }
 0x118   : > { %5404 = vmatprep.mubr.msk.bf16.mxu0 %vm1504_vm2, %v5627_v34  ;;  %5472 = vmatprep.mubr.msk.bf16.mxu1 %vm1504_vm2, %v5628_v35  ;;  %v5651_v34 = vld [vmem:[%s6020_s10 + $0x2d0] sm:$0xff]  }
 0x119   : > { %v5652_v35 = vld [vmem:[%s6020_s10 + $0x3d0] sm:$0xff]  }
 0x11f   : > { %5405 = vmatmul.mubr.msk.bf16.gmra.mrb[92].mxu0 %vm1504_vm2, %v5629_v36  ;;  %5473 = vmatmul.mubr.msk.bf16.gmra.mrb[92].mxu1 %vm1504_vm2, %v5630_v37 }
 0x120   : > { %5408 = vmatprep.mubr.msk.bf16.mxu0 %vm1504_vm2, %v5631_v38  ;;  %5476 = vmatprep.mubr.msk.bf16.mxu1 %vm1504_vm2, %v5632_v39 }
 0x127   : > { %5409 = vmatmul.mubr.msk.bf16.gmra.mrb[96].mxu0 %vm1504_vm2, %v5633_v40  ;;  %5477 = vmatmul.mubr.msk.bf16.gmra.mrb[96].mxu1 %vm1504_vm2, %v5634_v41 }
 0x128   : > { %5412 = vmatprep.mubr.msk.bf16.mxu0 %vm1504_vm2, %v5635_v42  ;;  %5480 = vmatprep.mubr.msk.bf16.mxu1 %vm1504_vm2, %v5636_v43 }
 0x12f   : > { %5413 = vmatmul.mubr.msk.bf16.gmra.mrb[100].mxu0 %vm1504_vm2, %v5637_v44  ;;  %5481 = vmatmul.mubr.msk.bf16.gmra.mrb[100].mxu1 %vm1504_vm2, %v5638_v45 }
 0x130   : > { %5416 = vmatprep.mubr.msk.bf16.mxu0 %vm1504_vm2, %v5639_v46  ;;  %5484 = vmatprep.mubr.msk.bf16.mxu1 %vm1504_vm2, %v5640_v47 }
 0x137   : > { %5417 = vmatmul.mubr.msk.bf16.gmra.mrb[104].mxu0 %vm1504_vm2, %v5641_v48  ;;  %5485 = vmatmul.mubr.msk.bf16.gmra.mrb[104].mxu1 %vm1504_vm2, %v5642_v49 }
 0x138   : > { %5420 = vmatprep.mubr.msk.bf16.mxu0 %vm1504_vm2, %v5643_v50  ;;  %5488 = vmatprep.mubr.msk.bf16.mxu1 %vm1504_vm2, %v5644_v51 }
 0x13a   : > { %v5242_v54 = vpop.f32.mrb[0].mxu0  ;;  %v5310_v55 = vpop.f32.mrb[0].mxu1 }
 0x13b   : > { %v1905_v56 = vmul.f32 %v5242_v54, %v6243_v52  ;;  %v2649_v57 = vmul.f32 %v5310_v55, %v6243_v52  ;;  %v1642_v58 = vpop.f32.mrb[1].mxu0  ;;  %v2392_v59 = vpop.f32.mrb[1].mxu1 }
 0x13c   : > { %v1903_v62 = vmul.f32 %v6243_v52, %v1642_v58  ;;  %v2647_v63 = vmul.f32 %v6243_v52, %v2392_v59  ;;  %v5243_v0 = vpop.f32.mrb[2].mxu0  ;;  %v5311_v1 = vpop.f32.mrb[2].mxu1 }
 0x13d   : > { %v6261_v4 = vadd.f32 %v6250_v53, %v1905_v56  ;;  %v6264_v5 = vadd.f32 %v6250_v53, %v2649_v57  ;;  %v1906_v6 = vmul.f32 %v5243_v0, %v6243_v52  ;;  %v2650_v7 = vmul.f32 %v5311_v1, %v6243_v52  ;;  %v1645_v8 = vpop.f32.mrb[3].mxu0  ;;  %v2395_v9 = vpop.f32.mrb[3].mxu1 }
 0x13e   : > { %v6269_v10 = vadd.f32 %v6250_v53, %v1903_v62  ;;  %v6272_v11 = vadd.f32 %v6250_v53, %v2647_v63  ;;  %v1904_v12 = vmul.f32 %v6243_v52, %v1645_v8  ;;  %v2648_v13 = vmul.f32 %v6243_v52, %v2395_v9  ;;  %v5653_v62 = vld [vmem:[%s6020_s10 + $0x2d8] sm:$0xff]  }
 0x13f   : > { %v6279_v15 = vadd.f32 %v6250_v53, %v1906_v6  ;;  %v6282_v16 = vadd.f32 %v6250_v53, %v2650_v7  ;;  %5421 = vmatmul.mubr.msk.bf16.gmra.mrb[108].mxu0 %vm1504_vm2, %v5645_v60  ;;  %5489 = vmatmul.mubr.msk.bf16.gmra.mrb[108].mxu1 %vm1504_vm2, %v5646_v61  ;;  %v5654_v63 = vld [vmem:[%s6020_s10 + $0x3d8] sm:$0xff]   ;;  %v5655_v6 = vld [vmem:[%s6020_s10 + $0x2e0] sm:$0xff]  }
 0x140   : > { %v6289_v18 = vadd.f32 %v6250_v53, %v1904_v12  ;;  %v6292_v19 = vadd.f32 %v6250_v53, %v2648_v13  ;;  %5424 = vmatprep.mubr.msk.bf16.mxu0 %vm1504_vm2, %v5647_v2  ;;  %5492 = vmatprep.mubr.msk.bf16.mxu1 %vm1504_vm2, %v5648_v3  ;;  %v5656_v7 = vld [vmem:[%s6020_s10 + $0x3e0] sm:$0xff]  }
 0x142   : > { %v5246_v22 = vpop.f32.mrb[4].mxu0  ;;  %v5314_v23 = vpop.f32.mrb[4].mxu1 }
 0x143   : > { %v1909_v24 = vmul.f32 %v5246_v22, %v6243_v52  ;;  %v2653_v25 = vmul.f32 %v5314_v23, %v6243_v52  ;;  %v1658_v26 = vpop.f32.mrb[5].mxu0  ;;  %v2408_v27 = vpop.f32.mrb[5].mxu1 }
 0x144   : > { %v1907_v30 = vmul.f32 %v6243_v52, %v1658_v26  ;;  %v2651_v31 = vmul.f32 %v6243_v52, %v2408_v27  ;;  %v5247_v32 = vpop.f32.mrb[6].mxu0  ;;  %v5315_v33 = vpop.f32.mrb[6].mxu1 }
 0x145   : > { %v6309_v36 = vadd.f32 %v6250_v53, %v1909_v24  ;;  %v6312_v37 = vadd.f32 %v6250_v53, %v2653_v25  ;;  %v1910_v38 = vmul.f32 %v5247_v32, %v6243_v52  ;;  %v2654_v39 = vmul.f32 %v5315_v33, %v6243_v52  ;;  %v1661_v40 = vpop.f32.mrb[7].mxu0  ;;  %v2411_v41 = vpop.f32.mrb[7].mxu1 }
 0x146   : > { %v6317_v42 = vadd.f32 %v6250_v53, %v1907_v30  ;;  %v6320_v43 = vadd.f32 %v6250_v53, %v2651_v31  ;;  %v1908_v44 = vmul.f32 %v6243_v52, %v1661_v40  ;;  %v2652_v45 = vmul.f32 %v6243_v52, %v2411_v41 }
 0x147   : > { %v6327_v47 = vadd.f32 %v6250_v53, %v1910_v38  ;;  %v6330_v48 = vadd.f32 %v6250_v53, %v2654_v39  ;;  %5425 = vmatmul.mubr.msk.bf16.gmra.mrb[112].mxu0 %vm1504_vm2, %v5649_v28  ;;  %5493 = vmatmul.mubr.msk.bf16.gmra.mrb[112].mxu1 %vm1504_vm2, %v5650_v29 }
 0x148   : > { %v6337_v50 = vadd.f32 %v6250_v53, %v1908_v44  ;;  %v6340_v51 = vadd.f32 %v6250_v53, %v2652_v45  ;;  %5428 = vmatprep.mubr.msk.bf16.mxu0 %vm1504_vm2, %v5651_v34  ;;  %5496 = vmatprep.mubr.msk.bf16.mxu1 %vm1504_vm2, %v5652_v35 }
 0x14a   : > { %v5250_v56 = vpop.f32.mrb[8].mxu0  ;;  %v5318_v57 = vpop.f32.mrb[8].mxu1 }
 0x14b   : > { %v1913_v58 = vmul.f32 %v5250_v56, %v6243_v52  ;;  %v2657_v59 = vmul.f32 %v5318_v57, %v6243_v52  ;;  %v1674_v60 = vpop.f32.mrb[9].mxu0  ;;  %v2424_v61 = vpop.f32.mrb[9].mxu1  ;;  %v5657_v56 = vld [vmem:[%s6020_s10 + $0x2e8] sm:$0xff]  }
 0x14c   : > { %v1911_v0 = vmul.f32 %v6243_v52, %v1674_v60  ;;  %v2655_v1 = vmul.f32 %v6243_v52, %v2424_v61  ;;  %v5251_v2 = vpop.f32.mrb[10].mxu0  ;;  %v5319_v3 = vpop.f32.mrb[10].mxu1  ;;  %v5658_v57 = vld [vmem:[%s6020_s10 + $0x3e8] sm:$0xff]  }
 0x14d   : > { %v6357_v8 = vadd.f32 %v6250_v53, %v1913_v58  ;;  %v6360_v9 = vadd.f32 %v6250_v53, %v2657_v59  ;;  %v1914_v12 = vmul.f32 %v5251_v2, %v6243_v52  ;;  %v2658_v13 = vmul.f32 %v5319_v3, %v6243_v52  ;;  %v1677_v22 = vpop.f32.mrb[11].mxu0  ;;  %v2427_v23 = vpop.f32.mrb[11].mxu1 }
 0x14e   : > { %v6365_v24 = vadd.f32 %v6250_v53, %v1911_v0  ;;  %v6368_v25 = vadd.f32 %v6250_v53, %v2655_v1  ;;  %v1912_v26 = vmul.f32 %v6243_v52, %v1677_v22  ;;  %v2656_v27 = vmul.f32 %v6243_v52, %v2427_v23 }
 0x14f   : > { %v6375_v29 = vadd.f32 %v6250_v53, %v1914_v12  ;;  %v6378_v30 = vadd.f32 %v6250_v53, %v2658_v13  ;;  %5429 = vmatmul.mubr.msk.bf16.gmra.mrb[116].mxu0 %vm1504_vm2, %v5653_v62  ;;  %5497 = vmatmul.mubr.msk.bf16.gmra.mrb[116].mxu1 %vm1504_vm2, %v5654_v63  ;;  %v5659_v62 = vld [vmem:[%s6020_s10 + $0x2f0] sm:$0xff]  }
 0x150   : > { %v6385_v32 = vadd.f32 %v6250_v53, %v1912_v26  ;;  %v6388_v33 = vadd.f32 %v6250_v53, %v2656_v27  ;;  %5432 = vmatprep.mubr.msk.bf16.mxu0 %vm1504_vm2, %v5655_v6  ;;  %5500 = vmatprep.mubr.msk.bf16.mxu1 %vm1504_vm2, %v5656_v7  ;;  %v5660_v63 = vld [vmem:[%s6020_s10 + $0x3f0] sm:$0xff]  }
 0x152   : > { %v5254_v38 = vpop.f32.mrb[12].mxu0  ;;  %v5322_v39 = vpop.f32.mrb[12].mxu1 }
 0x153   : > { %v1917_v40 = vmul.f32 %v5254_v38, %v6243_v52  ;;  %v2661_v41 = vmul.f32 %v5322_v39, %v6243_v52  ;;  %v1690_v44 = vpop.f32.mrb[13].mxu0  ;;  %v2440_v45 = vpop.f32.mrb[13].mxu1 }
 0x154   : > { %v1915_v58 = vmul.f32 %v6243_v52, %v1690_v44  ;;  %v2659_v59 = vmul.f32 %v6243_v52, %v2440_v45  ;;  %v5255_v60 = vpop.f32.mrb[14].mxu0  ;;  %v5323_v61 = vpop.f32.mrb[14].mxu1 }
 0x155   : > { %v6405_v0 = vadd.f32 %v6250_v53, %v1917_v40  ;;  %v6408_v1 = vadd.f32 %v6250_v53, %v2661_v41  ;;  %v1918_v2 = vmul.f32 %v5255_v60, %v6243_v52  ;;  %v2662_v3 = vmul.f32 %v5323_v61, %v6243_v52  ;;  %v1693_v6 = vpop.f32.mrb[15].mxu0  ;;  %v2443_v7 = vpop.f32.mrb[15].mxu1 }
 0x156   : > { %v6413_v12 = vadd.f32 %v6250_v53, %v1915_v58  ;;  %v6416_v13 = vadd.f32 %v6250_v53, %v2659_v59  ;;  %v1916_v22 = vmul.f32 %v6243_v52, %v1693_v6  ;;  %v2660_v23 = vmul.f32 %v6243_v52, %v2443_v7 }
 0x157   : > { %v6423_v27 = vadd.f32 %v6250_v53, %v1918_v2  ;;  %v6426_v38 = vadd.f32 %v6250_v53, %v2662_v3  ;;  %5433 = vmatmul.mubr.msk.bf16.gmra.mrb[120].mxu0 %vm1504_vm2, %v5657_v56  ;;  %5501 = vmatmul.mubr.msk.bf16.gmra.mrb[120].mxu1 %vm1504_vm2, %v5658_v57  ;;  %v5661_v2 = vld [vmem:[%s6020_s10 + $0x2f8] sm:$0xff]  }
 0x158   : > { %v6433_v40 = vadd.f32 %v6250_v53, %v1916_v22  ;;  %v6436_v41 = vadd.f32 %v6250_v53, %v2660_v23  ;;  %5436 = vmatprep.mubr.msk.bf16.mxu0 %vm1504_vm2, %v5659_v62  ;;  %5504 = vmatprep.mubr.msk.bf16.mxu1 %vm1504_vm2, %v5660_v63  ;;  %v5662_v3 = vld [vmem:[%s6020_s10 + $0x3f8] sm:$0xff]  }
 0x15a   : > { %v5258_v56 = vpop.f32.mrb[16].mxu0  ;;  %v5326_v57 = vpop.f32.mrb[16].mxu1 }
 0x15b   : > { %v1921_v58 = vmul.f32 %v5258_v56, %v6243_v52  ;;  %v2665_v59 = vmul.f32 %v5326_v57, %v6243_v52  ;;  %v1706_v60 = vpop.f32.mrb[17].mxu0  ;;  %v2456_v61 = vpop.f32.mrb[17].mxu1 }
 0x15c   : > { %v1919_v62 = vmul.f32 %v6243_v52, %v1706_v60  ;;  %v2663_v63 = vmul.f32 %v6243_v52, %v2456_v61  ;;  %v5259_v6 = vpop.f32.mrb[18].mxu0  ;;  %v5327_v7 = vpop.f32.mrb[18].mxu1 }
 0x15d   : > { %v6451_v22 = vadd.f32 %v6250_v53, %v1921_v58  ;;  %v6454_v23 = vadd.f32 %v6250_v53, %v2665_v59  ;;  %v1922_v56 = vmul.f32 %v5259_v6, %v6243_v52  ;;  %v2666_v57 = vmul.f32 %v5327_v7, %v6243_v52  ;;  %v1709_v45 = vpop.f32.mrb[19].mxu0  ;;  %v2459_v44 = vpop.f32.mrb[19].mxu1 }
 0x15e   : > { %v6459_v39 = vadd.f32 %v6250_v53, %v1919_v62  ;;  %v6462_v60 = vadd.f32 %v6250_v53, %v2663_v63  ;;  %v1920_v61 = vmul.f32 %v6243_v52, %v1709_v45  ;;  %v2664_v58 = vmul.f32 %v6243_v52, %v2459_v44 }
 0x15f   : > { %v6469_v26 = vadd.f32 %v6250_v53, %v1922_v56  ;;  %v6472_v6 = vadd.f32 %v6250_v53, %v2666_v57  ;;  %5437 = vmatmul.mubr.msk.bf16.gmra.mrb[124].mxu0 %vm1504_vm2, %v5661_v2  ;;  %5505 = vmatmul.mubr.msk.bf16.gmra.mrb[124].mxu1 %vm1504_vm2, %v5662_v3 }
 0x160   : > { %v6479_v45 = vadd.f32 %v6250_v53, %v1920_v61  ;;  %v6482_v44 = vadd.f32 %v6250_v53, %v2664_v58 }
 0x162   : > { %v5262_v56 = vpop.f32.mrb[20].mxu0  ;;  %v5330_v57 = vpop.f32.mrb[20].mxu1 }
 0x163   : > { %v1925_v2 = vmul.f32 %v5262_v56, %v6243_v52  ;;  %v2669_v3 = vmul.f32 %v5330_v57, %v6243_v52  ;;  %v1722_v59 = vpop.f32.mrb[21].mxu0  ;;  %v2472_v62 = vpop.f32.mrb[21].mxu1 }
 0x164   : > { %v1923_v61 = vmul.f32 %v6243_v52, %v1722_v59  ;;  %v2667_v35 = vmul.f32 %v6243_v52, %v2472_v62  ;;  %v5263_v58 = vpop.f32.mrb[22].mxu0  ;;  %v5331_v34 = vpop.f32.mrb[22].mxu1 }
 0x165   : > { %v6493_v31 = vadd.f32 %v6250_v53, %v1925_v2  ;;  %v6496_v63 = vadd.f32 %v6250_v53, %v2669_v3  ;;  %v1926_v7 = vmul.f32 %v5263_v58, %v6243_v52  ;;  %v2670_v56 = vmul.f32 %v5331_v34, %v6243_v52  ;;  %v1725_v28 = vpop.f32.mrb[23].mxu0  ;;  %v2475_v57 = vpop.f32.mrb[23].mxu1 }
 0x166   : > { %v6501_v55 = vadd.f32 %v6250_v53, %v1923_v61  ;;  %v6504_v59 = vadd.f32 %v6250_v53, %v2667_v35  ;;  %v1924_v62 = vmul.f32 %v6243_v52, %v1725_v28  ;;  %v2668_v2 = vmul.f32 %v6243_v52, %v2475_v57 }
 0x167   : > { %v6511_v54 = vadd.f32 %v6250_v53, %v1926_v7  ;;  %v6514_v34 = vadd.f32 %v6250_v53, %v2670_v56 }
 0x168   : > { %v6519_v58 = vadd.f32 %v6250_v53, %v1924_v62  ;;  %v6522_v35 = vadd.f32 %v6250_v53, %v2668_v2 }
 0x169   : > { %7629 = vst [vmem:[#allocation3_spill] sm:$0xff] %v6514_v34 }
 0x16a   : > { %7630 = vst [vmem:[#allocation4_spill] sm:$0xff] %v6519_v58  ;;  %7631 = vst [vmem:[#allocation5_spill] sm:$0xff] %v6522_v35  ;;  %v5266_v7 = vpop.f32.mrb[24].mxu0  ;;  %v5334_v3 = vpop.f32.mrb[24].mxu1 }
 0x16b   : > { %v1929_v56 = vmul.f32 %v5266_v7, %v6243_v52  ;;  %v2673_v49 = vmul.f32 %v5334_v3, %v6243_v52  ;;  %v1738_v46 = vpop.f32.mrb[25].mxu0  ;;  %v2488_v61 = vpop.f32.mrb[25].mxu1 }
 0x16c   : > { %v1927_v62 = vmul.f32 %v6243_v52, %v1738_v46  ;;  %v2671_v21 = vmul.f32 %v6243_v52, %v2488_v61  ;;  %v5267_v2 = vpop.f32.mrb[26].mxu0  ;;  %v5335_v20 = vpop.f32.mrb[26].mxu1 }
 0x16d   : > { %v6533_v17 = vadd.f32 %v6250_v53, %v1929_v56  ;;  %v6536_v28 = vadd.f32 %v6250_v53, %v2673_v49  ;;  %v1930_v57 = vmul.f32 %v5267_v2, %v6243_v52  ;;  %v2674_v7 = vmul.f32 %v5335_v20, %v6243_v52  ;;  %v1741_v14 = vpop.f32.mrb[27].mxu0  ;;  %v2491_v3 = vpop.f32.mrb[27].mxu1 }
 0x16e   : > { %v6541_v35 = vadd.f32 %v6250_v53, %v1927_v62  ;;  %v6544_v46 = vadd.f32 %v6250_v53, %v2671_v21  ;;  %v1928_v61 = vmul.f32 %v6243_v52, %v1741_v14  ;;  %v2672_v56 = vmul.f32 %v6243_v52, %v2491_v3 }
 0x16f   : > { %7632 = vst [vmem:[#allocation6_spill] sm:$0xff] %v6533_v17  ;;  %7633 = vst [vmem:[#allocation7_spill] sm:$0xff] %v6536_v28  ;;  %v6551_v58 = vadd.f32 %v6250_v53, %v1930_v57  ;;  %v6554_v20 = vadd.f32 %v6250_v53, %v2674_v7 }
 0x170   : > { %7634 = vst [vmem:[#allocation8_spill] sm:$0xff] %v6541_v35  ;;  %7635 = vst [vmem:[#allocation9_spill] sm:$0xff] %v6544_v46  ;;  %v6559_v2 = vadd.f32 %v6250_v53, %v1928_v61  ;;  %v6562_v21 = vadd.f32 %v6250_v53, %v2672_v56 }
 0x171   : > { %7636 = vst [vmem:[#allocation10_spill] sm:$0xff] %v6551_v58  ;;  %7637 = vst [vmem:[#allocation11_spill] sm:$0xff] %v6554_v20 }
 0x172   : > { %7638 = vst [vmem:[#allocation12_spill] sm:$0xff] %v6559_v2  ;;  %7639 = vst [vmem:[#allocation13_spill] sm:$0xff] %v6562_v21  ;;  %v5270_v57 = vpop.f32.mrb[28].mxu0  ;;  %v5338_v49 = vpop.f32.mrb[28].mxu1 }
 0x173   : > { %v1933_v7 = vmul.f32 %v5270_v57, %v6243_v52  ;;  %v2677_v28 = vmul.f32 %v5338_v49, %v6243_v52  ;;  %v1754_v17 = vpop.f32.mrb[29].mxu0  ;;  %v2504_v62 = vpop.f32.mrb[29].mxu1 }
 0x174   : > { %v1931_v61 = vmul.f32 %v6243_v52, %v1754_v17  ;;  %v2675_v46 = vmul.f32 %v6243_v52, %v2504_v62  ;;  %v5271_v56 = vpop.f32.mrb[30].mxu0  ;;  %v5339_v35 = vpop.f32.mrb[30].mxu1 }
 0x175   : > { %v6573_v34 = vadd.f32 %v6250_v53, %v1933_v7  ;;  %v6576_v14 = vadd.f32 %v6250_v53, %v2677_v28  ;;  %v1934_v3 = vmul.f32 %v5271_v56, %v6243_v52  ;;  %v2678_v57 = vmul.f32 %v5339_v35, %v6243_v52  ;;  %v1757_v21 = vpop.f32.mrb[31].mxu0  ;;  %v2507_v49 = vpop.f32.mrb[31].mxu1 }
 0x176   : > { %v6581_v2 = vadd.f32 %v6250_v53, %v1931_v61  ;;  %v6584_v17 = vadd.f32 %v6250_v53, %v2675_v46  ;;  %v1932_v62 = vmul.f32 %v6243_v52, %v1757_v21  ;;  %v2676_v7 = vmul.f32 %v6243_v52, %v2507_v49 }
 0x177   : > { %7640 = vst [vmem:[#allocation14_spill] sm:$0xff] %v6573_v34  ;;  %7641 = vst [vmem:[#allocation15_spill] sm:$0xff] %v6576_v14  ;;  %v6591_v20 = vadd.f32 %v6250_v53, %v1934_v3  ;;  %v6594_v35 = vadd.f32 %v6250_v53, %v2678_v57 }
 0x178   : > { %7642 = vst [vmem:[#allocation16_spill] sm:$0xff] %v6581_v2  ;;  %7643 = vst [vmem:[#allocation17_spill] sm:$0xff] %v6584_v17  ;;  %v6599_v56 = vadd.f32 %v6250_v53, %v1932_v62  ;;  %v6602_v46 = vadd.f32 %v6250_v53, %v2676_v7 }
 0x179   : > { %7644 = vst [vmem:[#allocation18_spill] sm:$0xff] %v6591_v20  ;;  %7645 = vst [vmem:[#allocation19_spill] sm:$0xff] %v6594_v35 }
 0x17a   : > { %7646 = vst [vmem:[#allocation20_spill] sm:$0xff] %v6599_v56  ;;  %7647 = vst [vmem:[#allocation21_spill] sm:$0xff] %v6602_v46  ;;  %v5274_v3 = vpop.f32.mrb[32].mxu0  ;;  %v5342_v28 = vpop.f32.mrb[32].mxu1 }
 0x17b   : > { %v1937_v57 = vmul.f32 %v5274_v3, %v6243_v52  ;;  %v2681_v14 = vmul.f32 %v5342_v28, %v6243_v52  ;;  %v1770_v34 = vpop.f32.mrb[33].mxu0  ;;  %v2520_v61 = vpop.f32.mrb[33].mxu1 }
 0x17c   : > { %v1935_v62 = vmul.f32 %v6243_v52, %v1770_v34  ;;  %v2679_v17 = vmul.f32 %v6243_v52, %v2520_v61  ;;  %v5275_v7 = vpop.f32.mrb[34].mxu0  ;;  %v5343_v2 = vpop.f32.mrb[34].mxu1 }
 0x17d   : > { %v6613_v58 = vadd.f32 %v6250_v53, %v1937_v57  ;;  %v6616_v21 = vadd.f32 %v6250_v53, %v2681_v14  ;;  %v1938_v49 = vmul.f32 %v5275_v7, %v6243_v52  ;;  %v2682_v3 = vmul.f32 %v5343_v2, %v6243_v52  ;;  %v1773_v46 = vpop.f32.mrb[35].mxu0  ;;  %v2523_v28 = vpop.f32.mrb[35].mxu1 }
 0x17e   : > { %v6621_v56 = vadd.f32 %v6250_v53, %v1935_v62  ;;  %v6624_v34 = vadd.f32 %v6250_v53, %v2679_v17  ;;  %v1936_v61 = vmul.f32 %v6243_v52, %v1773_v46  ;;  %v2680_v57 = vmul.f32 %v6243_v52, %v2523_v28 }
 0x17f   : > { %7648 = vst [vmem:[#allocation22_spill] sm:$0xff] %v6613_v58  ;;  %7649 = vst [vmem:[#allocation23_spill] sm:$0xff] %v6616_v21  ;;  %v6631_v35 = vadd.f32 %v6250_v53, %v1938_v49  ;;  %v6634_v2 = vadd.f32 %v6250_v53, %v2682_v3 }
 0x180   : > { %7650 = vst [vmem:[#allocation24_spill] sm:$0xff] %v6621_v56  ;;  %7651 = vst [vmem:[#allocation25_spill] sm:$0xff] %v6624_v34  ;;  %v6639_v7 = vadd.f32 %v6250_v53, %v1936_v61  ;;  %v6642_v17 = vadd.f32 %v6250_v53, %v2680_v57 }
 0x181   : > { %7652 = vst [vmem:[#allocation26_spill] sm:$0xff] %v6631_v35  ;;  %7653 = vst [vmem:[#allocation27_spill] sm:$0xff] %v6634_v2 }
 0x182   : > { %7654 = vst [vmem:[#allocation28_spill] sm:$0xff] %v6639_v7  ;;  %7655 = vst [vmem:[#allocation29_spill] sm:$0xff] %v6642_v17  ;;  %v5278_v49 = vpop.f32.mrb[36].mxu0  ;;  %v5346_v14 = vpop.f32.mrb[36].mxu1 }
 0x183   : > { %v1941_v3 = vmul.f32 %v5278_v49, %v6243_v52  ;;  %v2685_v21 = vmul.f32 %v5346_v14, %v6243_v52  ;;  %v1786_v58 = vpop.f32.mrb[37].mxu0  ;;  %v2536_v62 = vpop.f32.mrb[37].mxu1 }
 0x184   : > { %v1939_v61 = vmul.f32 %v6243_v52, %v1786_v58  ;;  %v2683_v34 = vmul.f32 %v6243_v52, %v2536_v62  ;;  %v5279_v57 = vpop.f32.mrb[38].mxu0  ;;  %v5347_v56 = vpop.f32.mrb[38].mxu1 }
 0x185   : > { %v6653_v20 = vadd.f32 %v6250_v53, %v1941_v3  ;;  %v6656_v46 = vadd.f32 %v6250_v53, %v2685_v21  ;;  %v1942_v28 = vmul.f32 %v5279_v57, %v6243_v52  ;;  %v2686_v49 = vmul.f32 %v5347_v56, %v6243_v52  ;;  %v1789_v17 = vpop.f32.mrb[39].mxu0  ;;  %v2539_v14 = vpop.f32.mrb[39].mxu1 }
 0x186   : > { %v6661_v7 = vadd.f32 %v6250_v53, %v1939_v61  ;;  %v6664_v58 = vadd.f32 %v6250_v53, %v2683_v34  ;;  %v1940_v62 = vmul.f32 %v6243_v52, %v1789_v17  ;;  %v2684_v3 = vmul.f32 %v6243_v52, %v2539_v14 }
 0x187   : > { %7656 = vst [vmem:[#allocation30_spill] sm:$0xff] %v6653_v20  ;;  %7657 = vst [vmem:[#allocation31_spill] sm:$0xff] %v6656_v46  ;;  %v6671_v2 = vadd.f32 %v6250_v53, %v1942_v28  ;;  %v6674_v56 = vadd.f32 %v6250_v53, %v2686_v49 }
 0x188   : > { %7658 = vst [vmem:[#allocation32_spill] sm:$0xff] %v6661_v7  ;;  %7659 = vst [vmem:[#allocation33_spill] sm:$0xff] %v6664_v58  ;;  %v6679_v57 = vadd.f32 %v6250_v53, %v1940_v62  ;;  %v6682_v34 = vadd.f32 %v6250_v53, %v2684_v3 }
 0x189   : > { %7660 = vst [vmem:[#allocation34_spill] sm:$0xff] %v6671_v2  ;;  %7661 = vst [vmem:[#allocation35_spill] sm:$0xff] %v6674_v56 }
 0x18a   : > { %7662 = vst [vmem:[#allocation36_spill] sm:$0xff] %v6679_v57  ;;  %7663 = vst [vmem:[#allocation37_spill] sm:$0xff] %v6682_v34  ;;  %v5282_v28 = vpop.f32.mrb[40].mxu0  ;;  %v5350_v21 = vpop.f32.mrb[40].mxu1 }
 0x18b   : > { %v1945_v49 = vmul.f32 %v5282_v28, %v6243_v52  ;;  %v2689_v46 = vmul.f32 %v5350_v21, %v6243_v52  ;;  %v1802_v20 = vpop.f32.mrb[41].mxu0  ;;  %v2552_v61 = vpop.f32.mrb[41].mxu1 }
 0x18c   : > { %v1943_v62 = vmul.f32 %v6243_v52, %v1802_v20  ;;  %v2687_v58 = vmul.f32 %v6243_v52, %v2552_v61  ;;  %v5283_v3 = vpop.f32.mrb[42].mxu0  ;;  %v5351_v7 = vpop.f32.mrb[42].mxu1 }
 0x18d   : > { %v6693_v35 = vadd.f32 %v6250_v53, %v1945_v49  ;;  %v6696_v17 = vadd.f32 %v6250_v53, %v2689_v46  ;;  %v1946_v14 = vmul.f32 %v5283_v3, %v6243_v52  ;;  %v2690_v28 = vmul.f32 %v5351_v7, %v6243_v52  ;;  %v1805_v34 = vpop.f32.mrb[43].mxu0  ;;  %v2555_v21 = vpop.f32.mrb[43].mxu1 }
 0x18e   : > { %v6701_v57 = vadd.f32 %v6250_v53, %v1943_v62  ;;  %v6704_v20 = vadd.f32 %v6250_v53, %v2687_v58  ;;  %v1944_v61 = vmul.f32 %v6243_v52, %v1805_v34  ;;  %v2688_v49 = vmul.f32 %v6243_v52, %v2555_v21 }
 0x18f   : > { %7664 = vst [vmem:[#allocation38_spill] sm:$0xff] %v6693_v35  ;;  %7665 = vst [vmem:[#allocation39_spill] sm:$0xff] %v6696_v17  ;;  %v6711_v56 = vadd.f32 %v6250_v53, %v1946_v14  ;;  %v6714_v7 = vadd.f32 %v6250_v53, %v2690_v28 }
 0x190   : > { %7666 = vst [vmem:[#allocation40_spill] sm:$0xff] %v6701_v57  ;;  %7667 = vst [vmem:[#allocation41_spill] sm:$0xff] %v6704_v20  ;;  %v6719_v3 = vadd.f32 %v6250_v53, %v1944_v61  ;;  %v6722_v58 = vadd.f32 %v6250_v53, %v2688_v49 }
 0x191   : > { %7668 = vst [vmem:[#allocation42_spill] sm:$0xff] %v6711_v56  ;;  %7669 = vst [vmem:[#allocation43_spill] sm:$0xff] %v6714_v7 }
 0x192   : > { %7670 = vst [vmem:[#allocation44_spill] sm:$0xff] %v6719_v3  ;;  %7671 = vst [vmem:[#allocation45_spill] sm:$0xff] %v6722_v58  ;;  %v5286_v14 = vpop.f32.mrb[44].mxu0  ;;  %v5354_v46 = vpop.f32.mrb[44].mxu1 }
 0x193   : > { %v1949_v28 = vmul.f32 %v5286_v14, %v6243_v52  ;;  %v2693_v17 = vmul.f32 %v5354_v46, %v6243_v52  ;;  %v1818_v35 = vpop.f32.mrb[45].mxu0  ;;  %v2568_v62 = vpop.f32.mrb[45].mxu1 }
 0x194   : > { %v1947_v61 = vmul.f32 %v6243_v52, %v1818_v35  ;;  %v2691_v20 = vmul.f32 %v6243_v52, %v2568_v62  ;;  %v5287_v49 = vpop.f32.mrb[46].mxu0  ;;  %v5355_v57 = vpop.f32.mrb[46].mxu1 }
 0x195   : > { %v6733_v2 = vadd.f32 %v6250_v53, %v1949_v28  ;;  %v6736_v34 = vadd.f32 %v6250_v53, %v2693_v17  ;;  %v1950_v21 = vmul.f32 %v5287_v49, %v6243_v52  ;;  %v2694_v14 = vmul.f32 %v5355_v57, %v6243_v52  ;;  %v1821_v58 = vpop.f32.mrb[47].mxu0  ;;  %v2571_v46 = vpop.f32.mrb[47].mxu1 }
 0x196   : > { %v6741_v3 = vadd.f32 %v6250_v53, %v1947_v61  ;;  %v6744_v35 = vadd.f32 %v6250_v53, %v2691_v20  ;;  %v1948_v62 = vmul.f32 %v6243_v52, %v1821_v58  ;;  %v2692_v28 = vmul.f32 %v6243_v52, %v2571_v46 }
 0x197   : > { %7672 = vst [vmem:[#allocation46_spill] sm:$0xff] %v6733_v2  ;;  %7673 = vst [vmem:[#allocation47_spill] sm:$0xff] %v6736_v34  ;;  %v6751_v7 = vadd.f32 %v6250_v53, %v1950_v21  ;;  %v6754_v57 = vadd.f32 %v6250_v53, %v2694_v14 }
 0x198   : > { %7674 = vst [vmem:[#allocation48_spill] sm:$0xff] %v6741_v3  ;;  %7675 = vst [vmem:[#allocation49_spill] sm:$0xff] %v6744_v35  ;;  %v6759_v49 = vadd.f32 %v6250_v53, %v1948_v62  ;;  %v6762_v20 = vadd.f32 %v6250_v53, %v2692_v28 }
 0x199   : > { %7676 = vst [vmem:[#allocation50_spill] sm:$0xff] %v6751_v7  ;;  %7677 = vst [vmem:[#allocation51_spill] sm:$0xff] %v6754_v57 }
 0x19a   : > { %7678 = vst [vmem:[#allocation52_spill] sm:$0xff] %v6759_v49  ;;  %7679 = vst [vmem:[#allocation53_spill] sm:$0xff] %v6762_v20  ;;  %v5290_v21 = vpop.f32.mrb[48].mxu0  ;;  %v5358_v17 = vpop.f32.mrb[48].mxu1 }
 0x19b   : > { %v1953_v14 = vmul.f32 %v5290_v21, %v6243_v52  ;;  %v2697_v34 = vmul.f32 %v5358_v17, %v6243_v52  ;;  %v1834_v2 = vpop.f32.mrb[49].mxu0  ;;  %v2584_v61 = vpop.f32.mrb[49].mxu1 }
 0x19c   : > { %v1951_v62 = vmul.f32 %v6243_v52, %v1834_v2  ;;  %v2695_v35 = vmul.f32 %v6243_v52, %v2584_v61  ;;  %v5291_v28 = vpop.f32.mrb[50].mxu0  ;;  %v5359_v3 = vpop.f32.mrb[50].mxu1 }
 0x19d   : > { %v6773_v56 = vadd.f32 %v6250_v53, %v1953_v14  ;;  %v6776_v58 = vadd.f32 %v6250_v53, %v2697_v34  ;;  %v1954_v46 = vmul.f32 %v5291_v28, %v6243_v52  ;;  %v2698_v21 = vmul.f32 %v5359_v3, %v6243_v52  ;;  %v1837_v20 = vpop.f32.mrb[51].mxu0  ;;  %v2587_v17 = vpop.f32.mrb[51].mxu1 }
 0x19e   : > { %v6781_v49 = vadd.f32 %v6250_v53, %v1951_v62  ;;  %v6784_v2 = vadd.f32 %v6250_v53, %v2695_v35  ;;  %v1952_v61 = vmul.f32 %v6243_v52, %v1837_v20  ;;  %v2696_v14 = vmul.f32 %v6243_v52, %v2587_v17 }
 0x19f   : > { %7680 = vst [vmem:[#allocation54_spill] sm:$0xff] %v6773_v56  ;;  %7681 = vst [vmem:[#allocation55_spill] sm:$0xff] %v6776_v58  ;;  %v6791_v57 = vadd.f32 %v6250_v53, %v1954_v46  ;;  %v6794_v3 = vadd.f32 %v6250_v53, %v2698_v21 }
 0x1a0   : > { %7682 = vst [vmem:[#allocation56_spill] sm:$0xff] %v6781_v49  ;;  %7683 = vst [vmem:[#allocation57_spill] sm:$0xff] %v6784_v2  ;;  %v6799_v28 = vadd.f32 %v6250_v53, %v1952_v61  ;;  %v6802_v35 = vadd.f32 %v6250_v53, %v2696_v14 }
 0x1a1   : > { %7684 = vst [vmem:[#allocation58_spill] sm:$0xff] %v6791_v57  ;;  %7685 = vst [vmem:[#allocation59_spill] sm:$0xff] %v6794_v3 }
 0x1a2   : > { %7686 = vst [vmem:[#allocation60_spill] sm:$0xff] %v6799_v28  ;;  %7687 = vst [vmem:[#allocation61_spill] sm:$0xff] %v6802_v35  ;;  %v5294_v46 = vpop.f32.mrb[52].mxu0  ;;  %v5362_v34 = vpop.f32.mrb[52].mxu1 }
 0x1a3   : > { %v1957_v21 = vmul.f32 %v5294_v46, %v6243_v52  ;;  %v2701_v58 = vmul.f32 %v5362_v34, %v6243_v52  ;;  %v1850_v56 = vpop.f32.mrb[53].mxu0  ;;  %v2600_v62 = vpop.f32.mrb[53].mxu1 }
 0x1a4   : > { %v1955_v61 = vmul.f32 %v6243_v52, %v1850_v56  ;;  %v2699_v2 = vmul.f32 %v6243_v52, %v2600_v62  ;;  %v5295_v14 = vpop.f32.mrb[54].mxu0  ;;  %v5363_v49 = vpop.f32.mrb[54].mxu1 }
 0x1a5   : > { %v6813_v7 = vadd.f32 %v6250_v53, %v1957_v21  ;;  %v6816_v20 = vadd.f32 %v6250_v53, %v2701_v58  ;;  %v1958_v17 = vmul.f32 %v5295_v14, %v6243_v52  ;;  %v2702_v46 = vmul.f32 %v5363_v49, %v6243_v52  ;;  %v1853_v35 = vpop.f32.mrb[55].mxu0  ;;  %v2603_v34 = vpop.f32.mrb[55].mxu1 }
 0x1a6   : > { %v6821_v28 = vadd.f32 %v6250_v53, %v1955_v61  ;;  %v6824_v56 = vadd.f32 %v6250_v53, %v2699_v2  ;;  %v1956_v62 = vmul.f32 %v6243_v52, %v1853_v35  ;;  %v2700_v21 = vmul.f32 %v6243_v52, %v2603_v34 }
 0x1a7   : > { %7688 = vst [vmem:[#allocation62_spill] sm:$0xff] %v6813_v7  ;;  %7689 = vst [vmem:[#allocation63_spill] sm:$0xff] %v6816_v20  ;;  %v6831_v3 = vadd.f32 %v6250_v53, %v1958_v17  ;;  %v6834_v49 = vadd.f32 %v6250_v53, %v2702_v46 }
 0x1a8   : > { %7690 = vst [vmem:[#allocation64_spill] sm:$0xff] %v6821_v28  ;;  %7691 = vst [vmem:[#allocation65_spill] sm:$0xff] %v6824_v56  ;;  %v6839_v14 = vadd.f32 %v6250_v53, %v1956_v62  ;;  %v6842_v2 = vadd.f32 %v6250_v53, %v2700_v21 }
 0x1a9   : > { %7692 = vst [vmem:[#allocation66_spill] sm:$0xff] %v6831_v3  ;;  %7693 = vst [vmem:[#allocation67_spill] sm:$0xff] %v6834_v49  ;;  %v7712_v3 = vmax.f32 %v6261_v4, %v6264_v5 }
 0x1aa   : > { %7694 = vst [vmem:[#allocation68_spill] sm:$0xff] %v6839_v14  ;;  %7695 = vst [vmem:[#allocation69_spill] sm:$0xff] %v6842_v2  ;;  %v5298_v17 = vpop.f32.mrb[56].mxu0  ;;  %v5366_v58 = vpop.f32.mrb[56].mxu1 }
 0x1ab   : > { %v1961_v46 = vmul.f32 %v5298_v17, %v6243_v52  ;;  %v2705_v20 = vmul.f32 %v5366_v58, %v6243_v52  ;;  %v1866_v7 = vpop.f32.mrb[57].mxu0  ;;  %v2616_v61 = vpop.f32.mrb[57].mxu1 }
 0x1ac   : > { %v1959_v62 = vmul.f32 %v6243_v52, %v1866_v7  ;;  %v2703_v56 = vmul.f32 %v6243_v52, %v2616_v61  ;;  %v5299_v21 = vpop.f32.mrb[58].mxu0  ;;  %v5367_v28 = vpop.f32.mrb[58].mxu1 }
 0x1ad   : > { %v6853_v57 = vadd.f32 %v6250_v53, %v1961_v46  ;;  %v6856_v35 = vadd.f32 %v6250_v53, %v2705_v20  ;;  %v1962_v34 = vmul.f32 %v5299_v21, %v6243_v52  ;;  %v2706_v17 = vmul.f32 %v5367_v28, %v6243_v52  ;;  %v1869_v2 = vpop.f32.mrb[59].mxu0  ;;  %v2619_v58 = vpop.f32.mrb[59].mxu1 }
 0x1ae   : > { %v6861_v14 = vadd.f32 %v6250_v53, %v1959_v62  ;;  %v6864_v7 = vadd.f32 %v6250_v53, %v2703_v56  ;;  %v1960_v61 = vmul.f32 %v6243_v52, %v1869_v2  ;;  %v2704_v46 = vmul.f32 %v6243_v52, %v2619_v58 }
 0x1af   : > { %7696 = vst [vmem:[#allocation70_spill] sm:$0xff] %v6853_v57  ;;  %7697 = vst [vmem:[#allocation71_spill] sm:$0xff] %v6856_v35  ;;  %v6871_v49 = vadd.f32 %v6250_v53, %v1962_v34  ;;  %v6874_v28 = vadd.f32 %v6250_v53, %v2706_v17 }
 0x1b0   : > { %7698 = vst [vmem:[#allocation72_spill] sm:$0xff] %v6861_v14  ;;  %7699 = vst [vmem:[#allocation73_spill] sm:$0xff] %v6864_v7  ;;  %v6879_v56 = vadd.f32 %v6250_v53, %v1960_v61  ;;  %v6882_v2 = vadd.f32 %v6250_v53, %v2704_v46 }
 0x1b1   : > { %7700 = vst [vmem:[#allocation74_spill] sm:$0xff] %v6871_v49  ;;  %7701 = vst [vmem:[#allocation75_spill] sm:$0xff] %v6874_v28 }
 0x1b2   : > { %7702 = vst [vmem:[#allocation76_spill] sm:$0xff] %v6879_v56  ;;  %7703 = vst [vmem:[#allocation77_spill] sm:$0xff] %v6882_v2  ;;  %v5302_v58 = vpop.f32.mrb[60].mxu0  ;;  %v5370_v20 = vpop.f32.mrb[60].mxu1 }
 0x1b3   : > { %v1965_v17 = vmul.f32 %v5302_v58, %v6243_v52  ;;  %v2709_v35 = vmul.f32 %v5370_v20, %v6243_v52  ;;  %v1882_v57 = vpop.f32.mrb[61].mxu0  ;;  %v2632_v62 = vpop.f32.mrb[61].mxu1 }
 0x1b4   : > { %v1963_v61 = vmul.f32 %v6243_v52, %v1882_v57  ;;  %v2707_v7 = vmul.f32 %v6243_v52, %v2632_v62  ;;  %v5303_v46 = vpop.f32.mrb[62].mxu0  ;;  %v5371_v14 = vpop.f32.mrb[62].mxu1 }
 0x1b5   : > { %v6895_v21 = vadd.f32 %v6250_v53, %v1965_v17  ;;  %v6898_v34 = vadd.f32 %v6250_v53, %v2709_v35  ;;  %v1966_v58 = vmul.f32 %v5303_v46, %v6243_v52  ;;  %v2710_v20 = vmul.f32 %v5371_v14, %v6243_v52  ;;  %v1885_v2 = vpop.f32.mrb[63].mxu0  ;;  %v2635_v56 = vpop.f32.mrb[63].mxu1 }
 0x1b6   : > { %v6903_v57 = vadd.f32 %v6250_v53, %v1963_v61  ;;  %v6906_v62 = vadd.f32 %v6250_v53, %v2707_v7  ;;  %v1964_v28 = vmul.f32 %v6243_v52, %v1885_v2  ;;  %v2708_v17 = vmul.f32 %v6243_v52, %v2635_v56 }
 0x1b7   : > { %7704 = vst [vmem:[#allocation78_spill] sm:$0xff] %v6895_v21  ;;  %7705 = vst [vmem:[#allocation79_spill] sm:$0xff] %v6898_v34  ;;  %v6913_v49 = vadd.f32 %v6250_v53, %v1966_v58  ;;  %v6916_v14 = vadd.f32 %v6250_v53, %v2710_v20 }
 0x1b8   : > { %7706 = vst [vmem:[#allocation80_spill] sm:$0xff] %v6903_v57  ;;  %7707 = vst [vmem:[#allocation81_spill] sm:$0xff] %v6906_v62  ;;  %v6921_v7 = vadd.f32 %v6250_v53, %v1964_v28  ;;  %v6924_v2 = vadd.f32 %v6250_v53, %v2708_v17 }
 0x1b9   : > { %7708 = vst [vmem:[#allocation82_spill] sm:$0xff] %v6913_v49  ;;  %7709 = vst [vmem:[#allocation83_spill] sm:$0xff] %v6916_v14 }
 0x1ba   : > { %7710 = vst [vmem:[#allocation84_spill] sm:$0xff] %v6921_v7  ;;  %7711 = vst [vmem:[#allocation85_spill] sm:$0xff] %v6924_v2  ;;  %v5378_v58 = vpop.f32.mrb[64].mxu0  ;;  %v5446_v35 = vpop.f32.mrb[64].mxu1 }
 0x1bb   : > { %v3451_v20 = vmul.f32 %v5378_v58, %v6243_v52  ;;  %v4253_v34 = vmul.f32 %v5446_v35, %v6243_v52  ;;  %v3194_v61 = vpop.f32.mrb[65].mxu0  ;;  %v3996_v62 = vpop.f32.mrb[65].mxu1 }
 0x1bc   : > { %v3449_v28 = vmul.f32 %v6243_v52, %v3194_v61  ;;  %v4251_v17 = vmul.f32 %v6243_v52, %v3996_v62  ;;  %v5379_v57 = vpop.f32.mrb[66].mxu0  ;;  %v5447_v21 = vpop.f32.mrb[66].mxu1 }
 0x1bd   : > { %v3515_v56 = vadd.f32 %v6250_v53, %v3451_v20  ;;  %v4317_v14 = vadd.f32 %v6250_v53, %v4253_v34  ;;  %v3452_v46 = vmul.f32 %v5379_v57, %v6243_v52  ;;  %v4254_v2 = vmul.f32 %v5447_v21, %v6243_v52  ;;  %v3197_v58 = vpop.f32.mrb[67].mxu0  ;;  %v3999_v7 = vpop.f32.mrb[67].mxu1 }
 0x1be   : > { %v3513_v35 = vadd.f32 %v6250_v53, %v3449_v28  ;;  %v4315_v49 = vadd.f32 %v6250_v53, %v4251_v17  ;;  %v3450_v61 = vmul.f32 %v6243_v52, %v3197_v58  ;;  %v4252_v62 = vmul.f32 %v6243_v52, %v3999_v7  ;;  %v6952_v28 = vld [vmem:[%s7544_s3] ss:$0 sm:$0xff] }
 0x1bf   : > { %v3579_v20 = vmax.f32 %v7712_v3, %v3515_v56  ;;  %v3516_v34 = vadd.f32 %v6250_v53, %v3452_v46  ;;  %v7713_v21 = vmax.f32 %v6269_v10, %v6272_v11  ;;  %v7714_v52 = vmax.f32 %v6279_v15, %v6282_v16 }
 0x1c0   : > { %v3514_v17 = vadd.f32 %v6952_v28, %v3450_v61  ;;  %v4318_v5 = vadd.f32 %v6952_v28, %v4254_v2  ;;  %v7715_v10 = vmax.f32 %v6289_v18, %v6292_v19  ;;  %v4316_v3 = vadd.f32 %v6952_v28, %v4252_v62  ;;  %v6971_v2 = vld [vmem:[%s7543_s2] ss:$0 sm:$0xff] }
 0x1c1   : > { %v3577_v57 = vmax.f32 %v7713_v21, %v3513_v35  ;;  %v4381_v58 = vmax.f32 %v3579_v20, %v4317_v14  ;;  %v3580_v4 = vmax.f32 %v7714_v52, %v3516_v34 }
 0x1c2   : > { %v3578_v11 = vmax.f32 %v7715_v10, %v3514_v17  ;;  %v5382_v14 = vpop.f32.mrb[68].mxu0  ;;  %v5450_v7 = vpop.f32.mrb[68].mxu1 }
 0x1c3   : > { %v4379_v53 = vmax.f32 %v3577_v57, %v4315_v49  ;;  %v4445_v15 = vmax.f32 %v4381_v58, 0.0  ;;  %v4382_v16 = vmax.f32 %v3580_v4, %v4318_v5  ;;  %v3455_v56 = vmul.f32 %v6971_v2, %v5382_v14  ;;  %v3210_v46 = vpop.f32.mrb[69].mxu0  ;;  %v4012_v18 = vpop.f32.mrb[69].mxu1 }
 0x1c4   : > { %v4257_v49 = vmul.f32 %v6971_v2, %v5450_v7  ;;  %v4380_v35 = vmax.f32 %v3578_v11, %v4316_v3  ;;  %v3453_v61 = vmul.f32 %v6971_v2, %v3210_v46  ;;  %v4255_v62 = vmul.f32 %v6971_v2, %v4012_v18  ;;  %v5383_v20 = vpop.f32.mrb[70].mxu0  ;;  %v5451_v34 = vpop.f32.mrb[70].mxu1 }
 0x1c5   : > { %v4443_v19 = vmax.f32 %v4379_v53, 0.0  ;;  %4510 = vst.msk [vmem:[%s6962_s24 + $0x10] sm:$0xff] %vm4507_vm3, %v4445_v15  ;;  %v4446_v21 = vmax.f32 %v4382_v16, 0.0  ;;  %v3519_v57 = vadd.f32 %v6952_v28, %v3455_v56  ;;  %v3456_v58 = vmul.f32 %v6971_v2, %v5383_v20  ;;  %v3213_v52 = vpop.f32.mrb[71].mxu0  ;;  %v4015_v4 = vpop.f32.mrb[71].mxu1 }
 0x1c6   : > { %v4321_v17 = vadd.f32 %v6952_v28, %v4257_v49  ;;  %v4444_v5 = vmax.f32 %v4380_v35, 0.0  ;;  %v3517_v53 = vadd.f32 %v6952_v28, %v3453_v61  ;;  %v4319_v10 = vadd.f32 %v6952_v28, %v4255_v62 }
 0x1c7   : > { %4508 = vst.msk [vmem:[%s6962_s24] sm:$0xff] %vm4507_vm3, %v4443_v19  ;;  %v4258_v11 = vmul.f32 %v6971_v2, %v5451_v34  ;;  %4511 = vst.msk [vmem:[%s6962_s24 + $0x18] sm:$0xff] %vm4507_vm3, %v4446_v21  ;;  %v7716_v3 = vmax.f32 %v6309_v36, %v6312_v37  ;;  %v3520_v7 = vadd.f32 %v6952_v28, %v3456_v58 }
 0x1c8   : > { %v3454_v15 = vmul.f32 %v6971_v2, %v3213_v52  ;;  %v4256_v16 = vmul.f32 %v6971_v2, %v4015_v4  ;;  %4509 = vst.msk [vmem:[%s6962_s24 + $0x8] sm:$0xff] %vm4507_vm3, %v4444_v5  ;;  %v7717_v56 = vmax.f32 %v6317_v42, %v6320_v43  ;;  %v7718_v18 = vmax.f32 %v6327_v47, %v6330_v48 }
 0x1c9   : > { %v3583_v14 = vmax.f32 %v7716_v3, %v3519_v57  ;;  %v4322_v36 = vadd.f32 %v6952_v28, %v4258_v11  ;;  %v7719_v42 = vmax.f32 %v6337_v50, %v6340_v51 }
 0x1ca   : > { %v3581_v49 = vmax.f32 %v7717_v56, %v3517_v53  ;;  %v3584_v19 = vmax.f32 %v7718_v18, %v3520_v7  ;;  %v3518_v37 = vadd.f32 %v6952_v28, %v3454_v15  ;;  %v4320_v61 = vadd.f32 %v6952_v28, %v4256_v16  ;;  %v5386_v62 = vpop.f32.mrb[72].mxu0  ;;  %v5454_v20 = vpop.f32.mrb[72].mxu1 }
 0x1cb   : > { %v4385_v46 = vmax.f32 %v3583_v14, %v4321_v17  ;;  %v3459_v57 = vmul.f32 %v6971_v2, %v5386_v62  ;;  %v3226_v47 = vpop.f32.mrb[73].mxu0  ;;  %v4028_v48 = vpop.f32.mrb[73].mxu1  ;;  %v4261_v58 = vmul.f32 %v6971_v2, %v5454_v20  ;;  %v7722_v20 = vmax.f32 %v6375_v29, %v6378_v30 }
 0x1cc   : > { %v4383_v35 = vmax.f32 %v3581_v49, %v4319_v10  ;;  %v4386_v21 = vmax.f32 %v3584_v19, %v4322_v36  ;;  %v3582_v43 = vmax.f32 %v7719_v42, %v3518_v37  ;;  %v3457_v52 = vmul.f32 %v6971_v2, %v3226_v47  ;;  %v5387_v5 = vpop.f32.mrb[74].mxu0  ;;  %v5455_v53 = vpop.f32.mrb[74].mxu1 }
 0x1cd   : > { %v4449_v34 = vmax.f32 %v4385_v46, 0.0  ;;  %v4259_v4 = vmul.f32 %v6971_v2, %v4028_v48  ;;  %v3523_v51 = vadd.f32 %v6952_v28, %v3459_v57  ;;  %v3460_v11 = vmul.f32 %v6971_v2, %v5387_v5  ;;  %v3229_v3 = vpop.f32.mrb[75].mxu0  ;;  %v4031_v14 = vpop.f32.mrb[75].mxu1 }
 0x1ce   : > { %v4447_v17 = vmax.f32 %v4383_v35, 0.0  ;;  %v4450_v10 = vmax.f32 %v4386_v21, 0.0  ;;  %v4384_v50 = vmax.f32 %v3582_v43, %v4320_v61  ;;  %v4325_v7 = vadd.f32 %v6952_v28, %v4261_v58 }
 0x1cf   : > { %4514 = vst.msk [vmem:[%s6962_s24 + $0x30] sm:$0xff] %vm4507_vm3, %v4449_v34  ;;  %v3521_v15 = vadd.f32 %v6952_v28, %v3457_v52  ;;  %v4323_v16 = vadd.f32 %v6952_v28, %v4259_v4  ;;  %v4262_v56 = vmul.f32 %v6971_v2, %v5455_v53  ;;  %v7720_v46 = vmax.f32 %v6357_v8, %v6360_v9 }
 0x1d0   : > { %4512 = vst.msk [vmem:[%s6962_s24 + $0x20] sm:$0xff] %vm4507_vm3, %v4447_v17  ;;  %4515 = vst.msk [vmem:[%s6962_s24 + $0x38] sm:$0xff] %vm4507_vm3, %v4450_v10  ;;  %v4448_v49 = vmax.f32 %v4384_v50, 0.0  ;;  %v3524_v19 = vadd.f32 %v6952_v28, %v3460_v11  ;;  %v3458_v36 = vmul.f32 %v6971_v2, %v3229_v3  ;;  %v7721_v37 = vmax.f32 %v6365_v24, %v6368_v25 }
 0x1d1   : > { %v3587_v18 = vmax.f32 %v7720_v46, %v3523_v51  ;;  %v4260_v61 = vmul.f32 %v6971_v2, %v4031_v14  ;;  %v4326_v8 = vadd.f32 %v6952_v28, %v4262_v56  ;;  %v7723_v47 = vmax.f32 %v6385_v32, %v6388_v33 }
 0x1d2   : > { %v3585_v35 = vmax.f32 %v7721_v37, %v3521_v15  ;;  %4513 = vst.msk [vmem:[%s6962_s24 + $0x28] sm:$0xff] %vm4507_vm3, %v4448_v49  ;;  %v3588_v34 = vmax.f32 %v7722_v20, %v3524_v19  ;;  %v3522_v9 = vadd.f32 %v6952_v28, %v3458_v36  ;;  %v5390_v43 = vpop.f32.mrb[76].mxu0  ;;  %v5458_v24 = vpop.f32.mrb[76].mxu1  ;;  %v7724_v49 = vmax.f32 %v6405_v0, %v6408_v1 }
 0x1d3   : > { %v4389_v62 = vmax.f32 %v3587_v18, %v4325_v7  ;;  %v4324_v42 = vadd.f32 %v6952_v28, %v4260_v61  ;;  %v3463_v17 = vmul.f32 %v6971_v2, %v5390_v43  ;;  %v3242_v29 = vpop.f32.mrb[77].mxu0  ;;  %v4044_v30 = vpop.f32.mrb[77].mxu1  ;;  %v4265_v52 = vmul.f32 %v6971_v2, %v5458_v24 }
 0x1d4   : > { %v4387_v21 = vmax.f32 %v3585_v35, %v4323_v16  ;;  %v4390_v57 = vmax.f32 %v3588_v34, %v4326_v8  ;;  %v3586_v48 = vmax.f32 %v7723_v47, %v3522_v9  ;;  %v3461_v4 = vmul.f32 %v6971_v2, %v3242_v29  ;;  %v5391_v53 = vpop.f32.mrb[78].mxu0  ;;  %v5459_v10 = vpop.f32.mrb[78].mxu1 }
 0x1d5   : > { %v4453_v25 = vmax.f32 %v4389_v62, 0.0  ;;  %v4263_v5 = vmul.f32 %v6971_v2, %v4044_v30  ;;  %v3527_v33 = vadd.f32 %v6952_v28, %v3463_v17  ;;  %v3464_v51 = vmul.f32 %v6971_v2, %v5391_v53  ;;  %v3245_v11 = vpop.f32.mrb[79].mxu0  ;;  %v4047_v3 = vpop.f32.mrb[79].mxu1 }
 0x1d6   : > { %v4451_v58 = vmax.f32 %v4387_v21, 0.0  ;;  %v4454_v50 = vmax.f32 %v4390_v57, 0.0  ;;  %v4388_v32 = vmax.f32 %v3586_v48, %v4324_v42  ;;  %v4329_v14 = vadd.f32 %v6952_v28, %v4265_v52 }
 0x1d7   : > { %4518 = vst.msk [vmem:[%s6962_s24 + $0x50] sm:$0xff] %vm4507_vm3, %v4453_v25  ;;  %v3525_v7 = vadd.f32 %v6952_v28, %v3461_v4  ;;  %v4327_v15 = vadd.f32 %v6952_v28, %v4263_v5  ;;  %v4266_v16 = vmul.f32 %v6971_v2, %v5459_v10  ;;  %v3591_v46 = vmax.f32 %v7724_v49, %v3527_v33 }
 0x1d8   : > { %4516 = vst.msk [vmem:[%s6962_s24 + $0x40] sm:$0xff] %vm4507_vm3, %v4451_v58  ;;  %4519 = vst.msk [vmem:[%s6962_s24 + $0x58] sm:$0xff] %vm4507_vm3, %v4454_v50  ;;  %v4452_v56 = vmax.f32 %v4388_v32, 0.0  ;;  %v3528_v18 = vadd.f32 %v6952_v28, %v3464_v51  ;;  %v3462_v19 = vmul.f32 %v6971_v2, %v3245_v11  ;;  %v7725_v36 = vmax.f32 %v6413_v12, %v6416_v13 }
 0x1d9   : > { %v4264_v35 = vmul.f32 %v6971_v2, %v4047_v3  ;;  %v4393_v61 = vmax.f32 %v3591_v46, %v4329_v14  ;;  %v7726_v62 = vmax.f32 %v6423_v27, %v6426_v38  ;;  %v4330_v0 = vadd.f32 %v6952_v28, %v4266_v16 }
 0x1da   : > { %v3589_v37 = vmax.f32 %v7725_v36, %v3525_v7  ;;  %4517 = vst.msk [vmem:[%s6962_s24 + $0x48] sm:$0xff] %vm4507_vm3, %v4452_v56  ;;  %v3526_v1 = vadd.f32 %v6952_v28, %v3462_v19  ;;  %v5394_v9 = vpop.f32.mrb[80].mxu0  ;;  %v5462_v12 = vpop.f32.mrb[80].mxu1  ;;  %v7727_v42 = vmax.f32 %v6433_v40, %v6436_v41  ;;  %v7728_v33 = vmax.f32 %v6451_v22, %v6454_v23 }
 0x1db   : > { %v3592_v20 = vmax.f32 %v7726_v62, %v3528_v18  ;;  %v4328_v8 = vadd.f32 %v6952_v28, %v4264_v35  ;;  %v4457_v13 = vmax.f32 %v4393_v61, 0.0  ;;  %v3467_v24 = vmul.f32 %v6971_v2, %v5394_v9  ;;  %v3258_v27 = vpop.f32.mrb[81].mxu0  ;;  %v4060_v38 = vpop.f32.mrb[81].mxu1 }
 0x1dc   : > { %v4391_v34 = vmax.f32 %v3589_v37, %v4327_v15  ;;  %v3590_v43 = vmax.f32 %v7727_v42, %v3526_v1  ;;  %v4269_v57 = vmul.f32 %v6971_v2, %v5462_v12  ;;  %v3465_v47 = vmul.f32 %v6971_v2, %v3258_v27  ;;  %v5395_v17 = vpop.f32.mrb[82].mxu0  ;;  %v5463_v29 = vpop.f32.mrb[82].mxu1 }
 0x1dd   : > { %v4394_v21 = vmax.f32 %v3592_v20, %v4330_v0  ;;  %v4267_v48 = vmul.f32 %v6971_v2, %v4060_v38  ;;  %4522 = vst.msk [vmem:[%s6962_s24 + $0x70] sm:$0xff] %vm4507_vm3, %v4457_v13  ;;  %v3531_v41 = vadd.f32 %v6952_v28, %v3467_v24  ;;  %v3468_v58 = vmul.f32 %v6971_v2, %v5395_v17  ;;  %v3261_v52 = vpop.f32.mrb[83].mxu0  ;;  %v4063_v4 = vpop.f32.mrb[83].mxu1 }
 0x1de   : > { %v4455_v25 = vmax.f32 %v4391_v34, 0.0  ;;  %v4392_v40 = vmax.f32 %v3590_v43, %v4328_v8  ;;  %v4333_v5 = vadd.f32 %v6952_v28, %v4269_v57  ;;  %v3529_v53 = vadd.f32 %v6952_v28, %v3465_v47 }
 0x1df   : > { %v4458_v30 = vmax.f32 %v4394_v21, 0.0  ;;  %v4331_v10 = vadd.f32 %v6952_v28, %v4267_v48  ;;  %v4270_v50 = vmul.f32 %v6971_v2, %v5463_v29  ;;  %v3595_v51 = vmax.f32 %v7728_v33, %v3531_v41  ;;  %v7734_v41 = vld [vmem:[#allocation3_spill] sm:$0xff] }
 0x1e0   : > { %4520 = vst.msk [vmem:[%s6962_s24 + $0x60] sm:$0xff] %vm4507_vm3, %v4455_v25  ;;  %v4456_v32 = vmax.f32 %v4392_v40, 0.0  ;;  %v3532_v11 = vadd.f32 %v6952_v28, %v3468_v58  ;;  %v3466_v3 = vmul.f32 %v6971_v2, %v3261_v52  ;;  %v7729_v14 = vmax.f32 %v6459_v39, %v6462_v60 }
 0x1e1   : > { %4523 = vst.msk [vmem:[%s6962_s24 + $0x78] sm:$0xff] %vm4507_vm3, %v4458_v30  ;;  %v4268_v15 = vmul.f32 %v6971_v2, %v4063_v4  ;;  %v4397_v16 = vmax.f32 %v3595_v51, %v4333_v5  ;;  %v7730_v56 = vmax.f32 %v6469_v26, %v6472_v6  ;;  %v4334_v22 = vadd.f32 %v6952_v28, %v4270_v50  ;;  %v7736_v50 = vld [vmem:[#allocation4_spill] sm:$0xff] }
 0x1e2   : > { %v3593_v7 = vmax.f32 %v7729_v14, %v3529_v53  ;;  %4521 = vst.msk [vmem:[%s6962_s24 + $0x68] sm:$0xff] %vm4507_vm3, %v4456_v32  ;;  %v3530_v23 = vadd.f32 %v6952_v28, %v3466_v3  ;;  %v5398_v19 = vpop.f32.mrb[84].mxu0  ;;  %v5466_v39 = vpop.f32.mrb[84].mxu1  ;;  %v7731_v37 = vmax.f32 %v6479_v45, %v6482_v44  ;;  %v7732_v25 = vmax.f32 %v6493_v31, %v6496_v63  ;;  %v7737_v32 = vld [vmem:[#allocation5_spill] sm:$0xff] }
 0x1e3   : > { %v3596_v49 = vmax.f32 %v7730_v56, %v3532_v11  ;;  %v4332_v18 = vadd.f32 %v6952_v28, %v4268_v15  ;;  %v4461_v60 = vmax.f32 %v4397_v16, 0.0  ;;  %v3471_v61 = vmul.f32 %v6971_v2, %v5398_v19  ;;  %v3274_v26 = vpop.f32.mrb[85].mxu0  ;;  %v4076_v6 = vpop.f32.mrb[85].mxu1 }
 0x1e4   : > { %v4395_v46 = vmax.f32 %v3593_v7, %v4331_v10  ;;  %v3594_v35 = vmax.f32 %v7731_v37, %v3530_v23  ;;  %v4273_v20 = vmul.f32 %v6971_v2, %v5466_v39  ;;  %v3469_v0 = vmul.f32 %v6971_v2, %v3274_v26  ;;  %v5399_v34 = vpop.f32.mrb[86].mxu0  ;;  %v5467_v8 = vpop.f32.mrb[86].mxu1  ;;  %v7739_v26 = vld [vmem:[#allocation6_spill] sm:$0xff] }
 0x1e5   : > { %v4398_v36 = vmax.f32 %v3596_v49, %v4334_v22  ;;  %v4271_v1 = vmul.f32 %v6971_v2, %v4076_v6  ;;  %4526 = vst.msk [vmem:[%s6962_s24 + $0x90] sm:$0xff] %vm4507_vm3, %v4461_v60  ;;  %v3535_v44 = vadd.f32 %v6952_v28, %v3471_v61  ;;  %v3472_v12 = vmul.f32 %v6971_v2, %v5399_v34  ;;  %v3277_v13 = vpop.f32.mrb[87].mxu0  ;;  %v4079_v21 = vpop.f32.mrb[87].mxu1  ;;  %v7740_v6 = vld [vmem:[#allocation7_spill] sm:$0xff]  ;;  %v7742_v34 = vld [vmem:[#allocation8_spill] sm:$0xff] }
 0x1e6   : > { %v4459_v62 = vmax.f32 %v4395_v46, 0.0  ;;  %v4396_v45 = vmax.f32 %v3594_v35, %v4332_v18  ;;  %v4337_v42 = vadd.f32 %v6952_v28, %v4273_v20  ;;  %v3533_v43 = vadd.f32 %v6952_v28, %v3469_v0 }
 0x1e7   : > { %v4462_v9 = vmax.f32 %v4398_v36, 0.0  ;;  %v4335_v24 = vadd.f32 %v6952_v28, %v4271_v1  ;;  %v4274_v27 = vmul.f32 %v6971_v2, %v5467_v8  ;;  %v3599_v57 = vmax.f32 %v7732_v25, %v3535_v44  ;;  %v7743_v8 = vld [vmem:[#allocation9_spill] sm:$0xff] }
 0x1e8   : > { %4524 = vst.msk [vmem:[%s6962_s24 + $0x80] sm:$0xff] %vm4507_vm3, %v4459_v62  ;;  %v4460_v38 = vmax.f32 %v4396_v45, 0.0  ;;  %v3536_v47 = vadd.f32 %v6952_v28, %v3472_v12  ;;  %v3470_v48 = vmul.f32 %v6971_v2, %v3277_v13  ;;  %v7733_v17 = vmax.f32 %v6501_v55, %v6504_v59  ;;  %v7745_v13 = vld [vmem:[#allocation10_spill] sm:$0xff] }
 0x1e9   : > { %4527 = vst.msk [vmem:[%s6962_s24 + $0x98] sm:$0xff] %vm4507_vm3, %v4462_v9  ;;  %v4272_v30 = vmul.f32 %v6971_v2, %v4079_v21  ;;  %v4401_v40 = vmax.f32 %v3599_v57, %v4337_v42  ;;  %v7735_v58 = vmax.f32 %v6511_v54, %v7734_v41  ;;  %v4338_v31 = vadd.f32 %v6952_v28, %v4274_v27  ;;  %v7746_v21 = vld [vmem:[#allocation11_spill] sm:$0xff] }
 0x1ea   : > { %v3597_v29 = vmax.f32 %v7733_v17, %v3533_v43  ;;  %4525 = vst.msk [vmem:[%s6962_s24 + $0x88] sm:$0xff] %vm4507_vm3, %v4460_v38  ;;  %v3534_v63 = vadd.f32 %v6952_v28, %v3470_v48  ;;  %v5402_v53 = vpop.f32.mrb[88].mxu0  ;;  %v5470_v55 = vpop.f32.mrb[88].mxu1  ;;  %v7738_v33 = vmax.f32 %v7736_v50, %v7737_v32  ;;  %v7741_v62 = vmax.f32 %v7739_v26, %v7740_v6 }
 0x1eb   : > { %v3600_v52 = vmax.f32 %v7735_v58, %v3536_v47  ;;  %v4336_v5 = vadd.f32 %v6952_v28, %v4272_v30  ;;  %v4465_v59 = vmax.f32 %v4401_v40, 0.0  ;;  %v3475_v11 = vmul.f32 %v6971_v2, %v5402_v53  ;;  %v3290_v54 = vpop.f32.mrb[89].mxu0  ;;  %v4092_v3 = vpop.f32.mrb[89].mxu1  ;;  %v7749_v30 = vld [vmem:[#allocation13_spill] sm:$0xff] }
 0x1ec   : > { %v4399_v4 = vmax.f32 %v3597_v29, %v4335_v24  ;;  %v3598_v51 = vmax.f32 %v7738_v33, %v3534_v63  ;;  %v4277_v7 = vmul.f32 %v6971_v2, %v5470_v55  ;;  %v3473_v15 = vmul.f32 %v6971_v2, %v3290_v54  ;;  %v5403_v56 = vpop.f32.mrb[90].mxu0  ;;  %v5471_v49 = vpop.f32.mrb[90].mxu1  ;;  %v7748_v29 = vld [vmem:[#allocation12_spill] sm:$0xff] }
 0x1ed   : > { %v4402_v10 = vmax.f32 %v3600_v52, %v4338_v31  ;;  %v4275_v16 = vmul.f32 %v6971_v2, %v4092_v3  ;;  %4530 = vst.msk [vmem:[%s6962_s24 + $0xb0] sm:$0xff] %vm4507_vm3, %v4465_v59  ;;  %v3539_v46 = vadd.f32 %v6952_v28, %v3475_v11  ;;  %v3476_v18 = vmul.f32 %v6971_v2, %v5403_v56  ;;  %v3293_v19 = vpop.f32.mrb[91].mxu0  ;;  %v4095_v39 = vpop.f32.mrb[91].mxu1  ;;  %v7752_v56 = vld [vmem:[#allocation15_spill] sm:$0xff] }
 0x1ee   : > { %v4463_v14 = vmax.f32 %v4399_v4, 0.0  ;;  %v4400_v23 = vmax.f32 %v3598_v51, %v4336_v5  ;;  %v4341_v60 = vadd.f32 %v6952_v28, %v4277_v7  ;;  %v3537_v36 = vadd.f32 %v6952_v28, %v3473_v15 }
 0x1ef   : > { %v4466_v22 = vmax.f32 %v4402_v10, 0.0  ;;  %v4339_v37 = vadd.f32 %v6952_v28, %v4275_v16  ;;  %v4278_v35 = vmul.f32 %v6971_v2, %v5471_v49  ;;  %v3603_v20 = vmax.f32 %v7741_v62, %v3539_v46  ;;  %v7751_v16 = vld [vmem:[#allocation14_spill] sm:$0xff] }
 0x1f0   : > { %4528 = vst.msk [vmem:[%s6962_s24 + $0xa0] sm:$0xff] %vm4507_vm3, %v4463_v14  ;;  %v4464_v61 = vmax.f32 %v4400_v23, 0.0  ;;  %v3540_v0 = vadd.f32 %v6952_v28, %v3476_v18  ;;  %v3474_v1 = vmul.f32 %v6971_v2, %v3293_v19  ;;  %v7744_v9 = vmax.f32 %v7742_v34, %v7743_v8  ;;  %v7754_v18 = vld [vmem:[#allocation16_spill] sm:$0xff]  ;;  %v7755_v19 = vld [vmem:[#allocation17_spill] sm:$0xff] }
 0x1f1   : > { %4531 = vst.msk [vmem:[%s6962_s24 + $0xb8] sm:$0xff] %vm4507_vm3, %v4466_v22  ;;  %v4276_v44 = vmul.f32 %v6971_v2, %v4095_v39  ;;  %v4405_v12 = vmax.f32 %v3603_v20, %v4341_v60  ;;  %v7747_v42 = vmax.f32 %v7745_v13, %v7746_v21  ;;  %v4342_v24 = vadd.f32 %v6952_v28, %v4278_v35  ;;  %v7757_v35 = vld [vmem:[#allocation18_spill] sm:$0xff] }
 0x1f2   : > { %v3601_v45 = vmax.f32 %v7744_v9, %v3537_v36  ;;  %4529 = vst.msk [vmem:[%s6962_s24 + $0xa8] sm:$0xff] %vm4507_vm3, %v4464_v61  ;;  %v3538_v27 = vadd.f32 %v6952_v28, %v3474_v1  ;;  %v5406_v57 = vpop.f32.mrb[92].mxu0  ;;  %v5474_v47 = vpop.f32.mrb[92].mxu1  ;;  %v7750_v40 = vmax.f32 %v7748_v29, %v7749_v30  ;;  %v7753_v49 = vmax.f32 %v7751_v16, %v7752_v56  ;;  %v7758_v61 = vld [vmem:[#allocation19_spill] sm:$0xff] }
 0x1f3   : > { %v3604_v43 = vmax.f32 %v7747_v42, %v3540_v0  ;;  %v4340_v25 = vadd.f32 %v6952_v28, %v4276_v44  ;;  %v4469_v48 = vmax.f32 %v4405_v12, 0.0  ;;  %v3479_v58 = vmul.f32 %v6971_v2, %v5406_v57  ;;  %v3306_v52 = vpop.f32.mrb[93].mxu0  ;;  %v4108_v31 = vpop.f32.mrb[93].mxu1  ;;  %v7760_v44 = vld [vmem:[#allocation20_spill] sm:$0xff]  ;;  %v7761_v12 = vld [vmem:[#allocation21_spill] sm:$0xff] }
 0x1f4   : > { %v4403_v38 = vmax.f32 %v3601_v45, %v4339_v37  ;;  %v3602_v41 = vmax.f32 %v7750_v40, %v3538_v27  ;;  %v4281_v4 = vmul.f32 %v6971_v2, %v5474_v47  ;;  %v3477_v5 = vmul.f32 %v6971_v2, %v3306_v52  ;;  %v5407_v55 = vpop.f32.mrb[94].mxu0  ;;  %v5475_v59 = vpop.f32.mrb[94].mxu1 }
 0x1f5   : > { %v4406_v17 = vmax.f32 %v3604_v43, %v4342_v24  ;;  %v4279_v53 = vmul.f32 %v6971_v2, %v4108_v31  ;;  %4534 = vst.msk [vmem:[%s6962_s24 + $0xd0] sm:$0xff] %vm4507_vm3, %v4469_v48  ;;  %v3543_v32 = vadd.f32 %v6952_v28, %v3479_v58  ;;  %v3480_v33 = vmul.f32 %v6971_v2, %v5407_v55  ;;  %v3309_v51 = vpop.f32.mrb[95].mxu0  ;;  %v4111_v11 = vpop.f32.mrb[95].mxu1  ;;  %v7764_v55 = vld [vmem:[#allocation23_spill] sm:$0xff] }
 0x1f6   : > { %v4467_v63 = vmax.f32 %v4403_v38, 0.0  ;;  %v4404_v50 = vmax.f32 %v3602_v41, %v4340_v25  ;;  %v4345_v54 = vadd.f32 %v6952_v28, %v4281_v4  ;;  %v3541_v3 = vadd.f32 %v6952_v28, %v3477_v5 }
 0x1f7   : > { %v4470_v10 = vmax.f32 %v4406_v17, 0.0  ;;  %v4343_v14 = vadd.f32 %v6952_v28, %v4279_v53  ;;  %v4282_v7 = vmul.f32 %v6971_v2, %v5475_v59  ;;  %v3607_v22 = vmax.f32 %v7753_v49, %v3543_v32  ;;  %v7763_v53 = vld [vmem:[#allocation22_spill] sm:$0xff] }
 0x1f8   : > { %4532 = vst.msk [vmem:[%s6962_s24 + $0xc0] sm:$0xff] %vm4507_vm3, %v4467_v63  ;;  %v4468_v15 = vmax.f32 %v4404_v50, 0.0  ;;  %v3544_v23 = vadd.f32 %v6952_v28, %v3480_v33  ;;  %v3478_v46 = vmul.f32 %v6971_v2, %v3309_v51  ;;  %v7756_v39 = vmax.f32 %v7754_v18, %v7755_v19  ;;  %v7766_v33 = vld [vmem:[#allocation24_spill] sm:$0xff]  ;;  %v7767_v51 = vld [vmem:[#allocation25_spill] sm:$0xff] }
 0x1f9   : > { %4535 = vst.msk [vmem:[%s6962_s24 + $0xd8] sm:$0xff] %vm4507_vm3, %v4470_v10  ;;  %v4280_v36 = vmul.f32 %v6971_v2, %v4111_v11  ;;  %v4409_v37 = vmax.f32 %v3607_v22, %v4345_v54  ;;  %v7759_v26 = vmax.f32 %v7757_v35, %v7758_v61  ;;  %v4346_v62 = vadd.f32 %v6952_v28, %v4282_v7  ;;  %v7769_v7 = vld [vmem:[#allocation26_spill] sm:$0xff] }
 0x1fa   : > { %v3605_v60 = vmax.f32 %v7756_v39, %v3541_v3  ;;  %4533 = vst.msk [vmem:[%s6962_s24 + $0xc8] sm:$0xff] %vm4507_vm3, %v4468_v15  ;;  %v3542_v20 = vadd.f32 %v6952_v28, %v3478_v46  ;;  %v5410_v34 = vpop.f32.mrb[96].mxu0  ;;  %v5478_v8 = vpop.f32.mrb[96].mxu1  ;;  %v7762_v13 = vmax.f32 %v7760_v44, %v7761_v12  ;;  %v7765_v59 = vmax.f32 %v7763_v53, %v7764_v55  ;;  %v7770_v15 = vld [vmem:[#allocation27_spill] sm:$0xff] }
 0x1fb   : > { %v3608_v6 = vmax.f32 %v7759_v26, %v3544_v23  ;;  %v4344_v1 = vadd.f32 %v6952_v28, %v4280_v36  ;;  %v4473_v9 = vmax.f32 %v4409_v37, 0.0  ;;  %v3483_v42 = vmul.f32 %v6971_v2, %v5410_v34  ;;  %v3322_v43 = vpop.f32.mrb[97].mxu0  ;;  %v4124_v24 = vpop.f32.mrb[97].mxu1  ;;  %v7772_v36 = vld [vmem:[#allocation28_spill] sm:$0xff]  ;;  %v7773_v37 = vld [vmem:[#allocation29_spill] sm:$0xff] }
 0x1fc   : > { %v4407_v0 = vmax.f32 %v3605_v60, %v4343_v14  ;;  %v3606_v21 = vmax.f32 %v7762_v13, %v3542_v20  ;;  %v4285_v38 = vmul.f32 %v6971_v2, %v5478_v8  ;;  %v3481_v25 = vmul.f32 %v6971_v2, %v3322_v43  ;;  %v5411_v47 = vpop.f32.mrb[98].mxu0  ;;  %v5479_v48 = vpop.f32.mrb[98].mxu1 }
 0x1fd   : > { %v4410_v45 = vmax.f32 %v3608_v6, %v4346_v62  ;;  %v4283_v57 = vmul.f32 %v6971_v2, %v4124_v24  ;;  %4538 = vst.msk [vmem:[%s6962_s24 + $0xf0] sm:$0xff] %vm4507_vm3, %v4473_v9  ;;  %v3547_v30 = vadd.f32 %v6952_v28, %v3483_v42  ;;  %v3484_v40 = vmul.f32 %v6971_v2, %v5411_v47  ;;  %v3325_v41 = vpop.f32.mrb[99].mxu0  ;;  %v4127_v58 = vpop.f32.mrb[99].mxu1  ;;  %v7776_v47 = vld [vmem:[#allocation31_spill] sm:$0xff] }
 0x1fe   : > { %v4471_v27 = vmax.f32 %v4407_v0, 0.0  ;;  %v4408_v29 = vmax.f32 %v3606_v21, %v4344_v1  ;;  %v4349_v52 = vadd.f32 %v6952_v28, %v4285_v38  ;;  %v3545_v31 = vadd.f32 %v6952_v28, %v3481_v25 }
 0x1ff   : > { %v4474_v17 = vmax.f32 %v4410_v45, 0.0  ;;  %v4347_v63 = vadd.f32 %v6952_v28, %v4283_v57  ;;  %v4286_v4 = vmul.f32 %v6971_v2, %v5479_v48  ;;  %v3611_v10 = vmax.f32 %v7765_v59, %v3547_v30  ;;  %v7775_v57 = vld [vmem:[#allocation30_spill] sm:$0xff] }
 0x200   : > { %4536 = vst.msk [vmem:[%s6962_s24 + $0xe0] sm:$0xff] %vm4507_vm3, %v4471_v27  ;;  %v4472_v5 = vmax.f32 %v4408_v29, 0.0  ;;  %v3548_v50 = vadd.f32 %v6952_v28, %v3484_v40  ;;  %v3482_v32 = vmul.f32 %v6971_v2, %v3325_v41  ;;  %v7768_v11 = vmax.f32 %v7766_v33, %v7767_v51  ;;  %v7778_v40 = vld [vmem:[#allocation32_spill] sm:$0xff]  ;;  %v7779_v41 = vld [vmem:[#allocation33_spill] sm:$0xff] }
 0x201   : > { %4539 = vst.msk [vmem:[%s6962_s24 + $0xf8] sm:$0xff] %vm4507_vm3, %v4474_v17  ;;  %v4284_v3 = vmul.f32 %v6971_v2, %v4127_v58  ;;  %v4413_v14 = vmax.f32 %v3611_v10, %v4349_v52  ;;  %v7771_v16 = vmax.f32 %v7769_v7, %v7770_v15  ;;  %v4350_v49 = vadd.f32 %v6952_v28, %v4286_v4  ;;  %v7781_v4 = vld [vmem:[#allocation34_spill] sm:$0xff] }
 0x202   : > { %v3609_v54 = vmax.f32 %v7768_v11, %v3545_v31  ;;  %4537 = vst.msk [vmem:[%s6962_s24 + $0xe8] sm:$0xff] %vm4507_vm3, %v4472_v5  ;;  %v3546_v22 = vadd.f32 %v6952_v28, %v3482_v32  ;;  %v5414_v18 = vpop.f32.mrb[100].mxu0  ;;  %v5482_v19 = vpop.f32.mrb[100].mxu1  ;;  %v7774_v35 = vmax.f32 %v7772_v36, %v7773_v37  ;;  %v7777_v48 = vmax.f32 %v7775_v57, %v7776_v47  ;;  %v7782_v5 = vld [vmem:[#allocation35_spill] sm:$0xff] }
 0x203   : > { %v3612_v56 = vmax.f32 %v7771_v16, %v3548_v50  ;;  %v4348_v46 = vadd.f32 %v6952_v28, %v4284_v3  ;;  %v4477_v39 = vmax.f32 %v4413_v14, 0.0  ;;  %v3487_v26 = vmul.f32 %v6971_v2, %v5414_v18  ;;  %v3338_v6 = vpop.f32.mrb[101].mxu0  ;;  %v4140_v62 = vpop.f32.mrb[101].mxu1  ;;  %v7784_v3 = vld [vmem:[#allocation36_spill] sm:$0xff]  ;;  %v7785_v14 = vld [vmem:[#allocation37_spill] sm:$0xff] }
 0x204   : > { %v4411_v23 = vmax.f32 %v3609_v54, %v4347_v63  ;;  %v3610_v61 = vmax.f32 %v7774_v35, %v3546_v22  ;;  %v4289_v0 = vmul.f32 %v6971_v2, %v5482_v19  ;;  %v3485_v1 = vmul.f32 %v6971_v2, %v3338_v6  ;;  %v5415_v8 = vpop.f32.mrb[102].mxu0  ;;  %v5483_v9 = vpop.f32.mrb[102].mxu1 }
 0x205   : > { %v4414_v60 = vmax.f32 %v3612_v56, %v4350_v49  ;;  %v4287_v34 = vmul.f32 %v6971_v2, %v4140_v62  ;;  %4542 = vst.msk [vmem:[%s6962_s24 + $0x110] sm:$0xff] %vm4507_vm3, %v4477_v39  ;;  %v3551_v12 = vadd.f32 %v6952_v28, %v3487_v26  ;;  %v3488_v13 = vmul.f32 %v6971_v2, %v5415_v8  ;;  %v3341_v21 = vpop.f32.mrb[103].mxu0  ;;  %v4143_v42 = vpop.f32.mrb[103].mxu1  ;;  %v7788_v8 = vld [vmem:[#allocation39_spill] sm:$0xff] }
 0x206   : > { %v4475_v20 = vmax.f32 %v4411_v23, 0.0  ;;  %v4412_v44 = vmax.f32 %v3610_v61, %v4348_v46  ;;  %v4353_v43 = vadd.f32 %v6952_v28, %v4289_v0  ;;  %v3549_v24 = vadd.f32 %v6952_v28, %v3485_v1 }
 0x207   : > { %v4478_v45 = vmax.f32 %v4414_v60, 0.0  ;;  %v4351_v27 = vadd.f32 %v6952_v28, %v4287_v34  ;;  %v4290_v38 = vmul.f32 %v6971_v2, %v5483_v9  ;;  %v3615_v17 = vmax.f32 %v7777_v48, %v3551_v12  ;;  %v7787_v34 = vld [vmem:[#allocation38_spill] sm:$0xff] }
 0x208   : > { %4540 = vst.msk [vmem:[%s6962_s24 + $0x100] sm:$0xff] %vm4507_vm3, %v4475_v20  ;;  %v4476_v25 = vmax.f32 %v4412_v44, 0.0  ;;  %v3552_v29 = vadd.f32 %v6952_v28, %v3488_v13  ;;  %v3486_v30 = vmul.f32 %v6971_v2, %v3341_v21  ;;  %v7780_v58 = vmax.f32 %v7778_v40, %v7779_v41  ;;  %v7790_v13 = vld [vmem:[#allocation40_spill] sm:$0xff]  ;;  %v7791_v21 = vld [vmem:[#allocation41_spill] sm:$0xff] }
 0x209   : > { %4543 = vst.msk [vmem:[%s6962_s24 + $0x118] sm:$0xff] %vm4507_vm3, %v4478_v45  ;;  %v4288_v31 = vmul.f32 %v6971_v2, %v4143_v42  ;;  %v4417_v63 = vmax.f32 %v3615_v17, %v4353_v43  ;;  %v7783_v53 = vmax.f32 %v7781_v4, %v7782_v5  ;;  %v4354_v59 = vadd.f32 %v6952_v28, %v4290_v38  ;;  %v7793_v38 = vld [vmem:[#allocation42_spill] sm:$0xff] }
 0x20a   : > { %v3613_v52 = vmax.f32 %v7780_v58, %v3549_v24  ;;  %4541 = vst.msk [vmem:[%s6962_s24 + $0x108] sm:$0xff] %vm4507_vm3, %v4476_v25  ;;  %v3550_v10 = vadd.f32 %v6952_v28, %v3486_v30  ;;  %v5418_v33 = vpop.f32.mrb[104].mxu0  ;;  %v5486_v51 = vpop.f32.mrb[104].mxu1  ;;  %v7786_v7 = vmax.f32 %v7784_v3, %v7785_v14  ;;  %v7789_v9 = vmax.f32 %v7787_v34, %v7788_v8  ;;  %v7794_v25 = vld [vmem:[#allocation43_spill] sm:$0xff] }
 0x20b   : > { %v3616_v55 = vmax.f32 %v7783_v53, %v3552_v29  ;;  %v4352_v32 = vadd.f32 %v6952_v28, %v4288_v31  ;;  %v4481_v11 = vmax.f32 %v4417_v63, 0.0  ;;  %v3491_v16 = vmul.f32 %v6971_v2, %v5418_v33  ;;  %v3354_v56 = vpop.f32.mrb[105].mxu0  ;;  %v4156_v49 = vpop.f32.mrb[105].mxu1  ;;  %v7796_v31 = vld [vmem:[#allocation44_spill] sm:$0xff]  ;;  %v7797_v63 = vld [vmem:[#allocation45_spill] sm:$0xff] }
 0x20c   : > { %v4415_v50 = vmax.f32 %v3613_v52, %v4351_v27  ;;  %v3614_v15 = vmax.f32 %v7786_v7, %v3550_v10  ;;  %v4293_v23 = vmul.f32 %v6971_v2, %v5486_v51  ;;  %v3489_v46 = vmul.f32 %v6971_v2, %v3354_v56  ;;  %v5419_v19 = vpop.f32.mrb[106].mxu0  ;;  %v5487_v39 = vpop.f32.mrb[106].mxu1 }
 0x20d   : > { %v4418_v54 = vmax.f32 %v3616_v55, %v4354_v59  ;;  %v4291_v18 = vmul.f32 %v6971_v2, %v4156_v49  ;;  %4546 = vst.msk [vmem:[%s6962_s24 + $0x130] sm:$0xff] %vm4507_vm3, %v4481_v11  ;;  %v3555_v37 = vadd.f32 %v6952_v28, %v3491_v16  ;;  %v3492_v35 = vmul.f32 %v6971_v2, %v5419_v19  ;;  %v3357_v61 = vpop.f32.mrb[107].mxu0  ;;  %v4159_v26 = vpop.f32.mrb[107].mxu1  ;;  %v7800_v19 = vld [vmem:[#allocation47_spill] sm:$0xff] }
 0x20e   : > { %v4479_v22 = vmax.f32 %v4415_v50, 0.0  ;;  %v4416_v36 = vmax.f32 %v3614_v15, %v4352_v32  ;;  %v4357_v6 = vadd.f32 %v6952_v28, %v4293_v23  ;;  %v3553_v62 = vadd.f32 %v6952_v28, %v3489_v46 }
 0x20f   : > { %v4482_v60 = vmax.f32 %v4418_v54, 0.0  ;;  %v4355_v20 = vadd.f32 %v6952_v28, %v4291_v18  ;;  %v4294_v0 = vmul.f32 %v6971_v2, %v5487_v39  ;;  %v3619_v45 = vmax.f32 %v7789_v9, %v3555_v37  ;;  %v7799_v18 = vld [vmem:[#allocation46_spill] sm:$0xff] }
 0x210   : > { %4544 = vst.msk [vmem:[%s6962_s24 + $0x120] sm:$0xff] %vm4507_vm3, %v4479_v22  ;;  %v4480_v1 = vmax.f32 %v4416_v36, 0.0  ;;  %v3556_v44 = vadd.f32 %v6952_v28, %v3492_v35  ;;  %v3490_v12 = vmul.f32 %v6971_v2, %v3357_v61  ;;  %v7792_v42 = vmax.f32 %v7790_v13, %v7791_v21  ;;  %v7802_v35 = vld [vmem:[#allocation48_spill] sm:$0xff]  ;;  %v7803_v61 = vld [vmem:[#allocation49_spill] sm:$0xff] }
 0x211   : > { %4547 = vst.msk [vmem:[%s6962_s24 + $0x138] sm:$0xff] %vm4507_vm3, %v4482_v60  ;;  %v4292_v24 = vmul.f32 %v6971_v2, %v4159_v26  ;;  %v4421_v27 = vmax.f32 %v3619_v45, %v4357_v6  ;;  %v7795_v57 = vmax.f32 %v7793_v38, %v7794_v25  ;;  %v4358_v48 = vadd.f32 %v6952_v28, %v4294_v0  ;;  %v7805_v0 = vld [vmem:[#allocation50_spill] sm:$0xff] }
 0x212   : > { %v3617_v43 = vmax.f32 %v7792_v42, %v3553_v62  ;;  %4545 = vst.msk [vmem:[%s6962_s24 + $0x128] sm:$0xff] %vm4507_vm3, %v4480_v1  ;;  %v3554_v17 = vadd.f32 %v6952_v28, %v3490_v12  ;;  %v5422_v40 = vpop.f32.mrb[108].mxu0  ;;  %v5490_v41 = vpop.f32.mrb[108].mxu1  ;;  %v7798_v4 = vmax.f32 %v7796_v31, %v7797_v63  ;;  %v7801_v39 = vmax.f32 %v7799_v18, %v7800_v19  ;;  %v7806_v1 = vld [vmem:[#allocation51_spill] sm:$0xff] }
 0x213   : > { %v3620_v47 = vmax.f32 %v7795_v57, %v3556_v44  ;;  %v4356_v30 = vadd.f32 %v6952_v28, %v4292_v24  ;;  %v4485_v58 = vmax.f32 %v4421_v27, 0.0  ;;  %v3495_v53 = vmul.f32 %v6971_v2, %v5422_v40  ;;  %v3370_v55 = vpop.f32.mrb[109].mxu0  ;;  %v4172_v59 = vpop.f32.mrb[109].mxu1  ;;  %v7808_v24 = vld [vmem:[#allocation52_spill] sm:$0xff]  ;;  %v7809_v27 = vld [vmem:[#allocation53_spill] sm:$0xff] }
 0x214   : > { %v4419_v29 = vmax.f32 %v3617_v43, %v4355_v20  ;;  %v3618_v5 = vmax.f32 %v7798_v4, %v3554_v17  ;;  %v4297_v50 = vmul.f32 %v6971_v2, %v5490_v41  ;;  %v3493_v32 = vmul.f32 %v6971_v2, %v3370_v55  ;;  %v5423_v51 = vpop.f32.mrb[110].mxu0  ;;  %v5491_v11 = vpop.f32.mrb[110].mxu1 }
 0x215   : > { %v4422_v52 = vmax.f32 %v3620_v47, %v4358_v48  ;;  %v4295_v33 = vmul.f32 %v6971_v2, %v4172_v59  ;;  %4550 = vst.msk [vmem:[%s6962_s24 + $0x150] sm:$0xff] %vm4507_vm3, %v4485_v58  ;;  %v3559_v14 = vadd.f32 %v6952_v28, %v3495_v53  ;;  %v3496_v7 = vmul.f32 %v6971_v2, %v5423_v51  ;;  %v3373_v15 = vpop.f32.mrb[111].mxu0  ;;  %v4175_v16 = vpop.f32.mrb[111].mxu1  ;;  %v7812_v51 = vld [vmem:[#allocation55_spill] sm:$0xff] }
 0x216   : > { %v4483_v10 = vmax.f32 %v4419_v29, 0.0  ;;  %v4420_v3 = vmax.f32 %v3618_v5, %v4356_v30  ;;  %v4361_v56 = vadd.f32 %v6952_v28, %v4297_v50  ;;  %v3557_v49 = vadd.f32 %v6952_v28, %v3493_v32 }
 0x217   : > { %v4486_v54 = vmax.f32 %v4422_v52, 0.0  ;;  %v4359_v22 = vadd.f32 %v6952_v28, %v4295_v33  ;;  %v4298_v23 = vmul.f32 %v6971_v2, %v5491_v11  ;;  %v3623_v60 = vmax.f32 %v7801_v39, %v3559_v14  ;;  %v7811_v33 = vld [vmem:[#allocation54_spill] sm:$0xff] }
 0x218   : > { %4548 = vst.msk [vmem:[%s6962_s24 + $0x140] sm:$0xff] %vm4507_vm3, %v4483_v10  ;;  %v4484_v46 = vmax.f32 %v4420_v3, 0.0  ;;  %v3560_v36 = vadd.f32 %v6952_v28, %v3496_v7  ;;  %v3494_v37 = vmul.f32 %v6971_v2, %v3373_v15  ;;  %v7804_v26 = vmax.f32 %v7802_v35, %v7803_v61  ;;  %v7814_v7 = vld [vmem:[#allocation56_spill] sm:$0xff]  ;;  %v7815_v15 = vld [vmem:[#allocation57_spill] sm:$0xff] }
 0x219   : > { %4551 = vst.msk [vmem:[%s6962_s24 + $0x158] sm:$0xff] %vm4507_vm3, %v4486_v54  ;;  %v4296_v62 = vmul.f32 %v6971_v2, %v4175_v16  ;;  %v4425_v20 = vmax.f32 %v3623_v60, %v4361_v56  ;;  %v7807_v34 = vmax.f32 %v7805_v0, %v7806_v1  ;;  %v4362_v9 = vadd.f32 %v6952_v28, %v4298_v23  ;;  %v7817_v23 = vld [vmem:[#allocation58_spill] sm:$0xff] }
 0x21a   : > { %v3621_v6 = vmax.f32 %v7804_v26, %v3557_v49  ;;  %4549 = vst.msk [vmem:[%s6962_s24 + $0x148] sm:$0xff] %vm4507_vm3, %v4484_v46  ;;  %v3558_v45 = vadd.f32 %v6952_v28, %v3494_v37  ;;  %v5426_v13 = vpop.f32.mrb[112].mxu0  ;;  %v5494_v21 = vpop.f32.mrb[112].mxu1  ;;  %v7810_v38 = vmax.f32 %v7808_v24, %v7809_v27  ;;  %v7813_v11 = vmax.f32 %v7811_v33, %v7812_v51  ;;  %v7818_v46 = vld [vmem:[#allocation59_spill] sm:$0xff] }
 0x21b   : > { %v3624_v8 = vmax.f32 %v7807_v34, %v3560_v36  ;;  %v4360_v12 = vadd.f32 %v6952_v28, %v4296_v62  ;;  %v4489_v42 = vmax.f32 %v4425_v20, 0.0  ;;  %v3499_v57 = vmul.f32 %v6971_v2, %v5426_v13  ;;  %v3386_v47 = vpop.f32.mrb[113].mxu0  ;;  %v4188_v48 = vpop.f32.mrb[113].mxu1  ;;  %v7820_v62 = vld [vmem:[#allocation60_spill] sm:$0xff]  ;;  %v7821_v20 = vld [vmem:[#allocation61_spill] sm:$0xff] }
 0x21c   : > { %v4423_v44 = vmax.f32 %v3621_v6, %v4359_v22  ;;  %v3622_v25 = vmax.f32 %v7810_v38, %v3558_v45  ;;  %v4301_v29 = vmul.f32 %v6971_v2, %v5494_v21  ;;  %v3497_v30 = vmul.f32 %v6971_v2, %v3386_v47  ;;  %v5427_v41 = vpop.f32.mrb[114].mxu0  ;;  %v5495_v58 = vpop.f32.mrb[114].mxu1 }
 0x21d   : > { %v4426_v43 = vmax.f32 %v3624_v8, %v4362_v9  ;;  %v4299_v40 = vmul.f32 %v6971_v2, %v4188_v48  ;;  %4554 = vst.msk [vmem:[%s6962_s24 + $0x170] sm:$0xff] %vm4507_vm3, %v4489_v42  ;;  %v3563_v63 = vadd.f32 %v6952_v28, %v3499_v57  ;;  %v3500_v4 = vmul.f32 %v6971_v2, %v5427_v41  ;;  %v3389_v5 = vpop.f32.mrb[115].mxu0  ;;  %v4191_v53 = vpop.f32.mrb[115].mxu1  ;;  %v7823_v41 = vld [vmem:[#allocation62_spill] sm:$0xff] }
 0x21e   : > { %v4487_v17 = vmax.f32 %v4423_v44, 0.0  ;;  %v4424_v31 = vmax.f32 %v3622_v25, %v4360_v12  ;;  %v4365_v55 = vadd.f32 %v6952_v28, %v4301_v29  ;;  %v3561_v59 = vadd.f32 %v6952_v28, %v3497_v30 }
 0x21f   : > { %v4490_v52 = vmax.f32 %v4426_v43, 0.0  ;;  %v4363_v10 = vadd.f32 %v6952_v28, %v4299_v40  ;;  %v4302_v50 = vmul.f32 %v6971_v2, %v5495_v58  ;;  %v3627_v54 = vmax.f32 %v7813_v11, %v3563_v63  ;;  %v7824_v58 = vld [vmem:[#allocation63_spill] sm:$0xff] }
 0x220   : > { %4552 = vst.msk [vmem:[%s6962_s24 + $0x160] sm:$0xff] %vm4507_vm3, %v4487_v17  ;;  %v4488_v32 = vmax.f32 %v4424_v31, 0.0  ;;  %v3564_v3 = vadd.f32 %v6952_v28, %v3500_v4  ;;  %v3498_v14 = vmul.f32 %v6971_v2, %v3389_v5  ;;  %v7816_v16 = vmax.f32 %v7814_v7, %v7815_v15  ;;  %v7420_v17 = vld [vmem:[%s7544_s3] ss:$0 sm:$0xff]  ;;  %v7826_v4 = vld [vmem:[#allocation64_spill] sm:$0xff]  ;;  %v7827_v5 = vld [vmem:[#allocation65_spill] sm:$0xff] }
 0x221   : > { %4555 = vst.msk [vmem:[%s6962_s24 + $0x178] sm:$0xff] %vm4507_vm3, %v4490_v52  ;;  %v4300_v49 = vmul.f32 %v6971_v2, %v4191_v53  ;;  %v4429_v22 = vmax.f32 %v3627_v54, %v4365_v55  ;;  %v7819_v18 = vmax.f32 %v7817_v23, %v7818_v46  ;;  %v4366_v39 = vadd.f32 %v6952_v28, %v4302_v50  ;;  %v7829_v50 = vld [vmem:[#allocation66_spill] sm:$0xff]  ;;  %v7449_v46 = vld [vmem:[%s7543_s2] ss:$0 sm:$0xff] }
 0x222   : > { %v3625_v56 = vmax.f32 %v7816_v16, %v3561_v59  ;;  %4553 = vst.msk [vmem:[%s6962_s24 + $0x168] sm:$0xff] %vm4507_vm3, %v4488_v32  ;;  %v3562_v60 = vadd.f32 %v6952_v28, %v3498_v14  ;;  %v5430_v35 = vpop.f32.mrb[116].mxu0  ;;  %v5498_v61 = vpop.f32.mrb[116].mxu1  ;;  %v7822_v0 = vmax.f32 %v7820_v62, %v7821_v20  ;;  %v7825_v52 = vmax.f32 %v7823_v41, %v7824_v58  ;;  %v7830_v32 = vld [vmem:[#allocation67_spill] sm:$0xff] }
 0x223   : > { %v3628_v19 = vmax.f32 %v7819_v18, %v3564_v3  ;;  %v4364_v37 = vadd.f32 %v6952_v28, %v4300_v49  ;;  %v4493_v26 = vmax.f32 %v4429_v22, 0.0  ;;  %v3503_v34 = vmul.f32 %v6971_v2, %v5430_v35  ;;  %v3402_v8 = vpop.f32.mrb[117].mxu0  ;;  %v4204_v9 = vpop.f32.mrb[117].mxu1  ;;  %v7833_v49 = vld [vmem:[#allocation69_spill] sm:$0xff] }
 0x224   : > { %v4427_v36 = vmax.f32 %v3625_v56, %v4363_v10  ;;  %v3626_v1 = vmax.f32 %v7822_v0, %v3562_v60  ;;  %v4305_v44 = vmul.f32 %v6971_v2, %v5498_v61  ;;  %v3501_v12 = vmul.f32 %v6971_v2, %v3402_v8  ;;  %v5431_v21 = vpop.f32.mrb[118].mxu0  ;;  %v5499_v42 = vpop.f32.mrb[118].mxu1 }
 0x225   : > { %v4430_v6 = vmax.f32 %v3628_v19, %v4366_v39  ;;  %v4303_v13 = vmul.f32 %v6971_v2, %v4204_v9  ;;  %4558 = vst.msk [vmem:[%s6962_s24 + $0x190] sm:$0xff] %vm4507_vm3, %v4493_v26  ;;  %v3567_v27 = vadd.f32 %v6952_v28, %v3503_v34  ;;  %v3504_v38 = vmul.f32 %v6971_v2, %v5431_v21  ;;  %v3405_v25 = vpop.f32.mrb[119].mxu0  ;;  %v4207_v57 = vpop.f32.mrb[119].mxu1  ;;  %v7836_v21 = vld [vmem:[#allocation71_spill] sm:$0xff] }
 0x226   : > { %v4491_v45 = vmax.f32 %v4427_v36, 0.0  ;;  %v4428_v24 = vmax.f32 %v3626_v1, %v4364_v37  ;;  %v4369_v47 = vadd.f32 %v6952_v28, %v4305_v44  ;;  %v3565_v48 = vadd.f32 %v6952_v28, %v3501_v12 }
 0x227   : > { %v4494_v43 = vmax.f32 %v4430_v6, 0.0  ;;  %v4367_v29 = vadd.f32 %v7420_v17, %v4303_v13  ;;  %v4306_v30 = vmul.f32 %v6971_v2, %v5499_v42  ;;  %v3631_v31 = vmax.f32 %v7825_v52, %v3567_v27  ;;  %v7835_v13 = vld [vmem:[#allocation70_spill] sm:$0xff] }
 0x228   : > { %4556 = vst.msk [vmem:[%s6962_s24 + $0x180] sm:$0xff] %vm4507_vm3, %v4491_v45  ;;  %v4492_v40 = vmax.f32 %v4428_v24, 0.0  ;;  %v3568_v63 = vadd.f32 %v7420_v17, %v3504_v38  ;;  %v3502_v28 = vmul.f32 %v6971_v2, %v3405_v25  ;;  %v7828_v53 = vmax.f32 %v7826_v4, %v7827_v5  ;;  %v7838_v38 = vld [vmem:[#allocation72_spill] sm:$0xff]  ;;  %v7839_v25 = vld [vmem:[#allocation73_spill] sm:$0xff] }
 0x229   : > { %4559 = vst.msk [vmem:[%s6962_s24 + $0x198] sm:$0xff] %vm4507_vm3, %v4494_v43  ;;  %v4304_v59 = vmul.f32 %v6971_v2, %v4207_v57  ;;  %v4433_v10 = vmax.f32 %v3631_v31, %v4369_v47  ;;  %v7831_v33 = vmax.f32 %v7829_v50, %v7830_v32  ;;  %v4370_v11 = vadd.f32 %v7420_v17, %v4306_v30  ;;  %v7832_v2 = vld [vmem:[#allocation68_spill] sm:$0xff]  ;;  %v7841_v30 = vld [vmem:[#allocation74_spill] sm:$0xff] }
 0x22a   : > { %v3629_v55 = vmax.f32 %v7828_v53, %v3565_v48  ;;  %4557 = vst.msk [vmem:[%s6962_s24 + $0x188] sm:$0xff] %vm4507_vm3, %v4492_v40  ;;  %v3566_v54 = vadd.f32 %v7420_v17, %v3502_v28  ;;  %v5434_v7 = vpop.f32.mrb[120].mxu0  ;;  %v5502_v15 = vpop.f32.mrb[120].mxu1  ;;  %v7834_v22 = vmax.f32 %v7832_v2, %v7833_v49  ;;  %v7837_v42 = vmax.f32 %v7835_v13, %v7836_v21  ;;  %v7842_v40 = vld [vmem:[#allocation75_spill] sm:$0xff] }
 0x22b   : > { %v3632_v51 = vmax.f32 %v7831_v33, %v3568_v63  ;;  %v4368_v14 = vadd.f32 %v7420_v17, %v4304_v59  ;;  %v4497_v16 = vmax.f32 %v4433_v10, 0.0  ;;  %v3507_v18 = vmul.f32 %v7449_v46, %v5434_v7  ;;  %v3418_v19 = vpop.f32.mrb[121].mxu0  ;;  %v4220_v39 = vpop.f32.mrb[121].mxu1  ;;  %v7844_v59 = vld [vmem:[#allocation76_spill] sm:$0xff]  ;;  %v7845_v10 = vld [vmem:[#allocation77_spill] sm:$0xff] }
 0x22c   : > { %v4431_v3 = vmax.f32 %v3629_v55, %v4367_v29  ;;  %v3630_v23 = vmax.f32 %v7834_v22, %v3566_v54  ;;  %v4309_v36 = vmul.f32 %v7449_v46, %v5502_v15  ;;  %v3505_v37 = vmul.f32 %v7449_v46, %v3418_v19  ;;  %v5435_v61 = vpop.f32.mrb[122].mxu0  ;;  %v5503_v26 = vpop.f32.mrb[122].mxu1 }
 0x22d   : > { %v4434_v56 = vmax.f32 %v3632_v51, %v4370_v11  ;;  %v4307_v35 = vmul.f32 %v7449_v46, %v4220_v39  ;;  %4562 = vst.msk [vmem:[%s6962_s24 + $0x1b0] sm:$0xff] %vm4507_vm3, %v4497_v16  ;;  %v3571_v20 = vadd.f32 %v7420_v17, %v3507_v18  ;;  %v3508_v0 = vmul.f32 %v7449_v46, %v5435_v61  ;;  %v3421_v1 = vpop.f32.mrb[123].mxu0  ;;  %v4223_v34 = vpop.f32.mrb[123].mxu1  ;;  %v7848_v61 = vld [vmem:[#allocation79_spill] sm:$0xff] }
 0x22e   : > { %v4495_v60 = vmax.f32 %v4431_v3, 0.0  ;;  %v4432_v62 = vmax.f32 %v3630_v23, %v4368_v14  ;;  %v4373_v8 = vadd.f32 %v7420_v17, %v4309_v36  ;;  %v3569_v9 = vadd.f32 %v7420_v17, %v3505_v37 }
 0x22f   : > { %v4498_v6 = vmax.f32 %v4434_v56, 0.0  ;;  %v4371_v45 = vadd.f32 %v7420_v17, %v4307_v35  ;;  %v4310_v44 = vmul.f32 %v7449_v46, %v5503_v26  ;;  %v3635_v43 = vmax.f32 %v7837_v42, %v3571_v20  ;;  %v7847_v35 = vld [vmem:[#allocation78_spill] sm:$0xff] }
 0x230   : > { %4560 = vst.msk [vmem:[%s6962_s24 + $0x1a0] sm:$0xff] %vm4507_vm3, %v4495_v60  ;;  %v4496_v12 = vmax.f32 %v4432_v62, 0.0  ;;  %v3572_v24 = vadd.f32 %v7420_v17, %v3508_v0  ;;  %v3506_v27 = vmul.f32 %v7449_v46, %v3421_v1  ;;  %v7840_v57 = vmax.f32 %v7838_v38, %v7839_v25  ;;  %v7850_v0 = vld [vmem:[#allocation80_spill] sm:$0xff]  ;;  %v7851_v1 = vld [vmem:[#allocation81_spill] sm:$0xff] }
 0x231   : > { %4563 = vst.msk [vmem:[%s6962_s24 + $0x1b8] sm:$0xff] %vm4507_vm3, %v4498_v6  ;;  %v4308_v48 = vmul.f32 %v7449_v46, %v4223_v34  ;;  %v4437_v29 = vmax.f32 %v3635_v43, %v4373_v8  ;;  %v7843_v41 = vmax.f32 %v7841_v30, %v7842_v40  ;;  %v4374_v52 = vadd.f32 %v7420_v17, %v4310_v44  ;;  %v7853_v44 = vld [vmem:[#allocation82_spill] sm:$0xff]  ;;  %v7856_v25 = vld [vmem:[#allocation84_spill] sm:$0xff] }
 0x232   : > { %v3633_v47 = vmax.f32 %v7840_v57, %v3569_v9  ;;  %4561 = vst.msk [vmem:[%s6962_s24 + $0x1a8] sm:$0xff] %vm4507_vm3, %v4496_v12  ;;  %v3570_v31 = vadd.f32 %v7420_v17, %v3506_v27  ;;  %v5438_v4 = vpop.f32.mrb[124].mxu0  ;;  %v5506_v5 = vpop.f32.mrb[124].mxu1  ;;  %v7846_v50 = vmax.f32 %v7844_v59, %v7845_v10  ;;  %v7849_v26 = vmax.f32 %v7847_v35, %v7848_v61  ;;  %v7854_v12 = vld [vmem:[#allocation83_spill] sm:$0xff]  ;;  %v7857_v57 = vld [vmem:[#allocation85_spill] sm:$0xff] }
 0x233   : > { %v3636_v58 = vmax.f32 %v7843_v41, %v3572_v24  ;;  %v4372_v28 = vadd.f32 %v7420_v17, %v4308_v48  ;;  %v4501_v53 = vmax.f32 %v4437_v29, 0.0  ;;  %v3511_v33 = vmul.f32 %v7449_v46, %v5438_v4  ;;  %v3434_v51 = vpop.f32.mrb[125].mxu0  ;;  %v4236_v11 = vpop.f32.mrb[125].mxu1 }
 0x234   : > { %v4435_v63 = vmax.f32 %v3633_v47, %v4371_v45  ;;  %v3634_v32 = vmax.f32 %v7846_v50, %v3570_v31  ;;  %v4313_v3 = vmul.f32 %v7449_v46, %v5506_v5  ;;  %v3509_v14 = vmul.f32 %v7449_v46, %v3434_v51  ;;  %v5439_v15 = vpop.f32.mrb[126].mxu0  ;;  %v5507_v16 = vpop.f32.mrb[126].mxu1 }
 0x235   : > { %v4438_v55 = vmax.f32 %v3636_v58, %v4374_v52  ;;  %v4311_v7 = vmul.f32 %v7449_v46, %v4236_v11  ;;  %4566 = vst.msk [vmem:[%s6962_s24 + $0x1d0] sm:$0xff] %vm4507_vm3, %v4501_v53  ;;  %v3575_v49 = vadd.f32 %v7420_v17, %v3511_v33  ;;  %v3512_v22 = vmul.f32 %v7449_v46, %v5439_v15  ;;  %v3437_v23 = vpop.f32.mrb[127].mxu0  ;;  %v4239_v18 = vpop.f32.mrb[127].mxu1 }
 0x236   : > { %v4499_v54 = vmax.f32 %v4435_v63, 0.0  ;;  %v4436_v2 = vmax.f32 %v3634_v32, %v4372_v28  ;;  %v4377_v19 = vadd.f32 %v7420_v17, %v4313_v3  ;;  %v3573_v39 = vadd.f32 %v7420_v17, %v3509_v14 }
 0x237   : > { %v4502_v56 = vmax.f32 %v4438_v55, 0.0  ;;  %v4375_v60 = vadd.f32 %v7420_v17, %v4311_v7  ;;  %v4314_v36 = vmul.f32 %v7449_v46, %v5507_v16  ;;  %v3639_v6 = vmax.f32 %v7849_v26, %v3575_v49 }
 0x238   : > { %4564 = vst.msk [vmem:[%s6962_s24 + $0x1c0] sm:$0xff] %vm4507_vm3, %v4499_v54  ;;  %v4500_v37 = vmax.f32 %v4436_v2, 0.0  ;;  %v3576_v62 = vadd.f32 %v7420_v17, %v3512_v22  ;;  %v3510_v20 = vmul.f32 %v7449_v46, %v3437_v23  ;;  %v7852_v34 = vmax.f32 %v7850_v0, %v7851_v1 }
 0x239   : > { %4567 = vst.msk [vmem:[%s6962_s24 + $0x1d8] sm:$0xff] %vm4507_vm3, %v4502_v56  ;;  %v4312_v9 = vmul.f32 %v7449_v46, %v4239_v18  ;;  %v4441_v45 = vmax.f32 %v3639_v6, %v4377_v19  ;;  %v7855_v13 = vmax.f32 %v7853_v44, %v7854_v12  ;;  %v4378_v42 = vadd.f32 %v7420_v17, %v4314_v36 }
 0x23a   : > { %v3637_v8 = vmax.f32 %v7852_v34, %v3573_v39  ;;  %4565 = vst.msk [vmem:[%s6962_s24 + $0x1c8] sm:$0xff] %vm4507_vm3, %v4500_v37  ;;  %v3574_v43 = vadd.f32 %v7420_v17, %v3510_v20  ;;  %v7858_v47 = vmax.f32 %v7856_v25, %v7857_v57 }
 0x23b   : > { %v3640_v21 = vmax.f32 %v7855_v13, %v3576_v62  ;;  %v4505_v27 = vmax.f32 %v4441_v45, 0.0  ;;  %v4376_v48 = vadd.f32 %v7420_v17, %v4312_v9 }
 0x23c   : > { %v4439_v24 = vmax.f32 %v3637_v8, %v4375_v60  ;;  %v3638_v46 = vmax.f32 %v7858_v47, %v3574_v43 }
 0x23d   : > { %v4442_v38 = vmax.f32 %v3640_v21, %v4378_v42  ;;  %4570 = vst.msk [vmem:[%s6962_s24 + $0x1f0] sm:$0xff] %vm4507_vm3, %v4505_v27 }
 0x23e   : > { %v4503_v29 = vmax.f32 %v4439_v24, 0.0  ;;  %v4440_v40 = vmax.f32 %v3638_v46, %v4376_v48 }
 0x23f   : > { %v4506_v30 = vmax.f32 %v4442_v38, 0.0 }
 0x240   : > { %4568 = vst.msk [vmem:[%s6962_s24 + $0x1e0] sm:$0xff] %vm4507_vm3, %v4503_v29  ;;  %v4504_v41 = vmax.f32 %v4440_v40, 0.0 }
 0x241   : > { %4571 = vst.msk [vmem:[%s6962_s24 + $0x1f8] sm:$0xff] %vm4507_vm3, %v4506_v30 }
 0x242   : > { %4569 = vst.msk [vmem:[%s6962_s24 + $0x1e8] sm:$0xff] %vm4507_vm3, %v4504_v41 }
 0x243 PF: > { %p11_p9 = scmp.ge.s32.totalorder %s5734_s19, 5   ;;  %s7859_s15 = smov %s5685_s16 }
 0x244   : > { %s7860_s16 = smov %s5743_s22  ;;  %s7861_s17 = smov %s5734_s19 }
 0x245   :  { %13 = sbr.rel (!%p11_p9) target bundleno = 2 (0x2), region = 115 }

// kernel: forward.6
= control target key start
LH: loop header
LB: loop body
LE: loop exit
PB: predicated region body
PF: predicated region fallthrough
CT: control target
= control target key end

     0   :  { %v3725_v0 = vmov 0   ;;  %vm356_vm0 = vcmask 130048   ;;  %s5572_s1 = inlined_call_operand.vmem [shape: bf16[144,16], index: 1, kind: input, shape index: {}]   ;;  %s5573_s0 = inlined_call_operand.vmem [shape: bf16[4,384,144], index: 0, kind: input, shape index: {}]   ;;  %s5574_s2 = inlined_call_operand.vmem [shape: f32[1,16], index: 2, kind: input, shape index: {}]   ;;  %s5575_s3 = inlined_call_operand.vmem [shape: f32[1,16], index: 3, kind: input, shape index: {}]   ;;  %s5576_s4 = inlined_call_operand.vmem [shape: f32[384,16], index: 4, kind: output, shape index: {}]  }
   0x1   :  { %429 = vmatprep.subr.bf16.mxu0 %v3725_v0  ;;  %1099 = vmatprep.subr.bf16.mxu1 %v3725_v0  ;;  %v3424_v1 = vld [vmem:[%s5572_s1] sm:$0xff]   ;;  %v3759_v2 = vld [vmem:[%s5572_s1 + $0x8] sm:$0xff]   ;;  %v3768_v3 = vld [vmem:[%s5572_s1 + $0x10] sm:$0xff]  }
   0x2   :  { %430 = vmatpush1.bf16.msra.mxu0 %v3424_v1  ;;  %1100 = vmatpush1.bf16.msra.mxu1 %v3424_v1  ;;  %v3775_v4 = vld [vmem:[%s5572_s1 + $0x18] sm:$0xff]   ;;  %v3435_v5 = vld [vmem:[%s5573_s0 + $0x4] ss:$8 sps:$4 sm:$0xff]   ;;  %v3812_v9 = vld [vmem:[%s5572_s1 + $0x30] sm:$0xff]  }
   0x3   :  { %431 = vmatprep.subr.bf16.mxu0 %v3725_v0  ;;  %1101 = vmatprep.subr.bf16.mxu1 %v3725_v0  ;;  %v3438_v6 = vld [vmem:[%s5573_s0 + $0x184] ss:$8 sps:$4 sm:$0xff]   ;;  %v3821_v10 = vld [vmem:[%s5572_s1 + $0x38] sm:$0xff]   ;;  %v3433_v12 = vld [vmem:[%s5573_s0] ss:$8 sps:$4 sm:$0xff]  }
   0x4   :  { %3037 = vmatprep.mubr.msk.bf16.mxu0 %vm356_vm0, %v3435_v5  ;;  %3159 = vmatprep.mubr.msk.bf16.mxu1 %vm356_vm0, %v3438_v6  ;;  %v3794_v7 = vld [vmem:[%s5572_s1 + $0x20] sm:$0xff]   ;;  %v3803_v8 = vld [vmem:[%s5572_s1 + $0x28] sm:$0xff]   ;;  %v3439_v14 = vld [vmem:[%s5573_s0 + $0x14] ss:$8 sps:$4 sm:$0xff]  }
   0x5   :  { %v3830_v11 = vld [vmem:[%s5572_s1 + $0x40] sm:$0xff]   ;;  %v3441_v15 = vld [vmem:[%s5573_s0 + $0x194] ss:$8 sps:$4 sm:$0xff]   ;;  %v3443_v16 = vld [vmem:[%s5573_s0 + $0x10] ss:$8 sps:$4 sm:$0xff]  }
   0x6   :  { %432 = vmatpush1.bf16.msra.mxu0 %v3759_v2  ;;  %1102 = vmatpush1.bf16.msra.mxu1 %v3759_v2  ;;  %v3436_v13 = vld [vmem:[%s5573_s0 + $0x180] ss:$8 sps:$4 sm:$0xff]   ;;  %v3444_v17 = vld [vmem:[%s5573_s0 + $0x190] ss:$8 sps:$4 sm:$0xff]   ;;  %v3445_v18 = vld [vmem:[%s5573_s0 + $0x24] ss:$8 sps:$4 sm:$0xff]  }
   0x7   :  { %433 = vmatprep.subr.bf16.mxu0 %v3725_v0  ;;  %1103 = vmatprep.subr.bf16.mxu1 %v3725_v0  ;;  %v3447_v19 = vld [vmem:[%s5573_s0 + $0x1a4] ss:$8 sps:$4 sm:$0xff]   ;;  %v3449_v20 = vld [vmem:[%s5573_s0 + $0x20] ss:$8 sps:$4 sm:$0xff]   ;;  %v3451_v22 = vld [vmem:[%s5573_s0 + $0x34] ss:$8 sps:$4 sm:$0xff]  }
   0x8   :  { %v3450_v21 = vld [vmem:[%s5573_s0 + $0x1a0] ss:$8 sps:$4 sm:$0xff]   ;;  %v3453_v23 = vld [vmem:[%s5573_s0 + $0x1b4] ss:$8 sps:$4 sm:$0xff]   ;;  %v3455_v24 = vld [vmem:[%s5573_s0 + $0x30] ss:$8 sps:$4 sm:$0xff]  }
   0x9   :  { %v3456_v25 = vld [vmem:[%s5573_s0 + $0x1b0] ss:$8 sps:$4 sm:$0xff]   ;;  %v3457_v26 = vld [vmem:[%s5573_s0 + $0x44] ss:$8 sps:$4 sm:$0xff]   ;;  %v3461_v28 = vld [vmem:[%s5573_s0 + $0x40] ss:$8 sps:$4 sm:$0xff]  }
   0xa   :  { %434 = vmatpush1.bf16.msra.mxu0 %v3768_v3  ;;  %1104 = vmatpush1.bf16.msra.mxu1 %v3768_v3  ;;  %v3459_v27 = vld [vmem:[%s5573_s0 + $0x1c4] ss:$8 sps:$4 sm:$0xff]   ;;  %v3462_v29 = vld [vmem:[%s5573_s0 + $0x1c0] ss:$8 sps:$4 sm:$0xff]   ;;  %v3463_v30 = vld [vmem:[%s5573_s0 + $0x54] ss:$8 sps:$4 sm:$0xff]  }
   0xb   :  { %435 = vmatprep.subr.bf16.mxu0 %v3725_v0  ;;  %1105 = vmatprep.subr.bf16.mxu1 %v3725_v0  ;;  %v3465_v31 = vld [vmem:[%s5573_s0 + $0x1d4] ss:$8 sps:$4 sm:$0xff]   ;;  %v3467_v32 = vld [vmem:[%s5573_s0 + $0x50] ss:$8 sps:$4 sm:$0xff]   ;;  %v3469_v34 = vld [vmem:[%s5573_s0 + $0x64] ss:$8 sps:$4 sm:$0xff]  }
   0xc   :  { %v3468_v33 = vld [vmem:[%s5573_s0 + $0x1d0] ss:$8 sps:$4 sm:$0xff]   ;;  %v3471_v35 = vld [vmem:[%s5573_s0 + $0x1e4] ss:$8 sps:$4 sm:$0xff]   ;;  %v3473_v36 = vld [vmem:[%s5573_s0 + $0x60] ss:$8 sps:$4 sm:$0xff]  }
   0xd   :  { %v3474_v37 = vld [vmem:[%s5573_s0 + $0x1e0] ss:$8 sps:$4 sm:$0xff]   ;;  %v3475_v38 = vld [vmem:[%s5573_s0 + $0x74] ss:$8 sps:$4 sm:$0xff]   ;;  %v3479_v40 = vld [vmem:[%s5573_s0 + $0x70] ss:$8 sps:$4 sm:$0xff]  }
   0xe   :  { %436 = vmatpush1.bf16.msra.mxu0 %v3775_v4  ;;  %1106 = vmatpush1.bf16.msra.mxu1 %v3775_v4  ;;  %v3477_v39 = vld [vmem:[%s5573_s0 + $0x1f4] ss:$8 sps:$4 sm:$0xff]   ;;  %v3480_v41 = vld [vmem:[%s5573_s0 + $0x1f0] ss:$8 sps:$4 sm:$0xff]   ;;  %v3481_v42 = vld [vmem:[%s5573_s0 + $0x84] ss:$8 sps:$4 sm:$0xff]  }
   0xf   :  { %437 = vmatprep.subr.bf16.mxu0 %v3725_v0  ;;  %1107 = vmatprep.subr.bf16.mxu1 %v3725_v0  ;;  %v3483_v43 = vld [vmem:[%s5573_s0 + $0x204] ss:$8 sps:$4 sm:$0xff]   ;;  %v3485_v44 = vld [vmem:[%s5573_s0 + $0x80] ss:$8 sps:$4 sm:$0xff]   ;;  %v3487_v46 = vld [vmem:[%s5573_s0 + $0x94] ss:$8 sps:$4 sm:$0xff]  }
  0x10   :  { %v3486_v45 = vld [vmem:[%s5573_s0 + $0x200] ss:$8 sps:$4 sm:$0xff]   ;;  %v3489_v47 = vld [vmem:[%s5573_s0 + $0x214] ss:$8 sps:$4 sm:$0xff]   ;;  %v3491_v48 = vld [vmem:[%s5573_s0 + $0x90] ss:$8 sps:$4 sm:$0xff]  }
  0x11   :  { %v3492_v49 = vld [vmem:[%s5573_s0 + $0x210] ss:$8 sps:$4 sm:$0xff]   ;;  %v3493_v50 = vld [vmem:[%s5573_s0 + $0xa4] ss:$8 sps:$4 sm:$0xff]   ;;  %v3497_v52 = vld [vmem:[%s5573_s0 + $0xa0] ss:$8 sps:$4 sm:$0xff]  }
  0x12   :  { %438 = vmatpush1.bf16.msra.mxu0 %v3794_v7  ;;  %1108 = vmatpush1.bf16.msra.mxu1 %v3794_v7  ;;  %v3495_v51 = vld [vmem:[%s5573_s0 + $0x224] ss:$8 sps:$4 sm:$0xff]   ;;  %v3498_v53 = vld [vmem:[%s5573_s0 + $0x220] ss:$8 sps:$4 sm:$0xff]   ;;  %v3499_v54 = vld [vmem:[%s5573_s0 + $0xb4] ss:$8 sps:$4 sm:$0xff]  }
  0x13   :  { %439 = vmatprep.subr.bf16.mxu0 %v3725_v0  ;;  %1109 = vmatprep.subr.bf16.mxu1 %v3725_v0  ;;  %v3501_v55 = vld [vmem:[%s5573_s0 + $0x234] ss:$8 sps:$4 sm:$0xff]   ;;  %v3503_v56 = vld [vmem:[%s5573_s0 + $0xb0] ss:$8 sps:$4 sm:$0xff]   ;;  %v3505_v58 = vld [vmem:[%s5573_s0 + $0xc4] ss:$8 sps:$4 sm:$0xff]  }
  0x14   :  { %v3504_v57 = vld [vmem:[%s5573_s0 + $0x230] ss:$8 sps:$4 sm:$0xff]   ;;  %v3507_v59 = vld [vmem:[%s5573_s0 + $0x244] ss:$8 sps:$4 sm:$0xff]   ;;  %v3509_v60 = vld [vmem:[%s5573_s0 + $0xc0] ss:$8 sps:$4 sm:$0xff]  }
  0x15   :  { %v3510_v61 = vld [vmem:[%s5573_s0 + $0x240] ss:$8 sps:$4 sm:$0xff]   ;;  %v3511_v62 = vld [vmem:[%s5573_s0 + $0xd4] ss:$8 sps:$4 sm:$0xff]  }
  0x16   :  { %440 = vmatpush1.bf16.msra.mxu0 %v3803_v8  ;;  %1110 = vmatpush1.bf16.msra.mxu1 %v3803_v8  ;;  %v3513_v63 = vld [vmem:[%s5573_s0 + $0x254] ss:$8 sps:$4 sm:$0xff]   ;;  %v3522_v5 = vld [vmem:[%s5573_s0 + $0x260] ss:$8 sps:$4 sm:$0xff]  }
  0x17   :  { %441 = vmatprep.subr.bf16.mxu0 %v3725_v0  ;;  %1111 = vmatprep.subr.bf16.mxu1 %v3725_v0  ;;  %v3523_v6 = vld [vmem:[%s5573_s0 + $0xf4] ss:$8 sps:$4 sm:$0xff]  }
  0x1a   :  { %442 = vmatpush1.bf16.msra.mxu0 %v3812_v9  ;;  %1112 = vmatpush1.bf16.msra.mxu1 %v3812_v9 }
  0x1b   :  { %443 = vmatprep.subr.bf16.mxu0 %v3725_v0  ;;  %1113 = vmatprep.subr.bf16.mxu1 %v3725_v0 }
  0x1e   :  { %444 = vmatpush1.bf16.msra.mxu0 %v3821_v10  ;;  %1114 = vmatpush1.bf16.msra.mxu1 %v3821_v10 }
  0x1f   :  { %445 = vmatprep.subr.bf16.mxu0 %v3725_v0  ;;  %1115 = vmatprep.subr.bf16.mxu1 %v3725_v0 }
  0x22   :  { %446 = vmatpush1.bf16.msra.mxu0 %v3830_v11  ;;  %1116 = vmatpush1.bf16.msra.mxu1 %v3830_v11 }
  0x23   :  { %1805 = vmatprep.subr.bf16.mxu0 %v3725_v0  ;;  %2511 = vmatprep.subr.bf16.mxu1 %v3725_v0 }
  0x25   :  { %462 = vmatmul.mubr.bf16.vlgmr.msra.gmra.mrb[0].mxu0 %v3433_v12  ;;  %1132 = vmatmul.mubr.bf16.vlgmr.msra.gmra.mrb[0].mxu1 %v3436_v13  ;;  %v3533_v12 = vld [vmem:[%s5573_s0 + $0x100] ss:$8 sps:$4 sm:$0xff]  }
  0x26   :  { %1806 = vmatpush1.bf16.msra.mxu0 %v3424_v1  ;;  %2512 = vmatpush1.bf16.msra.mxu1 %v3424_v1  ;;  %v3516_v1 = vld [vmem:[%s5573_s0 + $0x250] ss:$8 sps:$4 sm:$0xff]   ;;  %v3534_v13 = vld [vmem:[%s5573_s0 + $0x280] ss:$8 sps:$4 sm:$0xff]  }
  0x27   :  { %3038 = vmatprep.mubr.msk.bf16.mxu0 %vm356_vm0, %v3439_v14  ;;  %3160 = vmatprep.mubr.msk.bf16.mxu1 %vm356_vm0, %v3441_v15  ;;  %v3535_v14 = vld [vmem:[%s5573_s0 + $0x114] ss:$8 sps:$4 sm:$0xff]  }
  0x28   :  { %1807 = vmatprep.subr.bf16.mxu0 %v3725_v0  ;;  %2513 = vmatprep.subr.bf16.mxu1 %v3725_v0  ;;  %v3537_v15 = vld [vmem:[%s5573_s0 + $0x294] ss:$8 sps:$4 sm:$0xff]  }
  0x2a   :  { %1808 = vmatpush1.bf16.msra.mxu0 %v3759_v2  ;;  %2514 = vmatpush1.bf16.msra.mxu1 %v3759_v2  ;;  %v3517_v2 = vld [vmem:[%s5573_s0 + $0xe4] ss:$8 sps:$4 sm:$0xff]  }
  0x2b   :  { %1809 = vmatprep.subr.bf16.mxu0 %v3725_v0  ;;  %2515 = vmatprep.subr.bf16.mxu1 %v3725_v0 }
  0x2d   :  { %470 = vmatmul.mubr.bf16.gmra.mrb[4].mxu0 %v3443_v16  ;;  %1140 = vmatmul.mubr.bf16.gmra.mrb[4].mxu1 %v3444_v17  ;;  %v3539_v16 = vld [vmem:[%s5573_s0 + $0x110] ss:$8 sps:$4 sm:$0xff]  }
  0x2e   :  { %3039 = vmatprep.mubr.msk.bf16.mxu0 %vm356_vm0, %v3445_v18  ;;  %3161 = vmatprep.mubr.msk.bf16.mxu1 %vm356_vm0, %v3447_v19  ;;  %v3540_v17 = vld [vmem:[%s5573_s0 + $0x290] ss:$8 sps:$4 sm:$0xff]   ;;  %v3541_v18 = vld [vmem:[%s5573_s0 + $0x124] ss:$8 sps:$4 sm:$0xff]  }
  0x2f   :  { %1810 = vmatpush1.bf16.msra.mxu0 %v3768_v3  ;;  %2516 = vmatpush1.bf16.msra.mxu1 %v3768_v3  ;;  %v3519_v3 = vld [vmem:[%s5573_s0 + $0x264] ss:$8 sps:$4 sm:$0xff]  }
  0x30   :  { %1811 = vmatprep.subr.bf16.mxu0 %v3725_v0  ;;  %2517 = vmatprep.subr.bf16.mxu1 %v3725_v0  ;;  %v3543_v19 = vld [vmem:[%s5573_s0 + $0x2a4] ss:$8 sps:$4 sm:$0xff]  }
  0x33   :  { %1812 = vmatpush1.bf16.msra.mxu0 %v3775_v4  ;;  %2518 = vmatpush1.bf16.msra.mxu1 %v3775_v4  ;;  %v3521_v4 = vld [vmem:[%s5573_s0 + $0xe0] ss:$8 sps:$4 sm:$0xff]  }
  0x34   :  { %1813 = vmatprep.subr.bf16.mxu0 %v3725_v0  ;;  %2519 = vmatprep.subr.bf16.mxu1 %v3725_v0 }
  0x35   :  { %478 = vmatmul.mubr.bf16.gmra.mrb[8].mxu0 %v3449_v20  ;;  %1148 = vmatmul.mubr.bf16.gmra.mrb[8].mxu1 %v3450_v21  ;;  %v3545_v20 = vld [vmem:[%s5573_s0 + $0x120] ss:$8 sps:$4 sm:$0xff]  }
  0x36   :  { %3040 = vmatprep.mubr.msk.bf16.mxu0 %vm356_vm0, %v3451_v22  ;;  %3162 = vmatprep.mubr.msk.bf16.mxu1 %vm356_vm0, %v3453_v23  ;;  %v3546_v21 = vld [vmem:[%s5573_s0 + $0x2a0] ss:$8 sps:$4 sm:$0xff]   ;;  %v3547_v22 = vld [vmem:[%s5573_s0 + $0x134] ss:$8 sps:$4 sm:$0xff]  }
  0x37   :  { %1814 = vmatpush1.bf16.msra.mxu0 %v3794_v7  ;;  %2520 = vmatpush1.bf16.msra.mxu1 %v3794_v7  ;;  %v3525_v7 = vld [vmem:[%s5573_s0 + $0x274] ss:$8 sps:$4 sm:$0xff]  }
  0x38   :  { %1815 = vmatprep.subr.bf16.mxu0 %v3725_v0  ;;  %2521 = vmatprep.subr.bf16.mxu1 %v3725_v0  ;;  %v3549_v23 = vld [vmem:[%s5573_s0 + $0x2b4] ss:$8 sps:$4 sm:$0xff]  }
  0x3b   :  { %1816 = vmatpush1.bf16.msra.mxu0 %v3803_v8  ;;  %2522 = vmatpush1.bf16.msra.mxu1 %v3803_v8  ;;  %v3527_v8 = vld [vmem:[%s5573_s0 + $0xf0] ss:$8 sps:$4 sm:$0xff]  }
  0x3c   :  { %1817 = vmatprep.subr.bf16.mxu0 %v3725_v0  ;;  %2523 = vmatprep.subr.bf16.mxu1 %v3725_v0 }
  0x3d   :  { %486 = vmatmul.mubr.bf16.gmra.mrb[12].mxu0 %v3455_v24  ;;  %1156 = vmatmul.mubr.bf16.gmra.mrb[12].mxu1 %v3456_v25  ;;  %v3551_v24 = vld [vmem:[%s5573_s0 + $0x130] ss:$8 sps:$4 sm:$0xff]  }
  0x3e   :  { %3041 = vmatprep.mubr.msk.bf16.mxu0 %vm356_vm0, %v3457_v26  ;;  %3163 = vmatprep.mubr.msk.bf16.mxu1 %vm356_vm0, %v3459_v27  ;;  %v3552_v25 = vld [vmem:[%s5573_s0 + $0x2b0] ss:$8 sps:$4 sm:$0xff]   ;;  %v3553_v26 = vld [vmem:[%s5573_s0 + $0x144] ss:$8 sps:$4 sm:$0xff]  }
  0x3f   :  { %1818 = vmatpush1.bf16.msra.mxu0 %v3812_v9  ;;  %2524 = vmatpush1.bf16.msra.mxu1 %v3812_v9  ;;  %v3528_v9 = vld [vmem:[%s5573_s0 + $0x270] ss:$8 sps:$4 sm:$0xff]   ;;  %v3555_v27 = vld [vmem:[%s5573_s0 + $0x2c4] ss:$8 sps:$4 sm:$0xff]  }
  0x40   :  { %1819 = vmatprep.subr.bf16.mxu0 %v3725_v0  ;;  %2525 = vmatprep.subr.bf16.mxu1 %v3725_v0 }
  0x43   :  { %1820 = vmatpush1.bf16.msra.mxu0 %v3821_v10  ;;  %2526 = vmatpush1.bf16.msra.mxu1 %v3821_v10  ;;  %v3529_v10 = vld [vmem:[%s5573_s0 + $0x104] ss:$8 sps:$4 sm:$0xff]  }
  0x44   :  { %1821 = vmatprep.subr.bf16.mxu0 %v3725_v0  ;;  %2527 = vmatprep.subr.bf16.mxu1 %v3725_v0  ;;  %v3515_v0 = vld [vmem:[%s5573_s0 + $0xd0] ss:$8 sps:$4 sm:$0xff]  }
  0x45   :  { %494 = vmatmul.mubr.bf16.gmra.mrb[16].mxu0 %v3461_v28  ;;  %1164 = vmatmul.mubr.bf16.gmra.mrb[16].mxu1 %v3462_v29  ;;  %v3557_v28 = vld [vmem:[%s5573_s0 + $0x140] ss:$8 sps:$4 sm:$0xff]  }
  0x46   :  { %3042 = vmatprep.mubr.msk.bf16.mxu0 %vm356_vm0, %v3463_v30  ;;  %3164 = vmatprep.mubr.msk.bf16.mxu1 %vm356_vm0, %v3465_v31  ;;  %v3558_v29 = vld [vmem:[%s5573_s0 + $0x2c0] ss:$8 sps:$4 sm:$0xff]   ;;  %v3559_v30 = vld [vmem:[%s5573_s0 + $0x154] ss:$8 sps:$4 sm:$0xff]  }
  0x47   :  { %1822 = vmatpush1.bf16.msra.mxu0 %v3830_v11  ;;  %2528 = vmatpush1.bf16.msra.mxu1 %v3830_v11  ;;  %v3531_v11 = vld [vmem:[%s5573_s0 + $0x284] ss:$8 sps:$4 sm:$0xff]   ;;  %v3561_v31 = vld [vmem:[%s5573_s0 + $0x2d4] ss:$8 sps:$4 sm:$0xff]  }
  0x4d   :  { %502 = vmatmul.mubr.bf16.gmra.mrb[20].mxu0 %v3467_v32  ;;  %1172 = vmatmul.mubr.bf16.gmra.mrb[20].mxu1 %v3468_v33  ;;  %v3563_v32 = vld [vmem:[%s5573_s0 + $0x150] ss:$8 sps:$4 sm:$0xff]  }
  0x4e   :  { %3043 = vmatprep.mubr.msk.bf16.mxu0 %vm356_vm0, %v3469_v34  ;;  %3165 = vmatprep.mubr.msk.bf16.mxu1 %vm356_vm0, %v3471_v35  ;;  %v3564_v33 = vld [vmem:[%s5573_s0 + $0x2d0] ss:$8 sps:$4 sm:$0xff]   ;;  %v3565_v34 = vld [vmem:[%s5573_s0 + $0x164] ss:$8 sps:$4 sm:$0xff]  }
  0x4f   :  { %v3567_v35 = vld [vmem:[%s5573_s0 + $0x2e4] ss:$8 sps:$4 sm:$0xff]  }
  0x55   :  { %510 = vmatmul.mubr.bf16.gmra.mrb[24].mxu0 %v3473_v36  ;;  %1180 = vmatmul.mubr.bf16.gmra.mrb[24].mxu1 %v3474_v37  ;;  %v3569_v36 = vld [vmem:[%s5573_s0 + $0x160] ss:$8 sps:$4 sm:$0xff]  }
  0x56   :  { %3044 = vmatprep.mubr.msk.bf16.mxu0 %vm356_vm0, %v3475_v38  ;;  %3166 = vmatprep.mubr.msk.bf16.mxu1 %vm356_vm0, %v3477_v39  ;;  %v3570_v37 = vld [vmem:[%s5573_s0 + $0x2e0] ss:$8 sps:$4 sm:$0xff]   ;;  %v3571_v38 = vld [vmem:[%s5573_s0 + $0x174] ss:$8 sps:$4 sm:$0xff]  }
  0x57   :  { %v3573_v39 = vld [vmem:[%s5573_s0 + $0x2f4] ss:$8 sps:$4 sm:$0xff]  }
  0x5d   :  { %518 = vmatmul.mubr.bf16.gmra.mrb[28].mxu0 %v3479_v40  ;;  %1188 = vmatmul.mubr.bf16.gmra.mrb[28].mxu1 %v3480_v41  ;;  %v3575_v40 = vld [vmem:[%s5573_s0 + $0x170] ss:$8 sps:$4 sm:$0xff]  }
  0x5e   :  { %3045 = vmatprep.mubr.msk.bf16.mxu0 %vm356_vm0, %v3481_v42  ;;  %3167 = vmatprep.mubr.msk.bf16.mxu1 %vm356_vm0, %v3483_v43  ;;  %v3576_v41 = vld [vmem:[%s5573_s0 + $0x2f0] ss:$8 sps:$4 sm:$0xff]   ;;  %v3579_v42 = vld [vmem:[%s5573_s0 + $0x304] ss:$8 sps:$4 sm:$0xff]  }
  0x5f   :  { %v3582_v43 = vld [vmem:[%s5573_s0 + $0x484] ss:$8 sps:$4 sm:$0xff]  }
  0x65   :  { %526 = vmatmul.mubr.bf16.gmra.mrb[32].mxu0 %v3485_v44  ;;  %1196 = vmatmul.mubr.bf16.gmra.mrb[32].mxu1 %v3486_v45  ;;  %v3577_v44 = vld [vmem:[%s5573_s0 + $0x300] ss:$8 sps:$4 sm:$0xff]  }
  0x66   :  { %3046 = vmatprep.mubr.msk.bf16.mxu0 %vm356_vm0, %v3487_v46  ;;  %3168 = vmatprep.mubr.msk.bf16.mxu1 %vm356_vm0, %v3489_v47  ;;  %v3580_v45 = vld [vmem:[%s5573_s0 + $0x480] ss:$8 sps:$4 sm:$0xff]   ;;  %v3583_v46 = vld [vmem:[%s5573_s0 + $0x314] ss:$8 sps:$4 sm:$0xff]  }
  0x67   :  { %v3585_v47 = vld [vmem:[%s5573_s0 + $0x494] ss:$8 sps:$4 sm:$0xff]  }
  0x6d   :  { %534 = vmatmul.mubr.bf16.gmra.mrb[36].mxu0 %v3491_v48  ;;  %1204 = vmatmul.mubr.bf16.gmra.mrb[36].mxu1 %v3492_v49  ;;  %v3587_v48 = vld [vmem:[%s5573_s0 + $0x310] ss:$8 sps:$4 sm:$0xff]  }
  0x6e   :  { %3047 = vmatprep.mubr.msk.bf16.mxu0 %vm356_vm0, %v3493_v50  ;;  %3169 = vmatprep.mubr.msk.bf16.mxu1 %vm356_vm0, %v3495_v51  ;;  %v3588_v49 = vld [vmem:[%s5573_s0 + $0x490] ss:$8 sps:$4 sm:$0xff]   ;;  %v3589_v50 = vld [vmem:[%s5573_s0 + $0x324] ss:$8 sps:$4 sm:$0xff]  }
  0x6f   :  { %v3591_v51 = vld [vmem:[%s5573_s0 + $0x4a4] ss:$8 sps:$4 sm:$0xff]  }
  0x75   :  { %542 = vmatmul.mubr.bf16.gmra.mrb[40].mxu0 %v3497_v52  ;;  %1212 = vmatmul.mubr.bf16.gmra.mrb[40].mxu1 %v3498_v53  ;;  %v3593_v52 = vld [vmem:[%s5573_s0 + $0x320] ss:$8 sps:$4 sm:$0xff]  }
  0x76   :  { %3048 = vmatprep.mubr.msk.bf16.mxu0 %vm356_vm0, %v3499_v54  ;;  %3170 = vmatprep.mubr.msk.bf16.mxu1 %vm356_vm0, %v3501_v55  ;;  %v3594_v53 = vld [vmem:[%s5573_s0 + $0x4a0] ss:$8 sps:$4 sm:$0xff]   ;;  %v3595_v54 = vld [vmem:[%s5573_s0 + $0x334] ss:$8 sps:$4 sm:$0xff]  }
  0x77   :  { %v3597_v55 = vld [vmem:[%s5573_s0 + $0x4b4] ss:$8 sps:$4 sm:$0xff]  }
  0x7d   :  { %550 = vmatmul.mubr.bf16.gmra.mrb[44].mxu0 %v3503_v56  ;;  %1220 = vmatmul.mubr.bf16.gmra.mrb[44].mxu1 %v3504_v57  ;;  %v4249_v56 = vld [vmem:[%s5574_s2] ss:$0 sm:$0xff] }
  0x7e   :  { %3049 = vmatprep.mubr.msk.bf16.mxu0 %vm356_vm0, %v3505_v58  ;;  %3171 = vmatprep.mubr.msk.bf16.mxu1 %vm356_vm0, %v3507_v59  ;;  %v4256_v57 = vld [vmem:[%s5575_s3] ss:$0 sm:$0xff] }
  0x85   :  { %558 = vmatmul.mubr.bf16.gmra.mrb[48].mxu0 %v3509_v60  ;;  %1228 = vmatmul.mubr.bf16.gmra.mrb[48].mxu1 %v3510_v61 }
  0x86   :  { %3050 = vmatprep.mubr.msk.bf16.mxu0 %vm356_vm0, %v3511_v62  ;;  %3172 = vmatprep.mubr.msk.bf16.mxu1 %vm356_vm0, %v3513_v63 }
  0x8d   :  { %566 = vmatmul.mubr.bf16.gmra.mrb[52].mxu0 %v3515_v0  ;;  %1236 = vmatmul.mubr.bf16.gmra.mrb[52].mxu1 %v3516_v1  ;;  %v3599_v0 = vld [vmem:[%s5573_s0 + $0x330] ss:$8 sps:$4 sm:$0xff]  }
  0x8e   :  { %3051 = vmatprep.mubr.msk.bf16.mxu0 %vm356_vm0, %v3517_v2  ;;  %3173 = vmatprep.mubr.msk.bf16.mxu1 %vm356_vm0, %v3519_v3  ;;  %v3600_v1 = vld [vmem:[%s5573_s0 + $0x4b0] ss:$8 sps:$4 sm:$0xff]  }
  0x95   :  { %574 = vmatmul.mubr.bf16.gmra.mrb[56].mxu0 %v3521_v4  ;;  %1244 = vmatmul.mubr.bf16.gmra.mrb[56].mxu1 %v3522_v5  ;;  %v3601_v4 = vld [vmem:[%s5573_s0 + $0x344] ss:$8 sps:$4 sm:$0xff]  }
  0x96   :  { %3052 = vmatprep.mubr.msk.bf16.mxu0 %vm356_vm0, %v3523_v6  ;;  %3174 = vmatprep.mubr.msk.bf16.mxu1 %vm356_vm0, %v3525_v7  ;;  %v3603_v5 = vld [vmem:[%s5573_s0 + $0x4c4] ss:$8 sps:$4 sm:$0xff]  }
  0x9d   :  { %582 = vmatmul.mubr.bf16.gmra.mrb[60].mxu0 %v3527_v8  ;;  %1252 = vmatmul.mubr.bf16.gmra.mrb[60].mxu1 %v3528_v9 }
  0x9e   :  { %3053 = vmatprep.mubr.msk.bf16.mxu0 %vm356_vm0, %v3529_v10  ;;  %3175 = vmatprep.mubr.msk.bf16.mxu1 %vm356_vm0, %v3531_v11 }
  0xa5   :  { %590 = vmatmul.mubr.bf16.gmra.mrb[64].mxu0 %v3533_v12  ;;  %1260 = vmatmul.mubr.bf16.gmra.mrb[64].mxu1 %v3534_v13 }
  0xa6   :  { %3054 = vmatprep.mubr.msk.bf16.mxu0 %vm356_vm0, %v3535_v14  ;;  %3176 = vmatprep.mubr.msk.bf16.mxu1 %vm356_vm0, %v3537_v15 }
  0xad   :  { %598 = vmatmul.mubr.bf16.gmra.mrb[68].mxu0 %v3539_v16  ;;  %1268 = vmatmul.mubr.bf16.gmra.mrb[68].mxu1 %v3540_v17 }
  0xae   :  { %3055 = vmatprep.mubr.msk.bf16.mxu0 %vm356_vm0, %v3541_v18  ;;  %3177 = vmatprep.mubr.msk.bf16.mxu1 %vm356_vm0, %v3543_v19 }
  0xb5   :  { %606 = vmatmul.mubr.bf16.gmra.mrb[72].mxu0 %v3545_v20  ;;  %1276 = vmatmul.mubr.bf16.gmra.mrb[72].mxu1 %v3546_v21 }
  0xb6   :  { %3056 = vmatprep.mubr.msk.bf16.mxu0 %vm356_vm0, %v3547_v22  ;;  %3178 = vmatprep.mubr.msk.bf16.mxu1 %vm356_vm0, %v3549_v23  ;;  %v3605_v22 = vld [vmem:[%s5573_s0 + $0x340] ss:$8 sps:$4 sm:$0xff]  }
  0xb7   :  { %v3606_v23 = vld [vmem:[%s5573_s0 + $0x4c0] ss:$8 sps:$4 sm:$0xff]  }
  0xbd   :  { %614 = vmatmul.mubr.bf16.gmra.mrb[76].mxu0 %v3551_v24  ;;  %1284 = vmatmul.mubr.bf16.gmra.mrb[76].mxu1 %v3552_v25 }
  0xbe   :  { %3057 = vmatprep.mubr.msk.bf16.mxu0 %vm356_vm0, %v3553_v26  ;;  %3179 = vmatprep.mubr.msk.bf16.mxu1 %vm356_vm0, %v3555_v27  ;;  %v3607_v26 = vld [vmem:[%s5573_s0 + $0x354] ss:$8 sps:$4 sm:$0xff]  }
  0xbf   :  { %v3609_v27 = vld [vmem:[%s5573_s0 + $0x4d4] ss:$8 sps:$4 sm:$0xff]  }
  0xc5   :  { %622 = vmatmul.mubr.bf16.gmra.mrb[80].mxu0 %v3557_v28  ;;  %1292 = vmatmul.mubr.bf16.gmra.mrb[80].mxu1 %v3558_v29 }
  0xc6   :  { %3058 = vmatprep.mubr.msk.bf16.mxu0 %vm356_vm0, %v3559_v30  ;;  %3180 = vmatprep.mubr.msk.bf16.mxu1 %vm356_vm0, %v3561_v31 }
  0xcd   :  { %630 = vmatmul.mubr.bf16.gmra.mrb[84].mxu0 %v3563_v32  ;;  %1300 = vmatmul.mubr.bf16.gmra.mrb[84].mxu1 %v3564_v33 }
  0xce   :  { %3059 = vmatprep.mubr.msk.bf16.mxu0 %vm356_vm0, %v3565_v34  ;;  %3181 = vmatprep.mubr.msk.bf16.mxu1 %vm356_vm0, %v3567_v35 }
  0xd5   :  { %638 = vmatmul.mubr.bf16.gmra.mrb[88].mxu0 %v3569_v36  ;;  %1308 = vmatmul.mubr.bf16.gmra.mrb[88].mxu1 %v3570_v37 }
  0xd6   :  { %3060 = vmatprep.mubr.msk.bf16.mxu0 %vm356_vm0, %v3571_v38  ;;  %3182 = vmatprep.mubr.msk.bf16.mxu1 %vm356_vm0, %v3573_v39 }
  0xdd   :  { %646 = vmatmul.mubr.bf16.gmra.mrb[92].mxu0 %v3575_v40  ;;  %1316 = vmatmul.mubr.bf16.gmra.mrb[92].mxu1 %v3576_v41 }
  0xde   :  { %3279 = vmatprep.mubr.msk.bf16.mxu0 %vm356_vm0, %v3579_v42  ;;  %3399 = vmatprep.mubr.msk.bf16.mxu1 %vm356_vm0, %v3582_v43 }
  0xe5   :  { %1838 = vmatmul.mubr.bf16.vlgmr.msra.gmra.mrb[96].mxu0 %v3577_v44  ;;  %2544 = vmatmul.mubr.bf16.vlgmr.msra.gmra.mrb[96].mxu1 %v3580_v45  ;;  %v3611_v44 = vld [vmem:[%s5573_s0 + $0x350] ss:$8 sps:$4 sm:$0xff]  }
  0xe6   :  { %3280 = vmatprep.mubr.msk.bf16.mxu0 %vm356_vm0, %v3583_v46  ;;  %3400 = vmatprep.mubr.msk.bf16.mxu1 %vm356_vm0, %v3585_v47  ;;  %v3612_v45 = vld [vmem:[%s5573_s0 + $0x4d0] ss:$8 sps:$4 sm:$0xff]  }
  0xed   :  { %1846 = vmatmul.mubr.bf16.gmra.mrb[100].mxu0 %v3587_v48  ;;  %2552 = vmatmul.mubr.bf16.gmra.mrb[100].mxu1 %v3588_v49  ;;  %v3613_v48 = vld [vmem:[%s5573_s0 + $0x364] ss:$8 sps:$4 sm:$0xff]  }
  0xee   :  { %3281 = vmatprep.mubr.msk.bf16.mxu0 %vm356_vm0, %v3589_v50  ;;  %3401 = vmatprep.mubr.msk.bf16.mxu1 %vm356_vm0, %v3591_v51  ;;  %v3615_v49 = vld [vmem:[%s5573_s0 + $0x4e4] ss:$8 sps:$4 sm:$0xff]  }
  0xf5   :  { %1854 = vmatmul.mubr.bf16.gmra.mrb[104].mxu0 %v3593_v52  ;;  %2560 = vmatmul.mubr.bf16.gmra.mrb[104].mxu1 %v3594_v53 }
  0xf6   :  { %3282 = vmatprep.mubr.msk.bf16.mxu0 %vm356_vm0, %v3595_v54  ;;  %3402 = vmatprep.mubr.msk.bf16.mxu1 %vm356_vm0, %v3597_v55 }
  0xf8   :  { %v463_v58 = vpop.f32.mrb[0].mxu0  ;;  %v1133_v59 = vpop.f32.mrb[0].mxu1 }
  0xf9   :  { %v660_v60 = vmul.f32 %v4249_v56, %v463_v58  ;;  %v1324_v61 = vmul.f32 %v4249_v56, %v1133_v59  ;;  %v465_v62 = vpop.f32.mrb[1].mxu0  ;;  %v1135_v63 = vpop.f32.mrb[1].mxu1 }
  0xfa   :  { %v466_v2 = vpop.f32.mrb[2].mxu0  ;;  %v1136_v3 = vpop.f32.mrb[2].mxu1 }
  0xfb   :  { %v4273_v6 = vadd.f32 %v4256_v57, %v660_v60  ;;  %v4276_v7 = vadd.f32 %v4256_v57, %v1324_v61  ;;  %v661_v8 = vmul.f32 %v4249_v56, %v466_v2  ;;  %v1325_v9 = vmul.f32 %v4249_v56, %v1136_v3  ;;  %v468_v10 = vpop.f32.mrb[3].mxu0  ;;  %v1138_v11 = vpop.f32.mrb[3].mxu1 }
  0xfc   :  { %v3619_v10 = vld [vmem:[%s5573_s0 + $0x374] ss:$8 sps:$4 sm:$0xff]  }
  0xfd   :  { %v4283_v13 = vadd.f32 %v4256_v57, %v661_v8  ;;  %v4286_v14 = vadd.f32 %v4256_v57, %v1325_v9  ;;  %1862 = vmatmul.mubr.bf16.gmra.mrb[108].mxu0 %v3599_v0  ;;  %2568 = vmatmul.mubr.bf16.gmra.mrb[108].mxu1 %v3600_v1  ;;  %v3621_v11 = vld [vmem:[%s5573_s0 + $0x4f4] ss:$8 sps:$4 sm:$0xff]  }
  0xfe   :  { %3283 = vmatprep.mubr.msk.bf16.mxu0 %vm356_vm0, %v3601_v4  ;;  %3403 = vmatprep.mubr.msk.bf16.mxu1 %vm356_vm0, %v3603_v5  ;;  %v3617_v4 = vld [vmem:[%s5573_s0 + $0x360] ss:$8 sps:$4 sm:$0xff]  }
  0xff   :  { %v3618_v5 = vld [vmem:[%s5573_s0 + $0x4e0] ss:$8 sps:$4 sm:$0xff]  }
 0x100   :  { %v471_v16 = vpop.f32.mrb[4].mxu0  ;;  %v1141_v17 = vpop.f32.mrb[4].mxu1 }
 0x101   :  { %v662_v18 = vmul.f32 %v4249_v56, %v471_v16  ;;  %v1326_v19 = vmul.f32 %v4249_v56, %v1141_v17  ;;  %v473_v20 = vpop.f32.mrb[5].mxu0  ;;  %v1143_v21 = vpop.f32.mrb[5].mxu1 }
 0x102   :  { %v474_v24 = vpop.f32.mrb[6].mxu0  ;;  %v1144_v25 = vpop.f32.mrb[6].mxu1 }
 0x103   :  { %v4307_v28 = vadd.f32 %v4256_v57, %v662_v18  ;;  %v4310_v29 = vadd.f32 %v4256_v57, %v1326_v19  ;;  %v663_v30 = vmul.f32 %v4249_v56, %v474_v24  ;;  %v1327_v31 = vmul.f32 %v4249_v56, %v1144_v25  ;;  %v476_v32 = vpop.f32.mrb[7].mxu0  ;;  %v1146_v33 = vpop.f32.mrb[7].mxu1 }
 0x105   :  { %v4317_v35 = vadd.f32 %v4256_v57, %v663_v30  ;;  %v4320_v36 = vadd.f32 %v4256_v57, %v1327_v31  ;;  %1870 = vmatmul.mubr.bf16.gmra.mrb[112].mxu0 %v3605_v22  ;;  %2576 = vmatmul.mubr.bf16.gmra.mrb[112].mxu1 %v3606_v23 }
 0x106   :  { %3284 = vmatprep.mubr.msk.bf16.mxu0 %vm356_vm0, %v3607_v26  ;;  %3404 = vmatprep.mubr.msk.bf16.mxu1 %vm356_vm0, %v3609_v27 }
 0x108   :  { %v479_v38 = vpop.f32.mrb[8].mxu0  ;;  %v1149_v39 = vpop.f32.mrb[8].mxu1 }
 0x109   :  { %v664_v40 = vmul.f32 %v4249_v56, %v479_v38  ;;  %v1328_v41 = vmul.f32 %v4249_v56, %v1149_v39  ;;  %v481_v42 = vpop.f32.mrb[9].mxu0  ;;  %v1151_v43 = vpop.f32.mrb[9].mxu1  ;;  %v3623_v38 = vld [vmem:[%s5573_s0 + $0x370] ss:$8 sps:$4 sm:$0xff]  }
 0x10a   :  { %v482_v46 = vpop.f32.mrb[10].mxu0  ;;  %v1152_v47 = vpop.f32.mrb[10].mxu1  ;;  %v3624_v39 = vld [vmem:[%s5573_s0 + $0x4f0] ss:$8 sps:$4 sm:$0xff]   ;;  %v3625_v42 = vld [vmem:[%s5573_s0 + $0x384] ss:$8 sps:$4 sm:$0xff]  }
 0x10b   :  { %v4341_v50 = vadd.f32 %v4256_v57, %v664_v40  ;;  %v4344_v51 = vadd.f32 %v4256_v57, %v1328_v41  ;;  %v665_v52 = vmul.f32 %v4249_v56, %v482_v46  ;;  %v1329_v53 = vmul.f32 %v4249_v56, %v1152_v47  ;;  %v484_v54 = vpop.f32.mrb[11].mxu0  ;;  %v1154_v55 = vpop.f32.mrb[11].mxu1  ;;  %v3627_v43 = vld [vmem:[%s5573_s0 + $0x504] ss:$8 sps:$4 sm:$0xff]  }
 0x10d   :  { %v4351_v59 = vadd.f32 %v4256_v57, %v665_v52  ;;  %v4354_v60 = vadd.f32 %v4256_v57, %v1329_v53  ;;  %1878 = vmatmul.mubr.bf16.gmra.mrb[116].mxu0 %v3611_v44  ;;  %2584 = vmatmul.mubr.bf16.gmra.mrb[116].mxu1 %v3612_v45 }
 0x10e   :  { %3285 = vmatprep.mubr.msk.bf16.mxu0 %vm356_vm0, %v3613_v48  ;;  %3405 = vmatprep.mubr.msk.bf16.mxu1 %vm356_vm0, %v3615_v49 }
 0x110   :  { %v487_v62 = vpop.f32.mrb[12].mxu0  ;;  %v1157_v63 = vpop.f32.mrb[12].mxu1 }
 0x111   :  { %v666_v0 = vmul.f32 %v4249_v56, %v487_v62  ;;  %v1330_v1 = vmul.f32 %v4249_v56, %v1157_v63  ;;  %v489_v2 = vpop.f32.mrb[13].mxu0  ;;  %v1159_v3 = vpop.f32.mrb[13].mxu1 }
 0x112   :  { %v490_v8 = vpop.f32.mrb[14].mxu0  ;;  %v1160_v9 = vpop.f32.mrb[14].mxu1 }
 0x113   :  { %v4375_v16 = vadd.f32 %v4256_v57, %v666_v0  ;;  %v4378_v17 = vadd.f32 %v4256_v57, %v1330_v1  ;;  %v667_v18 = vmul.f32 %v4249_v56, %v490_v8  ;;  %v1331_v19 = vmul.f32 %v4249_v56, %v1160_v9  ;;  %v492_v20 = vpop.f32.mrb[15].mxu0  ;;  %v1162_v21 = vpop.f32.mrb[15].mxu1 }
 0x115   :  { %v4385_v23 = vadd.f32 %v4256_v57, %v667_v18  ;;  %v4388_v24 = vadd.f32 %v4256_v57, %v1331_v19  ;;  %1886 = vmatmul.mubr.bf16.gmra.mrb[120].mxu0 %v3617_v4  ;;  %2592 = vmatmul.mubr.bf16.gmra.mrb[120].mxu1 %v3618_v5  ;;  %v3629_v4 = vld [vmem:[%s5573_s0 + $0x380] ss:$8 sps:$4 sm:$0xff]  }
 0x116   :  { %3286 = vmatprep.mubr.msk.bf16.mxu0 %vm356_vm0, %v3619_v10  ;;  %3406 = vmatprep.mubr.msk.bf16.mxu1 %vm356_vm0, %v3621_v11  ;;  %v3630_v5 = vld [vmem:[%s5573_s0 + $0x500] ss:$8 sps:$4 sm:$0xff]   ;;  %v3631_v10 = vld [vmem:[%s5573_s0 + $0x394] ss:$8 sps:$4 sm:$0xff]  }
 0x117   :  { %v3633_v11 = vld [vmem:[%s5573_s0 + $0x514] ss:$8 sps:$4 sm:$0xff]  }
 0x118   :  { %v495_v26 = vpop.f32.mrb[16].mxu0  ;;  %v1165_v27 = vpop.f32.mrb[16].mxu1 }
 0x119   :  { %v668_v30 = vmul.f32 %v4249_v56, %v495_v26  ;;  %v1332_v31 = vmul.f32 %v4249_v56, %v1165_v27  ;;  %v497_v32 = vpop.f32.mrb[17].mxu0  ;;  %v1167_v33 = vpop.f32.mrb[17].mxu1 }
 0x11a   :  { %v498_v40 = vpop.f32.mrb[18].mxu0  ;;  %v1168_v41 = vpop.f32.mrb[18].mxu1 }
 0x11b   :  { %v4409_v44 = vadd.f32 %v4256_v57, %v668_v30  ;;  %v4412_v45 = vadd.f32 %v4256_v57, %v1332_v31  ;;  %v669_v46 = vmul.f32 %v4249_v56, %v498_v40  ;;  %v1333_v47 = vmul.f32 %v4249_v56, %v1168_v41  ;;  %v500_v48 = vpop.f32.mrb[19].mxu0  ;;  %v1170_v49 = vpop.f32.mrb[19].mxu1 }
 0x11d   :  { %v4419_v53 = vadd.f32 %v4256_v57, %v669_v46  ;;  %v4422_v54 = vadd.f32 %v4256_v57, %v1333_v47  ;;  %1894 = vmatmul.mubr.bf16.gmra.mrb[124].mxu0 %v3623_v38  ;;  %2600 = vmatmul.mubr.bf16.gmra.mrb[124].mxu1 %v3624_v39  ;;  %v3635_v46 = vld [vmem:[%s5573_s0 + $0x390] ss:$8 sps:$4 sm:$0xff]  }
 0x11e   :  { %3287 = vmatprep.mubr.msk.bf16.mxu0 %vm356_vm0, %v3625_v42  ;;  %3407 = vmatprep.mubr.msk.bf16.mxu1 %vm356_vm0, %v3627_v43  ;;  %v3636_v47 = vld [vmem:[%s5573_s0 + $0x510] ss:$8 sps:$4 sm:$0xff]  }
 0x120   :  { %v503_v62 = vpop.f32.mrb[20].mxu0  ;;  %v1173_v63 = vpop.f32.mrb[20].mxu1 }
 0x121   :  { %v670_v0 = vmul.f32 %v4249_v56, %v503_v62  ;;  %v1334_v1 = vmul.f32 %v4249_v56, %v1173_v63  ;;  %v505_v2 = vpop.f32.mrb[21].mxu0  ;;  %v1175_v3 = vpop.f32.mrb[21].mxu1  ;;  %v3637_v62 = vld [vmem:[%s5573_s0 + $0x3a4] ss:$8 sps:$4 sm:$0xff]  }
 0x122   :  { %v506_v8 = vpop.f32.mrb[22].mxu0  ;;  %v1176_v9 = vpop.f32.mrb[22].mxu1  ;;  %v3639_v63 = vld [vmem:[%s5573_s0 + $0x524] ss:$8 sps:$4 sm:$0xff]  }
 0x123   :  { %v4443_v18 = vadd.f32 %v4256_v57, %v670_v0  ;;  %v4446_v19 = vadd.f32 %v4256_v57, %v1334_v1  ;;  %v671_v20 = vmul.f32 %v4249_v56, %v506_v8  ;;  %v1335_v21 = vmul.f32 %v4249_v56, %v1176_v9  ;;  %v508_v26 = vpop.f32.mrb[23].mxu0  ;;  %v1178_v27 = vpop.f32.mrb[23].mxu1 }
 0x125   :  { %v4453_v31 = vadd.f32 %v4256_v57, %v671_v20  ;;  %v4456_v32 = vadd.f32 %v4256_v57, %v1335_v21  ;;  %1902 = vmatmul.mubr.bf16.gmra.mrb[128].mxu0 %v3629_v4  ;;  %2608 = vmatmul.mubr.bf16.gmra.mrb[128].mxu1 %v3630_v5 }
 0x126   :  { %3288 = vmatprep.mubr.msk.bf16.mxu0 %vm356_vm0, %v3631_v10  ;;  %3408 = vmatprep.mubr.msk.bf16.mxu1 %vm356_vm0, %v3633_v11 }
 0x128   :  { %v511_v38 = vpop.f32.mrb[24].mxu0  ;;  %v1181_v39 = vpop.f32.mrb[24].mxu1 }
 0x129   :  { %v672_v40 = vmul.f32 %v4249_v56, %v511_v38  ;;  %v1336_v41 = vmul.f32 %v4249_v56, %v1181_v39  ;;  %v513_v42 = vpop.f32.mrb[25].mxu0  ;;  %v1183_v43 = vpop.f32.mrb[25].mxu1 }
 0x12a   :  { %v514_v48 = vpop.f32.mrb[26].mxu0  ;;  %v1184_v49 = vpop.f32.mrb[26].mxu1 }
 0x12b   :  { %v4477_v0 = vadd.f32 %v4256_v57, %v672_v40  ;;  %v4480_v1 = vadd.f32 %v4256_v57, %v1336_v41  ;;  %v673_v2 = vmul.f32 %v4249_v56, %v514_v48  ;;  %v1337_v3 = vmul.f32 %v4249_v56, %v1184_v49  ;;  %v516_v4 = vpop.f32.mrb[27].mxu0  ;;  %v1186_v5 = vpop.f32.mrb[27].mxu1  ;;  %v3641_v40 = vld [vmem:[%s5573_s0 + $0x3a0] ss:$8 sps:$4 sm:$0xff]  }
 0x12c   :  { %v3642_v41 = vld [vmem:[%s5573_s0 + $0x520] ss:$8 sps:$4 sm:$0xff]  }
 0x12d   :  { %v4487_v9 = vadd.f32 %v4256_v57, %v673_v2  ;;  %v4490_v10 = vadd.f32 %v4256_v57, %v1337_v3  ;;  %1910 = vmatmul.mubr.bf16.gmra.mrb[132].mxu0 %v3635_v46  ;;  %2616 = vmatmul.mubr.bf16.gmra.mrb[132].mxu1 %v3636_v47  ;;  %v3643_v46 = vld [vmem:[%s5573_s0 + $0x3b4] ss:$8 sps:$4 sm:$0xff]  }
 0x12e   :  { %3289 = vmatprep.mubr.msk.bf16.mxu0 %vm356_vm0, %v3637_v62  ;;  %3409 = vmatprep.mubr.msk.bf16.mxu1 %vm356_vm0, %v3639_v63  ;;  %v3645_v47 = vld [vmem:[%s5573_s0 + $0x534] ss:$8 sps:$4 sm:$0xff]  }
 0x130   :  { %v519_v20 = vpop.f32.mrb[28].mxu0  ;;  %v1189_v21 = vpop.f32.mrb[28].mxu1 }
 0x131   :  { %v674_v26 = vmul.f32 %v4249_v56, %v519_v20  ;;  %v1338_v27 = vmul.f32 %v4249_v56, %v1189_v21  ;;  %v521_v38 = vpop.f32.mrb[29].mxu0  ;;  %v1191_v39 = vpop.f32.mrb[29].mxu1 }
 0x132   :  { %v522_v42 = vpop.f32.mrb[30].mxu0  ;;  %v1192_v43 = vpop.f32.mrb[30].mxu1 }
 0x133   :  { %v4511_v48 = vadd.f32 %v4256_v57, %v674_v26  ;;  %v4514_v49 = vadd.f32 %v4256_v57, %v1338_v27  ;;  %v675_v62 = vmul.f32 %v4249_v56, %v522_v42  ;;  %v1339_v63 = vmul.f32 %v4249_v56, %v1192_v43  ;;  %v524_v2 = vpop.f32.mrb[31].mxu0  ;;  %v1194_v3 = vpop.f32.mrb[31].mxu1 }
 0x135   :  { %v4521_v5 = vadd.f32 %v4256_v57, %v675_v62  ;;  %v4524_v20 = vadd.f32 %v4256_v57, %v1339_v63  ;;  %1918 = vmatmul.mubr.bf16.gmra.mrb[136].mxu0 %v3641_v40  ;;  %2624 = vmatmul.mubr.bf16.gmra.mrb[136].mxu1 %v3642_v41  ;;  %v3647_v40 = vld [vmem:[%s5573_s0 + $0x3b0] ss:$8 sps:$4 sm:$0xff]   ;;  %v3649_v62 = vld [vmem:[%s5573_s0 + $0x3c4] ss:$8 sps:$4 sm:$0xff]  }
 0x136   :  { %3290 = vmatprep.mubr.msk.bf16.mxu0 %vm356_vm0, %v3643_v46  ;;  %3410 = vmatprep.mubr.msk.bf16.mxu1 %vm356_vm0, %v3645_v47  ;;  %v3648_v41 = vld [vmem:[%s5573_s0 + $0x530] ss:$8 sps:$4 sm:$0xff]   ;;  %v3651_v63 = vld [vmem:[%s5573_s0 + $0x544] ss:$8 sps:$4 sm:$0xff]  }
 0x138   :  { %v527_v26 = vpop.f32.mrb[32].mxu0  ;;  %v1197_v27 = vpop.f32.mrb[32].mxu1 }
 0x139   :  { %v676_v38 = vmul.f32 %v4249_v56, %v527_v26  ;;  %v1340_v39 = vmul.f32 %v4249_v56, %v1197_v27  ;;  %v529_v42 = vpop.f32.mrb[33].mxu0  ;;  %v1199_v43 = vpop.f32.mrb[33].mxu1 }
 0x13a   :  { %v530_v46 = vpop.f32.mrb[34].mxu0  ;;  %v1200_v47 = vpop.f32.mrb[34].mxu1 }
 0x13b   :  { %v4545_v2 = vadd.f32 %v4256_v57, %v676_v38  ;;  %v4548_v3 = vadd.f32 %v4256_v57, %v1340_v39  ;;  %v677_v26 = vmul.f32 %v4249_v56, %v530_v46  ;;  %v1341_v27 = vmul.f32 %v4249_v56, %v1200_v47  ;;  %v532_v42 = vpop.f32.mrb[35].mxu0  ;;  %v1202_v43 = vpop.f32.mrb[35].mxu1 }
 0x13d   :  { %v4555_v4 = vadd.f32 %v4256_v57, %v677_v26  ;;  %v4558_v11 = vadd.f32 %v4256_v57, %v1341_v27  ;;  %1926 = vmatmul.mubr.bf16.gmra.mrb[140].mxu0 %v3647_v40  ;;  %2632 = vmatmul.mubr.bf16.gmra.mrb[140].mxu1 %v3648_v41  ;;  %v3653_v40 = vld [vmem:[%s5573_s0 + $0x3c0] ss:$8 sps:$4 sm:$0xff]   ;;  %v3655_v27 = vld [vmem:[%s5573_s0 + $0x3d4] ss:$8 sps:$4 sm:$0xff]  }
 0x13e   :  { %3291 = vmatprep.mubr.msk.bf16.mxu0 %vm356_vm0, %v3649_v62  ;;  %3411 = vmatprep.mubr.msk.bf16.mxu1 %vm356_vm0, %v3651_v63  ;;  %v3654_v41 = vld [vmem:[%s5573_s0 + $0x540] ss:$8 sps:$4 sm:$0xff]  }
 0x140   :  { %v535_v39 = vpop.f32.mrb[36].mxu0  ;;  %v1205_v46 = vpop.f32.mrb[36].mxu1 }
 0x141   :  { %v678_v47 = vmul.f32 %v4249_v56, %v535_v39  ;;  %v1342_v42 = vmul.f32 %v4249_v56, %v1205_v46  ;;  %v537_v26 = vpop.f32.mrb[37].mxu0  ;;  %v1207_v43 = vpop.f32.mrb[37].mxu1  ;;  %v3657_v39 = vld [vmem:[%s5573_s0 + $0x554] ss:$8 sps:$4 sm:$0xff]  }
 0x142   :  { %v538_v62 = vpop.f32.mrb[38].mxu0  ;;  %v1208_v63 = vpop.f32.mrb[38].mxu1 }
 0x143   :  { %v4579_v46 = vadd.f32 %v4256_v57, %v678_v47  ;;  %v4582_v26 = vadd.f32 %v4256_v57, %v1342_v42  ;;  %v679_v43 = vmul.f32 %v4249_v56, %v538_v62  ;;  %v1343_v38 = vmul.f32 %v4249_v56, %v1208_v63  ;;  %v540_v21 = vpop.f32.mrb[39].mxu0  ;;  %v1210_v8 = vpop.f32.mrb[39].mxu1 }
 0x145   :  { %v4589_v30 = vadd.f32 %v4256_v57, %v679_v43  ;;  %v4592_v55 = vadd.f32 %v4256_v57, %v1343_v38  ;;  %1934 = vmatmul.mubr.bf16.gmra.mrb[144].mxu0 %v3653_v40  ;;  %2640 = vmatmul.mubr.bf16.gmra.mrb[144].mxu1 %v3654_v41  ;;  %v3659_v38 = vld [vmem:[%s5573_s0 + $0x3d0] ss:$8 sps:$4 sm:$0xff]  }
 0x146   :  { %3292 = vmatprep.mubr.msk.bf16.mxu0 %vm356_vm0, %v3655_v27  ;;  %3412 = vmatprep.mubr.msk.bf16.mxu1 %vm356_vm0, %v3657_v39  ;;  %v3660_v40 = vld [vmem:[%s5573_s0 + $0x550] ss:$8 sps:$4 sm:$0xff]   ;;  %v3661_v39 = vld [vmem:[%s5573_s0 + $0x3e4] ss:$8 sps:$4 sm:$0xff]  }
 0x148   :  { %v543_v21 = vpop.f32.mrb[40].mxu0  ;;  %v1213_v8 = vpop.f32.mrb[40].mxu1 }
 0x149   :  { %v680_v42 = vmul.f32 %v4249_v56, %v543_v21  ;;  %v1344_v62 = vmul.f32 %v4249_v56, %v1213_v8  ;;  %v545_v63 = vpop.f32.mrb[41].mxu0  ;;  %v1215_v43 = vpop.f32.mrb[41].mxu1  ;;  %v3663_v21 = vld [vmem:[%s5573_s0 + $0x564] ss:$8 sps:$4 sm:$0xff]  }
 0x14a   :  { %v546_v41 = vpop.f32.mrb[42].mxu0  ;;  %v1216_v27 = vpop.f32.mrb[42].mxu1 }
 0x14b   :  { %v4613_v8 = vadd.f32 %v4256_v57, %v680_v42  ;;  %v4616_v63 = vadd.f32 %v4256_v57, %v1344_v62  ;;  %v681_v43 = vmul.f32 %v4249_v56, %v546_v41  ;;  %v1345_v47 = vmul.f32 %v4249_v56, %v1216_v27  ;;  %v548_v33 = vpop.f32.mrb[43].mxu0  ;;  %v1218_v52 = vpop.f32.mrb[43].mxu1 }
 0x14d   :  { %v4623_v22 = vadd.f32 %v4256_v57, %v681_v43  ;;  %v4626_v61 = vadd.f32 %v4256_v57, %v1345_v47  ;;  %1942 = vmatmul.mubr.bf16.gmra.mrb[148].mxu0 %v3659_v38  ;;  %2648 = vmatmul.mubr.bf16.gmra.mrb[148].mxu1 %v3660_v40  ;;  %v3665_v47 = vld [vmem:[%s5573_s0 + $0x3e0] ss:$8 sps:$4 sm:$0xff]  }
 0x14e   :  { %3293 = vmatprep.mubr.msk.bf16.mxu0 %vm356_vm0, %v3661_v39  ;;  %3413 = vmatprep.mubr.msk.bf16.mxu1 %vm356_vm0, %v3663_v21  ;;  %v3666_v38 = vld [vmem:[%s5573_s0 + $0x560] ss:$8 sps:$4 sm:$0xff]   ;;  %v3667_v21 = vld [vmem:[%s5573_s0 + $0x3f4] ss:$8 sps:$4 sm:$0xff]  }
 0x150   :  { %v551_v33 = vpop.f32.mrb[44].mxu0  ;;  %v1221_v52 = vpop.f32.mrb[44].mxu1 }
 0x151   :  { %v682_v62 = vmul.f32 %v4249_v56, %v551_v33  ;;  %v1346_v41 = vmul.f32 %v4249_v56, %v1221_v52  ;;  %v553_v27 = vpop.f32.mrb[45].mxu0  ;;  %v1223_v43 = vpop.f32.mrb[45].mxu1  ;;  %v3669_v33 = vld [vmem:[%s5573_s0 + $0x574] ss:$8 sps:$4 sm:$0xff]  }
 0x152   :  { %v554_v40 = vpop.f32.mrb[46].mxu0  ;;  %v1224_v39 = vpop.f32.mrb[46].mxu1 }
 0x153   :  { %v4647_v52 = vadd.f32 %v4256_v57, %v682_v62  ;;  %v4650_v27 = vadd.f32 %v4256_v57, %v1346_v41  ;;  %v683_v43 = vmul.f32 %v4249_v56, %v554_v40  ;;  %v1347_v42 = vmul.f32 %v4249_v56, %v1224_v39  ;;  %v556_v25 = vpop.f32.mrb[47].mxu0  ;;  %v1226_v58 = vpop.f32.mrb[47].mxu1 }
 0x155   :  { %5629 = vst [vmem:[#allocation2_spill] sm:$0xff] %v4647_v52  ;;  %5630 = vst [vmem:[#allocation3_spill] sm:$0xff] %v4650_v27  ;;  %v4657_v34 = vadd.f32 %v4256_v57, %v683_v43  ;;  %v4660_v15 = vadd.f32 %v4256_v57, %v1347_v42  ;;  %1950 = vmatmul.mubr.bf16.gmra.mrb[152].mxu0 %v3665_v47  ;;  %2656 = vmatmul.mubr.bf16.gmra.mrb[152].mxu1 %v3666_v38  ;;  %v3671_v42 = vld [vmem:[%s5573_s0 + $0x3f0] ss:$8 sps:$4 sm:$0xff]  }
 0x156   :  { %3294 = vmatprep.mubr.msk.bf16.mxu0 %vm356_vm0, %v3667_v21  ;;  %3414 = vmatprep.mubr.msk.bf16.mxu1 %vm356_vm0, %v3669_v33  ;;  %v3672_v47 = vld [vmem:[%s5573_s0 + $0x570] ss:$8 sps:$4 sm:$0xff]   ;;  %v3673_v33 = vld [vmem:[%s5573_s0 + $0x404] ss:$8 sps:$4 sm:$0xff]  }
 0x157   :  { %5631 = vst [vmem:[#allocation4_spill] sm:$0xff] %v4657_v34  ;;  %5632 = vst [vmem:[#allocation5_spill] sm:$0xff] %v4660_v15 }
 0x158   :  { %v559_v25 = vpop.f32.mrb[48].mxu0  ;;  %v1229_v58 = vpop.f32.mrb[48].mxu1 }
 0x159   :  { %v684_v41 = vmul.f32 %v4249_v56, %v559_v25  ;;  %v1348_v40 = vmul.f32 %v4249_v56, %v1229_v58  ;;  %v561_v39 = vpop.f32.mrb[49].mxu0  ;;  %v1231_v43 = vpop.f32.mrb[49].mxu1  ;;  %v3675_v25 = vld [vmem:[%s5573_s0 + $0x584] ss:$8 sps:$4 sm:$0xff]  }
 0x15a   :  { %v562_v38 = vpop.f32.mrb[50].mxu0  ;;  %v1232_v21 = vpop.f32.mrb[50].mxu1 }
 0x15b   :  { %v4681_v58 = vadd.f32 %v4256_v57, %v684_v41  ;;  %v4684_v39 = vadd.f32 %v4256_v57, %v1348_v40  ;;  %v685_v43 = vmul.f32 %v4249_v56, %v562_v38  ;;  %v1349_v62 = vmul.f32 %v4249_v56, %v1232_v21  ;;  %v564_v37 = vpop.f32.mrb[51].mxu0  ;;  %v1234_v12 = vpop.f32.mrb[51].mxu1 }
 0x15d   :  { %5633 = vst [vmem:[#allocation6_spill] sm:$0xff] %v4681_v58  ;;  %5634 = vst [vmem:[#allocation7_spill] sm:$0xff] %v4684_v39  ;;  %v4691_v34 = vadd.f32 %v4256_v57, %v685_v43  ;;  %v4694_v27 = vadd.f32 %v4256_v57, %v1349_v62  ;;  %1958 = vmatmul.mubr.bf16.gmra.mrb[156].mxu0 %v3671_v42  ;;  %2664 = vmatmul.mubr.bf16.gmra.mrb[156].mxu1 %v3672_v47  ;;  %v3677_v62 = vld [vmem:[%s5573_s0 + $0x400] ss:$8 sps:$4 sm:$0xff]  }
 0x15e   :  { %3295 = vmatprep.mubr.msk.bf16.mxu0 %vm356_vm0, %v3673_v33  ;;  %3415 = vmatprep.mubr.msk.bf16.mxu1 %vm356_vm0, %v3675_v25  ;;  %v3678_v42 = vld [vmem:[%s5573_s0 + $0x580] ss:$8 sps:$4 sm:$0xff]   ;;  %v3679_v25 = vld [vmem:[%s5573_s0 + $0x414] ss:$8 sps:$4 sm:$0xff]  }
 0x15f   :  { %5635 = vst [vmem:[#allocation8_spill] sm:$0xff] %v4691_v34  ;;  %5636 = vst [vmem:[#allocation9_spill] sm:$0xff] %v4694_v27 }
 0x160   :  { %v567_v37 = vpop.f32.mrb[52].mxu0  ;;  %v1237_v12 = vpop.f32.mrb[52].mxu1 }
 0x161   :  { %v686_v40 = vmul.f32 %v4249_v56, %v567_v37  ;;  %v1350_v38 = vmul.f32 %v4249_v56, %v1237_v12  ;;  %v569_v21 = vpop.f32.mrb[53].mxu0  ;;  %v1239_v43 = vpop.f32.mrb[53].mxu1  ;;  %v3681_v37 = vld [vmem:[%s5573_s0 + $0x594] ss:$8 sps:$4 sm:$0xff]  }
 0x162   :  { %v570_v47 = vpop.f32.mrb[54].mxu0  ;;  %v1240_v33 = vpop.f32.mrb[54].mxu1 }
 0x163   :  { %v4715_v12 = vadd.f32 %v4256_v57, %v686_v40  ;;  %v4718_v21 = vadd.f32 %v4256_v57, %v1350_v38  ;;  %v687_v43 = vmul.f32 %v4249_v56, %v570_v47  ;;  %v1351_v41 = vmul.f32 %v4249_v56, %v1240_v33  ;;  %v572_v15 = vpop.f32.mrb[55].mxu0  ;;  %v1242_v27 = vpop.f32.mrb[55].mxu1 }
 0x165   :  { %5637 = vst [vmem:[#allocation10_spill] sm:$0xff] %v4715_v12  ;;  %5638 = vst [vmem:[#allocation11_spill] sm:$0xff] %v4718_v21  ;;  %v4725_v39 = vadd.f32 %v4256_v57, %v687_v43  ;;  %v4728_v58 = vadd.f32 %v4256_v57, %v1351_v41  ;;  %1966 = vmatmul.mubr.bf16.gmra.mrb[160].mxu0 %v3677_v62  ;;  %2672 = vmatmul.mubr.bf16.gmra.mrb[160].mxu1 %v3678_v42  ;;  %v3683_v41 = vld [vmem:[%s5573_s0 + $0x410] ss:$8 sps:$4 sm:$0xff]  }
 0x166   :  { %3296 = vmatprep.mubr.msk.bf16.mxu0 %vm356_vm0, %v3679_v25  ;;  %3416 = vmatprep.mubr.msk.bf16.mxu1 %vm356_vm0, %v3681_v37  ;;  %v3684_v62 = vld [vmem:[%s5573_s0 + $0x590] ss:$8 sps:$4 sm:$0xff]   ;;  %v3685_v37 = vld [vmem:[%s5573_s0 + $0x424] ss:$8 sps:$4 sm:$0xff]  }
 0x167   :  { %5639 = vst [vmem:[#allocation12_spill] sm:$0xff] %v4725_v39  ;;  %5640 = vst [vmem:[#allocation13_spill] sm:$0xff] %v4728_v58 }
 0x168   :  { %v575_v15 = vpop.f32.mrb[56].mxu0  ;;  %v1245_v27 = vpop.f32.mrb[56].mxu1 }
 0x169   :  { %v688_v38 = vmul.f32 %v4249_v56, %v575_v15  ;;  %v1352_v47 = vmul.f32 %v4249_v56, %v1245_v27  ;;  %v577_v33 = vpop.f32.mrb[57].mxu0  ;;  %v1247_v43 = vpop.f32.mrb[57].mxu1  ;;  %v3687_v15 = vld [vmem:[%s5573_s0 + $0x5a4] ss:$8 sps:$4 sm:$0xff]  }
 0x16a   :  { %v578_v42 = vpop.f32.mrb[58].mxu0  ;;  %v1248_v25 = vpop.f32.mrb[58].mxu1 }
 0x16b   :  { %v4749_v27 = vadd.f32 %v4256_v57, %v688_v38  ;;  %v4752_v33 = vadd.f32 %v4256_v57, %v1352_v47  ;;  %v689_v43 = vmul.f32 %v4249_v56, %v578_v42  ;;  %v1353_v40 = vmul.f32 %v4249_v56, %v1248_v25  ;;  %v580_v34 = vpop.f32.mrb[59].mxu0  ;;  %v1250_v58 = vpop.f32.mrb[59].mxu1 }
 0x16d   :  { %5641 = vst [vmem:[#allocation14_spill] sm:$0xff] %v4749_v27  ;;  %5642 = vst [vmem:[#allocation15_spill] sm:$0xff] %v4752_v33  ;;  %v4759_v21 = vadd.f32 %v4256_v57, %v689_v43  ;;  %v4762_v12 = vadd.f32 %v4256_v57, %v1353_v40  ;;  %1974 = vmatmul.mubr.bf16.gmra.mrb[164].mxu0 %v3683_v41  ;;  %2680 = vmatmul.mubr.bf16.gmra.mrb[164].mxu1 %v3684_v62  ;;  %v3689_v40 = vld [vmem:[%s5573_s0 + $0x420] ss:$8 sps:$4 sm:$0xff]  }
 0x16e   :  { %3297 = vmatprep.mubr.msk.bf16.mxu0 %vm356_vm0, %v3685_v37  ;;  %3417 = vmatprep.mubr.msk.bf16.mxu1 %vm356_vm0, %v3687_v15  ;;  %v3690_v41 = vld [vmem:[%s5573_s0 + $0x5a0] ss:$8 sps:$4 sm:$0xff]   ;;  %v3691_v15 = vld [vmem:[%s5573_s0 + $0x434] ss:$8 sps:$4 sm:$0xff]  }
 0x16f   :  { %5643 = vst [vmem:[#allocation16_spill] sm:$0xff] %v4759_v21  ;;  %5644 = vst [vmem:[#allocation17_spill] sm:$0xff] %v4762_v12 }
 0x170   :  { %v583_v34 = vpop.f32.mrb[60].mxu0  ;;  %v1253_v58 = vpop.f32.mrb[60].mxu1 }
 0x171   :  { %v690_v47 = vmul.f32 %v4249_v56, %v583_v34  ;;  %v1354_v42 = vmul.f32 %v4249_v56, %v1253_v58  ;;  %v585_v25 = vpop.f32.mrb[61].mxu0  ;;  %v1255_v43 = vpop.f32.mrb[61].mxu1  ;;  %v3693_v34 = vld [vmem:[%s5573_s0 + $0x5b4] ss:$8 sps:$4 sm:$0xff]  }
 0x172   :  { %v586_v62 = vpop.f32.mrb[62].mxu0  ;;  %v1256_v37 = vpop.f32.mrb[62].mxu1 }
 0x173   :  { %v4783_v58 = vadd.f32 %v4256_v57, %v690_v47  ;;  %v4786_v25 = vadd.f32 %v4256_v57, %v1354_v42  ;;  %v691_v43 = vmul.f32 %v4249_v56, %v586_v62  ;;  %v1355_v38 = vmul.f32 %v4249_v56, %v1256_v37  ;;  %v588_v39 = vpop.f32.mrb[63].mxu0  ;;  %v1258_v12 = vpop.f32.mrb[63].mxu1 }
 0x175   :  { %5645 = vst [vmem:[#allocation18_spill] sm:$0xff] %v4783_v58  ;;  %5646 = vst [vmem:[#allocation19_spill] sm:$0xff] %v4786_v25  ;;  %v4793_v33 = vadd.f32 %v4256_v57, %v691_v43  ;;  %v4796_v27 = vadd.f32 %v4256_v57, %v1355_v38  ;;  %1982 = vmatmul.mubr.bf16.gmra.mrb[168].mxu0 %v3689_v40  ;;  %2688 = vmatmul.mubr.bf16.gmra.mrb[168].mxu1 %v3690_v41  ;;  %v3695_v38 = vld [vmem:[%s5573_s0 + $0x430] ss:$8 sps:$4 sm:$0xff]  }
 0x176   :  { %3298 = vmatprep.mubr.msk.bf16.mxu0 %vm356_vm0, %v3691_v15  ;;  %3418 = vmatprep.mubr.msk.bf16.mxu1 %vm356_vm0, %v3693_v34  ;;  %v3696_v40 = vld [vmem:[%s5573_s0 + $0x5b0] ss:$8 sps:$4 sm:$0xff]   ;;  %v3697_v34 = vld [vmem:[%s5573_s0 + $0x444] ss:$8 sps:$4 sm:$0xff]  }
 0x177   :  { %5647 = vst [vmem:[#allocation20_spill] sm:$0xff] %v4793_v33  ;;  %5648 = vst [vmem:[#allocation21_spill] sm:$0xff] %v4796_v27 }
 0x178   :  { %v591_v39 = vpop.f32.mrb[64].mxu0  ;;  %v1261_v12 = vpop.f32.mrb[64].mxu1 }
 0x179   :  { %v692_v42 = vmul.f32 %v4249_v56, %v591_v39  ;;  %v1356_v62 = vmul.f32 %v4249_v56, %v1261_v12  ;;  %v593_v37 = vpop.f32.mrb[65].mxu0  ;;  %v1263_v43 = vpop.f32.mrb[65].mxu1  ;;  %v3699_v39 = vld [vmem:[%s5573_s0 + $0x5c4] ss:$8 sps:$4 sm:$0xff]  }
 0x17a   :  { %v594_v41 = vpop.f32.mrb[66].mxu0  ;;  %v1264_v15 = vpop.f32.mrb[66].mxu1 }
 0x17b   :  { %v4817_v12 = vadd.f32 %v4256_v57, %v692_v42  ;;  %v4820_v37 = vadd.f32 %v4256_v57, %v1356_v62  ;;  %v693_v43 = vmul.f32 %v4249_v56, %v594_v41  ;;  %v1357_v47 = vmul.f32 %v4249_v56, %v1264_v15  ;;  %v596_v21 = vpop.f32.mrb[67].mxu0  ;;  %v1266_v27 = vpop.f32.mrb[67].mxu1 }
 0x17d   :  { %5649 = vst [vmem:[#allocation22_spill] sm:$0xff] %v4817_v12  ;;  %5650 = vst [vmem:[#allocation23_spill] sm:$0xff] %v4820_v37  ;;  %v4827_v25 = vadd.f32 %v4256_v57, %v693_v43  ;;  %v4830_v58 = vadd.f32 %v4256_v57, %v1357_v47  ;;  %1990 = vmatmul.mubr.bf16.gmra.mrb[172].mxu0 %v3695_v38  ;;  %2696 = vmatmul.mubr.bf16.gmra.mrb[172].mxu1 %v3696_v40  ;;  %v3701_v47 = vld [vmem:[%s5573_s0 + $0x440] ss:$8 sps:$4 sm:$0xff]  }
 0x17e   :  { %3299 = vmatprep.mubr.msk.bf16.mxu0 %vm356_vm0, %v3697_v34  ;;  %3419 = vmatprep.mubr.msk.bf16.mxu1 %vm356_vm0, %v3699_v39  ;;  %v3702_v38 = vld [vmem:[%s5573_s0 + $0x5c0] ss:$8 sps:$4 sm:$0xff]   ;;  %v3703_v39 = vld [vmem:[%s5573_s0 + $0x454] ss:$8 sps:$4 sm:$0xff]  }
 0x17f   :  { %5651 = vst [vmem:[#allocation24_spill] sm:$0xff] %v4827_v25  ;;  %5652 = vst [vmem:[#allocation25_spill] sm:$0xff] %v4830_v58 }
 0x180   :  { %v599_v21 = vpop.f32.mrb[68].mxu0  ;;  %v1269_v27 = vpop.f32.mrb[68].mxu1 }
 0x181   :  { %v694_v62 = vmul.f32 %v4249_v56, %v599_v21  ;;  %v1358_v41 = vmul.f32 %v4249_v56, %v1269_v27  ;;  %v601_v15 = vpop.f32.mrb[69].mxu0  ;;  %v1271_v43 = vpop.f32.mrb[69].mxu1  ;;  %v3705_v21 = vld [vmem:[%s5573_s0 + $0x5d4] ss:$8 sps:$4 sm:$0xff]  }
 0x182   :  { %v602_v40 = vpop.f32.mrb[70].mxu0  ;;  %v1272_v34 = vpop.f32.mrb[70].mxu1 }
 0x183   :  { %v4851_v27 = vadd.f32 %v4256_v57, %v694_v62  ;;  %v4854_v15 = vadd.f32 %v4256_v57, %v1358_v41  ;;  %v695_v43 = vmul.f32 %v4249_v56, %v602_v40  ;;  %v1359_v42 = vmul.f32 %v4249_v56, %v1272_v34  ;;  %v604_v33 = vpop.f32.mrb[71].mxu0  ;;  %v1274_v58 = vpop.f32.mrb[71].mxu1 }
 0x185   :  { %5653 = vst [vmem:[#allocation26_spill] sm:$0xff] %v4851_v27  ;;  %5654 = vst [vmem:[#allocation27_spill] sm:$0xff] %v4854_v15  ;;  %v4861_v37 = vadd.f32 %v4256_v57, %v695_v43  ;;  %v4864_v12 = vadd.f32 %v4256_v57, %v1359_v42  ;;  %1998 = vmatmul.mubr.bf16.gmra.mrb[176].mxu0 %v3701_v47  ;;  %2704 = vmatmul.mubr.bf16.gmra.mrb[176].mxu1 %v3702_v38  ;;  %v3707_v42 = vld [vmem:[%s5573_s0 + $0x450] ss:$8 sps:$4 sm:$0xff]  }
 0x186   :  { %3300 = vmatprep.mubr.msk.bf16.mxu0 %vm356_vm0, %v3703_v39  ;;  %3420 = vmatprep.mubr.msk.bf16.mxu1 %vm356_vm0, %v3705_v21  ;;  %v3708_v47 = vld [vmem:[%s5573_s0 + $0x5d0] ss:$8 sps:$4 sm:$0xff]   ;;  %v3709_v21 = vld [vmem:[%s5573_s0 + $0x464] ss:$8 sps:$4 sm:$0xff]  }
 0x187   :  { %5655 = vst [vmem:[#allocation28_spill] sm:$0xff] %v4861_v37  ;;  %5656 = vst [vmem:[#allocation29_spill] sm:$0xff] %v4864_v12 }
 0x188   :  { %v607_v33 = vpop.f32.mrb[72].mxu0  ;;  %v1277_v58 = vpop.f32.mrb[72].mxu1 }
 0x189   :  { %v696_v41 = vmul.f32 %v4249_v56, %v607_v33  ;;  %v1360_v40 = vmul.f32 %v4249_v56, %v1277_v58  ;;  %v609_v34 = vpop.f32.mrb[73].mxu0  ;;  %v1279_v43 = vpop.f32.mrb[73].mxu1  ;;  %v3711_v33 = vld [vmem:[%s5573_s0 + $0x5e4] ss:$8 sps:$4 sm:$0xff]  }
 0x18a   :  { %v610_v38 = vpop.f32.mrb[74].mxu0  ;;  %v1280_v39 = vpop.f32.mrb[74].mxu1 }
 0x18b   :  { %v4885_v58 = vadd.f32 %v4256_v57, %v696_v41  ;;  %v4888_v34 = vadd.f32 %v4256_v57, %v1360_v40  ;;  %v697_v43 = vmul.f32 %v4249_v56, %v610_v38  ;;  %v1361_v62 = vmul.f32 %v4249_v56, %v1280_v39  ;;  %v612_v25 = vpop.f32.mrb[75].mxu0  ;;  %v1282_v12 = vpop.f32.mrb[75].mxu1 }
 0x18d   :  { %5657 = vst [vmem:[#allocation30_spill] sm:$0xff] %v4885_v58  ;;  %5658 = vst [vmem:[#allocation31_spill] sm:$0xff] %v4888_v34  ;;  %v4895_v15 = vadd.f32 %v4256_v57, %v697_v43  ;;  %v4898_v27 = vadd.f32 %v4256_v57, %v1361_v62  ;;  %2006 = vmatmul.mubr.bf16.gmra.mrb[180].mxu0 %v3707_v42  ;;  %2712 = vmatmul.mubr.bf16.gmra.mrb[180].mxu1 %v3708_v47  ;;  %v3713_v62 = vld [vmem:[%s5573_s0 + $0x460] ss:$8 sps:$4 sm:$0xff]  }
 0x18e   :  { %3301 = vmatprep.mubr.msk.bf16.mxu0 %vm356_vm0, %v3709_v21  ;;  %3421 = vmatprep.mubr.msk.bf16.mxu1 %vm356_vm0, %v3711_v33  ;;  %v3714_v42 = vld [vmem:[%s5573_s0 + $0x5e0] ss:$8 sps:$4 sm:$0xff]   ;;  %v3715_v33 = vld [vmem:[%s5573_s0 + $0x474] ss:$8 sps:$4 sm:$0xff]  }
 0x18f   :  { %5659 = vst [vmem:[#allocation32_spill] sm:$0xff] %v4895_v15  ;;  %5660 = vst [vmem:[#allocation33_spill] sm:$0xff] %v4898_v27 }
 0x190   :  { %v615_v25 = vpop.f32.mrb[76].mxu0  ;;  %v1285_v12 = vpop.f32.mrb[76].mxu1 }
 0x191   :  { %v698_v40 = vmul.f32 %v4249_v56, %v615_v25  ;;  %v1362_v38 = vmul.f32 %v4249_v56, %v1285_v12  ;;  %v617_v39 = vpop.f32.mrb[77].mxu0  ;;  %v1287_v43 = vpop.f32.mrb[77].mxu1  ;;  %v3717_v56 = vld [vmem:[%s5573_s0 + $0x5f4] ss:$8 sps:$4 sm:$0xff]  }
 0x192   :  { %v618_v47 = vpop.f32.mrb[78].mxu0  ;;  %v1288_v21 = vpop.f32.mrb[78].mxu1  ;;  %v4927_v39 = vld [vmem:[%s5574_s2] ss:$0 sm:$0xff] }
 0x193   :  { %v4919_v25 = vadd.f32 %v4256_v57, %v698_v40  ;;  %v4922_v12 = vadd.f32 %v4256_v57, %v1362_v38  ;;  %v699_v43 = vmul.f32 %v4927_v39, %v618_v47  ;;  %v1363_v41 = vmul.f32 %v4927_v39, %v1288_v21  ;;  %v620_v37 = vpop.f32.mrb[79].mxu0  ;;  %v1290_v27 = vpop.f32.mrb[79].mxu1  ;;  %v4936_v40 = vld [vmem:[%s5575_s3] ss:$0 sm:$0xff] }
 0x195   :  { %5661 = vst [vmem:[#allocation34_spill] sm:$0xff] %v4919_v25  ;;  %5662 = vst [vmem:[#allocation35_spill] sm:$0xff] %v4922_v12  ;;  %v4939_v57 = vadd.f32 %v4936_v40, %v699_v43  ;;  %v4942_v38 = vadd.f32 %v4936_v40, %v1363_v41  ;;  %2014 = vmatmul.mubr.bf16.gmra.mrb[184].mxu0 %v3713_v62  ;;  %2720 = vmatmul.mubr.bf16.gmra.mrb[184].mxu1 %v3714_v42  ;;  %v3719_v41 = vld [vmem:[%s5573_s0 + $0x470] ss:$8 sps:$4 sm:$0xff]  }
 0x196   :  { %3302 = vmatprep.mubr.msk.bf16.mxu0 %vm356_vm0, %v3715_v33  ;;  %3422 = vmatprep.mubr.msk.bf16.mxu1 %vm356_vm0, %v3717_v56  ;;  %v3720_v62 = vld [vmem:[%s5573_s0 + $0x5f0] ss:$8 sps:$4 sm:$0xff]  }
 0x197   :  { %5663 = vst [vmem:[#allocation36_spill] sm:$0xff] %v4939_v57  ;;  %5664 = vst [vmem:[#allocation37_spill] sm:$0xff] %v4942_v38 }
 0x198   :  { %v623_v27 = vpop.f32.mrb[80].mxu0  ;;  %v1293_v47 = vpop.f32.mrb[80].mxu1 }
 0x199   :  { %v700_v21 = vmul.f32 %v4927_v39, %v623_v27  ;;  %v1364_v15 = vmul.f32 %v4927_v39, %v1293_v47  ;;  %v625_v43 = vpop.f32.mrb[81].mxu0  ;;  %v1295_v12 = vpop.f32.mrb[81].mxu1 }
 0x19a   :  { %v626_v42 = vpop.f32.mrb[82].mxu0  ;;  %v1296_v33 = vpop.f32.mrb[82].mxu1 }
 0x19b   :  { %v4957_v56 = vadd.f32 %v4936_v40, %v700_v21  ;;  %v4960_v37 = vadd.f32 %v4936_v40, %v1364_v15  ;;  %v701_v27 = vmul.f32 %v4927_v39, %v626_v42  ;;  %v1365_v12 = vmul.f32 %v4927_v39, %v1296_v33  ;;  %v628_v47 = vpop.f32.mrb[83].mxu0  ;;  %v1298_v43 = vpop.f32.mrb[83].mxu1 }
 0x19d   :  { %5665 = vst [vmem:[#allocation38_spill] sm:$0xff] %v4957_v56  ;;  %5666 = vst [vmem:[#allocation39_spill] sm:$0xff] %v4960_v37  ;;  %v4967_v57 = vadd.f32 %v4936_v40, %v701_v27  ;;  %v4970_v25 = vadd.f32 %v4936_v40, %v1365_v12  ;;  %2022 = vmatmul.mubr.bf16.gmra.mrb[188].mxu0 %v3719_v41  ;;  %2728 = vmatmul.mubr.bf16.gmra.mrb[188].mxu1 %v3720_v62 }
 0x19f   :  { %5667 = vst [vmem:[#allocation40_spill] sm:$0xff] %v4967_v57  ;;  %5668 = vst [vmem:[#allocation41_spill] sm:$0xff] %v4970_v25 }
 0x1a0   :  { %v631_v21 = vpop.f32.mrb[84].mxu0  ;;  %v1301_v42 = vpop.f32.mrb[84].mxu1 }
 0x1a1   :  { %v702_v33 = vmul.f32 %v4927_v39, %v631_v21  ;;  %v1366_v47 = vmul.f32 %v4927_v39, %v1301_v42  ;;  %v633_v43 = vpop.f32.mrb[85].mxu0  ;;  %v1303_v34 = vpop.f32.mrb[85].mxu1 }
 0x1a2   :  { %v634_v38 = vpop.f32.mrb[86].mxu0  ;;  %v1304_v37 = vpop.f32.mrb[86].mxu1 }
 0x1a3   :  { %v4977_v27 = vadd.f32 %v4936_v40, %v702_v33  ;;  %v4980_v12 = vadd.f32 %v4936_v40, %v1366_v47  ;;  %v703_v41 = vmul.f32 %v4927_v39, %v634_v38  ;;  %v1367_v62 = vmul.f32 %v4927_v39, %v1304_v37  ;;  %v636_v15 = vpop.f32.mrb[87].mxu0  ;;  %v1306_v25 = vpop.f32.mrb[87].mxu1 }
 0x1a5   :  { %5669 = vst [vmem:[#allocation42_spill] sm:$0xff] %v4977_v27  ;;  %5670 = vst [vmem:[#allocation43_spill] sm:$0xff] %v4980_v12  ;;  %v4987_v42 = vadd.f32 %v4936_v40, %v703_v41  ;;  %v4990_v34 = vadd.f32 %v4936_v40, %v1367_v62 }
 0x1a7   :  { %5671 = vst [vmem:[#allocation44_spill] sm:$0xff] %v4987_v42  ;;  %5672 = vst [vmem:[#allocation45_spill] sm:$0xff] %v4990_v34 }
 0x1a8   :  { %v639_v47 = vpop.f32.mrb[88].mxu0  ;;  %v1309_v43 = vpop.f32.mrb[88].mxu1 }
 0x1a9   :  { %v704_v38 = vmul.f32 %v4927_v39, %v639_v47  ;;  %v1368_v37 = vmul.f32 %v4927_v39, %v1309_v43  ;;  %v641_v15 = vpop.f32.mrb[89].mxu0  ;;  %v1311_v25 = vpop.f32.mrb[89].mxu1 }
 0x1aa   :  { %v642_v57 = vpop.f32.mrb[90].mxu0  ;;  %v1312_v56 = vpop.f32.mrb[90].mxu1 }
 0x1ab   :  { %v4997_v21 = vadd.f32 %v4936_v40, %v704_v38  ;;  %v5000_v41 = vadd.f32 %v4936_v40, %v1368_v37  ;;  %v705_v62 = vmul.f32 %v4927_v39, %v642_v57  ;;  %v1369_v33 = vmul.f32 %v4927_v39, %v1312_v56  ;;  %v644_v34 = vpop.f32.mrb[91].mxu0  ;;  %v1314_v42 = vpop.f32.mrb[91].mxu1 }
 0x1ad   :  { %5673 = vst [vmem:[#allocation46_spill] sm:$0xff] %v4997_v21  ;;  %5674 = vst [vmem:[#allocation47_spill] sm:$0xff] %v5000_v41  ;;  %v5007_v43 = vadd.f32 %v4936_v40, %v705_v62  ;;  %v5010_v15 = vadd.f32 %v4936_v40, %v1369_v33 }
 0x1af   :  { %5675 = vst [vmem:[#allocation48_spill] sm:$0xff] %v5007_v43  ;;  %5676 = vst [vmem:[#allocation49_spill] sm:$0xff] %v5010_v15 }
 0x1b0   :  { %v647_v37 = vpop.f32.mrb[92].mxu0  ;;  %v1317_v25 = vpop.f32.mrb[92].mxu1 }
 0x1b1   :  { %v706_v57 = vmul.f32 %v4927_v39, %v647_v37  ;;  %v1370_v56 = vmul.f32 %v4927_v39, %v1317_v25  ;;  %v649_v34 = vpop.f32.mrb[93].mxu0  ;;  %v1319_v42 = vpop.f32.mrb[93].mxu1 }
 0x1b2   :  { %v650_v12 = vpop.f32.mrb[94].mxu0  ;;  %v1320_v27 = vpop.f32.mrb[94].mxu1 }
 0x1b3   :  { %v5017_v47 = vadd.f32 %v4936_v40, %v706_v57  ;;  %v5020_v62 = vadd.f32 %v4936_v40, %v1370_v56  ;;  %v707_v33 = vmul.f32 %v4927_v39, %v650_v12  ;;  %v1371_v38 = vmul.f32 %v4927_v39, %v1320_v27  ;;  %v652_v15 = vpop.f32.mrb[95].mxu0  ;;  %v1322_v43 = vpop.f32.mrb[95].mxu1 }
 0x1b5   :  { %5677 = vst [vmem:[#allocation50_spill] sm:$0xff] %v5017_v47  ;;  %5678 = vst [vmem:[#allocation51_spill] sm:$0xff] %v5020_v62  ;;  %v5027_v25 = vadd.f32 %v4936_v40, %v707_v33  ;;  %v5030_v34 = vadd.f32 %v4936_v40, %v1371_v38 }
 0x1b7   :  { %5679 = vst [vmem:[#allocation52_spill] sm:$0xff] %v5027_v25  ;;  %5680 = vst [vmem:[#allocation53_spill] sm:$0xff] %v5030_v34  ;;  %v5681_v34 = vmax.f32 %v4273_v6, %v4276_v7 }
 0x1b8   :  { %v1839_v56 = vpop.f32.mrb[96].mxu0  ;;  %v2545_v42 = vpop.f32.mrb[96].mxu1 }
 0x1b9   :  { %v2030_v12 = vmul.f32 %v4927_v39, %v1839_v56  ;;  %v2736_v27 = vmul.f32 %v4927_v39, %v2545_v42  ;;  %v1841_v15 = vpop.f32.mrb[97].mxu0  ;;  %v2547_v43 = vpop.f32.mrb[97].mxu1 }
 0x1ba   :  { %v1842_v41 = vpop.f32.mrb[98].mxu0  ;;  %v2548_v21 = vpop.f32.mrb[98].mxu1  ;;  %v5682_v43 = vmax.f32 %v4283_v13, %v4286_v14 }
 0x1bb   :  { %v2078_v37 = vadd.f32 %v4936_v40, %v2030_v12  ;;  %v2784_v33 = vadd.f32 %v4936_v40, %v2736_v27  ;;  %v2031_v38 = vmul.f32 %v4927_v39, %v1842_v41  ;;  %v2737_v62 = vmul.f32 %v4927_v39, %v2548_v21  ;;  %v1844_v47 = vpop.f32.mrb[99].mxu0  ;;  %v2550_v57 = vpop.f32.mrb[99].mxu1 }
 0x1bd   :  { %v2126_v56 = vmax.f32 %v5681_v34, %v2078_v37  ;;  %v2079_v42 = vadd.f32 %v4936_v40, %v2031_v38  ;;  %v2785_v12 = vadd.f32 %v4936_v40, %v2737_v62  ;;  %v5683_v38 = vmax.f32 %v4307_v28, %v4310_v29 }
 0x1bf   :  { %v2832_v15 = vmax.f32 %v2126_v56, %v2784_v33  ;;  %v2127_v25 = vmax.f32 %v5682_v43, %v2079_v42 }
 0x1c0   :  { %v1847_v27 = vpop.f32.mrb[100].mxu0  ;;  %v2553_v58 = vpop.f32.mrb[100].mxu1 }
 0x1c1   :  { %v2880_v41 = vmax.f32 %v2832_v15, 0.0  ;;  %v2833_v52 = vmax.f32 %v2127_v25, %v2785_v12  ;;  %v2032_v21 = vmul.f32 %v4927_v39, %v1847_v27  ;;  %v2738_v47 = vmul.f32 %v4927_v39, %v2553_v58  ;;  %v1849_v57 = vpop.f32.mrb[101].mxu0  ;;  %v2555_v6 = vpop.f32.mrb[101].mxu1 }
 0x1c2   :  { %v1850_v7 = vpop.f32.mrb[102].mxu0  ;;  %v2556_v37 = vpop.f32.mrb[102].mxu1  ;;  %v5684_v15 = vmax.f32 %v4317_v35, %v4320_v36 }
 0x1c3   :  { %2928 = vst.msk [vmem:[%s5576_s4] sm:$0xff] %vm356_vm0, %v2880_v41  ;;  %v2881_v13 = vmax.f32 %v2833_v52, 0.0  ;;  %v2080_v14 = vadd.f32 %v4936_v40, %v2032_v21  ;;  %v2786_v62 = vadd.f32 %v4936_v40, %v2738_v47  ;;  %v2033_v25 = vmul.f32 %v4927_v39, %v1850_v7  ;;  %v1852_v34 = vpop.f32.mrb[103].mxu0  ;;  %v2558_v33 = vpop.f32.mrb[103].mxu1 }
 0x1c4   :  { %v2739_v58 = vmul.f32 %v4927_v39, %v2556_v37  ;;  %v5685_v33 = vmax.f32 %v4341_v50, %v4344_v51 }
 0x1c5   :  { %2929 = vst.msk [vmem:[%s5576_s4 + $0x8] sm:$0xff] %vm356_vm0, %v2881_v13  ;;  %v2128_v56 = vmax.f32 %v5683_v38, %v2080_v14  ;;  %v2081_v52 = vadd.f32 %v4936_v40, %v2033_v25 }
 0x1c6   :  { %v2787_v12 = vadd.f32 %v4936_v40, %v2739_v58 }
 0x1c7   :  { %v2834_v42 = vmax.f32 %v2128_v56, %v2786_v62  ;;  %v2129_v43 = vmax.f32 %v5684_v15, %v2081_v52  ;;  %v5686_v52 = vmax.f32 %v4351_v59, %v4354_v60 }
 0x1c8   :  { %v1855_v27 = vpop.f32.mrb[104].mxu0  ;;  %v2561_v41 = vpop.f32.mrb[104].mxu1 }
 0x1c9   :  { %v2882_v21 = vmax.f32 %v2834_v42, 0.0  ;;  %v2835_v47 = vmax.f32 %v2129_v43, %v2787_v12  ;;  %v2034_v57 = vmul.f32 %v4927_v39, %v1855_v27  ;;  %v2740_v6 = vmul.f32 %v4927_v39, %v2561_v41  ;;  %v1857_v7 = vpop.f32.mrb[105].mxu0  ;;  %v2563_v28 = vpop.f32.mrb[105].mxu1 }
 0x1ca   :  { %v1858_v29 = vpop.f32.mrb[106].mxu0  ;;  %v2564_v37 = vpop.f32.mrb[106].mxu1 }
 0x1cb   :  { %2930 = vst.msk [vmem:[%s5576_s4 + $0x10] sm:$0xff] %vm356_vm0, %v2882_v21  ;;  %v2883_v35 = vmax.f32 %v2835_v47, 0.0  ;;  %v2082_v36 = vadd.f32 %v4936_v40, %v2034_v57  ;;  %v2788_v13 = vadd.f32 %v4936_v40, %v2740_v6  ;;  %v2035_v14 = vmul.f32 %v4927_v39, %v1858_v29  ;;  %v1860_v62 = vpop.f32.mrb[107].mxu0  ;;  %v2566_v25 = vpop.f32.mrb[107].mxu1 }
 0x1cc   :  { %v2741_v34 = vmul.f32 %v4927_v39, %v2564_v37  ;;  %v5688_v25 = vmax.f32 %v4385_v23, %v4388_v24 }
 0x1cd   :  { %2931 = vst.msk [vmem:[%s5576_s4 + $0x18] sm:$0xff] %vm356_vm0, %v2883_v35  ;;  %v2130_v58 = vmax.f32 %v5685_v33, %v2082_v36  ;;  %v2083_v38 = vadd.f32 %v4936_v40, %v2035_v14  ;;  %v5687_v36 = vmax.f32 %v4375_v16, %v4378_v17 }
 0x1ce   :  { %v2789_v15 = vadd.f32 %v4936_v40, %v2741_v34 }
 0x1cf   :  { %v2836_v56 = vmax.f32 %v2130_v58, %v2788_v13  ;;  %v2131_v42 = vmax.f32 %v5686_v52, %v2083_v38 }
 0x1d0   :  { %v1863_v43 = vpop.f32.mrb[108].mxu0  ;;  %v2569_v12 = vpop.f32.mrb[108].mxu1 }
 0x1d1   :  { %v2884_v27 = vmax.f32 %v2836_v56, 0.0  ;;  %v2837_v41 = vmax.f32 %v2131_v42, %v2789_v15  ;;  %v2036_v21 = vmul.f32 %v4927_v39, %v1863_v43  ;;  %v2742_v47 = vmul.f32 %v4927_v39, %v2569_v12  ;;  %v1865_v57 = vpop.f32.mrb[109].mxu0  ;;  %v2571_v50 = vpop.f32.mrb[109].mxu1 }
 0x1d2   :  { %v1866_v51 = vpop.f32.mrb[110].mxu0  ;;  %v2572_v6 = vpop.f32.mrb[110].mxu1  ;;  %v5689_v50 = vmax.f32 %v4409_v44, %v4412_v45 }
 0x1d3   :  { %2932 = vst.msk [vmem:[%s5576_s4 + $0x20] sm:$0xff] %vm356_vm0, %v2884_v27  ;;  %v2885_v59 = vmax.f32 %v2837_v41, 0.0  ;;  %v2084_v60 = vadd.f32 %v4936_v40, %v2036_v21  ;;  %v2790_v7 = vadd.f32 %v4936_v40, %v2742_v47  ;;  %v2037_v28 = vmul.f32 %v4927_v39, %v1866_v51  ;;  %v1868_v29 = vpop.f32.mrb[111].mxu0  ;;  %v2574_v37 = vpop.f32.mrb[111].mxu1 }
 0x1d4   :  { %v2743_v35 = vmul.f32 %v4927_v39, %v2572_v6 }
 0x1d5   :  { %2933 = vst.msk [vmem:[%s5576_s4 + $0x28] sm:$0xff] %vm356_vm0, %v2885_v59  ;;  %v2132_v13 = vmax.f32 %v5687_v36, %v2084_v60  ;;  %v2085_v14 = vadd.f32 %v4936_v40, %v2037_v28  ;;  %v5690_v60 = vmax.f32 %v4419_v53, %v4422_v54 }
 0x1d6   :  { %v2791_v33 = vadd.f32 %v4936_v40, %v2743_v35 }
 0x1d7   :  { %v2838_v62 = vmax.f32 %v2132_v13, %v2790_v7  ;;  %v2133_v34 = vmax.f32 %v5688_v25, %v2085_v14 }
 0x1d8   :  { %v1871_v58 = vpop.f32.mrb[112].mxu0  ;;  %v2577_v38 = vpop.f32.mrb[112].mxu1 }
 0x1d9   :  { %v2886_v56 = vmax.f32 %v2838_v62, 0.0  ;;  %v2839_v52 = vmax.f32 %v2133_v34, %v2791_v33  ;;  %v2038_v42 = vmul.f32 %v4927_v39, %v1871_v58  ;;  %v2744_v15 = vmul.f32 %v4927_v39, %v2577_v38  ;;  %v1873_v43 = vpop.f32.mrb[113].mxu0  ;;  %v2579_v16 = vpop.f32.mrb[113].mxu1 }
 0x1da   :  { %v1874_v17 = vpop.f32.mrb[114].mxu0  ;;  %v2580_v12 = vpop.f32.mrb[114].mxu1  ;;  %v5692_v16 = vmax.f32 %v4453_v31, %v4456_v32 }
 0x1db   :  { %2934 = vst.msk [vmem:[%s5576_s4 + $0x30] sm:$0xff] %vm356_vm0, %v2886_v56  ;;  %v2887_v23 = vmax.f32 %v2839_v52, 0.0  ;;  %v2086_v24 = vadd.f32 %v4936_v40, %v2038_v42  ;;  %v2792_v27 = vadd.f32 %v4936_v40, %v2744_v15  ;;  %v2039_v41 = vmul.f32 %v4927_v39, %v1874_v17  ;;  %v1876_v21 = vpop.f32.mrb[115].mxu0  ;;  %v2582_v47 = vpop.f32.mrb[115].mxu1 }
 0x1dc   :  { %v2745_v57 = vmul.f32 %v4927_v39, %v2580_v12  ;;  %v5691_v52 = vmax.f32 %v4443_v18, %v4446_v19 }
 0x1dd   :  { %2935 = vst.msk [vmem:[%s5576_s4 + $0x38] sm:$0xff] %vm356_vm0, %v2887_v23  ;;  %v2134_v51 = vmax.f32 %v5689_v50, %v2086_v24  ;;  %v2087_v6 = vadd.f32 %v4936_v40, %v2039_v41 }
 0x1de   :  { %v2793_v28 = vadd.f32 %v4936_v40, %v2745_v57 }
 0x1df   :  { %v2840_v59 = vmax.f32 %v2134_v51, %v2792_v27  ;;  %v2135_v7 = vmax.f32 %v5690_v60, %v2087_v6 }
 0x1e0   :  { %v1879_v29 = vpop.f32.mrb[116].mxu0  ;;  %v2585_v37 = vpop.f32.mrb[116].mxu1 }
 0x1e1   :  { %v2888_v35 = vmax.f32 %v2840_v59, 0.0  ;;  %v2841_v36 = vmax.f32 %v2135_v7, %v2793_v28  ;;  %v2040_v13 = vmul.f32 %v4927_v39, %v1879_v29  ;;  %v2746_v14 = vmul.f32 %v4927_v39, %v2585_v37  ;;  %v1881_v62 = vpop.f32.mrb[117].mxu0  ;;  %v2587_v44 = vpop.f32.mrb[117].mxu1 }
 0x1e2   :  { %v1882_v45 = vpop.f32.mrb[118].mxu0  ;;  %v2588_v25 = vpop.f32.mrb[118].mxu1  ;;  %v5693_v28 = vmax.f32 %v4477_v0, %v4480_v1 }
 0x1e3   :  { %2936 = vst.msk [vmem:[%s5576_s4 + $0x40] sm:$0xff] %vm356_vm0, %v2888_v35  ;;  %v2889_v53 = vmax.f32 %v2841_v36, 0.0  ;;  %v2088_v54 = vadd.f32 %v4936_v40, %v2040_v13  ;;  %v2794_v34 = vadd.f32 %v4936_v40, %v2746_v14  ;;  %v2041_v33 = vmul.f32 %v4927_v39, %v1882_v45  ;;  %v1884_v58 = vpop.f32.mrb[119].mxu0  ;;  %v2590_v38 = vpop.f32.mrb[119].mxu1 }
 0x1e4   :  { %v2747_v56 = vmul.f32 %v4927_v39, %v2588_v25  ;;  %v5694_v36 = vmax.f32 %v4487_v9, %v4490_v10 }
 0x1e5   :  { %2937 = vst.msk [vmem:[%s5576_s4 + $0x48] sm:$0xff] %vm356_vm0, %v2889_v53  ;;  %v2136_v42 = vmax.f32 %v5691_v52, %v2088_v54  ;;  %v2089_v15 = vadd.f32 %v4936_v40, %v2041_v33 }
 0x1e6   :  { %v2795_v12 = vadd.f32 %v4936_v40, %v2747_v56 }
 0x1e7   :  { %v2842_v43 = vmax.f32 %v2136_v42, %v2794_v34  ;;  %v2137_v17 = vmax.f32 %v5692_v16, %v2089_v15  ;;  %v5695_v15 = vmax.f32 %v4511_v48, %v4514_v49 }
 0x1e8   :  { %v1887_v23 = vpop.f32.mrb[120].mxu0  ;;  %v2593_v24 = vpop.f32.mrb[120].mxu1 }
 0x1e9   :  { %v2890_v27 = vmax.f32 %v2842_v43, 0.0  ;;  %v2843_v41 = vmax.f32 %v2137_v17, %v2795_v12  ;;  %v2042_v21 = vmul.f32 %v4927_v39, %v1887_v23  ;;  %v2748_v47 = vmul.f32 %v4927_v39, %v2593_v24  ;;  %v1889_v57 = vpop.f32.mrb[121].mxu0  ;;  %v2595_v18 = vpop.f32.mrb[121].mxu1 }
 0x1ea   :  { %v1890_v19 = vpop.f32.mrb[122].mxu0  ;;  %v2596_v50 = vpop.f32.mrb[122].mxu1  ;;  %v5696_v12 = vmax.f32 %v4521_v5, %v4524_v20 }
 0x1eb   :  { %2938 = vst.msk [vmem:[%s5576_s4 + $0x50] sm:$0xff] %vm356_vm0, %v2890_v27  ;;  %v2891_v31 = vmax.f32 %v2843_v41, 0.0  ;;  %v2090_v32 = vadd.f32 %v4936_v40, %v2042_v21  ;;  %v2796_v51 = vadd.f32 %v4936_v40, %v2748_v47  ;;  %v2043_v6 = vmul.f32 %v4927_v39, %v1890_v19  ;;  %v1892_v59 = vpop.f32.mrb[123].mxu0  ;;  %v2598_v60 = vpop.f32.mrb[123].mxu1 }
 0x1ec   :  { %v2749_v7 = vmul.f32 %v4927_v39, %v2596_v50  ;;  %v5697_v60 = vmax.f32 %v4545_v2, %v4548_v3 }
 0x1ed   :  { %2939 = vst.msk [vmem:[%s5576_s4 + $0x58] sm:$0xff] %vm356_vm0, %v2891_v31  ;;  %v2138_v29 = vmax.f32 %v5693_v28, %v2090_v32  ;;  %v2091_v37 = vadd.f32 %v4936_v40, %v2043_v6 }
 0x1ee   :  { %v2797_v14 = vadd.f32 %v4936_v40, %v2749_v7 }
 0x1ef   :  { %v2844_v35 = vmax.f32 %v2138_v29, %v2796_v51  ;;  %v2139_v13 = vmax.f32 %v5694_v36, %v2091_v37  ;;  %v5698_v37 = vmax.f32 %v4555_v4, %v4558_v11 }
 0x1f0   :  { %v1895_v62 = vpop.f32.mrb[124].mxu0  ;;  %v2601_v44 = vpop.f32.mrb[124].mxu1 }
 0x1f1   :  { %v2892_v45 = vmax.f32 %v2844_v35, 0.0  ;;  %v2845_v25 = vmax.f32 %v2139_v13, %v2797_v14  ;;  %v2044_v53 = vmul.f32 %v4927_v39, %v1895_v62  ;;  %v2750_v54 = vmul.f32 %v4927_v39, %v2601_v44  ;;  %v1897_v34 = vpop.f32.mrb[125].mxu0  ;;  %v2603_v0 = vpop.f32.mrb[125].mxu1 }
 0x1f2   :  { %v1898_v1 = vpop.f32.mrb[126].mxu0  ;;  %v2604_v33 = vpop.f32.mrb[126].mxu1 }
 0x1f3   :  { %2940 = vst.msk [vmem:[%s5576_s4 + $0x60] sm:$0xff] %vm356_vm0, %v2892_v45  ;;  %v2893_v9 = vmax.f32 %v2845_v25, 0.0  ;;  %v2092_v10 = vadd.f32 %v4936_v40, %v2044_v53  ;;  %v2798_v58 = vadd.f32 %v4936_v40, %v2750_v54  ;;  %v2045_v38 = vmul.f32 %v4927_v39, %v1898_v1  ;;  %v1900_v56 = vpop.f32.mrb[127].mxu0  ;;  %v2606_v52 = vpop.f32.mrb[127].mxu1 }
 0x1f4   :  { %v2751_v42 = vmul.f32 %v4927_v39, %v2604_v33  ;;  %v5700_v52 = vmax.f32 %v4589_v30, %v4592_v55 }
 0x1f5   :  { %2941 = vst.msk [vmem:[%s5576_s4 + $0x68] sm:$0xff] %vm356_vm0, %v2893_v9  ;;  %v2140_v43 = vmax.f32 %v5695_v15, %v2092_v10  ;;  %v2093_v16 = vadd.f32 %v4936_v40, %v2045_v38  ;;  %v5699_v10 = vmax.f32 %v4579_v46, %v4582_v26 }
 0x1f6   :  { %v2799_v24 = vadd.f32 %v4936_v40, %v2751_v42 }
 0x1f7   :  { %v2846_v17 = vmax.f32 %v2140_v43, %v2798_v58  ;;  %v2141_v23 = vmax.f32 %v5696_v12, %v2093_v16 }
 0x1f8   :  { %v1903_v27 = vpop.f32.mrb[128].mxu0  ;;  %v2609_v41 = vpop.f32.mrb[128].mxu1 }
 0x1f9   :  { %v2894_v21 = vmax.f32 %v2846_v17, 0.0  ;;  %v2847_v47 = vmax.f32 %v2141_v23, %v2799_v24  ;;  %v2046_v57 = vmul.f32 %v4927_v39, %v1903_v27  ;;  %v2752_v18 = vmul.f32 %v4927_v39, %v2609_v41  ;;  %v1905_v19 = vpop.f32.mrb[129].mxu0  ;;  %v2611_v48 = vpop.f32.mrb[129].mxu1 }
 0x1fa   :  { %v1906_v49 = vpop.f32.mrb[130].mxu0  ;;  %v2612_v50 = vpop.f32.mrb[130].mxu1  ;;  %v5701_v48 = vmax.f32 %v4613_v8, %v4616_v63 }
 0x1fb   :  { %2942 = vst.msk [vmem:[%s5576_s4 + $0x70] sm:$0xff] %vm356_vm0, %v2894_v21  ;;  %v2895_v5 = vmax.f32 %v2847_v47, 0.0  ;;  %v2094_v20 = vadd.f32 %v4936_v40, %v2046_v57  ;;  %v2800_v31 = vadd.f32 %v4936_v40, %v2752_v18  ;;  %v2047_v32 = vmul.f32 %v4927_v39, %v1906_v49  ;;  %v1908_v51 = vpop.f32.mrb[131].mxu0  ;;  %v2614_v6 = vpop.f32.mrb[131].mxu1 }
 0x1fc   :  { %v2753_v59 = vmul.f32 %v4927_v39, %v2612_v50 }
 0x1fd   :  { %2943 = vst.msk [vmem:[%s5576_s4 + $0x78] sm:$0xff] %vm356_vm0, %v2895_v5  ;;  %v2142_v7 = vmax.f32 %v5697_v60, %v2094_v20  ;;  %v2095_v28 = vadd.f32 %v4936_v40, %v2047_v32  ;;  %v5702_v20 = vmax.f32 %v4623_v22, %v4626_v61 }
 0x1fe   :  { %v2801_v36 = vadd.f32 %v4936_v40, %v2753_v59 }
 0x1ff   :  { %v2848_v29 = vmax.f32 %v2142_v7, %v2800_v31  ;;  %v2143_v35 = vmax.f32 %v5698_v37, %v2095_v28 }
 0x200   :  { %v1911_v13 = vpop.f32.mrb[132].mxu0  ;;  %v2617_v14 = vpop.f32.mrb[132].mxu1 }
 0x201   :  { %v2896_v62 = vmax.f32 %v2848_v29, 0.0  ;;  %v2849_v44 = vmax.f32 %v2143_v35, %v2801_v36  ;;  %v2048_v45 = vmul.f32 %v4927_v39, %v1911_v13  ;;  %v2754_v25 = vmul.f32 %v4927_v39, %v2617_v14  ;;  %v1913_v53 = vpop.f32.mrb[133].mxu0  ;;  %v2619_v2 = vpop.f32.mrb[133].mxu1 }
 0x202   :  { %v1914_v3 = vpop.f32.mrb[134].mxu0  ;;  %v2620_v54 = vpop.f32.mrb[134].mxu1 }
 0x203   :  { %2944 = vst.msk [vmem:[%s5576_s4 + $0x80] sm:$0xff] %vm356_vm0, %v2896_v62  ;;  %v2897_v11 = vmax.f32 %v2849_v44, 0.0  ;;  %v2096_v4 = vadd.f32 %v4936_v40, %v2048_v45  ;;  %v2802_v34 = vadd.f32 %v4936_v40, %v2754_v25  ;;  %v2049_v0 = vmul.f32 %v4927_v39, %v1914_v3  ;;  %v1916_v1 = vpop.f32.mrb[135].mxu0  ;;  %v2622_v33 = vpop.f32.mrb[135].mxu1  ;;  %v5703_v44 = vld [vmem:[#allocation2_spill] sm:$0xff]  ;;  %v5704_v45 = vld [vmem:[#allocation3_spill] sm:$0xff] }
 0x204   :  { %v2755_v9 = vmul.f32 %v4927_v39, %v2620_v54  ;;  %v5705_v25 = vmax.f32 %v5703_v44, %v5704_v45  ;;  %v5706_v54 = vld [vmem:[#allocation4_spill] sm:$0xff]  ;;  %v5719_v45 = vld [vmem:[#allocation13_spill] sm:$0xff] }
 0x205   :  { %2945 = vst.msk [vmem:[%s5576_s4 + $0x88] sm:$0xff] %vm356_vm0, %v2897_v11  ;;  %v2144_v58 = vmax.f32 %v5699_v10, %v2096_v4  ;;  %v2097_v38 = vadd.f32 %v4936_v40, %v2049_v0  ;;  %v5707_v11 = vld [vmem:[#allocation5_spill] sm:$0xff]  ;;  %v5718_v44 = vld [vmem:[#allocation12_spill] sm:$0xff] }
 0x206   :  { %v2803_v15 = vadd.f32 %v4936_v40, %v2755_v9  ;;  %v5708_v4 = vmax.f32 %v5706_v54, %v5707_v11 }
 0x207   :  { %v2850_v56 = vmax.f32 %v2144_v58, %v2802_v34  ;;  %v2145_v42 = vmax.f32 %v5700_v52, %v2097_v38 }
 0x208   :  { %v1919_v43 = vpop.f32.mrb[136].mxu0  ;;  %v2625_v16 = vpop.f32.mrb[136].mxu1 }
 0x209   :  { %v2898_v17 = vmax.f32 %v2850_v56, 0.0  ;;  %v2851_v12 = vmax.f32 %v2145_v42, %v2803_v15  ;;  %v2050_v23 = vmul.f32 %v4927_v39, %v1919_v43  ;;  %v2756_v24 = vmul.f32 %v4927_v39, %v2625_v16  ;;  %v1921_v27 = vpop.f32.mrb[137].mxu0  ;;  %v2627_v46 = vpop.f32.mrb[137].mxu1 }
 0x20a   :  { %v1922_v26 = vpop.f32.mrb[138].mxu0  ;;  %v2628_v41 = vpop.f32.mrb[138].mxu1  ;;  %v5709_v46 = vld [vmem:[#allocation6_spill] sm:$0xff] }
 0x20b   :  { %2946 = vst.msk [vmem:[%s5576_s4 + $0x90] sm:$0xff] %vm356_vm0, %v2898_v17  ;;  %v2899_v55 = vmax.f32 %v2851_v12, 0.0  ;;  %v2098_v30 = vadd.f32 %v4936_v40, %v2050_v23  ;;  %v2804_v21 = vadd.f32 %v4936_v40, %v2756_v24  ;;  %v2051_v47 = vmul.f32 %v4927_v39, %v1922_v26  ;;  %v1924_v57 = vpop.f32.mrb[139].mxu0  ;;  %v2630_v18 = vpop.f32.mrb[139].mxu1  ;;  %v5710_v26 = vld [vmem:[#allocation7_spill] sm:$0xff] }
 0x20c   :  { %v2757_v19 = vmul.f32 %v4927_v39, %v2628_v41  ;;  %v5711_v41 = vmax.f32 %v5709_v46, %v5710_v26  ;;  %v5713_v57 = vld [vmem:[#allocation9_spill] sm:$0xff]  ;;  %v5724_v46 = vld [vmem:[#allocation16_spill] sm:$0xff] }
 0x20d   :  { %2947 = vst.msk [vmem:[%s5576_s4 + $0x98] sm:$0xff] %vm356_vm0, %v2899_v55  ;;  %v2146_v49 = vmax.f32 %v5701_v48, %v2098_v30  ;;  %v2099_v50 = vadd.f32 %v4936_v40, %v2051_v47  ;;  %v5712_v47 = vld [vmem:[#allocation8_spill] sm:$0xff]  ;;  %v5725_v26 = vld [vmem:[#allocation17_spill] sm:$0xff] }
 0x20e   :  { %v2805_v32 = vadd.f32 %v4936_v40, %v2757_v19  ;;  %v5714_v18 = vmax.f32 %v5712_v47, %v5713_v57 }
 0x20f   :  { %v2852_v5 = vmax.f32 %v2146_v49, %v2804_v21  ;;  %v2147_v31 = vmax.f32 %v5702_v20, %v2099_v50 }
 0x210   :  { %v1927_v51 = vpop.f32.mrb[140].mxu0  ;;  %v2633_v6 = vpop.f32.mrb[140].mxu1 }
 0x211   :  { %v2900_v59 = vmax.f32 %v2852_v5, 0.0  ;;  %v2853_v60 = vmax.f32 %v2147_v31, %v2805_v32  ;;  %v2052_v7 = vmul.f32 %v4927_v39, %v1927_v51  ;;  %v2758_v28 = vmul.f32 %v4927_v39, %v2633_v6  ;;  %v1929_v29 = vpop.f32.mrb[141].mxu0  ;;  %v2635_v8 = vpop.f32.mrb[141].mxu1 }
 0x212   :  { %v1930_v63 = vpop.f32.mrb[142].mxu0  ;;  %v2636_v37 = vpop.f32.mrb[142].mxu1 }
 0x213   :  { %2948 = vst.msk [vmem:[%s5576_s4 + $0xa0] sm:$0xff] %vm356_vm0, %v2900_v59  ;;  %v2901_v61 = vmax.f32 %v2853_v60, 0.0  ;;  %v2100_v22 = vadd.f32 %v4936_v40, %v2052_v7  ;;  %v2806_v35 = vadd.f32 %v4936_v40, %v2758_v28  ;;  %v2053_v36 = vmul.f32 %v4927_v39, %v1930_v63  ;;  %v1932_v13 = vpop.f32.mrb[143].mxu0  ;;  %v2638_v14 = vpop.f32.mrb[143].mxu1 }
 0x214   :  { %v2759_v62 = vmul.f32 %v4927_v39, %v2636_v37 }
 0x215   :  { %2949 = vst.msk [vmem:[%s5576_s4 + $0xa8] sm:$0xff] %vm356_vm0, %v2901_v61  ;;  %v2148_v53 = vmax.f32 %v5705_v25, %v2100_v22  ;;  %v2101_v2 = vadd.f32 %v4936_v40, %v2053_v36  ;;  %v5715_v22 = vld [vmem:[#allocation10_spill] sm:$0xff]  ;;  %v5720_v25 = vmax.f32 %v5718_v44, %v5719_v45 }
 0x216   :  { %v2807_v0 = vadd.f32 %v4936_v40, %v2759_v62 }
 0x217   :  { %v2854_v3 = vmax.f32 %v2148_v53, %v2806_v35  ;;  %v2149_v34 = vmax.f32 %v5708_v4, %v2101_v2  ;;  %v5716_v35 = vld [vmem:[#allocation11_spill] sm:$0xff] }
 0x218   :  { %v1935_v1 = vpop.f32.mrb[144].mxu0  ;;  %v2641_v33 = vpop.f32.mrb[144].mxu1  ;;  %v5717_v36 = vmax.f32 %v5715_v22, %v5716_v35  ;;  %v5730_v22 = vld [vmem:[#allocation20_spill] sm:$0xff]  ;;  %v5731_v35 = vld [vmem:[#allocation21_spill] sm:$0xff] }
 0x219   :  { %v2902_v9 = vmax.f32 %v2854_v3, 0.0  ;;  %v2855_v10 = vmax.f32 %v2149_v34, %v2807_v0  ;;  %v2054_v58 = vmul.f32 %v4927_v39, %v1935_v1  ;;  %v2760_v38 = vmul.f32 %v4927_v39, %v2641_v33  ;;  %v1937_v56 = vpop.f32.mrb[145].mxu0  ;;  %v2643_v52 = vpop.f32.mrb[145].mxu1 }
 0x21a   :  { %v1938_v42 = vpop.f32.mrb[146].mxu0  ;;  %v2644_v15 = vpop.f32.mrb[146].mxu1 }
 0x21b   :  { %2950 = vst.msk [vmem:[%s5576_s4 + $0xb0] sm:$0xff] %vm356_vm0, %v2902_v9  ;;  %v2903_v43 = vmax.f32 %v2855_v10, 0.0  ;;  %v2102_v16 = vadd.f32 %v4936_v40, %v2054_v58  ;;  %v2808_v17 = vadd.f32 %v4936_v40, %v2760_v38  ;;  %v2055_v12 = vmul.f32 %v4927_v39, %v1938_v42  ;;  %v1940_v23 = vpop.f32.mrb[147].mxu0  ;;  %v2646_v24 = vpop.f32.mrb[147].mxu1 }
 0x21c   :  { %v2761_v27 = vmul.f32 %v4927_v39, %v2644_v15 }
 0x21d   :  { %2951 = vst.msk [vmem:[%s5576_s4 + $0xb8] sm:$0xff] %vm356_vm0, %v2903_v43  ;;  %v2150_v55 = vmax.f32 %v5711_v41, %v2102_v16  ;;  %v2103_v30 = vadd.f32 %v4936_v40, %v2055_v12  ;;  %v5721_v16 = vld [vmem:[#allocation14_spill] sm:$0xff]  ;;  %v5726_v41 = vmax.f32 %v5724_v46, %v5725_v26 }
 0x21e   :  { %v2809_v48 = vadd.f32 %v4936_v40, %v2761_v27 }
 0x21f   :  { %v2856_v21 = vmax.f32 %v2150_v55, %v2808_v17  ;;  %v2151_v19 = vmax.f32 %v5714_v18, %v2103_v30  ;;  %v5722_v17 = vld [vmem:[#allocation15_spill] sm:$0xff] }
 0x220   :  { %v1943_v49 = vpop.f32.mrb[148].mxu0  ;;  %v2649_v50 = vpop.f32.mrb[148].mxu1  ;;  %v5723_v12 = vmax.f32 %v5721_v16, %v5722_v17  ;;  %v5736_v16 = vld [vmem:[#allocation24_spill] sm:$0xff]  ;;  %v5737_v17 = vld [vmem:[#allocation25_spill] sm:$0xff] }
 0x221   :  { %v2904_v5 = vmax.f32 %v2856_v21, 0.0  ;;  %v2857_v20 = vmax.f32 %v2151_v19, %v2809_v48  ;;  %v2056_v31 = vmul.f32 %v4927_v39, %v1943_v49  ;;  %v2762_v32 = vmul.f32 %v4927_v39, %v2649_v50  ;;  %v1945_v51 = vpop.f32.mrb[149].mxu0  ;;  %v2651_v6 = vpop.f32.mrb[149].mxu1 }
 0x222   :  { %v1946_v59 = vpop.f32.mrb[150].mxu0  ;;  %v2652_v60 = vpop.f32.mrb[150].mxu1 }
 0x223   :  { %2952 = vst.msk [vmem:[%s5576_s4 + $0xc0] sm:$0xff] %vm356_vm0, %v2904_v5  ;;  %v2905_v7 = vmax.f32 %v2857_v20, 0.0  ;;  %v2104_v28 = vadd.f32 %v4936_v40, %v2056_v31  ;;  %v2810_v29 = vadd.f32 %v4936_v40, %v2762_v32  ;;  %v2057_v8 = vmul.f32 %v4927_v39, %v1946_v59  ;;  %v1948_v63 = vpop.f32.mrb[151].mxu0  ;;  %v2654_v37 = vpop.f32.mrb[151].mxu1 }
 0x224   :  { %v2763_v61 = vmul.f32 %v4927_v39, %v2652_v60 }
 0x225   :  { %2953 = vst.msk [vmem:[%s5576_s4 + $0xc8] sm:$0xff] %vm356_vm0, %v2905_v7  ;;  %v2152_v13 = vmax.f32 %v5717_v36, %v2104_v28  ;;  %v2105_v14 = vadd.f32 %v4936_v40, %v2057_v8  ;;  %v5727_v28 = vld [vmem:[#allocation18_spill] sm:$0xff]  ;;  %v5732_v36 = vmax.f32 %v5730_v22, %v5731_v35 }
 0x226   :  { %v2811_v2 = vadd.f32 %v4936_v40, %v2763_v61 }
 0x227   :  { %v2858_v62 = vmax.f32 %v2152_v13, %v2810_v29  ;;  %v2153_v53 = vmax.f32 %v5720_v25, %v2105_v14  ;;  %v5728_v29 = vld [vmem:[#allocation19_spill] sm:$0xff] }
 0x228   :  { %v1951_v3 = vpop.f32.mrb[152].mxu0  ;;  %v2657_v54 = vpop.f32.mrb[152].mxu1  ;;  %v5729_v8 = vmax.f32 %v5727_v28, %v5728_v29  ;;  %v5742_v28 = vld [vmem:[#allocation28_spill] sm:$0xff]  ;;  %v5743_v29 = vld [vmem:[#allocation29_spill] sm:$0xff] }
 0x229   :  { %v2906_v11 = vmax.f32 %v2858_v62, 0.0  ;;  %v2859_v4 = vmax.f32 %v2153_v53, %v2811_v2  ;;  %v2058_v34 = vmul.f32 %v4927_v39, %v1951_v3  ;;  %v2764_v0 = vmul.f32 %v4927_v39, %v2657_v54  ;;  %v1953_v1 = vpop.f32.mrb[153].mxu0  ;;  %v2659_v33 = vpop.f32.mrb[153].mxu1 }
 0x22a   :  { %v1954_v9 = vpop.f32.mrb[154].mxu0  ;;  %v2660_v10 = vpop.f32.mrb[154].mxu1 }
 0x22b   :  { %2954 = vst.msk [vmem:[%s5576_s4 + $0xd0] sm:$0xff] %vm356_vm0, %v2906_v11  ;;  %v2907_v58 = vmax.f32 %v2859_v4, 0.0  ;;  %v2106_v38 = vadd.f32 %v4936_v40, %v2058_v34  ;;  %v2812_v56 = vadd.f32 %v4936_v40, %v2764_v0  ;;  %v2059_v52 = vmul.f32 %v4927_v39, %v1954_v9  ;;  %v1956_v42 = vpop.f32.mrb[155].mxu0  ;;  %v2662_v15 = vpop.f32.mrb[155].mxu1 }
 0x22c   :  { %v2765_v43 = vmul.f32 %v4927_v39, %v2660_v10 }
 0x22d   :  { %2955 = vst.msk [vmem:[%s5576_s4 + $0xd8] sm:$0xff] %vm356_vm0, %v2907_v58  ;;  %v2154_v23 = vmax.f32 %v5723_v12, %v2106_v38  ;;  %v2107_v24 = vadd.f32 %v4936_v40, %v2059_v52  ;;  %v5733_v38 = vld [vmem:[#allocation22_spill] sm:$0xff]  ;;  %v5738_v12 = vmax.f32 %v5736_v16, %v5737_v17 }
 0x22e   :  { %v2813_v30 = vadd.f32 %v4936_v40, %v2765_v43 }
 0x22f   :  { %v2860_v27 = vmax.f32 %v2154_v23, %v2812_v56  ;;  %v2155_v55 = vmax.f32 %v5726_v41, %v2107_v24  ;;  %v5734_v56 = vld [vmem:[#allocation23_spill] sm:$0xff] }
 0x230   :  { %v1959_v21 = vpop.f32.mrb[156].mxu0  ;;  %v2665_v47 = vpop.f32.mrb[156].mxu1  ;;  %v5735_v52 = vmax.f32 %v5733_v38, %v5734_v56  ;;  %v5748_v38 = vld [vmem:[#allocation32_spill] sm:$0xff]  ;;  %v5749_v56 = vld [vmem:[#allocation33_spill] sm:$0xff] }
 0x231   :  { %v2908_v57 = vmax.f32 %v2860_v27, 0.0  ;;  %v2861_v18 = vmax.f32 %v2155_v55, %v2813_v30  ;;  %v2060_v19 = vmul.f32 %v4927_v39, %v1959_v21  ;;  %v2766_v48 = vmul.f32 %v4927_v39, %v2665_v47  ;;  %v1961_v49 = vpop.f32.mrb[157].mxu0  ;;  %v2667_v50 = vpop.f32.mrb[157].mxu1 }
 0x232   :  { %v1962_v5 = vpop.f32.mrb[158].mxu0  ;;  %v2668_v20 = vpop.f32.mrb[158].mxu1 }
 0x233   :  { %2956 = vst.msk [vmem:[%s5576_s4 + $0xe0] sm:$0xff] %vm356_vm0, %v2908_v57  ;;  %v2909_v31 = vmax.f32 %v2861_v18, 0.0  ;;  %v2108_v32 = vadd.f32 %v4936_v40, %v2060_v19  ;;  %v2814_v51 = vadd.f32 %v4936_v40, %v2766_v48  ;;  %v2061_v6 = vmul.f32 %v4927_v39, %v1962_v5  ;;  %v1964_v59 = vpop.f32.mrb[159].mxu0  ;;  %v2670_v60 = vpop.f32.mrb[159].mxu1 }
 0x234   :  { %v2767_v7 = vmul.f32 %v4927_v39, %v2668_v20 }
 0x235   :  { %2957 = vst.msk [vmem:[%s5576_s4 + $0xe8] sm:$0xff] %vm356_vm0, %v2909_v31  ;;  %v2156_v63 = vmax.f32 %v5729_v8, %v2108_v32  ;;  %v2109_v37 = vadd.f32 %v4936_v40, %v2061_v6  ;;  %v5739_v32 = vld [vmem:[#allocation26_spill] sm:$0xff]  ;;  %v5744_v8 = vmax.f32 %v5742_v28, %v5743_v29 }
 0x236   :  { %v2815_v14 = vadd.f32 %v4936_v40, %v2767_v7 }
 0x237   :  { %v2862_v61 = vmax.f32 %v2156_v63, %v2814_v51  ;;  %v2157_v13 = vmax.f32 %v5732_v36, %v2109_v37  ;;  %v5740_v51 = vld [vmem:[#allocation27_spill] sm:$0xff]  ;;  %v5425_v36 = vld [vmem:[%s5574_s2] ss:$0 sm:$0xff] }
 0x238   :  { %v1967_v62 = vpop.f32.mrb[160].mxu0  ;;  %v2673_v44 = vpop.f32.mrb[160].mxu1  ;;  %v5741_v6 = vmax.f32 %v5739_v32, %v5740_v51  ;;  %v5754_v32 = vld [vmem:[#allocation36_spill] sm:$0xff]  ;;  %v5755_v51 = vld [vmem:[#allocation37_spill] sm:$0xff] }
 0x239   :  { %v2910_v45 = vmax.f32 %v2862_v61, 0.0  ;;  %v2863_v25 = vmax.f32 %v2157_v13, %v2815_v14  ;;  %v2062_v53 = vmul.f32 %v4927_v39, %v1967_v62  ;;  %v2768_v2 = vmul.f32 %v4927_v39, %v2673_v44  ;;  %v1969_v3 = vpop.f32.mrb[161].mxu0  ;;  %v2675_v54 = vpop.f32.mrb[161].mxu1 }
 0x23a   :  { %v1970_v11 = vpop.f32.mrb[162].mxu0  ;;  %v2676_v4 = vpop.f32.mrb[162].mxu1 }
 0x23b   :  { %2958 = vst.msk [vmem:[%s5576_s4 + $0xf0] sm:$0xff] %vm356_vm0, %v2910_v45  ;;  %v2911_v34 = vmax.f32 %v2863_v25, 0.0  ;;  %v2110_v0 = vadd.f32 %v4936_v40, %v2062_v53  ;;  %v2816_v1 = vadd.f32 %v4936_v40, %v2768_v2  ;;  %v2063_v33 = vmul.f32 %v4927_v39, %v1970_v11  ;;  %v1972_v9 = vpop.f32.mrb[163].mxu0  ;;  %v2678_v10 = vpop.f32.mrb[163].mxu1  ;;  %v5436_v53 = vld [vmem:[%s5575_s3] ss:$0 sm:$0xff] }
 0x23c   :  { %v2769_v58 = vmul.f32 %v4927_v39, %v2676_v4 }
 0x23d   :  { %2959 = vst.msk [vmem:[%s5576_s4 + $0xf8] sm:$0xff] %vm356_vm0, %v2911_v34  ;;  %v2158_v42 = vmax.f32 %v5735_v52, %v2110_v0  ;;  %v2111_v15 = vadd.f32 %v4936_v40, %v2063_v33  ;;  %v5745_v0 = vld [vmem:[#allocation30_spill] sm:$0xff]  ;;  %v5750_v52 = vmax.f32 %v5748_v38, %v5749_v56 }
 0x23e   :  { %v2817_v24 = vadd.f32 %v4936_v40, %v2769_v58 }
 0x23f   :  { %v2864_v43 = vmax.f32 %v2158_v42, %v2816_v1  ;;  %v2159_v23 = vmax.f32 %v5738_v12, %v2111_v15  ;;  %v5746_v1 = vld [vmem:[#allocation31_spill] sm:$0xff] }
 0x240   :  { %v1975_v27 = vpop.f32.mrb[164].mxu0  ;;  %v2681_v46 = vpop.f32.mrb[164].mxu1  ;;  %v5747_v33 = vmax.f32 %v5745_v0, %v5746_v1  ;;  %v5760_v0 = vld [vmem:[#allocation40_spill] sm:$0xff]  ;;  %v5761_v1 = vld [vmem:[#allocation41_spill] sm:$0xff] }
 0x241   :  { %v2912_v26 = vmax.f32 %v2864_v43, 0.0  ;;  %v2865_v41 = vmax.f32 %v2159_v23, %v2817_v24  ;;  %v2064_v55 = vmul.f32 %v4927_v39, %v1975_v27  ;;  %v2770_v30 = vmul.f32 %v4927_v39, %v2681_v46  ;;  %v1977_v21 = vpop.f32.mrb[165].mxu0  ;;  %v2683_v47 = vpop.f32.mrb[165].mxu1 }
 0x242   :  { %v1978_v57 = vpop.f32.mrb[166].mxu0  ;;  %v2684_v18 = vpop.f32.mrb[166].mxu1 }
 0x243   :  { %2960 = vst.msk [vmem:[%s5576_s4 + $0x100] sm:$0xff] %vm356_vm0, %v2912_v26  ;;  %v2913_v19 = vmax.f32 %v2865_v41, 0.0  ;;  %v2112_v48 = vadd.f32 %v4936_v40, %v2064_v55  ;;  %v2818_v49 = vadd.f32 %v4936_v40, %v2770_v30  ;;  %v2065_v50 = vmul.f32 %v4927_v39, %v1978_v57  ;;  %v1980_v5 = vpop.f32.mrb[167].mxu0  ;;  %v2686_v20 = vpop.f32.mrb[167].mxu1 }
 0x244   :  { %v2771_v31 = vmul.f32 %v4927_v39, %v2684_v18 }
 0x245   :  { %2961 = vst.msk [vmem:[%s5576_s4 + $0x108] sm:$0xff] %vm356_vm0, %v2913_v19  ;;  %v2160_v59 = vmax.f32 %v5741_v6, %v2112_v48  ;;  %v2113_v60 = vadd.f32 %v4936_v40, %v2065_v50  ;;  %v5751_v48 = vld [vmem:[#allocation34_spill] sm:$0xff]  ;;  %v5756_v6 = vmax.f32 %v5754_v32, %v5755_v51 }
 0x246   :  { %v2819_v37 = vadd.f32 %v4936_v40, %v2771_v31 }
 0x247   :  { %v2866_v7 = vmax.f32 %v2160_v59, %v2818_v49  ;;  %v2161_v63 = vmax.f32 %v5744_v8, %v2113_v60  ;;  %v5752_v49 = vld [vmem:[#allocation35_spill] sm:$0xff] }
 0x248   :  { %v1983_v61 = vpop.f32.mrb[168].mxu0  ;;  %v2689_v39 = vpop.f32.mrb[168].mxu1  ;;  %v5753_v50 = vmax.f32 %v5751_v48, %v5752_v49  ;;  %v5766_v48 = vld [vmem:[#allocation44_spill] sm:$0xff]  ;;  %v5767_v49 = vld [vmem:[#allocation45_spill] sm:$0xff] }
 0x249   :  { %v2914_v22 = vmax.f32 %v2866_v7, 0.0  ;;  %v2867_v35 = vmax.f32 %v2161_v63, %v2819_v37  ;;  %v2066_v13 = vmul.f32 %v5425_v36, %v1983_v61  ;;  %v2772_v14 = vmul.f32 %v5425_v36, %v2689_v39  ;;  %v1985_v62 = vpop.f32.mrb[169].mxu0  ;;  %v2691_v44 = vpop.f32.mrb[169].mxu1 }
 0x24a   :  { %v1986_v45 = vpop.f32.mrb[170].mxu0  ;;  %v2692_v25 = vpop.f32.mrb[170].mxu1 }
 0x24b   :  { %2962 = vst.msk [vmem:[%s5576_s4 + $0x110] sm:$0xff] %vm356_vm0, %v2914_v22  ;;  %v2915_v40 = vmax.f32 %v2867_v35, 0.0  ;;  %v2114_v2 = vadd.f32 %v5436_v53, %v2066_v13  ;;  %v2820_v3 = vadd.f32 %v5436_v53, %v2772_v14  ;;  %v2067_v54 = vmul.f32 %v5425_v36, %v1986_v45  ;;  %v1988_v11 = vpop.f32.mrb[171].mxu0  ;;  %v2694_v4 = vpop.f32.mrb[171].mxu1 }
 0x24c   :  { %v2773_v34 = vmul.f32 %v5425_v36, %v2692_v25 }
 0x24d   :  { %2963 = vst.msk [vmem:[%s5576_s4 + $0x118] sm:$0xff] %vm356_vm0, %v2915_v40  ;;  %v2162_v9 = vmax.f32 %v5747_v33, %v2114_v2  ;;  %v2115_v10 = vadd.f32 %v5436_v53, %v2067_v54  ;;  %v5757_v2 = vld [vmem:[#allocation38_spill] sm:$0xff]  ;;  %v5762_v33 = vmax.f32 %v5760_v0, %v5761_v1 }
 0x24e   :  { %v2821_v15 = vadd.f32 %v5436_v53, %v2773_v34 }
 0x24f   :  { %v2868_v58 = vmax.f32 %v2162_v9, %v2820_v3  ;;  %v2163_v42 = vmax.f32 %v5750_v52, %v2115_v10  ;;  %v5758_v3 = vld [vmem:[#allocation39_spill] sm:$0xff] }
 0x250   :  { %v1991_v43 = vpop.f32.mrb[172].mxu0  ;;  %v2697_v16 = vpop.f32.mrb[172].mxu1  ;;  %v5759_v54 = vmax.f32 %v5757_v2, %v5758_v3  ;;  %v5772_v2 = vld [vmem:[#allocation48_spill] sm:$0xff]  ;;  %v5773_v3 = vld [vmem:[#allocation49_spill] sm:$0xff] }
 0x251   :  { %v2916_v17 = vmax.f32 %v2868_v58, 0.0  ;;  %v2869_v12 = vmax.f32 %v2163_v42, %v2821_v15  ;;  %v2068_v23 = vmul.f32 %v5425_v36, %v1991_v43  ;;  %v2774_v24 = vmul.f32 %v5425_v36, %v2697_v16  ;;  %v1993_v27 = vpop.f32.mrb[173].mxu0  ;;  %v2699_v46 = vpop.f32.mrb[173].mxu1 }
 0x252   :  { %v1994_v26 = vpop.f32.mrb[174].mxu0  ;;  %v2700_v41 = vpop.f32.mrb[174].mxu1 }
 0x253   :  { %2964 = vst.msk [vmem:[%s5576_s4 + $0x120] sm:$0xff] %vm356_vm0, %v2916_v17  ;;  %v2917_v55 = vmax.f32 %v2869_v12, 0.0  ;;  %v2116_v30 = vadd.f32 %v5436_v53, %v2068_v23  ;;  %v2822_v21 = vadd.f32 %v5436_v53, %v2774_v24  ;;  %v2069_v47 = vmul.f32 %v5425_v36, %v1994_v26  ;;  %v1996_v57 = vpop.f32.mrb[175].mxu0  ;;  %v2702_v18 = vpop.f32.mrb[175].mxu1 }
 0x254   :  { %v2775_v19 = vmul.f32 %v5425_v36, %v2700_v41 }
 0x255   :  { %2965 = vst.msk [vmem:[%s5576_s4 + $0x128] sm:$0xff] %vm356_vm0, %v2917_v55  ;;  %v2164_v5 = vmax.f32 %v5753_v50, %v2116_v30  ;;  %v2117_v20 = vadd.f32 %v5436_v53, %v2069_v47  ;;  %v5763_v30 = vld [vmem:[#allocation42_spill] sm:$0xff]  ;;  %v5768_v50 = vmax.f32 %v5766_v48, %v5767_v49 }
 0x256   :  { %v2823_v60 = vadd.f32 %v5436_v53, %v2775_v19 }
 0x257   :  { %v2870_v31 = vmax.f32 %v2164_v5, %v2822_v21  ;;  %v2165_v59 = vmax.f32 %v5756_v6, %v2117_v20  ;;  %v5764_v21 = vld [vmem:[#allocation43_spill] sm:$0xff] }
 0x258   :  { %v1999_v7 = vpop.f32.mrb[176].mxu0  ;;  %v2705_v28 = vpop.f32.mrb[176].mxu1  ;;  %v5765_v47 = vmax.f32 %v5763_v30, %v5764_v21  ;;  %v5778_v30 = vld [vmem:[#allocation52_spill] sm:$0xff]  ;;  %v5779_v21 = vld [vmem:[#allocation53_spill] sm:$0xff] }
 0x259   :  { %v2918_v29 = vmax.f32 %v2870_v31, 0.0  ;;  %v2871_v8 = vmax.f32 %v2165_v59, %v2823_v60  ;;  %v2070_v63 = vmul.f32 %v5425_v36, %v1999_v7  ;;  %v2776_v37 = vmul.f32 %v5425_v36, %v2705_v28  ;;  %v2001_v61 = vpop.f32.mrb[177].mxu0  ;;  %v2707_v39 = vpop.f32.mrb[177].mxu1 }
 0x25a   :  { %v2002_v22 = vpop.f32.mrb[178].mxu0  ;;  %v2708_v35 = vpop.f32.mrb[178].mxu1 }
 0x25b   :  { %2966 = vst.msk [vmem:[%s5576_s4 + $0x130] sm:$0xff] %vm356_vm0, %v2918_v29  ;;  %v2919_v13 = vmax.f32 %v2871_v8, 0.0  ;;  %v2118_v14 = vadd.f32 %v5436_v53, %v2070_v63  ;;  %v2824_v62 = vadd.f32 %v5436_v53, %v2776_v37  ;;  %v2071_v44 = vmul.f32 %v5425_v36, %v2002_v22  ;;  %v2004_v45 = vpop.f32.mrb[179].mxu0  ;;  %v2710_v25 = vpop.f32.mrb[179].mxu1 }
 0x25c   :  { %v2777_v40 = vmul.f32 %v5425_v36, %v2708_v35 }
 0x25d   :  { %2967 = vst.msk [vmem:[%s5576_s4 + $0x138] sm:$0xff] %vm356_vm0, %v2919_v13  ;;  %v2166_v11 = vmax.f32 %v5759_v54, %v2118_v14  ;;  %v2119_v4 = vadd.f32 %v5436_v53, %v2071_v44  ;;  %v5769_v14 = vld [vmem:[#allocation46_spill] sm:$0xff]  ;;  %v5774_v54 = vmax.f32 %v5772_v2, %v5773_v3 }
 0x25e   :  { %v2825_v10 = vadd.f32 %v5436_v53, %v2777_v40 }
 0x25f   :  { %v2872_v34 = vmax.f32 %v2166_v11, %v2824_v62  ;;  %v2167_v9 = vmax.f32 %v5762_v33, %v2119_v4  ;;  %v5770_v62 = vld [vmem:[#allocation47_spill] sm:$0xff] }
 0x260   :  { %v2007_v58 = vpop.f32.mrb[180].mxu0  ;;  %v2713_v38 = vpop.f32.mrb[180].mxu1  ;;  %v5771_v44 = vmax.f32 %v5769_v14, %v5770_v62 }
 0x261   :  { %v2920_v56 = vmax.f32 %v2872_v34, 0.0  ;;  %v2873_v52 = vmax.f32 %v2167_v9, %v2825_v10  ;;  %v2072_v42 = vmul.f32 %v5425_v36, %v2007_v58  ;;  %v2778_v15 = vmul.f32 %v5425_v36, %v2713_v38  ;;  %v2009_v43 = vpop.f32.mrb[181].mxu0  ;;  %v2715_v16 = vpop.f32.mrb[181].mxu1 }
 0x262   :  { %v2010_v17 = vpop.f32.mrb[182].mxu0  ;;  %v2716_v12 = vpop.f32.mrb[182].mxu1 }
 0x263   :  { %2968 = vst.msk [vmem:[%s5576_s4 + $0x140] sm:$0xff] %vm356_vm0, %v2920_v56  ;;  %v2921_v23 = vmax.f32 %v2873_v52, 0.0  ;;  %v2120_v24 = vadd.f32 %v5436_v53, %v2072_v42  ;;  %v2826_v27 = vadd.f32 %v5436_v53, %v2778_v15  ;;  %v2073_v46 = vmul.f32 %v5425_v36, %v2010_v17  ;;  %v2012_v26 = vpop.f32.mrb[183].mxu0  ;;  %v2718_v41 = vpop.f32.mrb[183].mxu1 }
 0x264   :  { %v2779_v55 = vmul.f32 %v5425_v36, %v2716_v12 }
 0x265   :  { %2969 = vst.msk [vmem:[%s5576_s4 + $0x148] sm:$0xff] %vm356_vm0, %v2921_v23  ;;  %v2168_v57 = vmax.f32 %v5765_v47, %v2120_v24  ;;  %v2121_v18 = vadd.f32 %v5436_v53, %v2073_v46  ;;  %v5775_v24 = vld [vmem:[#allocation50_spill] sm:$0xff]  ;;  %v5780_v47 = vmax.f32 %v5778_v30, %v5779_v21 }
 0x266   :  { %v2827_v20 = vadd.f32 %v5436_v53, %v2779_v55 }
 0x267   :  { %v2874_v19 = vmax.f32 %v2168_v57, %v2826_v27  ;;  %v2169_v5 = vmax.f32 %v5768_v50, %v2121_v18  ;;  %v5776_v27 = vld [vmem:[#allocation51_spill] sm:$0xff] }
 0x268   :  { %v2015_v31 = vpop.f32.mrb[184].mxu0  ;;  %v2721_v32 = vpop.f32.mrb[184].mxu1  ;;  %v5777_v46 = vmax.f32 %v5775_v24, %v5776_v27 }
 0x269   :  { %v2922_v51 = vmax.f32 %v2874_v19, 0.0  ;;  %v2875_v6 = vmax.f32 %v2169_v5, %v2827_v20  ;;  %v2074_v59 = vmul.f32 %v5425_v36, %v2015_v31  ;;  %v2780_v60 = vmul.f32 %v5425_v36, %v2721_v32  ;;  %v2017_v7 = vpop.f32.mrb[185].mxu0  ;;  %v2723_v28 = vpop.f32.mrb[185].mxu1 }
 0x26a   :  { %v2018_v29 = vpop.f32.mrb[186].mxu0  ;;  %v2724_v8 = vpop.f32.mrb[186].mxu1 }
 0x26b   :  { %2970 = vst.msk [vmem:[%s5576_s4 + $0x150] sm:$0xff] %vm356_vm0, %v2922_v51  ;;  %v2923_v63 = vmax.f32 %v2875_v6, 0.0  ;;  %v2122_v37 = vadd.f32 %v5436_v53, %v2074_v59  ;;  %v2828_v61 = vadd.f32 %v5436_v53, %v2780_v60  ;;  %v2075_v39 = vmul.f32 %v5425_v36, %v2018_v29  ;;  %v2020_v22 = vpop.f32.mrb[187].mxu0  ;;  %v2726_v35 = vpop.f32.mrb[187].mxu1 }
 0x26c   :  { %v2781_v13 = vmul.f32 %v5425_v36, %v2724_v8 }
 0x26d   :  { %2971 = vst.msk [vmem:[%s5576_s4 + $0x158] sm:$0xff] %vm356_vm0, %v2923_v63  ;;  %v2170_v45 = vmax.f32 %v5771_v44, %v2122_v37  ;;  %v2123_v25 = vadd.f32 %v5436_v53, %v2075_v39 }
 0x26e   :  { %v2829_v4 = vadd.f32 %v5436_v53, %v2781_v13 }
 0x26f   :  { %v2876_v40 = vmax.f32 %v2170_v45, %v2828_v61  ;;  %v2171_v11 = vmax.f32 %v5774_v54, %v2123_v25 }
 0x270   :  { %v2023_v34 = vpop.f32.mrb[188].mxu0  ;;  %v2729_v0 = vpop.f32.mrb[188].mxu1 }
 0x271   :  { %v2924_v1 = vmax.f32 %v2876_v40, 0.0  ;;  %v2877_v33 = vmax.f32 %v2171_v11, %v2829_v4  ;;  %v2076_v9 = vmul.f32 %v5425_v36, %v2023_v34  ;;  %v2782_v10 = vmul.f32 %v5425_v36, %v2729_v0  ;;  %v2025_v58 = vpop.f32.mrb[189].mxu0  ;;  %v2731_v38 = vpop.f32.mrb[189].mxu1 }
 0x272   :  { %v2026_v56 = vpop.f32.mrb[190].mxu0  ;;  %v2732_v52 = vpop.f32.mrb[190].mxu1 }
 0x273   :  { %2972 = vst.msk [vmem:[%s5576_s4 + $0x160] sm:$0xff] %vm356_vm0, %v2924_v1  ;;  %v2925_v42 = vmax.f32 %v2877_v33, 0.0  ;;  %v2124_v15 = vadd.f32 %v5436_v53, %v2076_v9  ;;  %v2830_v43 = vadd.f32 %v5436_v53, %v2782_v10  ;;  %v2077_v16 = vmul.f32 %v5425_v36, %v2026_v56  ;;  %v2028_v17 = vpop.f32.mrb[191].mxu0  ;;  %v2734_v12 = vpop.f32.mrb[191].mxu1 }
 0x274   :  { %v2783_v23 = vmul.f32 %v5425_v36, %v2732_v52 }
 0x275   :  { %2973 = vst.msk [vmem:[%s5576_s4 + $0x168] sm:$0xff] %vm356_vm0, %v2925_v42  ;;  %v2172_v26 = vmax.f32 %v5777_v46, %v2124_v15  ;;  %v2125_v41 = vadd.f32 %v5436_v53, %v2077_v16 }
 0x276   :  { %v2831_v18 = vadd.f32 %v5436_v53, %v2783_v23 }
 0x277   :  { %v2878_v55 = vmax.f32 %v2172_v26, %v2830_v43  ;;  %v2173_v57 = vmax.f32 %v5780_v47, %v2125_v41 }
 0x279   :  { %v2926_v19 = vmax.f32 %v2878_v55, 0.0  ;;  %v2879_v36 = vmax.f32 %v2173_v57, %v2831_v18 }
 0x27b   :  { %2974 = vst.msk [vmem:[%s5576_s4 + $0x170] sm:$0xff] %vm356_vm0, %v2926_v19  ;;  %v2927_v48 = vmax.f32 %v2879_v36, 0.0 }
 0x27d   :  { %2975 = vst.msk [vmem:[%s5576_s4 + $0x178] sm:$0xff] %vm356_vm0, %v2927_v48 }

// kernel: forward.7
= control target key start
LH: loop header
LB: loop body
LE: loop exit
PB: predicated region body
PF: predicated region fallthrough
CT: control target
= control target key end

     0   :  { %v1129_v0 = vmov 0   ;;  %vm158_vm0 = vcmask 130048   ;;  %s1690_s1 = inlined_call_operand.vmem [shape: bf16[144,16], index: 1, kind: input, shape index: {}]   ;;  %s1691_s0 = inlined_call_operand.vmem [shape: bf16[4,96,144], index: 0, kind: input, shape index: {}]   ;;  %s1692_s2 = inlined_call_operand.vmem [shape: f32[1,16], index: 2, kind: input, shape index: {}]   ;;  %s1693_s3 = inlined_call_operand.vmem [shape: f32[1,16], index: 3, kind: input, shape index: {}]   ;;  %s1694_s4 = inlined_call_operand.vmem [shape: f32[96,16], index: 4, kind: output, shape index: {}]  }
   0x1   :  { %177 = vmatprep.subr.bf16.mxu0 %v1129_v0  ;;  %379 = vmatprep.subr.bf16.mxu1 %v1129_v0  ;;  %v1048_v1 = vld [vmem:[%s1690_s1] sm:$0xff]   ;;  %v1049_v2 = vld [vmem:[%s1690_s1 + $0x8] sm:$0xff]   ;;  %v1168_v3 = vld [vmem:[%s1690_s1 + $0x10] sm:$0xff]  }
   0x2   :  { %178 = vmatpush1.bf16.msra.mxu0 %v1048_v1  ;;  %380 = vmatpush1.bf16.msra.mxu1 %v1048_v1  ;;  %v1175_v4 = vld [vmem:[%s1690_s1 + $0x18] sm:$0xff]   ;;  %v1059_v5 = vld [vmem:[%s1691_s0 + $0x4] ss:$8 sps:$4 sm:$0xff]   ;;  %v1212_v9 = vld [vmem:[%s1690_s1 + $0x30] sm:$0xff]  }
   0x3   :  { %179 = vmatprep.subr.bf16.mxu0 %v1129_v0  ;;  %381 = vmatprep.subr.bf16.mxu1 %v1129_v0  ;;  %v1062_v6 = vld [vmem:[%s1691_s0 + $0x64] ss:$8 sps:$4 sm:$0xff]   ;;  %v1221_v10 = vld [vmem:[%s1690_s1 + $0x38] sm:$0xff]   ;;  %v1057_v12 = vld [vmem:[%s1691_s0] ss:$8 sps:$4 sm:$0xff]  }
   0x4   :  { %949 = vmatprep.mubr.msk.bf16.mxu0 %vm158_vm0, %v1059_v5  ;;  %981 = vmatprep.mubr.msk.bf16.mxu1 %vm158_vm0, %v1062_v6  ;;  %v1194_v7 = vld [vmem:[%s1690_s1 + $0x20] sm:$0xff]   ;;  %v1203_v8 = vld [vmem:[%s1690_s1 + $0x28] sm:$0xff]   ;;  %v1063_v14 = vld [vmem:[%s1691_s0 + $0x14] ss:$8 sps:$4 sm:$0xff]  }
   0x5   :  { %v1230_v11 = vld [vmem:[%s1690_s1 + $0x40] sm:$0xff]   ;;  %v1065_v15 = vld [vmem:[%s1691_s0 + $0x74] ss:$8 sps:$4 sm:$0xff]   ;;  %v1067_v16 = vld [vmem:[%s1691_s0 + $0x10] ss:$8 sps:$4 sm:$0xff]  }
   0x6   :  { %180 = vmatpush1.bf16.msra.mxu0 %v1049_v2  ;;  %382 = vmatpush1.bf16.msra.mxu1 %v1049_v2  ;;  %v1060_v13 = vld [vmem:[%s1691_s0 + $0x60] ss:$8 sps:$4 sm:$0xff]   ;;  %v1068_v17 = vld [vmem:[%s1691_s0 + $0x70] ss:$8 sps:$4 sm:$0xff]   ;;  %v1069_v18 = vld [vmem:[%s1691_s0 + $0x24] ss:$8 sps:$4 sm:$0xff]  }
   0x7   :  { %181 = vmatprep.subr.bf16.mxu0 %v1129_v0  ;;  %383 = vmatprep.subr.bf16.mxu1 %v1129_v0  ;;  %v1071_v19 = vld [vmem:[%s1691_s0 + $0x84] ss:$8 sps:$4 sm:$0xff]   ;;  %v1073_v20 = vld [vmem:[%s1691_s0 + $0x20] ss:$8 sps:$4 sm:$0xff]   ;;  %v1075_v22 = vld [vmem:[%s1691_s0 + $0x34] ss:$8 sps:$4 sm:$0xff]  }
   0x8   :  { %v1074_v21 = vld [vmem:[%s1691_s0 + $0x80] ss:$8 sps:$4 sm:$0xff]   ;;  %v1077_v23 = vld [vmem:[%s1691_s0 + $0x94] ss:$8 sps:$4 sm:$0xff]   ;;  %v1079_v24 = vld [vmem:[%s1691_s0 + $0x30] ss:$8 sps:$4 sm:$0xff]  }
   0x9   :  { %v1080_v25 = vld [vmem:[%s1691_s0 + $0x90] ss:$8 sps:$4 sm:$0xff]   ;;  %v1081_v26 = vld [vmem:[%s1691_s0 + $0x44] ss:$8 sps:$4 sm:$0xff]   ;;  %v1085_v28 = vld [vmem:[%s1691_s0 + $0x40] ss:$8 sps:$4 sm:$0xff]  }
   0xa   :  { %182 = vmatpush1.bf16.msra.mxu0 %v1168_v3  ;;  %384 = vmatpush1.bf16.msra.mxu1 %v1168_v3  ;;  %v1083_v27 = vld [vmem:[%s1691_s0 + $0xa4] ss:$8 sps:$4 sm:$0xff]   ;;  %v1086_v29 = vld [vmem:[%s1691_s0 + $0xa0] ss:$8 sps:$4 sm:$0xff]   ;;  %v1087_v30 = vld [vmem:[%s1691_s0 + $0x54] ss:$8 sps:$4 sm:$0xff]  }
   0xb   :  { %183 = vmatprep.subr.bf16.mxu0 %v1129_v0  ;;  %385 = vmatprep.subr.bf16.mxu1 %v1129_v0  ;;  %v1089_v31 = vld [vmem:[%s1691_s0 + $0xb4] ss:$8 sps:$4 sm:$0xff]   ;;  %v1091_v32 = vld [vmem:[%s1691_s0 + $0x50] ss:$8 sps:$4 sm:$0xff]   ;;  %v1095_v34 = vld [vmem:[%s1691_s0 + $0xc4] ss:$8 sps:$4 sm:$0xff]  }
   0xc   :  { %v1092_v33 = vld [vmem:[%s1691_s0 + $0xb0] ss:$8 sps:$4 sm:$0xff]   ;;  %v1098_v35 = vld [vmem:[%s1691_s0 + $0x124] ss:$8 sps:$4 sm:$0xff]   ;;  %v1093_v36 = vld [vmem:[%s1691_s0 + $0xc0] ss:$8 sps:$4 sm:$0xff]  }
   0xd   :  { %v1096_v37 = vld [vmem:[%s1691_s0 + $0x120] ss:$8 sps:$4 sm:$0xff]   ;;  %v1099_v38 = vld [vmem:[%s1691_s0 + $0xd4] ss:$8 sps:$4 sm:$0xff]   ;;  %v1103_v40 = vld [vmem:[%s1691_s0 + $0xd0] ss:$8 sps:$4 sm:$0xff]  }
   0xe   :  { %184 = vmatpush1.bf16.msra.mxu0 %v1175_v4  ;;  %386 = vmatpush1.bf16.msra.mxu1 %v1175_v4  ;;  %v1101_v39 = vld [vmem:[%s1691_s0 + $0x134] ss:$8 sps:$4 sm:$0xff]   ;;  %v1104_v41 = vld [vmem:[%s1691_s0 + $0x130] ss:$8 sps:$4 sm:$0xff]   ;;  %v1105_v42 = vld [vmem:[%s1691_s0 + $0xe4] ss:$8 sps:$4 sm:$0xff]  }
   0xf   :  { %185 = vmatprep.subr.bf16.mxu0 %v1129_v0  ;;  %387 = vmatprep.subr.bf16.mxu1 %v1129_v0  ;;  %v1107_v43 = vld [vmem:[%s1691_s0 + $0x144] ss:$8 sps:$4 sm:$0xff]   ;;  %v1109_v44 = vld [vmem:[%s1691_s0 + $0xe0] ss:$8 sps:$4 sm:$0xff]   ;;  %v1111_v46 = vld [vmem:[%s1691_s0 + $0xf4] ss:$8 sps:$4 sm:$0xff]  }
  0x10   :  { %v1110_v45 = vld [vmem:[%s1691_s0 + $0x140] ss:$8 sps:$4 sm:$0xff]   ;;  %v1113_v47 = vld [vmem:[%s1691_s0 + $0x154] ss:$8 sps:$4 sm:$0xff]   ;;  %v1115_v48 = vld [vmem:[%s1691_s0 + $0xf0] ss:$8 sps:$4 sm:$0xff]  }
  0x11   :  { %v1116_v49 = vld [vmem:[%s1691_s0 + $0x150] ss:$8 sps:$4 sm:$0xff]   ;;  %v1117_v50 = vld [vmem:[%s1691_s0 + $0x104] ss:$8 sps:$4 sm:$0xff]   ;;  %v1121_v52 = vld [vmem:[%s1691_s0 + $0x100] ss:$8 sps:$4 sm:$0xff]  }
  0x12   :  { %186 = vmatpush1.bf16.msra.mxu0 %v1194_v7  ;;  %388 = vmatpush1.bf16.msra.mxu1 %v1194_v7  ;;  %v1119_v51 = vld [vmem:[%s1691_s0 + $0x164] ss:$8 sps:$4 sm:$0xff]   ;;  %v1122_v53 = vld [vmem:[%s1691_s0 + $0x160] ss:$8 sps:$4 sm:$0xff]   ;;  %v1123_v54 = vld [vmem:[%s1691_s0 + $0x114] ss:$8 sps:$4 sm:$0xff]  }
  0x13   :  { %187 = vmatprep.subr.bf16.mxu0 %v1129_v0  ;;  %389 = vmatprep.subr.bf16.mxu1 %v1129_v0  ;;  %v1125_v55 = vld [vmem:[%s1691_s0 + $0x174] ss:$8 sps:$4 sm:$0xff]   ;;  %v1127_v56 = vld [vmem:[%s1691_s0 + $0x110] ss:$8 sps:$4 sm:$0xff]   ;;  %v1431_v58 = vld [vmem:[%s1692_s2] ss:$0 sm:$0xff] }
  0x14   :  { %v1128_v57 = vld [vmem:[%s1691_s0 + $0x170] ss:$8 sps:$4 sm:$0xff]   ;;  %v1436_v59 = vld [vmem:[%s1693_s3] ss:$0 sm:$0xff] }
  0x16   :  { %188 = vmatpush1.bf16.msra.mxu0 %v1203_v8  ;;  %390 = vmatpush1.bf16.msra.mxu1 %v1203_v8 }
  0x17   :  { %189 = vmatprep.subr.bf16.mxu0 %v1129_v0  ;;  %391 = vmatprep.subr.bf16.mxu1 %v1129_v0 }
  0x1a   :  { %190 = vmatpush1.bf16.msra.mxu0 %v1212_v9  ;;  %392 = vmatpush1.bf16.msra.mxu1 %v1212_v9 }
  0x1b   :  { %191 = vmatprep.subr.bf16.mxu0 %v1129_v0  ;;  %393 = vmatprep.subr.bf16.mxu1 %v1129_v0 }
  0x1e   :  { %192 = vmatpush1.bf16.msra.mxu0 %v1221_v10  ;;  %394 = vmatpush1.bf16.msra.mxu1 %v1221_v10 }
  0x1f   :  { %193 = vmatprep.subr.bf16.mxu0 %v1129_v0  ;;  %395 = vmatprep.subr.bf16.mxu1 %v1129_v0 }
  0x22   :  { %194 = vmatpush1.bf16.msra.mxu0 %v1230_v11  ;;  %396 = vmatpush1.bf16.msra.mxu1 %v1230_v11 }
  0x23   :  { %581 = vmatprep.subr.bf16.mxu0 %v1129_v0  ;;  %783 = vmatprep.subr.bf16.mxu1 %v1129_v0 }
  0x25   :  { %210 = vmatmul.mubr.bf16.vlgmr.msra.gmra.mrb[0].mxu0 %v1057_v12  ;;  %412 = vmatmul.mubr.bf16.vlgmr.msra.gmra.mrb[0].mxu1 %v1060_v13 }
  0x26   :  { %582 = vmatpush1.bf16.msra.mxu0 %v1048_v1  ;;  %784 = vmatpush1.bf16.msra.mxu1 %v1048_v1 }
  0x27   :  { %583 = vmatprep.subr.bf16.mxu0 %v1129_v0  ;;  %950 = vmatprep.mubr.msk.bf16.mxu0 %vm158_vm0, %v1063_v14 }
  0x28   :  { %982 = vmatprep.mubr.msk.bf16.mxu1 %vm158_vm0, %v1065_v15  ;;  %785 = vmatprep.subr.bf16.mxu1 %v1129_v0 }
  0x2a   :  { %584 = vmatpush1.bf16.msra.mxu0 %v1049_v2  ;;  %786 = vmatpush1.bf16.msra.mxu1 %v1049_v2 }
  0x2b   :  { %585 = vmatprep.subr.bf16.mxu0 %v1129_v0  ;;  %787 = vmatprep.subr.bf16.mxu1 %v1129_v0 }
  0x2d   :  { %218 = vmatmul.mubr.bf16.gmra.mrb[4].mxu0 %v1067_v16  ;;  %420 = vmatmul.mubr.bf16.gmra.mrb[4].mxu1 %v1068_v17 }
  0x2e   :  { %586 = vmatpush1.bf16.msra.mxu0 %v1168_v3  ;;  %788 = vmatpush1.bf16.msra.mxu1 %v1168_v3 }
  0x2f   :  { %951 = vmatprep.mubr.msk.bf16.mxu0 %vm158_vm0, %v1069_v18  ;;  %983 = vmatprep.mubr.msk.bf16.mxu1 %vm158_vm0, %v1071_v19 }
  0x30   :  { %587 = vmatprep.subr.bf16.mxu0 %v1129_v0  ;;  %789 = vmatprep.subr.bf16.mxu1 %v1129_v0 }
  0x32   :  { %588 = vmatpush1.bf16.msra.mxu0 %v1175_v4  ;;  %790 = vmatpush1.bf16.msra.mxu1 %v1175_v4 }
  0x33   :  { %589 = vmatprep.subr.bf16.mxu0 %v1129_v0  ;;  %791 = vmatprep.subr.bf16.mxu1 %v1129_v0 }
  0x35   :  { %226 = vmatmul.mubr.bf16.gmra.mrb[8].mxu0 %v1073_v20  ;;  %428 = vmatmul.mubr.bf16.gmra.mrb[8].mxu1 %v1074_v21 }
  0x36   :  { %952 = vmatprep.mubr.msk.bf16.mxu0 %vm158_vm0, %v1075_v22  ;;  %984 = vmatprep.mubr.msk.bf16.mxu1 %vm158_vm0, %v1077_v23 }
  0x37   :  { %590 = vmatpush1.bf16.msra.mxu0 %v1194_v7  ;;  %792 = vmatpush1.bf16.msra.mxu1 %v1194_v7 }
  0x38   :  { %591 = vmatprep.subr.bf16.mxu0 %v1129_v0  ;;  %793 = vmatprep.subr.bf16.mxu1 %v1129_v0 }
  0x3b   :  { %592 = vmatpush1.bf16.msra.mxu0 %v1203_v8  ;;  %794 = vmatpush1.bf16.msra.mxu1 %v1203_v8 }
  0x3c   :  { %593 = vmatprep.subr.bf16.mxu0 %v1129_v0  ;;  %795 = vmatprep.subr.bf16.mxu1 %v1129_v0 }
  0x3d   :  { %234 = vmatmul.mubr.bf16.gmra.mrb[12].mxu0 %v1079_v24  ;;  %436 = vmatmul.mubr.bf16.gmra.mrb[12].mxu1 %v1080_v25 }
  0x3e   :  { %953 = vmatprep.mubr.msk.bf16.mxu0 %vm158_vm0, %v1081_v26  ;;  %985 = vmatprep.mubr.msk.bf16.mxu1 %vm158_vm0, %v1083_v27 }
  0x3f   :  { %594 = vmatpush1.bf16.msra.mxu0 %v1212_v9  ;;  %796 = vmatpush1.bf16.msra.mxu1 %v1212_v9 }
  0x40   :  { %595 = vmatprep.subr.bf16.mxu0 %v1129_v0  ;;  %797 = vmatprep.subr.bf16.mxu1 %v1129_v0 }
  0x43   :  { %596 = vmatpush1.bf16.msra.mxu0 %v1221_v10  ;;  %798 = vmatpush1.bf16.msra.mxu1 %v1221_v10 }
  0x44   :  { %597 = vmatprep.subr.bf16.mxu0 %v1129_v0  ;;  %799 = vmatprep.subr.bf16.mxu1 %v1129_v0 }
  0x45   :  { %242 = vmatmul.mubr.bf16.gmra.mrb[16].mxu0 %v1085_v28  ;;  %444 = vmatmul.mubr.bf16.gmra.mrb[16].mxu1 %v1086_v29 }
  0x46   :  { %954 = vmatprep.mubr.msk.bf16.mxu0 %vm158_vm0, %v1087_v30  ;;  %986 = vmatprep.mubr.msk.bf16.mxu1 %vm158_vm0, %v1089_v31 }
  0x47   :  { %598 = vmatpush1.bf16.msra.mxu0 %v1230_v11  ;;  %800 = vmatpush1.bf16.msra.mxu1 %v1230_v11 }
  0x4d   :  { %250 = vmatmul.mubr.bf16.gmra.mrb[20].mxu0 %v1091_v32  ;;  %452 = vmatmul.mubr.bf16.gmra.mrb[20].mxu1 %v1092_v33 }
  0x4e   :  { %1011 = vmatprep.mubr.msk.bf16.mxu0 %vm158_vm0, %v1095_v34  ;;  %1041 = vmatprep.mubr.msk.bf16.mxu1 %vm158_vm0, %v1098_v35 }
  0x55   :  { %614 = vmatmul.mubr.bf16.vlgmr.msra.gmra.mrb[24].mxu0 %v1093_v36  ;;  %816 = vmatmul.mubr.bf16.vlgmr.msra.gmra.mrb[24].mxu1 %v1096_v37 }
  0x56   :  { %1012 = vmatprep.mubr.msk.bf16.mxu0 %vm158_vm0, %v1099_v38  ;;  %1042 = vmatprep.mubr.msk.bf16.mxu1 %vm158_vm0, %v1101_v39 }
  0x5d   :  { %622 = vmatmul.mubr.bf16.gmra.mrb[28].mxu0 %v1103_v40  ;;  %824 = vmatmul.mubr.bf16.gmra.mrb[28].mxu1 %v1104_v41 }
  0x5e   :  { %1013 = vmatprep.mubr.msk.bf16.mxu0 %vm158_vm0, %v1105_v42  ;;  %1043 = vmatprep.mubr.msk.bf16.mxu1 %vm158_vm0, %v1107_v43 }
  0x65   :  { %630 = vmatmul.mubr.bf16.gmra.mrb[32].mxu0 %v1109_v44  ;;  %832 = vmatmul.mubr.bf16.gmra.mrb[32].mxu1 %v1110_v45 }
  0x66   :  { %1014 = vmatprep.mubr.msk.bf16.mxu0 %vm158_vm0, %v1111_v46  ;;  %1044 = vmatprep.mubr.msk.bf16.mxu1 %vm158_vm0, %v1113_v47 }
  0x6d   :  { %638 = vmatmul.mubr.bf16.gmra.mrb[36].mxu0 %v1115_v48  ;;  %840 = vmatmul.mubr.bf16.gmra.mrb[36].mxu1 %v1116_v49 }
  0x6e   :  { %1015 = vmatprep.mubr.msk.bf16.mxu0 %vm158_vm0, %v1117_v50  ;;  %1045 = vmatprep.mubr.msk.bf16.mxu1 %vm158_vm0, %v1119_v51 }
  0x75   :  { %646 = vmatmul.mubr.bf16.gmra.mrb[40].mxu0 %v1121_v52  ;;  %848 = vmatmul.mubr.bf16.gmra.mrb[40].mxu1 %v1122_v53 }
  0x76   :  { %1016 = vmatprep.mubr.msk.bf16.mxu0 %vm158_vm0, %v1123_v54  ;;  %1046 = vmatprep.mubr.msk.bf16.mxu1 %vm158_vm0, %v1125_v55 }
  0x7d   :  { %654 = vmatmul.mubr.bf16.gmra.mrb[44].mxu0 %v1127_v56  ;;  %856 = vmatmul.mubr.bf16.gmra.mrb[44].mxu1 %v1128_v57 }
  0xf8   :  { %v211_v60 = vpop.f32.mrb[0].mxu0  ;;  %v413_v61 = vpop.f32.mrb[0].mxu1 }
  0xf9   :  { %v264_v62 = vmul.f32 %v1431_v58, %v211_v60  ;;  %v460_v63 = vmul.f32 %v1431_v58, %v413_v61  ;;  %v213_v0 = vpop.f32.mrb[1].mxu0  ;;  %v415_v1 = vpop.f32.mrb[1].mxu1 }
  0xfa   :  { %v214_v2 = vpop.f32.mrb[2].mxu0  ;;  %v416_v3 = vpop.f32.mrb[2].mxu1 }
  0xfb   :  { %v1441_v4 = vadd.f32 %v1436_v59, %v264_v62  ;;  %v1444_v5 = vadd.f32 %v1436_v59, %v460_v63  ;;  %v265_v6 = vmul.f32 %v1431_v58, %v214_v2  ;;  %v461_v7 = vmul.f32 %v1431_v58, %v416_v3  ;;  %v216_v8 = vpop.f32.mrb[3].mxu0  ;;  %v418_v9 = vpop.f32.mrb[3].mxu1 }
  0xfd   :  { %v484_v10 = vmax.f32 %v1441_v4, %v1444_v5  ;;  %v1451_v11 = vadd.f32 %v1436_v59, %v265_v6  ;;  %v1454_v12 = vadd.f32 %v1436_v59, %v461_v7 }
  0xff   :  { %v485_v13 = vmax.f32 %v1451_v11, %v1454_v12 }
 0x100   :  { %v219_v14 = vpop.f32.mrb[4].mxu0  ;;  %v421_v15 = vpop.f32.mrb[4].mxu1 }
 0x101   :  { %v266_v16 = vmul.f32 %v1431_v58, %v219_v14  ;;  %v462_v17 = vmul.f32 %v1431_v58, %v421_v15  ;;  %v221_v18 = vpop.f32.mrb[5].mxu0  ;;  %v423_v19 = vpop.f32.mrb[5].mxu1 }
 0x102   :  { %v222_v20 = vpop.f32.mrb[6].mxu0  ;;  %v424_v21 = vpop.f32.mrb[6].mxu1 }
 0x103   :  { %v1461_v22 = vadd.f32 %v1436_v59, %v266_v16  ;;  %v1464_v23 = vadd.f32 %v1436_v59, %v462_v17  ;;  %v267_v24 = vmul.f32 %v1431_v58, %v222_v20  ;;  %v463_v25 = vmul.f32 %v1431_v58, %v424_v21  ;;  %v224_v26 = vpop.f32.mrb[7].mxu0  ;;  %v426_v27 = vpop.f32.mrb[7].mxu1 }
 0x105   :  { %v486_v28 = vmax.f32 %v1461_v22, %v1464_v23  ;;  %v1471_v29 = vadd.f32 %v1436_v59, %v267_v24  ;;  %v1474_v30 = vadd.f32 %v1436_v59, %v463_v25 }
 0x107   :  { %v487_v31 = vmax.f32 %v1471_v29, %v1474_v30 }
 0x108   :  { %v227_v32 = vpop.f32.mrb[8].mxu0  ;;  %v429_v33 = vpop.f32.mrb[8].mxu1 }
 0x109   :  { %v268_v34 = vmul.f32 %v1431_v58, %v227_v32  ;;  %v464_v35 = vmul.f32 %v1431_v58, %v429_v33  ;;  %v229_v36 = vpop.f32.mrb[9].mxu0  ;;  %v431_v37 = vpop.f32.mrb[9].mxu1 }
 0x10a   :  { %v230_v38 = vpop.f32.mrb[10].mxu0  ;;  %v432_v39 = vpop.f32.mrb[10].mxu1 }
 0x10b   :  { %v1481_v40 = vadd.f32 %v1436_v59, %v268_v34  ;;  %v1484_v41 = vadd.f32 %v1436_v59, %v464_v35  ;;  %v269_v42 = vmul.f32 %v1431_v58, %v230_v38  ;;  %v465_v43 = vmul.f32 %v1431_v58, %v432_v39  ;;  %v232_v44 = vpop.f32.mrb[11].mxu0  ;;  %v434_v45 = vpop.f32.mrb[11].mxu1 }
 0x10d   :  { %v488_v46 = vmax.f32 %v1481_v40, %v1484_v41  ;;  %v1491_v47 = vadd.f32 %v1436_v59, %v269_v42  ;;  %v1494_v48 = vadd.f32 %v1436_v59, %v465_v43 }
 0x10f   :  { %v489_v49 = vmax.f32 %v1491_v47, %v1494_v48 }
 0x110   :  { %v235_v50 = vpop.f32.mrb[12].mxu0  ;;  %v437_v51 = vpop.f32.mrb[12].mxu1 }
 0x111   :  { %v270_v52 = vmul.f32 %v1431_v58, %v235_v50  ;;  %v466_v53 = vmul.f32 %v1431_v58, %v437_v51  ;;  %v237_v54 = vpop.f32.mrb[13].mxu0  ;;  %v439_v55 = vpop.f32.mrb[13].mxu1 }
 0x112   :  { %v238_v56 = vpop.f32.mrb[14].mxu0  ;;  %v440_v57 = vpop.f32.mrb[14].mxu1 }
 0x113   :  { %v1501_v60 = vadd.f32 %v1436_v59, %v270_v52  ;;  %v1504_v61 = vadd.f32 %v1436_v59, %v466_v53  ;;  %v271_v62 = vmul.f32 %v1431_v58, %v238_v56  ;;  %v467_v63 = vmul.f32 %v1431_v58, %v440_v57  ;;  %v240_v0 = vpop.f32.mrb[15].mxu0  ;;  %v442_v1 = vpop.f32.mrb[15].mxu1 }
 0x115   :  { %v490_v2 = vmax.f32 %v1501_v60, %v1504_v61  ;;  %v1511_v3 = vadd.f32 %v1436_v59, %v271_v62  ;;  %v1514_v6 = vadd.f32 %v1436_v59, %v467_v63 }
 0x117   :  { %v491_v7 = vmax.f32 %v1511_v3, %v1514_v6 }
 0x118   :  { %v243_v8 = vpop.f32.mrb[16].mxu0  ;;  %v445_v9 = vpop.f32.mrb[16].mxu1 }
 0x119   :  { %v272_v14 = vmul.f32 %v1431_v58, %v243_v8  ;;  %v468_v15 = vmul.f32 %v1431_v58, %v445_v9  ;;  %v245_v16 = vpop.f32.mrb[17].mxu0  ;;  %v447_v17 = vpop.f32.mrb[17].mxu1 }
 0x11a   :  { %v246_v18 = vpop.f32.mrb[18].mxu0  ;;  %v448_v19 = vpop.f32.mrb[18].mxu1 }
 0x11b   :  { %v1521_v20 = vadd.f32 %v1436_v59, %v272_v14  ;;  %v1524_v21 = vadd.f32 %v1436_v59, %v468_v15  ;;  %v273_v24 = vmul.f32 %v1431_v58, %v246_v18  ;;  %v469_v25 = vmul.f32 %v1431_v58, %v448_v19  ;;  %v248_v26 = vpop.f32.mrb[19].mxu0  ;;  %v450_v27 = vpop.f32.mrb[19].mxu1 }
 0x11d   :  { %v492_v32 = vmax.f32 %v1521_v20, %v1524_v21  ;;  %v1531_v33 = vadd.f32 %v1436_v59, %v273_v24  ;;  %v1534_v34 = vadd.f32 %v1436_v59, %v469_v25 }
 0x11f   :  { %v493_v35 = vmax.f32 %v1531_v33, %v1534_v34 }
 0x120   :  { %v251_v36 = vpop.f32.mrb[20].mxu0  ;;  %v453_v37 = vpop.f32.mrb[20].mxu1 }
 0x121   :  { %v274_v38 = vmul.f32 %v1431_v58, %v251_v36  ;;  %v470_v39 = vmul.f32 %v1431_v58, %v453_v37  ;;  %v253_v42 = vpop.f32.mrb[21].mxu0  ;;  %v455_v43 = vpop.f32.mrb[21].mxu1 }
 0x122   :  { %v254_v44 = vpop.f32.mrb[22].mxu0  ;;  %v456_v45 = vpop.f32.mrb[22].mxu1 }
 0x123   :  { %v1541_v50 = vadd.f32 %v1436_v59, %v274_v38  ;;  %v1544_v51 = vadd.f32 %v1436_v59, %v470_v39  ;;  %v275_v52 = vmul.f32 %v1431_v58, %v254_v44  ;;  %v471_v53 = vmul.f32 %v1431_v58, %v456_v45  ;;  %v256_v54 = vpop.f32.mrb[23].mxu0  ;;  %v458_v55 = vpop.f32.mrb[23].mxu1 }
 0x125   :  { %v494_v56 = vmax.f32 %v1541_v50, %v1544_v51  ;;  %v1551_v57 = vadd.f32 %v1436_v59, %v275_v52  ;;  %v1554_v62 = vadd.f32 %v1436_v59, %v471_v53 }
 0x127   :  { %v495_v63 = vmax.f32 %v1551_v57, %v1554_v62 }
 0x128   :  { %v615_v0 = vpop.f32.mrb[24].mxu0  ;;  %v817_v1 = vpop.f32.mrb[24].mxu1 }
 0x129   :  { %v662_v8 = vmul.f32 %v1431_v58, %v615_v0  ;;  %v864_v9 = vmul.f32 %v1431_v58, %v817_v1  ;;  %v617_v14 = vpop.f32.mrb[25].mxu0  ;;  %v819_v15 = vpop.f32.mrb[25].mxu1 }
 0x12a   :  { %v618_v16 = vpop.f32.mrb[26].mxu0  ;;  %v820_v17 = vpop.f32.mrb[26].mxu1 }
 0x12b   :  { %v674_v18 = vadd.f32 %v1436_v59, %v662_v8  ;;  %v876_v19 = vadd.f32 %v1436_v59, %v864_v9  ;;  %v663_v24 = vmul.f32 %v1431_v58, %v618_v16  ;;  %v865_v25 = vmul.f32 %v1431_v58, %v820_v17  ;;  %v620_v26 = vpop.f32.mrb[27].mxu0  ;;  %v822_v27 = vpop.f32.mrb[27].mxu1 }
 0x12d   :  { %v686_v36 = vmax.f32 %v484_v10, %v674_v18  ;;  %v675_v37 = vadd.f32 %v1436_v59, %v663_v24  ;;  %v877_v42 = vadd.f32 %v1436_v59, %v865_v25 }
 0x12f   :  { %v888_v38 = vmax.f32 %v686_v36, %v876_v19  ;;  %v687_v39 = vmax.f32 %v485_v13, %v675_v37 }
 0x130   :  { %v623_v43 = vpop.f32.mrb[28].mxu0  ;;  %v825_v44 = vpop.f32.mrb[28].mxu1 }
 0x131   :  { %v900_v45 = vmax.f32 %v888_v38, 0.0  ;;  %v889_v52 = vmax.f32 %v687_v39, %v877_v42  ;;  %v664_v53 = vmul.f32 %v1431_v58, %v623_v43  ;;  %v866_v54 = vmul.f32 %v1431_v58, %v825_v44  ;;  %v625_v55 = vpop.f32.mrb[29].mxu0  ;;  %v827_v4 = vpop.f32.mrb[29].mxu1 }
 0x132   :  { %v626_v5 = vpop.f32.mrb[30].mxu0  ;;  %v828_v10 = vpop.f32.mrb[30].mxu1 }
 0x133   :  { %912 = vst.msk [vmem:[%s1694_s4] sm:$0xff] %vm158_vm0, %v900_v45  ;;  %v901_v11 = vmax.f32 %v889_v52, 0.0  ;;  %v676_v12 = vadd.f32 %v1436_v59, %v664_v53  ;;  %v878_v13 = vadd.f32 %v1436_v59, %v866_v54  ;;  %v665_v0 = vmul.f32 %v1431_v58, %v626_v5  ;;  %v628_v1 = vpop.f32.mrb[31].mxu0  ;;  %v830_v8 = vpop.f32.mrb[31].mxu1 }
 0x134   :  { %v867_v9 = vmul.f32 %v1431_v58, %v828_v10 }
 0x135   :  { %913 = vst.msk [vmem:[%s1694_s4 + $0x8] sm:$0xff] %vm158_vm0, %v901_v11  ;;  %v688_v14 = vmax.f32 %v486_v28, %v676_v12  ;;  %v677_v15 = vadd.f32 %v1436_v59, %v665_v0 }
 0x136   :  { %v879_v18 = vadd.f32 %v1436_v59, %v867_v9 }
 0x137   :  { %v890_v16 = vmax.f32 %v688_v14, %v878_v13  ;;  %v689_v17 = vmax.f32 %v487_v31, %v677_v15 }
 0x138   :  { %v631_v19 = vpop.f32.mrb[32].mxu0  ;;  %v833_v24 = vpop.f32.mrb[32].mxu1 }
 0x139   :  { %v902_v25 = vmax.f32 %v890_v16, 0.0  ;;  %v891_v26 = vmax.f32 %v689_v17, %v879_v18  ;;  %v666_v27 = vmul.f32 %v1431_v58, %v631_v19  ;;  %v868_v36 = vmul.f32 %v1431_v58, %v833_v24  ;;  %v633_v37 = vpop.f32.mrb[33].mxu0  ;;  %v835_v22 = vpop.f32.mrb[33].mxu1 }
 0x13a   :  { %v634_v23 = vpop.f32.mrb[34].mxu0  ;;  %v836_v28 = vpop.f32.mrb[34].mxu1 }
 0x13b   :  { %914 = vst.msk [vmem:[%s1694_s4 + $0x10] sm:$0xff] %vm158_vm0, %v902_v25  ;;  %v903_v29 = vmax.f32 %v891_v26, 0.0  ;;  %v678_v30 = vadd.f32 %v1436_v59, %v666_v27  ;;  %v880_v31 = vadd.f32 %v1436_v59, %v868_v36  ;;  %v667_v38 = vmul.f32 %v1431_v58, %v634_v23  ;;  %v636_v39 = vpop.f32.mrb[35].mxu0  ;;  %v838_v42 = vpop.f32.mrb[35].mxu1 }
 0x13c   :  { %v869_v43 = vmul.f32 %v1431_v58, %v836_v28 }
 0x13d   :  { %915 = vst.msk [vmem:[%s1694_s4 + $0x18] sm:$0xff] %vm158_vm0, %v903_v29  ;;  %v690_v44 = vmax.f32 %v488_v46, %v678_v30  ;;  %v679_v45 = vadd.f32 %v1436_v59, %v667_v38 }
 0x13e   :  { %v881_v54 = vadd.f32 %v1436_v59, %v869_v43 }
 0x13f   :  { %v892_v52 = vmax.f32 %v690_v44, %v880_v31  ;;  %v691_v53 = vmax.f32 %v489_v49, %v679_v45 }
 0x140   :  { %v639_v55 = vpop.f32.mrb[36].mxu0  ;;  %v841_v4 = vpop.f32.mrb[36].mxu1 }
 0x141   :  { %v904_v5 = vmax.f32 %v892_v52, 0.0  ;;  %v893_v10 = vmax.f32 %v691_v53, %v881_v54  ;;  %v668_v11 = vmul.f32 %v1431_v58, %v639_v55  ;;  %v870_v12 = vmul.f32 %v1431_v58, %v841_v4  ;;  %v641_v13 = vpop.f32.mrb[37].mxu0  ;;  %v843_v40 = vpop.f32.mrb[37].mxu1 }
 0x142   :  { %v642_v41 = vpop.f32.mrb[38].mxu0  ;;  %v844_v46 = vpop.f32.mrb[38].mxu1 }
 0x143   :  { %916 = vst.msk [vmem:[%s1694_s4 + $0x20] sm:$0xff] %vm158_vm0, %v904_v5  ;;  %v905_v47 = vmax.f32 %v893_v10, 0.0  ;;  %v680_v48 = vadd.f32 %v1436_v59, %v668_v11  ;;  %v882_v49 = vadd.f32 %v1436_v59, %v870_v12  ;;  %v669_v0 = vmul.f32 %v1431_v58, %v642_v41  ;;  %v644_v1 = vpop.f32.mrb[39].mxu0  ;;  %v846_v8 = vpop.f32.mrb[39].mxu1 }
 0x144   :  { %v871_v9 = vmul.f32 %v1431_v58, %v844_v46 }
 0x145   :  { %917 = vst.msk [vmem:[%s1694_s4 + $0x28] sm:$0xff] %vm158_vm0, %v905_v47  ;;  %v692_v14 = vmax.f32 %v490_v2, %v680_v48  ;;  %v681_v15 = vadd.f32 %v1436_v59, %v669_v0 }
 0x146   :  { %v883_v18 = vadd.f32 %v1436_v59, %v871_v9 }
 0x147   :  { %v894_v16 = vmax.f32 %v692_v14, %v882_v49  ;;  %v693_v17 = vmax.f32 %v491_v7, %v681_v15 }
 0x148   :  { %v647_v19 = vpop.f32.mrb[40].mxu0  ;;  %v849_v24 = vpop.f32.mrb[40].mxu1 }
 0x149   :  { %v906_v25 = vmax.f32 %v894_v16, 0.0  ;;  %v895_v26 = vmax.f32 %v693_v17, %v883_v18  ;;  %v670_v27 = vmul.f32 %v1431_v58, %v647_v19  ;;  %v872_v36 = vmul.f32 %v1431_v58, %v849_v24  ;;  %v649_v37 = vpop.f32.mrb[41].mxu0  ;;  %v851_v60 = vpop.f32.mrb[41].mxu1 }
 0x14a   :  { %v650_v61 = vpop.f32.mrb[42].mxu0  ;;  %v852_v2 = vpop.f32.mrb[42].mxu1 }
 0x14b   :  { %918 = vst.msk [vmem:[%s1694_s4 + $0x30] sm:$0xff] %vm158_vm0, %v906_v25  ;;  %v907_v3 = vmax.f32 %v895_v26, 0.0  ;;  %v682_v6 = vadd.f32 %v1436_v59, %v670_v27  ;;  %v884_v7 = vadd.f32 %v1436_v59, %v872_v36  ;;  %v671_v22 = vmul.f32 %v1431_v58, %v650_v61  ;;  %v652_v23 = vpop.f32.mrb[43].mxu0  ;;  %v854_v28 = vpop.f32.mrb[43].mxu1 }
 0x14c   :  { %v873_v29 = vmul.f32 %v1431_v58, %v852_v2 }
 0x14d   :  { %919 = vst.msk [vmem:[%s1694_s4 + $0x38] sm:$0xff] %vm158_vm0, %v907_v3  ;;  %v694_v30 = vmax.f32 %v492_v32, %v682_v6  ;;  %v683_v31 = vadd.f32 %v1436_v59, %v671_v22 }
 0x14e   :  { %v885_v42 = vadd.f32 %v1436_v59, %v873_v29 }
 0x14f   :  { %v896_v38 = vmax.f32 %v694_v30, %v884_v7  ;;  %v695_v39 = vmax.f32 %v493_v35, %v683_v31 }
 0x150   :  { %v655_v43 = vpop.f32.mrb[44].mxu0  ;;  %v857_v44 = vpop.f32.mrb[44].mxu1 }
 0x151   :  { %v908_v45 = vmax.f32 %v896_v38, 0.0  ;;  %v897_v52 = vmax.f32 %v695_v39, %v885_v42  ;;  %v672_v53 = vmul.f32 %v1431_v58, %v655_v43  ;;  %v874_v54 = vmul.f32 %v1431_v58, %v857_v44  ;;  %v657_v55 = vpop.f32.mrb[45].mxu0  ;;  %v859_v20 = vpop.f32.mrb[45].mxu1 }
 0x152   :  { %v658_v21 = vpop.f32.mrb[46].mxu0  ;;  %v860_v32 = vpop.f32.mrb[46].mxu1 }
 0x153   :  { %920 = vst.msk [vmem:[%s1694_s4 + $0x40] sm:$0xff] %vm158_vm0, %v908_v45  ;;  %v909_v33 = vmax.f32 %v897_v52, 0.0  ;;  %v684_v34 = vadd.f32 %v1436_v59, %v672_v53  ;;  %v886_v35 = vadd.f32 %v1436_v59, %v874_v54  ;;  %v673_v4 = vmul.f32 %v1431_v58, %v658_v21  ;;  %v660_v5 = vpop.f32.mrb[47].mxu0  ;;  %v862_v10 = vpop.f32.mrb[47].mxu1 }
 0x154   :  { %v875_v11 = vmul.f32 %v1431_v58, %v860_v32 }
 0x155   :  { %921 = vst.msk [vmem:[%s1694_s4 + $0x48] sm:$0xff] %vm158_vm0, %v909_v33  ;;  %v696_v12 = vmax.f32 %v494_v56, %v684_v34  ;;  %v685_v13 = vadd.f32 %v1436_v59, %v673_v4 }
 0x156   :  { %v887_v46 = vadd.f32 %v1436_v59, %v875_v11 }
 0x157   :  { %v898_v40 = vmax.f32 %v696_v12, %v886_v35  ;;  %v697_v41 = vmax.f32 %v495_v63, %v685_v13 }
 0x159   :  { %v910_v47 = vmax.f32 %v898_v40, 0.0  ;;  %v899_v58 = vmax.f32 %v697_v41, %v887_v46 }
 0x15b   :  { %922 = vst.msk [vmem:[%s1694_s4 + $0x50] sm:$0xff] %vm158_vm0, %v910_v47  ;;  %v911_v48 = vmax.f32 %v899_v58, 0.0 }
 0x15d   :  { %923 = vst.msk [vmem:[%s1694_s4 + $0x58] sm:$0xff] %vm158_vm0, %v911_v48 }

// kernel: forward.8
= control target key start
LH: loop header
LB: loop body
LE: loop exit
PB: predicated region body
PF: predicated region fallthrough
CT: control target
= control target key end

     0   :  { %v513_v0 = vmov 0   ;;  %vm110_vm0 = vcmask 130048   ;;  %s696_s1 = inlined_call_operand.vmem [shape: bf16[144,16], index: 1, kind: input, shape index: {}]   ;;  %s697_s0 = inlined_call_operand.vmem [shape: bf16[4,24,144], index: 0, kind: input, shape index: {}]   ;;  %s698_s2 = inlined_call_operand.vmem [shape: f32[1,16], index: 2, kind: input, shape index: {}]   ;;  %s699_s3 = inlined_call_operand.vmem [shape: f32[1,16], index: 3, kind: input, shape index: {}]   ;;  %s700_s4 = inlined_call_operand.vmem [shape: f32[24,16], index: 4, kind: output, shape index: {}]  }
   0x1   :  { %117 = vmatprep.subr.bf16.mxu0 %v513_v0  ;;  %208 = vmatprep.subr.bf16.mxu1 %v513_v0  ;;  %v484_v1 = vld [vmem:[%s696_s1] sm:$0xff]   ;;  %v547_v2 = vld [vmem:[%s696_s1 + $0x8] sm:$0xff]   ;;  %v556_v3 = vld [vmem:[%s696_s1 + $0x10] sm:$0xff]  }
   0x2   :  { %118 = vmatpush1.bf16.msra.mxu0 %v484_v1  ;;  %209 = vmatpush1.bf16.msra.mxu1 %v484_v1  ;;  %v563_v4 = vld [vmem:[%s696_s1 + $0x18] sm:$0xff]   ;;  %v495_v5 = vld [vmem:[%s697_s0 + $0x4] ss:$8 sps:$4 sm:$0xff]   ;;  %v490_v9 = vld [vmem:[%s696_s1 + $0x30] sm:$0xff]  }
   0x3   :  { %119 = vmatprep.subr.bf16.mxu0 %v513_v0  ;;  %210 = vmatprep.subr.bf16.mxu1 %v513_v0  ;;  %v498_v6 = vld [vmem:[%s697_s0 + $0x1c] ss:$8 sps:$4 sm:$0xff]   ;;  %v489_v8 = vld [vmem:[%s696_s1 + $0x28] sm:$0xff]   ;;  %v496_v13 = vld [vmem:[%s697_s0 + $0x18] ss:$8 sps:$4 sm:$0xff]  }
   0x4   :  { %452 = vmatprep.mubr.msk.bf16.mxu0 %vm110_vm0, %v495_v5  ;;  %463 = vmatprep.mubr.msk.bf16.mxu1 %vm110_vm0, %v498_v6  ;;  %v488_v7 = vld [vmem:[%s696_s1 + $0x20] sm:$0xff]   ;;  %v491_v10 = vld [vmem:[%s696_s1 + $0x38] sm:$0xff]   ;;  %v40_v14 = vld [vmem:[%s697_s0 + $0x10] sm:$0xff] }
   0x5   :  { %v492_v11 = vld [vmem:[%s696_s1 + $0x40] sm:$0xff]   ;;  %v458_v15 = vld [vmem:[%s697_s0 + $0x28] sm:$0xff]  ;;  %v442_v16 = vcombine.high %v40_v14, %v40_v14  ;;  %v441_v18 = vcombine.low %v40_v14, %v40_v14  ;;  %v505_v20 = vld [vmem:[%s697_s0 + $0x34] ss:$8 sps:$4 sm:$0xff]  }
   0x6   :  { %120 = vmatpush1.bf16.msra.mxu0 %v547_v2  ;;  %211 = vmatpush1.bf16.msra.mxu1 %v547_v2  ;;  %v493_v12 = vld [vmem:[%s697_s0] ss:$8 sps:$4 sm:$0xff]   ;;  %v462_v17 = vcombine.high %v458_v15, %v458_v15  ;;  %v461_v19 = vcombine.low %v458_v15, %v458_v15  ;;  %v508_v21 = vld [vmem:[%s697_s0 + $0x4c] ss:$8 sps:$4 sm:$0xff]   ;;  %v476_v23 = vld [vmem:[%s697_s0 + $0x58] sm:$0xff] }
   0x7   :  { %121 = vmatprep.subr.bf16.mxu0 %v513_v0  ;;  %212 = vmatprep.subr.bf16.mxu1 %v513_v0  ;;  %v467_v22 = vld [vmem:[%s697_s0 + $0x40] sm:$0xff]  ;;  %v503_v24 = vld [vmem:[%s697_s0 + $0x30] ss:$8 sps:$4 sm:$0xff]   ;;  %v480_v27 = vcombine.high %v476_v23, %v476_v23  ;;  %v479_v29 = vcombine.low %v476_v23, %v476_v23 }
   0x8   :  { %v506_v25 = vld [vmem:[%s697_s0 + $0x48] ss:$8 sps:$4 sm:$0xff]   ;;  %v471_v26 = vcombine.high %v467_v22, %v467_v22  ;;  %v470_v28 = vcombine.low %v467_v22, %v467_v22  ;;  %v454_v30 = vld [vmem:[%s698_s2] ss:$0 sm:$0xff] }
   0x9   :  { %v670_v31 = vld [vmem:[%s699_s3] ss:$0 sm:$0xff] }
   0xa   :  { %122 = vmatpush1.bf16.msra.mxu0 %v556_v3  ;;  %213 = vmatpush1.bf16.msra.mxu1 %v556_v3 }
   0xb   :  { %123 = vmatprep.subr.bf16.mxu0 %v513_v0  ;;  %214 = vmatprep.subr.bf16.mxu1 %v513_v0 }
   0xe   :  { %124 = vmatpush1.bf16.msra.mxu0 %v563_v4  ;;  %215 = vmatpush1.bf16.msra.mxu1 %v563_v4 }
   0xf   :  { %125 = vmatprep.subr.bf16.mxu0 %v513_v0  ;;  %216 = vmatprep.subr.bf16.mxu1 %v513_v0 }
  0x12   :  { %126 = vmatpush1.bf16.msra.mxu0 %v488_v7  ;;  %217 = vmatpush1.bf16.msra.mxu1 %v488_v7 }
  0x13   :  { %127 = vmatprep.subr.bf16.mxu0 %v513_v0  ;;  %218 = vmatprep.subr.bf16.mxu1 %v513_v0 }
  0x16   :  { %128 = vmatpush1.bf16.msra.mxu0 %v489_v8  ;;  %219 = vmatpush1.bf16.msra.mxu1 %v489_v8 }
  0x17   :  { %129 = vmatprep.subr.bf16.mxu0 %v513_v0  ;;  %220 = vmatprep.subr.bf16.mxu1 %v513_v0 }
  0x1a   :  { %130 = vmatpush1.bf16.msra.mxu0 %v490_v9  ;;  %221 = vmatpush1.bf16.msra.mxu1 %v490_v9 }
  0x1b   :  { %131 = vmatprep.subr.bf16.mxu0 %v513_v0  ;;  %222 = vmatprep.subr.bf16.mxu1 %v513_v0 }
  0x1e   :  { %132 = vmatpush1.bf16.msra.mxu0 %v491_v10  ;;  %223 = vmatpush1.bf16.msra.mxu1 %v491_v10 }
  0x1f   :  { %133 = vmatprep.subr.bf16.mxu0 %v513_v0  ;;  %224 = vmatprep.subr.bf16.mxu1 %v513_v0 }
  0x22   :  { %134 = vmatpush1.bf16.msra.mxu0 %v492_v11  ;;  %225 = vmatpush1.bf16.msra.mxu1 %v492_v11 }
  0x23   :  { %290 = vmatprep.subr.bf16.mxu0 %v513_v0  ;;  %372 = vmatprep.subr.bf16.mxu1 %v513_v0 }
  0x25   :  { %150 = vmatmul.mubr.bf16.vlgmr.msra.gmra.mrb[0].mxu0 %v493_v12  ;;  %241 = vmatmul.mubr.bf16.vlgmr.msra.gmra.mrb[0].mxu1 %v496_v13 }
  0x26   :  { %291 = vmatpush1.bf16.msra.mxu0 %v484_v1  ;;  %373 = vmatpush1.bf16.msra.mxu1 %v484_v1 }
  0x27   :  { %292 = vmatprep.subr.bf16.mxu0 %v513_v0  ;;  %374 = vmatprep.subr.bf16.mxu1 %v513_v0 }
  0x28   :  { %453 = vmatprep.mubr.msk.bf16.mxu0 %vm110_vm0, %v442_v16  ;;  %464 = vmatprep.mubr.msk.bf16.mxu1 %vm110_vm0, %v462_v17 }
  0x2a   :  { %293 = vmatpush1.bf16.msra.mxu0 %v547_v2  ;;  %375 = vmatpush1.bf16.msra.mxu1 %v547_v2 }
  0x2b   :  { %294 = vmatprep.subr.bf16.mxu0 %v513_v0  ;;  %376 = vmatprep.subr.bf16.mxu1 %v513_v0 }
  0x2d   :  { %158 = vmatmul.mubr.bf16.gmra.mrb[4].mxu0 %v441_v18  ;;  %249 = vmatmul.mubr.bf16.gmra.mrb[4].mxu1 %v461_v19 }
  0x2e   :  { %295 = vmatpush1.bf16.msra.mxu0 %v556_v3  ;;  %377 = vmatpush1.bf16.msra.mxu1 %v556_v3 }
  0x2f   :  { %296 = vmatprep.subr.bf16.mxu0 %v513_v0  ;;  %378 = vmatprep.subr.bf16.mxu1 %v513_v0 }
  0x30   :  { %472 = vmatprep.mubr.msk.bf16.mxu0 %vm110_vm0, %v505_v20  ;;  %481 = vmatprep.mubr.msk.bf16.mxu1 %vm110_vm0, %v508_v21 }
  0x32   :  { %297 = vmatpush1.bf16.msra.mxu0 %v563_v4  ;;  %379 = vmatpush1.bf16.msra.mxu1 %v563_v4 }
  0x33   :  { %298 = vmatprep.subr.bf16.mxu0 %v513_v0  ;;  %380 = vmatprep.subr.bf16.mxu1 %v513_v0 }
  0x36   :  { %299 = vmatpush1.bf16.msra.mxu0 %v488_v7  ;;  %381 = vmatpush1.bf16.msra.mxu1 %v488_v7 }
  0x37   :  { %300 = vmatprep.subr.bf16.mxu0 %v513_v0  ;;  %382 = vmatprep.subr.bf16.mxu1 %v513_v0 }
  0x3a   :  { %301 = vmatpush1.bf16.msra.mxu0 %v489_v8  ;;  %383 = vmatpush1.bf16.msra.mxu1 %v489_v8 }
  0x3b   :  { %302 = vmatprep.subr.bf16.mxu0 %v513_v0  ;;  %384 = vmatprep.subr.bf16.mxu1 %v513_v0 }
  0x3e   :  { %303 = vmatpush1.bf16.msra.mxu0 %v490_v9  ;;  %385 = vmatpush1.bf16.msra.mxu1 %v490_v9 }
  0x3f   :  { %304 = vmatprep.subr.bf16.mxu0 %v513_v0  ;;  %386 = vmatprep.subr.bf16.mxu1 %v513_v0 }
  0x42   :  { %305 = vmatpush1.bf16.msra.mxu0 %v491_v10  ;;  %387 = vmatpush1.bf16.msra.mxu1 %v491_v10 }
  0x43   :  { %306 = vmatprep.subr.bf16.mxu0 %v513_v0  ;;  %388 = vmatprep.subr.bf16.mxu1 %v513_v0 }
  0x46   :  { %307 = vmatpush1.bf16.msra.mxu0 %v492_v11  ;;  %389 = vmatpush1.bf16.msra.mxu1 %v492_v11 }
  0x49   :  { %323 = vmatmul.mubr.bf16.vlgmr.msra.gmra.mrb[8].mxu0 %v503_v24  ;;  %405 = vmatmul.mubr.bf16.vlgmr.msra.gmra.mrb[8].mxu1 %v506_v25 }
  0x4a   :  { %473 = vmatprep.mubr.msk.bf16.mxu0 %vm110_vm0, %v471_v26  ;;  %482 = vmatprep.mubr.msk.bf16.mxu1 %vm110_vm0, %v480_v27 }
  0x51   :  { %331 = vmatmul.mubr.bf16.gmra.mrb[12].mxu0 %v470_v28  ;;  %413 = vmatmul.mubr.bf16.gmra.mrb[12].mxu1 %v479_v29 }
  0xf8   :  { %v151_v32 = vpop.f32.mrb[0].mxu0  ;;  %v242_v33 = vpop.f32.mrb[0].mxu1 }
  0xf9   :  { %v171_v34 = vmul.f32 %v454_v30, %v151_v32  ;;  %v256_v35 = vmul.f32 %v454_v30, %v242_v33  ;;  %v153_v36 = vpop.f32.mrb[1].mxu0  ;;  %v244_v37 = vpop.f32.mrb[1].mxu1 }
  0xfa   :  { %v154_v38 = vpop.f32.mrb[2].mxu0  ;;  %v245_v39 = vpop.f32.mrb[2].mxu1 }
  0xfb   :  { %v180_v40 = vadd.f32 %v670_v31, %v171_v34  ;;  %v259_v41 = vadd.f32 %v670_v31, %v256_v35  ;;  %v172_v42 = vmul.f32 %v454_v30, %v154_v38  ;;  %v257_v43 = vmul.f32 %v454_v30, %v245_v39  ;;  %v156_v44 = vpop.f32.mrb[3].mxu0  ;;  %v247_v45 = vpop.f32.mrb[3].mxu1 }
  0xfd   :  { %v262_v46 = vmax.f32 %v180_v40, %v259_v41  ;;  %v181_v47 = vadd.f32 %v670_v31, %v172_v42  ;;  %v260_v48 = vadd.f32 %v670_v31, %v257_v43 }
  0xff   :  { %v263_v49 = vmax.f32 %v181_v47, %v260_v48 }
 0x100   :  { %v159_v50 = vpop.f32.mrb[4].mxu0  ;;  %v250_v51 = vpop.f32.mrb[4].mxu1 }
 0x101   :  { %v173_v52 = vmul.f32 %v454_v30, %v159_v50  ;;  %v161_v53 = vpop.f32.mrb[5].mxu0  ;;  %v258_v54 = vmul.f32 %v454_v30, %v250_v51  ;;  %v252_v55 = vpop.f32.mrb[5].mxu1 }
 0x102   :  { %v162_v56 = vpop.f32.mrb[6].mxu0  ;;  %v253_v57 = vpop.f32.mrb[6].mxu1 }
 0x103   :  { %v182_v58 = vadd.f32 %v670_v31, %v173_v52  ;;  %v261_v59 = vadd.f32 %v670_v31, %v258_v54  ;;  %v163_v60 = vpop.f32.mrb[7].mxu0  ;;  %v254_v61 = vpop.f32.mrb[7].mxu1 }
 0x105   :  { %v264_v62 = vmax.f32 %v182_v58, %v261_v59 }
 0x11c   :  { %v324_v63 = vpop.f32.mrb[8].mxu0  ;;  %v406_v0 = vpop.f32.mrb[8].mxu1 }
 0x11d   :  { %v338_v1 = vmul.f32 %v454_v30, %v324_v63  ;;  %v420_v2 = vmul.f32 %v454_v30, %v406_v0  ;;  %v326_v3 = vpop.f32.mrb[9].mxu0  ;;  %v408_v4 = vpop.f32.mrb[9].mxu1 }
 0x11e   :  { %v327_v5 = vpop.f32.mrb[10].mxu0  ;;  %v409_v6 = vpop.f32.mrb[10].mxu1 }
 0x11f   :  { %v341_v7 = vadd.f32 %v670_v31, %v338_v1  ;;  %v423_v8 = vadd.f32 %v670_v31, %v420_v2  ;;  %v339_v9 = vmul.f32 %v454_v30, %v327_v5  ;;  %v421_v10 = vmul.f32 %v454_v30, %v409_v6  ;;  %v329_v11 = vpop.f32.mrb[11].mxu0  ;;  %v411_v12 = vpop.f32.mrb[11].mxu1 }
 0x121   :  { %v344_v13 = vmax.f32 %v262_v46, %v341_v7  ;;  %v342_v14 = vadd.f32 %v670_v31, %v339_v9  ;;  %v424_v17 = vadd.f32 %v670_v31, %v421_v10 }
 0x123   :  { %v426_v15 = vmax.f32 %v344_v13, %v423_v8  ;;  %v345_v16 = vmax.f32 %v263_v49, %v342_v14 }
 0x124   :  { %v332_v18 = vpop.f32.mrb[12].mxu0  ;;  %v414_v19 = vpop.f32.mrb[12].mxu1 }
 0x125   :  { %v429_v20 = vmax.f32 %v426_v15, 0.0  ;;  %v427_v21 = vmax.f32 %v345_v16, %v424_v17  ;;  %v340_v22 = vmul.f32 %v454_v30, %v332_v18  ;;  %v422_v23 = vmul.f32 %v454_v30, %v414_v19  ;;  %v334_v24 = vpop.f32.mrb[13].mxu0  ;;  %v416_v25 = vpop.f32.mrb[13].mxu1 }
 0x126   :  { %v335_v26 = vpop.f32.mrb[14].mxu0  ;;  %v417_v27 = vpop.f32.mrb[14].mxu1 }
 0x127   :  { %432 = vst.msk [vmem:[%s700_s4] sm:$0xff] %vm110_vm0, %v429_v20  ;;  %v430_v28 = vmax.f32 %v427_v21, 0.0  ;;  %v343_v29 = vadd.f32 %v670_v31, %v340_v22  ;;  %v425_v32 = vadd.f32 %v670_v31, %v422_v23  ;;  %v336_v33 = vpop.f32.mrb[15].mxu0  ;;  %v418_v34 = vpop.f32.mrb[15].mxu1 }
 0x129   :  { %433 = vst.msk [vmem:[%s700_s4 + $0x8] sm:$0xff] %vm110_vm0, %v430_v28  ;;  %v346_v30 = vmax.f32 %v264_v62, %v343_v29 }
 0x12b   :  { %v428_v35 = vmax.f32 %v346_v30, %v425_v32 }
 0x12d   :  { %v431_v36 = vmax.f32 %v428_v35, 0.0 }
 0x12f   :  { %434 = vst.msk [vmem:[%s700_s4 + $0x10] sm:$0xff] %vm110_vm0, %v431_v36 }

// kernel: forward.9
= control target key start
LH: loop header
LB: loop body
LE: loop exit
PB: predicated region body
PF: predicated region fallthrough
CT: control target
= control target key end

     0   :  { %v370_v0 = vmov 0   ;;  %vm99_vm0 = vcmask 130048   ;;  %vm320_vm1 = vcmask 64512   ;;  %s496_s1 = inlined_call_operand.vmem [shape: bf16[144,8], index: 1, kind: input, shape index: {}]   ;;  %s497_s0 = inlined_call_operand.vmem [shape: bf16[4,8,144], index: 0, kind: input, shape index: {}]   ;;  %s498_s2 = inlined_call_operand.vmem [shape: f32[1,8], index: 2, kind: input, shape index: {}]   ;;  %s499_s3 = inlined_call_operand.vmem [shape: f32[1,8], index: 3, kind: input, shape index: {}]   ;;  %s500_s4 = inlined_call_operand.vmem [shape: f32[8,8], index: 4, kind: output, shape index: {}]  }
   0x1   :  { %103 = vmatprep.subr.bf16.mxu0 %v370_v0  ;;  %168 = vmatprep.subr.bf16.mxu1 %v370_v0  ;;  %v353_v1 = vld [vmem:[%s496_s1] sm:$0xff]   ;;  %v404_v2 = vld [vmem:[%s496_s1 + $0x8] sm:$0xff]   ;;  %v413_v3 = vld [vmem:[%s496_s1 + $0x10] sm:$0xff]  }
   0x2   :  { %104 = vmatpush1.bf16.msra.mxu0 %v353_v1  ;;  %169 = vmatpush1.bf16.msra.mxu1 %v353_v1  ;;  %v38_v4 = vld [vmem:[%s497_s0] sm:$0xff]  ;;  %v340_v5 = vld [vmem:[%s497_s0 + $0x8] sm:$0xff]  ;;  %v356_v6 = vld [vmem:[%s496_s1 + $0x18] sm:$0xff]  }
   0x3   :  { %105 = vmatprep.subr.bf16.mxu0 %v370_v0  ;;  %170 = vmatprep.subr.bf16.mxu1 %v370_v0  ;;  %v327_v7 = vcombine.high %v38_v4, %v38_v4  ;;  %v342_v8 = vcombine.high %v340_v5, %v340_v5  ;;  %v357_v9 = vld [vmem:[%s496_s1 + $0x20] sm:$0xff]   ;;  %v358_v10 = vld [vmem:[%s496_s1 + $0x28] sm:$0xff]   ;;  %v359_v11 = vld [vmem:[%s496_s1 + $0x30] sm:$0xff]   ;;  %v326_v14 = vcombine.low %v38_v4, %v38_v4 }
   0x4   :  { %v360_v12 = vld [vmem:[%s496_s1 + $0x38] sm:$0xff]   ;;  %v361_v13 = vld [vmem:[%s496_s1 + $0x40] sm:$0xff]   ;;  %v341_v15 = vcombine.low %v340_v5, %v340_v5  ;;  %v344_v16 = vld [vmem:[%s497_s0 + $0x10] sm:$0xff] }
   0x5   :  { %337 = vmatprep.mubr.msk.bf16.mxu0 %vm99_vm0, %v327_v7  ;;  %343 = vmatprep.mubr.msk.bf16.mxu1 %vm99_vm0, %v342_v8  ;;  %v348_v17 = vld [vmem:[%s497_s0 + $0x18] sm:$0xff]  ;;  %v346_v18 = vcombine.high %v344_v16, %v344_v16  ;;  %v345_v20 = vcombine.low %v344_v16, %v344_v16  ;;  %v338_v22 = vld [vmem:[%s498_s2] ss:$0 sm:$0xff] }
   0x6   :  { %106 = vmatpush1.bf16.msra.mxu0 %v404_v2  ;;  %171 = vmatpush1.bf16.msra.mxu1 %v404_v2  ;;  %v350_v19 = vcombine.high %v348_v17, %v348_v17  ;;  %v349_v21 = vcombine.low %v348_v17, %v348_v17  ;;  %v339_v23 = vld [vmem:[%s499_s3] ss:$0 sm:$0xff] }
   0x7   :  { %107 = vmatprep.subr.bf16.mxu0 %v370_v0  ;;  %172 = vmatprep.subr.bf16.mxu1 %v370_v0 }
   0xa   :  { %108 = vmatpush1.bf16.msra.mxu0 %v413_v3  ;;  %173 = vmatpush1.bf16.msra.mxu1 %v413_v3 }
   0xb   :  { %109 = vmatprep.subr.bf16.mxu0 %v370_v0  ;;  %174 = vmatprep.subr.bf16.mxu1 %v370_v0 }
   0xe   :  { %110 = vmatpush1.bf16.msra.mxu0 %v356_v6  ;;  %175 = vmatpush1.bf16.msra.mxu1 %v356_v6 }
   0xf   :  { %111 = vmatprep.subr.bf16.mxu0 %v370_v0  ;;  %176 = vmatprep.subr.bf16.mxu1 %v370_v0 }
  0x12   :  { %112 = vmatpush1.bf16.msra.mxu0 %v357_v9  ;;  %177 = vmatpush1.bf16.msra.mxu1 %v357_v9 }
  0x13   :  { %113 = vmatprep.subr.bf16.mxu0 %v370_v0  ;;  %178 = vmatprep.subr.bf16.mxu1 %v370_v0 }
  0x16   :  { %114 = vmatpush1.bf16.msra.mxu0 %v358_v10  ;;  %179 = vmatpush1.bf16.msra.mxu1 %v358_v10 }
  0x17   :  { %115 = vmatprep.subr.bf16.mxu0 %v370_v0  ;;  %180 = vmatprep.subr.bf16.mxu1 %v370_v0 }
  0x1a   :  { %116 = vmatpush1.bf16.msra.mxu0 %v359_v11  ;;  %181 = vmatpush1.bf16.msra.mxu1 %v359_v11 }
  0x1b   :  { %117 = vmatprep.subr.bf16.mxu0 %v370_v0  ;;  %182 = vmatprep.subr.bf16.mxu1 %v370_v0 }
  0x1e   :  { %118 = vmatpush1.bf16.msra.mxu0 %v360_v12  ;;  %183 = vmatpush1.bf16.msra.mxu1 %v360_v12 }
  0x1f   :  { %119 = vmatprep.subr.bf16.mxu0 %v370_v0  ;;  %184 = vmatprep.subr.bf16.mxu1 %v370_v0 }
  0x22   :  { %120 = vmatpush1.bf16.msra.mxu0 %v361_v13  ;;  %185 = vmatpush1.bf16.msra.mxu1 %v361_v13 }
  0x23   :  { %222 = vmatprep.subr.bf16.mxu0 %v370_v0  ;;  %276 = vmatprep.subr.bf16.mxu1 %v370_v0 }
  0x25   :  { %136 = vmatmul.mubr.bf16.vlgmr.msra.gmra.mrb[0].mxu0 %v326_v14  ;;  %201 = vmatmul.mubr.bf16.vlgmr.msra.gmra.mrb[0].mxu1 %v341_v15 }
  0x26   :  { %223 = vmatpush1.bf16.msra.mxu0 %v353_v1  ;;  %277 = vmatpush1.bf16.msra.mxu1 %v353_v1 }
  0x27   :  { %224 = vmatprep.subr.bf16.mxu0 %v370_v0  ;;  %278 = vmatprep.subr.bf16.mxu1 %v370_v0 }
  0x28   :  { %347 = vmatprep.mubr.msk.bf16.mxu0 %vm99_vm0, %v346_v18  ;;  %351 = vmatprep.mubr.msk.bf16.mxu1 %vm99_vm0, %v350_v19 }
  0x2a   :  { %225 = vmatpush1.bf16.msra.mxu0 %v404_v2  ;;  %279 = vmatpush1.bf16.msra.mxu1 %v404_v2 }
  0x2b   :  { %226 = vmatprep.subr.bf16.mxu0 %v370_v0  ;;  %280 = vmatprep.subr.bf16.mxu1 %v370_v0 }
  0x2e   :  { %227 = vmatpush1.bf16.msra.mxu0 %v413_v3  ;;  %281 = vmatpush1.bf16.msra.mxu1 %v413_v3 }
  0x2f   :  { %228 = vmatprep.subr.bf16.mxu0 %v370_v0  ;;  %282 = vmatprep.subr.bf16.mxu1 %v370_v0 }
  0x32   :  { %229 = vmatpush1.bf16.msra.mxu0 %v356_v6  ;;  %283 = vmatpush1.bf16.msra.mxu1 %v356_v6 }
  0x33   :  { %230 = vmatprep.subr.bf16.mxu0 %v370_v0  ;;  %284 = vmatprep.subr.bf16.mxu1 %v370_v0 }
  0x36   :  { %231 = vmatpush1.bf16.msra.mxu0 %v357_v9  ;;  %285 = vmatpush1.bf16.msra.mxu1 %v357_v9 }
  0x37   :  { %232 = vmatprep.subr.bf16.mxu0 %v370_v0  ;;  %286 = vmatprep.subr.bf16.mxu1 %v370_v0 }
  0x3a   :  { %233 = vmatpush1.bf16.msra.mxu0 %v358_v10  ;;  %287 = vmatpush1.bf16.msra.mxu1 %v358_v10 }
  0x3b   :  { %234 = vmatprep.subr.bf16.mxu0 %v370_v0  ;;  %288 = vmatprep.subr.bf16.mxu1 %v370_v0 }
  0x3e   :  { %235 = vmatpush1.bf16.msra.mxu0 %v359_v11  ;;  %289 = vmatpush1.bf16.msra.mxu1 %v359_v11 }
  0x3f   :  { %236 = vmatprep.subr.bf16.mxu0 %v370_v0  ;;  %290 = vmatprep.subr.bf16.mxu1 %v370_v0 }
  0x42   :  { %237 = vmatpush1.bf16.msra.mxu0 %v360_v12  ;;  %291 = vmatpush1.bf16.msra.mxu1 %v360_v12 }
  0x43   :  { %238 = vmatprep.subr.bf16.mxu0 %v370_v0  ;;  %292 = vmatprep.subr.bf16.mxu1 %v370_v0 }
  0x46   :  { %239 = vmatpush1.bf16.msra.mxu0 %v361_v13  ;;  %293 = vmatpush1.bf16.msra.mxu1 %v361_v13 }
  0x49   :  { %255 = vmatmul.mubr.bf16.vlgmr.msra.gmra.mrb[4].mxu0 %v345_v20  ;;  %309 = vmatmul.mubr.bf16.vlgmr.msra.gmra.mrb[4].mxu1 %v349_v21 }
  0xf8   :  { %v137_v24 = vpop.f32.mrb[0].mxu0  ;;  %v202_v25 = vpop.f32.mrb[0].mxu1 }
  0xf9   :  { %v149_v26 = vmul.f32 %v338_v22, %v137_v24  ;;  %v208_v27 = vmul.f32 %v338_v22, %v202_v25  ;;  %v139_v28 = vpop.f32.mrb[1].mxu0  ;;  %v204_v29 = vpop.f32.mrb[1].mxu1 }
  0xfa   :  { %v140_v30 = vpop.f32.mrb[2].mxu0  ;;  %v205_v31 = vpop.f32.mrb[2].mxu1 }
  0xfb   :  { %v156_v32 = vadd.f32 %v339_v23, %v149_v26  ;;  %v209_v33 = vadd.f32 %v339_v23, %v208_v27  ;;  %v141_v34 = vpop.f32.mrb[3].mxu0  ;;  %v206_v35 = vpop.f32.mrb[3].mxu1 }
  0xfd   :  { %v210_v36 = vmax.f32 %v156_v32, %v209_v33 }
 0x11c   :  { %v256_v37 = vpop.f32.mrb[4].mxu0  ;;  %v310_v38 = vpop.f32.mrb[4].mxu1 }
 0x11d   :  { %v262_v39 = vmul.f32 %v338_v22, %v256_v37  ;;  %v316_v40 = vmul.f32 %v338_v22, %v310_v38  ;;  %v258_v41 = vpop.f32.mrb[5].mxu0  ;;  %v312_v42 = vpop.f32.mrb[5].mxu1 }
 0x11e   :  { %v259_v43 = vpop.f32.mrb[6].mxu0  ;;  %v313_v44 = vpop.f32.mrb[6].mxu1 }
 0x11f   :  { %v263_v45 = vadd.f32 %v339_v23, %v262_v39  ;;  %v317_v46 = vadd.f32 %v339_v23, %v316_v40  ;;  %v260_v47 = vpop.f32.mrb[7].mxu0  ;;  %v314_v48 = vpop.f32.mrb[7].mxu1 }
 0x121   :  { %v264_v49 = vmax.f32 %v210_v36, %v263_v45 }
 0x123   :  { %v318_v50 = vmax.f32 %v264_v49, %v317_v46 }
 0x125   :  { %v319_v51 = vmax.f32 %v318_v50, 0.0 }
 0x127   :  { %321 = vst.msk [vmem:[%s500_s4] sm:$0xff] %vm320_vm1, %v319_v51 }

</bundles_post_ra>
